<compile_context>
chip_gen: v5e
topology: v5e:2x2
jax: 0.10.0
libtpu: 0.0.40
codegen_flags: <defaults>
</compile_context>

<pallas_src>
import numpy as np
import jax
import jax.numpy as jnp
from jax import lax
from jax.experimental import pallas as pl
from jax.experimental.pallas import tpu as pltpu

HIGH = jax.lax.Precision.HIGHEST

# ---- static problem sizes (x has 20*10 board cells + 6 info scalars = 206) ----
B = 2
H0, W0 = 20, 10
OUT_DIM = 4
C1, C2, C3 = 32, 64, 128
H1, W1 = H0 - 2, W0 - 2          # 18, 8   after conv1
H2, W2 = H1 - 2, W1 - 2          # 16, 6   after conv2
H3, W3 = H2 - 2, W2 - 2          # 14, 4   after conv3
P0, P3 = H0 * W0, H3 * W3        # 200, 56
FEAT = P3 * C3                   # 7168
N_OH = 3 * 7                     # 21 one-hot features
OUT_PAD = 128                    # lane-padded output width (unmasked final store)

# Full-grid / batch-stacked layout: every conv activation lives on the original
# 20x10 grid (row = i*10 + j); batch b occupies rows [b*P_PAD, b*P_PAD + 200).
# A 3x3 VALID tap is then the constant row offset kh*10 + kw.
TAPS = tuple(kh * W0 + kw for kh in range(3) for kw in range(3))  # 0,1,2,10,...,22
P_PAD = 224                      # per-batch row block (mult of 8, >= 200 + 22)
R1 = B * P_PAD                   # 448 conv1 rows computed
R2 = 384                         # conv2 rows computed (only rows <= 379 are consumed)
R3 = 360                         # conv3 rows computed
BOARD_ROWS = 472                 # zero-padded board vector fed to the wrapper im2col

# Validity chain: a valid conv3 output row (offset <= 133 within its batch block)
# only ever reads board rows at within-batch offsets <= 133 + 3*22 = 199 < 200, so
# the cross-batch/padding garbage computed on other rows is never consumed.
assert (H3 - 1) * W0 + (W3 - 1) + 3 * TAPS[-1] < P0
assert P_PAD % 8 == 0 and P_PAD >= P0 + TAPS[-1]
assert BOARD_ROWS % 8 == 0 and BOARD_ROWS >= R1 + TAPS[-1]
assert R2 % 8 == 0 and R2 + TAPS[-1] <= R1
assert R3 % 8 == 0 and R3 + TAPS[-1] <= R2
assert R3 > (B - 1) * P_PAD + (H3 - 1) * W0 + (W3 - 1)   # covers all valid conv3 rows
assert R2 > (B - 1) * P_PAD + (H2 - 1) * W0 + (W2 - 1)   # covers all consumed conv2 rows


# ---------------------------------------------------------------------------
# The fused kernel
# ---------------------------------------------------------------------------
def _conv3x3(a, w, bias, n_rows):
    """3x3 VALID conv on the batch-stacked full grid as ONE MXU matmul.

    a: (R_in, Cin) f32 activations on the full grid; w: (9*Cin, Cout) bf16 with
    taps stacked (kh, kw)-major; bias: (1, Cout) f32.  The im2col patch buffer is
    built directly in bf16 (each tap slice cast before the lane-concat).  Rows
    outside each batch's valid region come out as garbage but are never consumed
    by valid outputs.
    """
    patches = jnp.concatenate(
        [a[off:off + n_rows, :].astype(jnp.bfloat16) for off in TAPS], axis=1)
    z = jnp.dot(patches, w, preferred_element_type=jnp.float32)
    return jnp.maximum(z + bias, 0.0)                       # (n_rows, Cout) f32


def fused_kernel(patch1_ref, w1_ref, b1_ref, w2_ref, b2_ref, w3_hbm, b3_ref,
                 fc0w_hbm, fc0b_ref, fc1wa_ref, fc1b_ref, fc2w_ref, fc2b_ref,
                 fc3w_ref, fc3b_ref, out_ref, w3_vmem, fc0w_vmem, dma_sem):
    # Start the two big weight transfers right away so the HBM->VMEM DMAs are
    # hidden under the preceding compute (w3: 144 KiB under conv1/conv2; fc0
    # weight: ~0.9 MiB under the whole conv trunk).
    w3_copy = pltpu.make_async_copy(w3_hbm, w3_vmem, dma_sem.at[0])
    fc0_copy = pltpu.make_async_copy(fc0w_hbm, fc0w_vmem, dma_sem.at[1])
    w3_copy.start()
    fc0_copy.start()

    # ---- conv1 (1 -> 32): one K=16 MXU matmul on the wrapper-built im2col. ----
    z1 = jnp.dot(patch1_ref[...], w1_ref[...], preferred_element_type=jnp.float32)
    a1 = jnp.maximum(z1 + b1_ref[...], 0.0)                 # (448, 32) f32

    # ---- conv2 (32 -> 64): one matmul, K = 288. ----
    a2 = _conv3x3(a1, w2_ref[...], b2_ref[...], R2)         # (384, 64)  f32

    # ---- conv3 (64 -> 128): one matmul, K = 576 (weight arrives via manual DMA). ----
    w3_copy.wait()
    a3 = _conv3x3(a2, w3_vmem[...], b3_ref[...], R3)        # (360, 128) f32

    # ---- fc0 without the wide flatten: gather 14 contiguous (4,128) blocks per
    # batch (j on sublanes, (i, c) on lanes) into an (B*4, 1792) bf16 matrix and
    # matmul against the (1792, 4*64) repacked fc0 weight; the per-j diagonal
    # blocks of the (B*4, 256) result are then summed into h0. ----
    a3b = a3.astype(jnp.bfloat16)
    rows = []
    for b in range(B):
        base = b * P_PAD
        rows.append(jnp.concatenate(
            [a3b[base + i * W0: base + i * W0 + W3, :] for i in range(H3)], axis=1))
    mstack = jnp.concatenate(rows, axis=0)                  # (B*4, 1792) bf16

    fc0_copy.wait()
    zall = jnp.dot(mstack, fc0w_vmem[...],
                   preferred_element_type=jnp.float32)      # (B*4, 256) f32

    h_rows = []
    for b in range(B):
        acc = fc0b_ref[...]                                 # (1, 64) f32
        for j in range(W3):
            acc = acc + zall[b * W3 + j: b * W3 + j + 1, j * 64:(j + 1) * 64]
        h_rows.append(acc)
    h0 = jnp.maximum(jnp.concatenate(h_rows, axis=0), 0.0)  # (B, 64) f32

    # ---- fc head (bf16 inputs, f32 accumulate).  fc1's one-hot branch is folded
    # into fc1b_ref (computed in the wrapper). ----
    h1 = jnp.maximum(
        jnp.dot(h0.astype(jnp.bfloat16), fc1wa_ref[...],
                preferred_element_type=jnp.float32) + fc1b_ref[...], 0.0)   # (B, 64)
    h2 = jnp.maximum(
        jnp.dot(h1.astype(jnp.bfloat16), fc2w_ref[...],
                preferred_element_type=jnp.float32) + fc2b_ref[...], 0.0)   # (B, 64)
    out_ref[...] = (jnp.dot(h2.astype(jnp.bfloat16), fc3w_ref[...],
                            preferred_element_type=jnp.float32)
                    + fc3b_ref[...])                                        # (B, 128)


# ---------------------------------------------------------------------------
# Wrapper (glue: slicing / one-hot / conv1 im2col / weight packing)
# ---------------------------------------------------------------------------
@jax.jit
def alt_dqn_forward(x, params):
    f32, bf16 = jnp.float32, jnp.bfloat16
    # x: (B, 206) f32 == [200 board cells | 3 next-block ids (assumed 1..7) | 3 unused]
    board = x[:, :P0]
    blocks = x[:, P0:P0 + 3].astype(jnp.int32) - 1          # convert_info: long() - 1
    onehot = jax.nn.one_hot(blocks, 7, dtype=f32).reshape(B, N_OH)
    # x[:, -3:] is intentionally dropped, exactly like convert_info's [:, :-3]

    # Batch-stacked, zero-padded board vector and its 9-tap im2col (conv1 LHS).
    board_blocks = jnp.pad(board, ((0, 0), (0, P_PAD - P0))).reshape(B * P_PAD)
    board_full = jnp.pad(board_blocks, (0, BOARD_ROWS - B * P_PAD))          # (472,)
    patch1 = jnp.stack([board_full[off:off + R1] for off in TAPS], axis=1)   # (448, 9)
    patch1 = jnp.pad(patch1, ((0, 0), (0, 16 - 9))).astype(bf16)             # (448, 16)

    w1 = jnp.pad(params["w1"].reshape(9, C1), ((0, 16 - 9), (0, 0))).astype(bf16)
    w2 = params["w2"].reshape(9 * C1, C2).astype(bf16)
    w3 = params["w3"].reshape(9 * C2, C3).astype(bf16)

    # fc0 weight repacked for the block-gathered activations:
    #   fc0w_big[i*128 + c, j*64 + o] = fc0_w[(i*4 + j)*128 + c, o]
    w0 = params["fc0_w"].reshape(H3, W3, C3, 64)
    fc0w_big = jnp.transpose(w0, (0, 2, 1, 3)).reshape(H3 * C3, W3 * 64).astype(bf16)

    fc1_wa = params["fc1_w"][:64].astype(bf16)               # acts on the fc0 features
    # one-hot branch hoisted out of the kernel (folded into fc1's bias)
    fc1_bias = (jnp.dot(onehot, params["fc1_w"][64:].astype(bf16).astype(f32),
                        precision=HIGH) + params["fc1_b"])                   # (B, 64)
    fc2_w = params["fc2_w"].astype(bf16)
    fc3_w = jnp.zeros((64, OUT_PAD), f32).at[:, :OUT_DIM].set(params["fc3_w"]).astype(bf16)
    fc3_b = jnp.zeros((1, OUT_PAD), f32).at[:, :OUT_DIM].set(params["fc3_b"])

    vmem = pl.BlockSpec(memory_space=pltpu.MemorySpace.VMEM)
    anyspace = pl.BlockSpec(memory_space=pl.ANY)
    in_specs = [vmem, vmem, vmem, vmem, vmem, anyspace, vmem,
                anyspace, vmem, vmem, vmem, vmem, vmem, vmem, vmem]

    out = pl.pallas_call(
        fused_kernel,
        out_shape=jax.ShapeDtypeStruct((B, OUT_PAD), f32),
        in_specs=in_specs,
        out_specs=vmem,
        scratch_shapes=[pltpu.VMEM((9 * C2, C3), bf16),          # w3 landing buffer
                        pltpu.VMEM((H3 * C3, W3 * 64), bf16),    # fc0 weight landing buffer
                        pltpu.SemaphoreType.DMA((2,))],
        cost_estimate=pl.CostEstimate(flops=76_000_000, transcendentals=0,
                                      bytes_accessed=1_200_000),
    )(patch1, w1, params["b1"], w2, params["b2"], w3, params["b3"],
      fc0w_big, params["fc0_b"], fc1_wa, fc1_bias,
      fc2_w, params["fc2_b"], fc3_w, fc3_b)
    return out[:, :OUT_DIM]


# ---------------------------------------------------------------------------
# Helper for loading real PyTorch checkpoints (documents the flatten permutation).
# fc1/fc2/fc3 additionally need the usual (out,in)->(in,out) transpose and conv
# weights need OIHW->HWIO before the (kh,kw)-major tap stacking used above.
# ---------------------------------------------------------------------------
def fc0_weight_from_torch(torch_fc0_weight):
    """Torch's nn.Linear(7168, 64) weight is (64, 7168) over a channel-major NCHW
    flatten (column = c*56 + (i*4 + j)).  This kernel's params use a spatial-major
    flatten with the weight stored (in, out): row = (i*4 + j)*128 + c."""
    w = jnp.asarray(torch_fc0_weight).reshape(64, C3, H3 * W3)   # (out, c, p)
    return jnp.transpose(w, (2, 1, 0)).reshape(FEAT, 64)


# ---------------------------------------------------------------------------
# Parameter init (deterministic, synthetic).  Linear layers mirror create_weights()
# (xavier_uniform weights, zero bias); conv layers use a simple uniform init
# (PyTorch's Conv2d default kaiming_uniform(a=sqrt(5)) is NOT replicated).
# ---------------------------------------------------------------------------
def init_params(key):
    keys = jax.random.split(key, 10)

    def uniform(k, shape, limit):
        return jax.random.uniform(k, shape, jnp.float32, -limit, limit)

    def xavier(k, fan_in, fan_out):
        lim = float(np.sqrt(6.0 / (fan_in + fan_out)))
        return uniform(k, (fan_in, fan_out), lim)

    def conv_w(k, cin, cout):
        lim = float(np.sqrt(6.0 / (cin * 9 + cout * 9)))
        return uniform(k, (3, 3, cin, cout), lim)            # HWIO

    p = {}
    p["w1"] = conv_w(keys[0], 1, C1)
    p["b1"] = uniform(keys[1], (1, C1), float(1.0 / np.sqrt(1 * 9)))
    p["w2"] = conv_w(keys[2], C1, C2)
    p["b2"] = uniform(keys[3], (1, C2), float(1.0 / np.sqrt(C1 * 9)))
    p["w3"] = conv_w(keys[4], C2, C3)
    p["b3"] = uniform(keys[5], (1, C3), float(1.0 / np.sqrt(C2 * 9)))
    p["fc0_w"] = xavier(keys[6], FEAT, 64)
    p["fc0_b"] = jnp.zeros((1, 64), jnp.float32)
    p["fc1_w"] = xavier(keys[7], 64 + N_OH, 64)
    p["fc1_b"] = jnp.zeros((1, 64), jnp.float32)
    p["fc2_w"] = xavier(keys[8], 64, 64)
    p["fc2_b"] = jnp.zeros((1, 64), jnp.float32)
    p["fc3_w"] = xavier(keys[9], 64, OUT_DIM)
    p["fc3_b"] = jnp.zeros((1, OUT_DIM), jnp.float32)
    return p


# ---------------------------------------------------------------------------
# Pure-JAX reference: same bf16 weights and the same mixed precision the kernel
# uses (bf16 matmul inputs, f32 accumulation, f32 bias/ReLU), same flatten order.
# ---------------------------------------------------------------------------
def reference_forward(x, params):
    f32, bf16 = jnp.float32, jnp.bfloat16

    def wq(w):                       # weights as the kernel sees them (bf16 valued)
        return w.astype(bf16).astype(f32)

    def aq(a):                       # activation rounding applied at matmul inputs
        return a.astype(bf16).astype(f32)

    board = x[:, :P0].reshape(B, 1, H0, W0)                  # NCHW, like PyTorch
    blocks = x[:, P0:P0 + 3].astype(jnp.int32) - 1
    onehot = jax.nn.one_hot(blocks, 7, dtype=f32).reshape(B, N_OH)

    def conv(a, w, bias):
        o = lax.conv_general_dilated(a, wq(w), (1, 1), "VALID",
                                     dimension_numbers=("NCHW", "HWIO", "NCHW"),
                                     precision=HIGH)
        return jax.nn.relu(o + bias.reshape(1, -1, 1, 1))

    a1 = conv(board, params["w1"], params["b1"])             # board is 0/1 -> exact in bf16
    a2 = conv(aq(a1), params["w2"], params["b2"])
    a3 = conv(aq(a2), params["w3"], params["b3"])
    feat = jnp.transpose(a3, (0, 2, 3, 1)).reshape(B, FEAT)  # spatial-major flatten

    def lin(h, w, bias):
        return jnp.dot(aq(h), wq(w), precision=HIGH) + bias

    h = jax.nn.relu(lin(feat, params["fc0_w"], params["fc0_b"]))
    h = jnp.concatenate([h, onehot], axis=1)
    h = jax.nn.relu(lin(h, params["fc1_w"], params["fc1_b"]))
    h = jax.nn.relu(lin(h, params["fc2_w"], params["fc2_b"]))
    return lin(h, params["fc3_w"], params["fc3_b"])


# TODO(synk): the .act() method (env.step probing over candidate actions + argmax)
# is host-side control flow around the forward pass and is not part of the kernel.

if __name__ == "__main__":
    key = jax.random.PRNGKey(0)
    k_params, k_board, k_blocks, k_extra = jax.random.split(key, 4)
    params = init_params(k_params)

    board = (jax.random.uniform(k_board, (B, P0)) < 0.5).astype(jnp.float32)   # 0/1 cells
    blocks = jax.random.randint(k_blocks, (B, 3), 1, 8).astype(jnp.float32)    # ids 1..7
    extra = jax.random.uniform(k_extra, (B, 3), dtype=jnp.float32)             # unused tail
    x = jnp.concatenate([board, blocks, extra], axis=1)                        # (B, 206) f32

    out = jax.block_until_ready(alt_dqn_forward(x, params))
    assert out.shape == (B, OUT_DIM) and out.dtype == jnp.float32

    ref = jax.block_until_ready(reference_forward(x, params))
    np.testing.assert_allclose(np.asarray(out), np.asarray(ref), rtol=2e-2, atol=2e-2)

    print("KERNEL_OK")
</pallas_src>

<mosaic_0001>
module attributes {stable_mosaic.version = 11 : i64} {
  func.func @fused_kernel(%arg0: memref<448x16xbf16, #tpu.memory_space<vmem>>, %arg1: memref<16x32xbf16, #tpu.memory_space<vmem>>, %arg2: memref<1x32xf32, #tpu.memory_space<vmem>>, %arg3: memref<288x64xbf16, #tpu.memory_space<vmem>>, %arg4: memref<1x64xf32, #tpu.memory_space<vmem>>, %arg5: memref<576x128xbf16, #tpu.memory_space<any>>, %arg6: memref<1x128xf32, #tpu.memory_space<vmem>>, %arg7: memref<1792x256xbf16, #tpu.memory_space<any>>, %arg8: memref<1x64xf32, #tpu.memory_space<vmem>>, %arg9: memref<64x64xbf16, #tpu.memory_space<vmem>>, %arg10: memref<2x64xf32, #tpu.memory_space<vmem>>, %arg11: memref<64x64xbf16, #tpu.memory_space<vmem>>, %arg12: memref<1x64xf32, #tpu.memory_space<vmem>>, %arg13: memref<64x128xbf16, #tpu.memory_space<vmem>>, %arg14: memref<1x128xf32, #tpu.memory_space<vmem>>, %arg15: memref<2x128xf32, #tpu.memory_space<vmem>>, %arg16: memref<576x128xbf16, #tpu.memory_space<vmem>>, %arg17: memref<1792x256xbf16, #tpu.memory_space<vmem>>, %arg18: memref<2x!tpu.dma_semaphore, #tpu.memory_space<semaphore_mem>>) attributes {dimension_semantics = [], scalar_prefetch = 0 : i64, scratch_operands = 3 : i64, tpu.core_type = #tpu.core_type<tc>} {
    %c0_i32 = arith.constant 0 : i32
    %0 = tpu.memref_slice %arg18[%c0_i32] : memref<2x!tpu.dma_semaphore, #tpu.memory_space<semaphore_mem>> -> memref<1x!tpu.dma_semaphore, #tpu.memory_space<semaphore_mem>>
    %1 = tpu.memref_squeeze %0 : memref<1x!tpu.dma_semaphore, #tpu.memory_space<semaphore_mem>> -> memref<!tpu.dma_semaphore, #tpu.memory_space<semaphore_mem>>
    tpu.enqueue_dma source(%arg5 : memref<576x128xbf16, #tpu.memory_space<any>>) target(%arg16 : memref<576x128xbf16, #tpu.memory_space<vmem>>) target_semaphore(%1 : memref<!tpu.dma_semaphore, #tpu.memory_space<semaphore_mem>>)
    %c1_i32 = arith.constant 1 : i32
    %2 = tpu.memref_slice %arg18[%c1_i32] : memref<2x!tpu.dma_semaphore, #tpu.memory_space<semaphore_mem>> -> memref<1x!tpu.dma_semaphore, #tpu.memory_space<semaphore_mem>>
    %3 = tpu.memref_squeeze %2 : memref<1x!tpu.dma_semaphore, #tpu.memory_space<semaphore_mem>> -> memref<!tpu.dma_semaphore, #tpu.memory_space<semaphore_mem>>
    tpu.enqueue_dma source(%arg7 : memref<1792x256xbf16, #tpu.memory_space<any>>) target(%arg17 : memref<1792x256xbf16, #tpu.memory_space<vmem>>) target_semaphore(%3 : memref<!tpu.dma_semaphore, #tpu.memory_space<semaphore_mem>>)
    %c0 = arith.constant 0 : index
    %c0_0 = arith.constant 0 : index
    %4 = vector.load %arg0[%c0, %c0_0] : memref<448x16xbf16, #tpu.memory_space<vmem>>, vector<448x16xbf16>
    %c0_1 = arith.constant 0 : index
    %c0_2 = arith.constant 0 : index
    %5 = vector.load %arg1[%c0_1, %c0_2] : memref<16x32xbf16, #tpu.memory_space<vmem>>, vector<16x32xbf16>
    %cst = arith.constant dense<0.000000e+00> : vector<448x32xf32>
    %6 = tpu.matmul %4, %5, %cst {dimension_numbers = #tpu.dot_dimension_numbers<[1], [0], [0], [1], [0, 0, 1, 1], [], []>} : vector<448x16xbf16>, vector<16x32xbf16>, vector<448x32xf32> -> vector<448x32xf32>
    %c0_3 = arith.constant 0 : index
    %c0_4 = arith.constant 0 : index
    %7 = vector.load %arg2[%c0_3, %c0_4] : memref<1x32xf32, #tpu.memory_space<vmem>>, vector<1x32xf32>
    %8 = vector.broadcast %7 : vector<1x32xf32> to vector<448x32xf32>
    %9 = arith.addf %6, %8 : vector<448x32xf32>
    %cst_5 = arith.constant 0.000000e+00 : f32
    %10 = vector.broadcast %cst_5 : f32 to vector<448x32xf32>
    %11 = arith.maximumf %9, %10 : vector<448x32xf32>
    %c0_6 = arith.constant 0 : index
    %c0_7 = arith.constant 0 : index
    %12 = vector.load %arg3[%c0_6, %c0_7] : memref<288x64xbf16, #tpu.memory_space<vmem>>, vector<288x64xbf16>
    %c0_8 = arith.constant 0 : index
    %c0_9 = arith.constant 0 : index
    %13 = vector.load %arg4[%c0_8, %c0_9] : memref<1x64xf32, #tpu.memory_space<vmem>>, vector<1x64xf32>
    %14 = vector.extract_strided_slice %11 {offsets = [0, 0], sizes = [384, 32], strides = [1, 1]} : vector<448x32xf32> to vector<384x32xf32>
    %15 = arith.truncf %14 : vector<384x32xf32> to vector<384x32xbf16>
    %16 = vector.extract_strided_slice %11 {offsets = [1, 0], sizes = [384, 32], strides = [1, 1]} : vector<448x32xf32> to vector<384x32xf32>
    %17 = arith.truncf %16 : vector<384x32xf32> to vector<384x32xbf16>
    %18 = vector.extract_strided_slice %11 {offsets = [2, 0], sizes = [384, 32], strides = [1, 1]} : vector<448x32xf32> to vector<384x32xf32>
    %19 = arith.truncf %18 : vector<384x32xf32> to vector<384x32xbf16>
    %20 = vector.extract_strided_slice %11 {offsets = [10, 0], sizes = [384, 32], strides = [1, 1]} : vector<448x32xf32> to vector<384x32xf32>
    %21 = arith.truncf %20 : vector<384x32xf32> to vector<384x32xbf16>
    %22 = vector.extract_strided_slice %11 {offsets = [11, 0], sizes = [384, 32], strides = [1, 1]} : vector<448x32xf32> to vector<384x32xf32>
    %23 = arith.truncf %22 : vector<384x32xf32> to vector<384x32xbf16>
    %24 = vector.extract_strided_slice %11 {offsets = [12, 0], sizes = [384, 32], strides = [1, 1]} : vector<448x32xf32> to vector<384x32xf32>
    %25 = arith.truncf %24 : vector<384x32xf32> to vector<384x32xbf16>
    %26 = vector.extract_strided_slice %11 {offsets = [20, 0], sizes = [384, 32], strides = [1, 1]} : vector<448x32xf32> to vector<384x32xf32>
    %27 = arith.truncf %26 : vector<384x32xf32> to vector<384x32xbf16>
    %28 = vector.extract_strided_slice %11 {offsets = [21, 0], sizes = [384, 32], strides = [1, 1]} : vector<448x32xf32> to vector<384x32xf32>
    %29 = arith.truncf %28 : vector<384x32xf32> to vector<384x32xbf16>
    %30 = vector.extract_strided_slice %11 {offsets = [22, 0], sizes = [384, 32], strides = [1, 1]} : vector<448x32xf32> to vector<384x32xf32>
    %31 = arith.truncf %30 : vector<384x32xf32> to vector<384x32xbf16>
    %32 = tpu.concatenate %15, %17, %19, %21, %23, %25, %27, %29, %31 in 1 : vector<384x32xbf16>, vector<384x32xbf16>, vector<384x32xbf16>, vector<384x32xbf16>, vector<384x32xbf16>, vector<384x32xbf16>, vector<384x32xbf16>, vector<384x32xbf16>, vector<384x32xbf16> -> vector<384x288xbf16>
    %cst_10 = arith.constant dense<0.000000e+00> : vector<384x64xf32>
    %33 = tpu.matmul %32, %12, %cst_10 {dimension_numbers = #tpu.dot_dimension_numbers<[1], [0], [0], [1], [0, 0, 1, 1], [], []>} : vector<384x288xbf16>, vector<288x64xbf16>, vector<384x64xf32> -> vector<384x64xf32>
    %34 = vector.broadcast %13 : vector<1x64xf32> to vector<384x64xf32>
    %35 = arith.addf %33, %34 : vector<384x64xf32>
    %cst_11 = arith.constant 0.000000e+00 : f32
    %36 = vector.broadcast %cst_11 : f32 to vector<384x64xf32>
    %37 = arith.maximumf %35, %36 : vector<384x64xf32>
    %c0_i32_12 = arith.constant 0 : i32
    %38 = tpu.memref_slice %arg18[%c0_i32_12] : memref<2x!tpu.dma_semaphore, #tpu.memory_space<semaphore_mem>> -> memref<1x!tpu.dma_semaphore, #tpu.memory_space<semaphore_mem>>
    %39 = tpu.memref_squeeze %38 : memref<1x!tpu.dma_semaphore, #tpu.memory_space<semaphore_mem>> -> memref<!tpu.dma_semaphore, #tpu.memory_space<semaphore_mem>>
    tpu.wait_dma2 semaphore(%39 : memref<!tpu.dma_semaphore, #tpu.memory_space<semaphore_mem>>) src(%arg5 : memref<576x128xbf16, #tpu.memory_space<any>>) dst(%arg16 : memref<576x128xbf16, #tpu.memory_space<vmem>>)
    %c0_13 = arith.constant 0 : index
    %c0_14 = arith.constant 0 : index
    %40 = vector.load %arg16[%c0_13, %c0_14] : memref<576x128xbf16, #tpu.memory_space<vmem>>, vector<576x128xbf16>
    %c0_15 = arith.constant 0 : index
    %c0_16 = arith.constant 0 : index
    %41 = vector.load %arg6[%c0_15, %c0_16] : memref<1x128xf32, #tpu.memory_space<vmem>>, vector<1x128xf32>
    %42 = vector.extract_strided_slice %37 {offsets = [0, 0], sizes = [360, 64], strides = [1, 1]} : vector<384x64xf32> to vector<360x64xf32>
    %43 = arith.truncf %42 : vector<360x64xf32> to vector<360x64xbf16>
    %44 = vector.extract_strided_slice %37 {offsets = [1, 0], sizes = [360, 64], strides = [1, 1]} : vector<384x64xf32> to vector<360x64xf32>
    %45 = arith.truncf %44 : vector<360x64xf32> to vector<360x64xbf16>
    %46 = vector.extract_strided_slice %37 {offsets = [2, 0], sizes = [360, 64], strides = [1, 1]} : vector<384x64xf32> to vector<360x64xf32>
    %47 = arith.truncf %46 : vector<360x64xf32> to vector<360x64xbf16>
    %48 = vector.extract_strided_slice %37 {offsets = [10, 0], sizes = [360, 64], strides = [1, 1]} : vector<384x64xf32> to vector<360x64xf32>
    %49 = arith.truncf %48 : vector<360x64xf32> to vector<360x64xbf16>
    %50 = vector.extract_strided_slice %37 {offsets = [11, 0], sizes = [360, 64], strides = [1, 1]} : vector<384x64xf32> to vector<360x64xf32>
    %51 = arith.truncf %50 : vector<360x64xf32> to vector<360x64xbf16>
    %52 = vector.extract_strided_slice %37 {offsets = [12, 0], sizes = [360, 64], strides = [1, 1]} : vector<384x64xf32> to vector<360x64xf32>
    %53 = arith.truncf %52 : vector<360x64xf32> to vector<360x64xbf16>
    %54 = vector.extract_strided_slice %37 {offsets = [20, 0], sizes = [360, 64], strides = [1, 1]} : vector<384x64xf32> to vector<360x64xf32>
    %55 = arith.truncf %54 : vector<360x64xf32> to vector<360x64xbf16>
    %56 = vector.extract_strided_slice %37 {offsets = [21, 0], sizes = [360, 64], strides = [1, 1]} : vector<384x64xf32> to vector<360x64xf32>
    %57 = arith.truncf %56 : vector<360x64xf32> to vector<360x64xbf16>
    %58 = vector.extract_strided_slice %37 {offsets = [22, 0], sizes = [360, 64], strides = [1, 1]} : vector<384x64xf32> to vector<360x64xf32>
    %59 = arith.truncf %58 : vector<360x64xf32> to vector<360x64xbf16>
    %60 = tpu.concatenate %43, %45, %47, %49, %51, %53, %55, %57, %59 in 1 : vector<360x64xbf16>, vector<360x64xbf16>, vector<360x64xbf16>, vector<360x64xbf16>, vector<360x64xbf16>, vector<360x64xbf16>, vector<360x64xbf16>, vector<360x64xbf16>, vector<360x64xbf16> -> vector<360x576xbf16>
    %cst_17 = arith.constant dense<0.000000e+00> : vector<360x128xf32>
    %61 = tpu.matmul %60, %40, %cst_17 {dimension_numbers = #tpu.dot_dimension_numbers<[1], [0], [0], [1], [0, 0, 1, 1], [], []>} : vector<360x576xbf16>, vector<576x128xbf16>, vector<360x128xf32> -> vector<360x128xf32>
    %62 = vector.broadcast %41 : vector<1x128xf32> to vector<360x128xf32>
    %63 = arith.addf %61, %62 : vector<360x128xf32>
    %cst_18 = arith.constant 0.000000e+00 : f32
    %64 = vector.broadcast %cst_18 : f32 to vector<360x128xf32>
    %65 = arith.maximumf %63, %64 : vector<360x128xf32>
    %66 = arith.truncf %65 : vector<360x128xf32> to vector<360x128xbf16>
    %67 = vector.extract_strided_slice %66 {offsets = [0, 0], sizes = [4, 128], strides = [1, 1]} : vector<360x128xbf16> to vector<4x128xbf16>
    %68 = vector.extract_strided_slice %66 {offsets = [10, 0], sizes = [4, 128], strides = [1, 1]} : vector<360x128xbf16> to vector<4x128xbf16>
    %69 = vector.extract_strided_slice %66 {offsets = [20, 0], sizes = [4, 128], strides = [1, 1]} : vector<360x128xbf16> to vector<4x128xbf16>
    %70 = vector.extract_strided_slice %66 {offsets = [30, 0], sizes = [4, 128], strides = [1, 1]} : vector<360x128xbf16> to vector<4x128xbf16>
    %71 = vector.extract_strided_slice %66 {offsets = [40, 0], sizes = [4, 128], strides = [1, 1]} : vector<360x128xbf16> to vector<4x128xbf16>
    %72 = vector.extract_strided_slice %66 {offsets = [50, 0], sizes = [4, 128], strides = [1, 1]} : vector<360x128xbf16> to vector<4x128xbf16>
    %73 = vector.extract_strided_slice %66 {offsets = [60, 0], sizes = [4, 128], strides = [1, 1]} : vector<360x128xbf16> to vector<4x128xbf16>
    %74 = vector.extract_strided_slice %66 {offsets = [70, 0], sizes = [4, 128], strides = [1, 1]} : vector<360x128xbf16> to vector<4x128xbf16>
    %75 = vector.extract_strided_slice %66 {offsets = [80, 0], sizes = [4, 128], strides = [1, 1]} : vector<360x128xbf16> to vector<4x128xbf16>
    %76 = vector.extract_strided_slice %66 {offsets = [90, 0], sizes = [4, 128], strides = [1, 1]} : vector<360x128xbf16> to vector<4x128xbf16>
    %77 = vector.extract_strided_slice %66 {offsets = [100, 0], sizes = [4, 128], strides = [1, 1]} : vector<360x128xbf16> to vector<4x128xbf16>
    %78 = vector.extract_strided_slice %66 {offsets = [110, 0], sizes = [4, 128], strides = [1, 1]} : vector<360x128xbf16> to vector<4x128xbf16>
    %79 = vector.extract_strided_slice %66 {offsets = [120, 0], sizes = [4, 128], strides = [1, 1]} : vector<360x128xbf16> to vector<4x128xbf16>
    %80 = vector.extract_strided_slice %66 {offsets = [130, 0], sizes = [4, 128], strides = [1, 1]} : vector<360x128xbf16> to vector<4x128xbf16>
    %81 = tpu.concatenate %67, %68, %69, %70, %71, %72, %73, %74, %75, %76, %77, %78, %79, %80 in 1 : vector<4x128xbf16>, vector<4x128xbf16>, vector<4x128xbf16>, vector<4x128xbf16>, vector<4x128xbf16>, vector<4x128xbf16>, vector<4x128xbf16>, vector<4x128xbf16>, vector<4x128xbf16>, vector<4x128xbf16>, vector<4x128xbf16>, vector<4x128xbf16>, vector<4x128xbf16>, vector<4x128xbf16> -> vector<4x1792xbf16>
    %82 = vector.extract_strided_slice %66 {offsets = [224, 0], sizes = [4, 128], strides = [1, 1]} : vector<360x128xbf16> to vector<4x128xbf16>
    %83 = vector.extract_strided_slice %66 {offsets = [234, 0], sizes = [4, 128], strides = [1, 1]} : vector<360x128xbf16> to vector<4x128xbf16>
    %84 = vector.extract_strided_slice %66 {offsets = [244, 0], sizes = [4, 128], strides = [1, 1]} : vector<360x128xbf16> to vector<4x128xbf16>
    %85 = vector.extract_strided_slice %66 {offsets = [254, 0], sizes = [4, 128], strides = [1, 1]} : vector<360x128xbf16> to vector<4x128xbf16>
    %86 = vector.extract_strided_slice %66 {offsets = [264, 0], sizes = [4, 128], strides = [1, 1]} : vector<360x128xbf16> to vector<4x128xbf16>
    %87 = vector.extract_strided_slice %66 {offsets = [274, 0], sizes = [4, 128], strides = [1, 1]} : vector<360x128xbf16> to vector<4x128xbf16>
    %88 = vector.extract_strided_slice %66 {offsets = [284, 0], sizes = [4, 128], strides = [1, 1]} : vector<360x128xbf16> to vector<4x128xbf16>
    %89 = vector.extract_strided_slice %66 {offsets = [294, 0], sizes = [4, 128], strides = [1, 1]} : vector<360x128xbf16> to vector<4x128xbf16>
    %90 = vector.extract_strided_slice %66 {offsets = [304, 0], sizes = [4, 128], strides = [1, 1]} : vector<360x128xbf16> to vector<4x128xbf16>
    %91 = vector.extract_strided_slice %66 {offsets = [314, 0], sizes = [4, 128], strides = [1, 1]} : vector<360x128xbf16> to vector<4x128xbf16>
    %92 = vector.extract_strided_slice %66 {offsets = [324, 0], sizes = [4, 128], strides = [1, 1]} : vector<360x128xbf16> to vector<4x128xbf16>
    %93 = vector.extract_strided_slice %66 {offsets = [334, 0], sizes = [4, 128], strides = [1, 1]} : vector<360x128xbf16> to vector<4x128xbf16>
    %94 = vector.extract_strided_slice %66 {offsets = [344, 0], sizes = [4, 128], strides = [1, 1]} : vector<360x128xbf16> to vector<4x128xbf16>
    %95 = vector.extract_strided_slice %66 {offsets = [354, 0], sizes = [4, 128], strides = [1, 1]} : vector<360x128xbf16> to vector<4x128xbf16>
    %96 = tpu.concatenate %82, %83, %84, %85, %86, %87, %88, %89, %90, %91, %92, %93, %94, %95 in 1 : vector<4x128xbf16>, vector<4x128xbf16>, vector<4x128xbf16>, vector<4x128xbf16>, vector<4x128xbf16>, vector<4x128xbf16>, vector<4x128xbf16>, vector<4x128xbf16>, vector<4x128xbf16>, vector<4x128xbf16>, vector<4x128xbf16>, vector<4x128xbf16>, vector<4x128xbf16>, vector<4x128xbf16> -> vector<4x1792xbf16>
    %97 = tpu.concatenate %81, %96 in 0 : vector<4x1792xbf16>, vector<4x1792xbf16> -> vector<8x1792xbf16>
    %c1_i32_19 = arith.constant 1 : i32
    %98 = tpu.memref_slice %arg18[%c1_i32_19] : memref<2x!tpu.dma_semaphore, #tpu.memory_space<semaphore_mem>> -> memref<1x!tpu.dma_semaphore, #tpu.memory_space<semaphore_mem>>
    %99 = tpu.memref_squeeze %98 : memref<1x!tpu.dma_semaphore, #tpu.memory_space<semaphore_mem>> -> memref<!tpu.dma_semaphore, #tpu.memory_space<semaphore_mem>>
    tpu.wait_dma2 semaphore(%99 : memref<!tpu.dma_semaphore, #tpu.memory_space<semaphore_mem>>) src(%arg7 : memref<1792x256xbf16, #tpu.memory_space<any>>) dst(%arg17 : memref<1792x256xbf16, #tpu.memory_space<vmem>>)
    %c0_20 = arith.constant 0 : index
    %c0_21 = arith.constant 0 : index
    %100 = vector.load %arg17[%c0_20, %c0_21] : memref<1792x256xbf16, #tpu.memory_space<vmem>>, vector<1792x256xbf16>
    %cst_22 = arith.constant dense<0.000000e+00> : vector<8x256xf32>
    %101 = tpu.matmul %97, %100, %cst_22 {dimension_numbers = #tpu.dot_dimension_numbers<[1], [0], [0], [1], [0, 0, 1, 1], [], []>} : vector<8x1792xbf16>, vector<1792x256xbf16>, vector<8x256xf32> -> vector<8x256xf32>
    %c0_23 = arith.constant 0 : index
    %c0_24 = arith.constant 0 : index
    %102 = vector.load %arg8[%c0_23, %c0_24] : memref<1x64xf32, #tpu.memory_space<vmem>>, vector<1x64xf32>
    %103 = vector.extract_strided_slice %101 {offsets = [0, 0], sizes = [1, 64], strides = [1, 1]} : vector<8x256xf32> to vector<1x64xf32>
    %104 = arith.addf %102, %103 : vector<1x64xf32>
    %105 = vector.extract_strided_slice %101 {offsets = [1, 64], sizes = [1, 64], strides = [1, 1]} : vector<8x256xf32> to vector<1x64xf32>
    %106 = arith.addf %104, %105 : vector<1x64xf32>
    %107 = vector.extract_strided_slice %101 {offsets = [2, 128], sizes = [1, 64], strides = [1, 1]} : vector<8x256xf32> to vector<1x64xf32>
    %108 = arith.addf %106, %107 : vector<1x64xf32>
    %109 = vector.extract_strided_slice %101 {offsets = [3, 192], sizes = [1, 64], strides = [1, 1]} : vector<8x256xf32> to vector<1x64xf32>
    %110 = arith.addf %108, %109 : vector<1x64xf32>
    %c0_25 = arith.constant 0 : index
    %c0_26 = arith.constant 0 : index
    %111 = vector.load %arg8[%c0_25, %c0_26] : memref<1x64xf32, #tpu.memory_space<vmem>>, vector<1x64xf32>
    %112 = vector.extract_strided_slice %101 {offsets = [4, 0], sizes = [1, 64], strides = [1, 1]} : vector<8x256xf32> to vector<1x64xf32>
    %113 = arith.addf %111, %112 : vector<1x64xf32>
    %114 = vector.extract_strided_slice %101 {offsets = [5, 64], sizes = [1, 64], strides = [1, 1]} : vector<8x256xf32> to vector<1x64xf32>
    %115 = arith.addf %113, %114 : vector<1x64xf32>
    %116 = vector.extract_strided_slice %101 {offsets = [6, 128], sizes = [1, 64], strides = [1, 1]} : vector<8x256xf32> to vector<1x64xf32>
    %117 = arith.addf %115, %116 : vector<1x64xf32>
    %118 = vector.extract_strided_slice %101 {offsets = [7, 192], sizes = [1, 64], strides = [1, 1]} : vector<8x256xf32> to vector<1x64xf32>
    %119 = arith.addf %117, %118 : vector<1x64xf32>
    %120 = tpu.concatenate %110, %119 in 0 : vector<1x64xf32>, vector<1x64xf32> -> vector<2x64xf32>
    %cst_27 = arith.constant 0.000000e+00 : f32
    %121 = vector.broadcast %cst_27 : f32 to vector<2x64xf32>
    %122 = arith.maximumf %120, %121 : vector<2x64xf32>
    %123 = arith.truncf %122 : vector<2x64xf32> to vector<2x64xbf16>
    %c0_28 = arith.constant 0 : index
    %c0_29 = arith.constant 0 : index
    %124 = vector.load %arg9[%c0_28, %c0_29] : memref<64x64xbf16, #tpu.memory_space<vmem>>, vector<64x64xbf16>
    %cst_30 = arith.constant dense<0.000000e+00> : vector<2x64xf32>
    %125 = tpu.matmul %123, %124, %cst_30 {dimension_numbers = #tpu.dot_dimension_numbers<[1], [0], [0], [1], [0, 0, 1, 1], [], []>} : vector<2x64xbf16>, vector<64x64xbf16>, vector<2x64xf32> -> vector<2x64xf32>
    %c0_31 = arith.constant 0 : index
    %c0_32 = arith.constant 0 : index
    %126 = vector.load %arg10[%c0_31, %c0_32] : memref<2x64xf32, #tpu.memory_space<vmem>>, vector<2x64xf32>
    %127 = arith.addf %125, %126 : vector<2x64xf32>
    %cst_33 = arith.constant 0.000000e+00 : f32
    %128 = vector.broadcast %cst_33 : f32 to vector<2x64xf32>
    %129 = arith.maximumf %127, %128 : vector<2x64xf32>
    %130 = arith.truncf %129 : vector<2x64xf32> to vector<2x64xbf16>
    %c0_34 = arith.constant 0 : index
    %c0_35 = arith.constant 0 : index
    %131 = vector.load %arg11[%c0_34, %c0_35] : memref<64x64xbf16, #tpu.memory_space<vmem>>, vector<64x64xbf16>
    %cst_36 = arith.constant dense<0.000000e+00> : vector<2x64xf32>
    %132 = tpu.matmul %130, %131, %cst_36 {dimension_numbers = #tpu.dot_dimension_numbers<[1], [0], [0], [1], [0, 0, 1, 1], [], []>} : vector<2x64xbf16>, vector<64x64xbf16>, vector<2x64xf32> -> vector<2x64xf32>
    %c0_37 = arith.constant 0 : index
    %c0_38 = arith.constant 0 : index
    %133 = vector.load %arg12[%c0_37, %c0_38] : memref<1x64xf32, #tpu.memory_space<vmem>>, vector<1x64xf32>
    %134 = vector.broadcast %133 : vector<1x64xf32> to vector<2x64xf32>
    %135 = arith.addf %132, %134 : vector<2x64xf32>
    %cst_39 = arith.constant 0.000000e+00 : f32
    %136 = vector.broadcast %cst_39 : f32 to vector<2x64xf32>
    %137 = arith.maximumf %135, %136 : vector<2x64xf32>
    %138 = arith.truncf %137 : vector<2x64xf32> to vector<2x64xbf16>
    %c0_40 = arith.constant 0 : index
    %c0_41 = arith.constant 0 : index
    %139 = vector.load %arg13[%c0_40, %c0_41] : memref<64x128xbf16, #tpu.memory_space<vmem>>, vector<64x128xbf16>
    %cst_42 = arith.constant dense<0.000000e+00> : vector<2x128xf32>
    %140 = tpu.matmul %138, %139, %cst_42 {dimension_numbers = #tpu.dot_dimension_numbers<[1], [0], [0], [1], [0, 0, 1, 1], [], []>} : vector<2x64xbf16>, vector<64x128xbf16>, vector<2x128xf32> -> vector<2x128xf32>
    %c0_43 = arith.constant 0 : index
    %c0_44 = arith.constant 0 : index
    %141 = vector.load %arg14[%c0_43, %c0_44] : memref<1x128xf32, #tpu.memory_space<vmem>>, vector<1x128xf32>
    %142 = vector.broadcast %141 : vector<1x128xf32> to vector<2x128xf32>
    %143 = arith.addf %140, %142 : vector<2x128xf32>
    %c0_45 = arith.constant 0 : index
    %c0_46 = arith.constant 0 : index
    %144 = vector.load %arg15[%c0_45, %c0_46] : memref<2x128xf32, #tpu.memory_space<vmem>>, vector<2x128xf32>
    tpu.vector_store %arg15[%c0_45, %c0_46], %143 {strides = array<i32>} : memref<2x128xf32, #tpu.memory_space<vmem>>, vector<2x128xf32>,
    return
  }
}

</mosaic_0001>

<bundles_post_ra>
// kernel: alt_dqn_forward.1
= control target key start
LH: loop header
LB: loop body
LE: loop exit
PB: predicated region body
PF: predicated region fallthrough
CT: control target
= control target key end

     0   :  { %20 = vsyncpa [#allocation6], 0  ;;  %s14662_s0 = inlined_call_operand.vmem [shape: bf16[448,16], index: 0, kind: input, shape index: {}]   ;;  %s14663_s1 = inlined_call_operand.vmem [shape: bf16[16,32], index: 1, kind: input, shape index: {}]   ;;  %s14664_s2 = inlined_call_operand.vmem [shape: f32[1,32], index: 2, kind: input, shape index: {}]   ;;  %s14665_s3 = inlined_call_operand.vmem [shape: bf16[288,64], index: 3, kind: input, shape index: {}]   ;;  %s14666_s4 = inlined_call_operand.vmem [shape: f32[1,64], index: 4, kind: input, shape index: {}]   ;;  %s14667_s5 = inlined_call_operand.vmem [shape: bf16[576,128], index: 5, kind: input, shape index: {}]   ;;  %s14668_s6 = inlined_call_operand.vmem [shape: f32[1,128], index: 6, kind: input, shape index: {}]   ;;  %s14669_s7 = inlined_call_operand.vmem [shape: bf16[1792,256], index: 7, kind: input, shape index: {}]   ;;  %s14670_s8 = inlined_call_operand.vmem [shape: f32[1,64], index: 8, kind: input, shape index: {}]   ;;  %s14671_s9 = inlined_call_operand.vmem [shape: bf16[64,64], index: 9, kind: input, shape index: {}]   ;;  %s14672_s10 = inlined_call_operand.vmem [shape: f32[2,64], index: 10, kind: input, shape index: {}]   ;;  %s14673_s11 = inlined_call_operand.vmem [shape: bf16[64,64], index: 11, kind: input, shape index: {}]   ;;  %s14674_s12 = inlined_call_operand.vmem [shape: f32[1,64], index: 12, kind: input, shape index: {}]   ;;  %s14675_s13 = inlined_call_operand.vmem [shape: bf16[64,128], index: 13, kind: input, shape index: {}]   ;;  %s14676_s14 = inlined_call_operand.vmem [shape: f32[1,128], index: 14, kind: input, shape index: {}]   ;;  %s14677_s15 = inlined_call_operand.hbm [shape: f32[2,128], index: 15, kind: output, shape index: {}]  }
   0x1   :  { %v58_v0 = vld [vmem:[%s14667_s5] sm:$0xff]  ;;  %v60_v1 = vld [vmem:[%s14667_s5 + $0x8] sm:$0xff]  ;;  %v62_v2 = vld [vmem:[%s14667_s5 + $0x10] sm:$0xff] }
   0x2   :  { %59 = vst [vmem:[#allocation2 + $0xb0] sm:$0xff] %v58_v0  ;;  %v64_v3 = vld [vmem:[%s14667_s5 + $0x18] sm:$0xff]  ;;  %v66_v4 = vld [vmem:[%s14667_s5 + $0x20] sm:$0xff]  ;;  %v68_v5 = vld [vmem:[%s14667_s5 + $0x28] sm:$0xff] }
   0x3   :  { %61 = vst [vmem:[#allocation2 + $0xd0] sm:$0xff] %v60_v1  ;;  %v70_v6 = vld [vmem:[%s14667_s5 + $0x30] sm:$0xff]  ;;  %v72_v7 = vld [vmem:[%s14667_s5 + $0x38] sm:$0xff]  ;;  %v74_v8 = vld [vmem:[%s14667_s5 + $0x40] sm:$0xff] }
   0x4   :  { %63 = vst [vmem:[#allocation2 + $0x10] sm:$0xff] %v62_v2  ;;  %v76_v9 = vld [vmem:[%s14667_s5 + $0x48] sm:$0xff]  ;;  %v78_v10 = vld [vmem:[%s14667_s5 + $0x50] sm:$0xff]  ;;  %v80_v11 = vld [vmem:[%s14667_s5 + $0x58] sm:$0xff] }
   0x5   :  { %65 = vst [vmem:[#allocation2 + $0x48] sm:$0xff] %v64_v3  ;;  %v82_v12 = vld [vmem:[%s14667_s5 + $0x60] sm:$0xff]  ;;  %v84_v13 = vld [vmem:[%s14667_s5 + $0x68] sm:$0xff]  ;;  %v86_v14 = vld [vmem:[%s14667_s5 + $0x70] sm:$0xff] }
   0x6   :  { %67 = vst [vmem:[#allocation2 + $0x108] sm:$0xff] %v66_v4  ;;  %v88_v15 = vld [vmem:[%s14667_s5 + $0x78] sm:$0xff]  ;;  %v90_v16 = vld [vmem:[%s14667_s5 + $0x80] sm:$0xff]  ;;  %v92_v17 = vld [vmem:[%s14667_s5 + $0x88] sm:$0xff] }
   0x7   :  { %69 = vst [vmem:[#allocation2 + $0x68] sm:$0xff] %v68_v5  ;;  %v94_v18 = vld [vmem:[%s14667_s5 + $0x90] sm:$0xff]  ;;  %v96_v19 = vld [vmem:[%s14667_s5 + $0x98] sm:$0xff]  ;;  %v98_v20 = vld [vmem:[%s14667_s5 + $0xa0] sm:$0xff] }
   0x8   :  { %71 = vst [vmem:[#allocation2 + $0x30] sm:$0xff] %v70_v6  ;;  %v100_v21 = vld [vmem:[%s14667_s5 + $0xa8] sm:$0xff]  ;;  %v102_v22 = vld [vmem:[%s14667_s5 + $0xb0] sm:$0xff]  ;;  %v104_v23 = vld [vmem:[%s14667_s5 + $0xb8] sm:$0xff] }
   0x9   :  { %73 = vst [vmem:[#allocation2 + $0x18] sm:$0xff] %v72_v7  ;;  %v106_v24 = vld [vmem:[%s14667_s5 + $0xc0] sm:$0xff]  ;;  %v108_v25 = vld [vmem:[%s14667_s5 + $0xc8] sm:$0xff]  ;;  %v110_v26 = vld [vmem:[%s14667_s5 + $0xd0] sm:$0xff] }
   0xa   :  { %75 = vst [vmem:[#allocation2 + $0x80] sm:$0xff] %v74_v8  ;;  %v112_v27 = vld [vmem:[%s14667_s5 + $0xd8] sm:$0xff]  ;;  %v114_v28 = vld [vmem:[%s14667_s5 + $0xe0] sm:$0xff]  ;;  %v116_v29 = vld [vmem:[%s14667_s5 + $0xe8] sm:$0xff] }
   0xb   :  { %77 = vst [vmem:[#allocation2 + $0x110] sm:$0xff] %v76_v9  ;;  %v118_v30 = vld [vmem:[%s14667_s5 + $0xf0] sm:$0xff]  ;;  %v120_v31 = vld [vmem:[%s14667_s5 + $0xf8] sm:$0xff]  ;;  %v122_v32 = vld [vmem:[%s14667_s5 + $0x100] sm:$0xff] }
   0xc   :  { %79 = vst [vmem:[#allocation2 + $0x118] sm:$0xff] %v78_v10  ;;  %v124_v33 = vld [vmem:[%s14667_s5 + $0x108] sm:$0xff]  ;;  %v126_v34 = vld [vmem:[%s14667_s5 + $0x110] sm:$0xff]  ;;  %v128_v35 = vld [vmem:[%s14667_s5 + $0x118] sm:$0xff] }
   0xd   :  { %81 = vst [vmem:[#allocation2 + $0x98] sm:$0xff] %v80_v11 }
   0xe   :  { %83 = vst [vmem:[#allocation2 + $0xf8] sm:$0xff] %v82_v12 }
   0xf   :  { %85 = vst [vmem:[#allocation2 + $0x38] sm:$0xff] %v84_v13 }
  0x10   :  { %87 = vst [vmem:[#allocation2 + $0x8] sm:$0xff] %v86_v14 }
  0x11   :  { %89 = vst [vmem:[#allocation2 + $0x78] sm:$0xff] %v88_v15 }
  0x12   :  { %91 = vst [vmem:[#allocation2 + $0x20] sm:$0xff] %v90_v16 }
  0x13   :  { %93 = vst [vmem:[#allocation2 + $0xc8] sm:$0xff] %v92_v17 }
  0x14   :  { %95 = vst [vmem:[#allocation2 + $0x90] sm:$0xff] %v94_v18 }
  0x15   :  { %97 = vst [vmem:[#allocation2 + $0xa0] sm:$0xff] %v96_v19 }
  0x16   :  { %99 = vst [vmem:[#allocation2 + $0x70] sm:$0xff] %v98_v20 }
  0x17   :  { %101 = vst [vmem:[#allocation2 + $0x58] sm:$0xff] %v100_v21 }
  0x18   :  { %103 = vst [vmem:[#allocation2 + $0xe0] sm:$0xff] %v102_v22 }
  0x19   :  { %105 = vst [vmem:[#allocation2 + $0x60] sm:$0xff] %v104_v23 }
  0x1a   :  { %107 = vst [vmem:[#allocation2 + $0xa8] sm:$0xff] %v106_v24 }
  0x1b   :  { %109 = vst [vmem:[#allocation2 + $0x88] sm:$0xff] %v108_v25 }
  0x1c   :  { %111 = vst [vmem:[#allocation2 + $0xd8] sm:$0xff] %v110_v26 }
  0x1d   :  { %113 = vst [vmem:[#allocation2 + $0xc0] sm:$0xff] %v112_v27 }
  0x1e   :  { %115 = vst [vmem:[#allocation2 + $0x50] sm:$0xff] %v114_v28 }
  0x1f   :  { %117 = vst [vmem:[#allocation2 + $0xf0] sm:$0xff] %v116_v29 }
  0x20   :  { %119 = vst [vmem:[#allocation2 + $0xb8] sm:$0xff] %v118_v30 }
  0x21   :  { %121 = vst [vmem:[#allocation2 + $0x28] sm:$0xff] %v120_v31 }
  0x22   :  { %123 = vst [vmem:[#allocation2 + $0x100] sm:$0xff] %v122_v32 }
  0x23   :  { %125 = vst [vmem:[#allocation2] sm:$0xff] %v124_v33 }
  0x24   :  { %127 = vst [vmem:[#allocation2 + $0x40] sm:$0xff] %v126_v34 }
  0x25   :  { %129 = vst [vmem:[#allocation2 + $0xe8] sm:$0xff] %v128_v35 }
  0x26   :  { %135 = vsyncadd [#allocation4], 4608  ;;  %v147_v36 = vld [vmem:[%s14669_s7] sm:$0xff]  ;;  %v149_v37 = vld [vmem:[%s14669_s7 + $0x8] sm:$0xff] }
  0x27   :  { %148 = vst [vmem:[#allocation3] sm:$0xff] %v147_v36  ;;  %v151_v38 = vld [vmem:[%s14669_s7 + $0x10] sm:$0xff]  ;;  %v153_v39 = vld [vmem:[%s14669_s7 + $0x18] sm:$0xff]  ;;  %v155_v40 = vld [vmem:[%s14669_s7 + $0x20] sm:$0xff] }
  0x28   :  { %150 = vst [vmem:[#allocation3 + $0x8] sm:$0xff] %v149_v37  ;;  %v157_v41 = vld [vmem:[%s14669_s7 + $0x28] sm:$0xff]  ;;  %v159_v42 = vld [vmem:[%s14669_s7 + $0x30] sm:$0xff]  ;;  %v161_v43 = vld [vmem:[%s14669_s7 + $0x38] sm:$0xff] }
  0x29   :  { %152 = vst [vmem:[#allocation3 + $0x10] sm:$0xff] %v151_v38  ;;  %v163_v44 = vld [vmem:[%s14669_s7 + $0x40] sm:$0xff]  ;;  %v165_v45 = vld [vmem:[%s14669_s7 + $0x48] sm:$0xff]  ;;  %v167_v46 = vld [vmem:[%s14669_s7 + $0x50] sm:$0xff] }
  0x2a   :  { %154 = vst [vmem:[#allocation3 + $0x18] sm:$0xff] %v153_v39  ;;  %v169_v47 = vld [vmem:[%s14669_s7 + $0x58] sm:$0xff]  ;;  %v171_v48 = vld [vmem:[%s14669_s7 + $0x60] sm:$0xff]  ;;  %v173_v49 = vld [vmem:[%s14669_s7 + $0x68] sm:$0xff] }
  0x2b   :  { %156 = vst [vmem:[#allocation3 + $0x20] sm:$0xff] %v155_v40  ;;  %v175_v50 = vld [vmem:[%s14669_s7 + $0x70] sm:$0xff]  ;;  %v177_v51 = vld [vmem:[%s14669_s7 + $0x78] sm:$0xff]  ;;  %v179_v52 = vld [vmem:[%s14669_s7 + $0x80] sm:$0xff] }
  0x2c   :  { %158 = vst [vmem:[#allocation3 + $0x28] sm:$0xff] %v157_v41  ;;  %v181_v53 = vld [vmem:[%s14669_s7 + $0x88] sm:$0xff]  ;;  %v183_v54 = vld [vmem:[%s14669_s7 + $0x90] sm:$0xff]  ;;  %v185_v55 = vld [vmem:[%s14669_s7 + $0x98] sm:$0xff] }
  0x2d   :  { %160 = vst [vmem:[#allocation3 + $0x30] sm:$0xff] %v159_v42  ;;  %v187_v56 = vld [vmem:[%s14669_s7 + $0xa0] sm:$0xff]  ;;  %v189_v57 = vld [vmem:[%s14669_s7 + $0xa8] sm:$0xff]  ;;  %v191_v58 = vld [vmem:[%s14669_s7 + $0xb0] sm:$0xff] }
  0x2e   :  { %162 = vst [vmem:[#allocation3 + $0x38] sm:$0xff] %v161_v43  ;;  %v193_v59 = vld [vmem:[%s14669_s7 + $0xb8] sm:$0xff]  ;;  %v195_v60 = vld [vmem:[%s14669_s7 + $0xc0] sm:$0xff]  ;;  %v197_v61 = vld [vmem:[%s14669_s7 + $0xc8] sm:$0xff] }
  0x2f   :  { %164 = vst [vmem:[#allocation3 + $0x40] sm:$0xff] %v163_v44  ;;  %v199_v62 = vld [vmem:[%s14669_s7 + $0xd0] sm:$0xff]  ;;  %v201_v63 = vld [vmem:[%s14669_s7 + $0xd8] sm:$0xff]  ;;  %v203_v0 = vld [vmem:[%s14669_s7 + $0xe0] sm:$0xff] }
  0x30   :  { %166 = vst [vmem:[#allocation3 + $0x48] sm:$0xff] %v165_v45  ;;  %v205_v1 = vld [vmem:[%s14669_s7 + $0xe8] sm:$0xff]  ;;  %v207_v2 = vld [vmem:[%s14669_s7 + $0xf0] sm:$0xff]  ;;  %v209_v3 = vld [vmem:[%s14669_s7 + $0xf8] sm:$0xff] }
  0x31   :  { %168 = vst [vmem:[#allocation3 + $0x50] sm:$0xff] %v167_v46  ;;  %v211_v4 = vld [vmem:[%s14669_s7 + $0x100] sm:$0xff]  ;;  %v213_v5 = vld [vmem:[%s14669_s7 + $0x108] sm:$0xff]  ;;  %v215_v6 = vld [vmem:[%s14669_s7 + $0x110] sm:$0xff] }
  0x32   :  { %170 = vst [vmem:[#allocation3 + $0x58] sm:$0xff] %v169_v47  ;;  %v217_v7 = vld [vmem:[%s14669_s7 + $0x118] sm:$0xff]  ;;  %v219_v8 = vld [vmem:[%s14669_s7 + $0x120] sm:$0xff]  ;;  %v221_v9 = vld [vmem:[%s14669_s7 + $0x128] sm:$0xff] }
  0x33   :  { %172 = vst [vmem:[#allocation3 + $0x60] sm:$0xff] %v171_v48  ;;  %v223_v10 = vld [vmem:[%s14669_s7 + $0x130] sm:$0xff]  ;;  %v225_v11 = vld [vmem:[%s14669_s7 + $0x138] sm:$0xff]  ;;  %v227_v12 = vld [vmem:[%s14669_s7 + $0x140] sm:$0xff] }
  0x34   :  { %174 = vst [vmem:[#allocation3 + $0x68] sm:$0xff] %v173_v49  ;;  %v229_v13 = vld [vmem:[%s14669_s7 + $0x148] sm:$0xff]  ;;  %v231_v14 = vld [vmem:[%s14669_s7 + $0x150] sm:$0xff]  ;;  %v233_v15 = vld [vmem:[%s14669_s7 + $0x158] sm:$0xff] }
  0x35   :  { %176 = vst [vmem:[#allocation3 + $0x70] sm:$0xff] %v175_v50  ;;  %v235_v16 = vld [vmem:[%s14669_s7 + $0x160] sm:$0xff]  ;;  %v237_v17 = vld [vmem:[%s14669_s7 + $0x168] sm:$0xff]  ;;  %v239_v18 = vld [vmem:[%s14669_s7 + $0x170] sm:$0xff] }
  0x36   :  { %178 = vst [vmem:[#allocation3 + $0x78] sm:$0xff] %v177_v51  ;;  %v241_v19 = vld [vmem:[%s14669_s7 + $0x178] sm:$0xff]  ;;  %v243_v20 = vld [vmem:[%s14669_s7 + $0x180] sm:$0xff]  ;;  %v245_v21 = vld [vmem:[%s14669_s7 + $0x188] sm:$0xff] }
  0x37   :  { %180 = vst [vmem:[#allocation3 + $0x80] sm:$0xff] %v179_v52  ;;  %v247_v22 = vld [vmem:[%s14669_s7 + $0x190] sm:$0xff]  ;;  %v249_v23 = vld [vmem:[%s14669_s7 + $0x198] sm:$0xff]  ;;  %v251_v24 = vld [vmem:[%s14669_s7 + $0x1a0] sm:$0xff] }
  0x38   :  { %182 = vst [vmem:[#allocation3 + $0x88] sm:$0xff] %v181_v53  ;;  %v253_v25 = vld [vmem:[%s14669_s7 + $0x1a8] sm:$0xff]  ;;  %v255_v26 = vld [vmem:[%s14669_s7 + $0x1b0] sm:$0xff]  ;;  %v257_v27 = vld [vmem:[%s14669_s7 + $0x1b8] sm:$0xff] }
  0x39   :  { %184 = vst [vmem:[#allocation3 + $0x90] sm:$0xff] %v183_v54  ;;  %v259_v28 = vld [vmem:[%s14669_s7 + $0x1c0] sm:$0xff]  ;;  %v261_v29 = vld [vmem:[%s14669_s7 + $0x1c8] sm:$0xff]  ;;  %v263_v30 = vld [vmem:[%s14669_s7 + $0x1d0] sm:$0xff] }
  0x3a   :  { %186 = vst [vmem:[#allocation3 + $0x98] sm:$0xff] %v185_v55  ;;  %v265_v31 = vld [vmem:[%s14669_s7 + $0x1d8] sm:$0xff]  ;;  %v267_v32 = vld [vmem:[%s14669_s7 + $0x1e0] sm:$0xff]  ;;  %v269_v33 = vld [vmem:[%s14669_s7 + $0x1e8] sm:$0xff] }
  0x3b   :  { %188 = vst [vmem:[#allocation3 + $0xa0] sm:$0xff] %v187_v56  ;;  %v271_v34 = vld [vmem:[%s14669_s7 + $0x1f0] sm:$0xff]  ;;  %v273_v35 = vld [vmem:[%s14669_s7 + $0x1f8] sm:$0xff]  ;;  %v275_v36 = vld [vmem:[%s14669_s7 + $0x200] sm:$0xff] }
  0x3c   :  { %190 = vst [vmem:[#allocation3 + $0xa8] sm:$0xff] %v189_v57  ;;  %v277_v37 = vld [vmem:[%s14669_s7 + $0x208] sm:$0xff]  ;;  %v279_v38 = vld [vmem:[%s14669_s7 + $0x210] sm:$0xff]  ;;  %v281_v39 = vld [vmem:[%s14669_s7 + $0x218] sm:$0xff] }
  0x3d   :  { %192 = vst [vmem:[#allocation3 + $0xb0] sm:$0xff] %v191_v58  ;;  %v283_v40 = vld [vmem:[%s14669_s7 + $0x220] sm:$0xff]  ;;  %v285_v41 = vld [vmem:[%s14669_s7 + $0x228] sm:$0xff]  ;;  %v287_v42 = vld [vmem:[%s14669_s7 + $0x230] sm:$0xff] }
  0x3e   :  { %194 = vst [vmem:[#allocation3 + $0xb8] sm:$0xff] %v193_v59  ;;  %v289_v43 = vld [vmem:[%s14669_s7 + $0x238] sm:$0xff]  ;;  %v291_v44 = vld [vmem:[%s14669_s7 + $0x240] sm:$0xff]  ;;  %v293_v45 = vld [vmem:[%s14669_s7 + $0x248] sm:$0xff] }
  0x3f   :  { %196 = vst [vmem:[#allocation3 + $0xc0] sm:$0xff] %v195_v60  ;;  %v295_v46 = vld [vmem:[%s14669_s7 + $0x250] sm:$0xff]  ;;  %v297_v47 = vld [vmem:[%s14669_s7 + $0x258] sm:$0xff]  ;;  %v299_v48 = vld [vmem:[%s14669_s7 + $0x260] sm:$0xff] }
  0x40   :  { %198 = vst [vmem:[#allocation3 + $0xc8] sm:$0xff] %v197_v61  ;;  %v301_v49 = vld [vmem:[%s14669_s7 + $0x268] sm:$0xff]  ;;  %v303_v50 = vld [vmem:[%s14669_s7 + $0x270] sm:$0xff]  ;;  %v305_v51 = vld [vmem:[%s14669_s7 + $0x278] sm:$0xff] }
  0x41   :  { %200 = vst [vmem:[#allocation3 + $0xd0] sm:$0xff] %v199_v62  ;;  %v307_v52 = vld [vmem:[%s14669_s7 + $0x280] sm:$0xff]  ;;  %v309_v53 = vld [vmem:[%s14669_s7 + $0x288] sm:$0xff]  ;;  %v311_v54 = vld [vmem:[%s14669_s7 + $0x290] sm:$0xff] }
  0x42   :  { %202 = vst [vmem:[#allocation3 + $0xd8] sm:$0xff] %v201_v63  ;;  %v313_v55 = vld [vmem:[%s14669_s7 + $0x298] sm:$0xff]  ;;  %v315_v56 = vld [vmem:[%s14669_s7 + $0x2a0] sm:$0xff]  ;;  %v317_v57 = vld [vmem:[%s14669_s7 + $0x2a8] sm:$0xff] }
  0x43   :  { %204 = vst [vmem:[#allocation3 + $0xe0] sm:$0xff] %v203_v0  ;;  %v319_v58 = vld [vmem:[%s14669_s7 + $0x2b0] sm:$0xff]  ;;  %v321_v59 = vld [vmem:[%s14669_s7 + $0x2b8] sm:$0xff]  ;;  %v323_v60 = vld [vmem:[%s14669_s7 + $0x2c0] sm:$0xff] }
  0x44   :  { %206 = vst [vmem:[#allocation3 + $0xe8] sm:$0xff] %v205_v1  ;;  %v325_v61 = vld [vmem:[%s14669_s7 + $0x2c8] sm:$0xff]  ;;  %v327_v62 = vld [vmem:[%s14669_s7 + $0x2d0] sm:$0xff]  ;;  %v329_v63 = vld [vmem:[%s14669_s7 + $0x2d8] sm:$0xff] }
  0x45   :  { %208 = vst [vmem:[#allocation3 + $0xf0] sm:$0xff] %v207_v2  ;;  %v331_v0 = vld [vmem:[%s14669_s7 + $0x2e0] sm:$0xff]  ;;  %v333_v1 = vld [vmem:[%s14669_s7 + $0x2e8] sm:$0xff]  ;;  %v335_v2 = vld [vmem:[%s14669_s7 + $0x2f0] sm:$0xff] }
  0x46   :  { %210 = vst [vmem:[#allocation3 + $0xf8] sm:$0xff] %v209_v3  ;;  %v337_v3 = vld [vmem:[%s14669_s7 + $0x2f8] sm:$0xff] }
  0x47   :  { %212 = vst [vmem:[#allocation3 + $0x100] sm:$0xff] %v211_v4  ;;  %v339_v4 = vld [vmem:[%s14669_s7 + $0x300] sm:$0xff] }
  0x48   :  { %214 = vst [vmem:[#allocation3 + $0x108] sm:$0xff] %v213_v5  ;;  %v341_v5 = vld [vmem:[%s14669_s7 + $0x308] sm:$0xff] }
  0x49   :  { %216 = vst [vmem:[#allocation3 + $0x110] sm:$0xff] %v215_v6  ;;  %v343_v6 = vld [vmem:[%s14669_s7 + $0x310] sm:$0xff] }
  0x4a   :  { %218 = vst [vmem:[#allocation3 + $0x118] sm:$0xff] %v217_v7  ;;  %v345_v7 = vld [vmem:[%s14669_s7 + $0x318] sm:$0xff] }
  0x4b   :  { %220 = vst [vmem:[#allocation3 + $0x120] sm:$0xff] %v219_v8  ;;  %v347_v8 = vld [vmem:[%s14669_s7 + $0x320] sm:$0xff] }
  0x4c   :  { %222 = vst [vmem:[#allocation3 + $0x128] sm:$0xff] %v221_v9  ;;  %v349_v9 = vld [vmem:[%s14669_s7 + $0x328] sm:$0xff] }
  0x4d   :  { %224 = vst [vmem:[#allocation3 + $0x130] sm:$0xff] %v223_v10  ;;  %v351_v10 = vld [vmem:[%s14669_s7 + $0x330] sm:$0xff] }
  0x4e   :  { %226 = vst [vmem:[#allocation3 + $0x138] sm:$0xff] %v225_v11  ;;  %v353_v11 = vld [vmem:[%s14669_s7 + $0x338] sm:$0xff] }
  0x4f   :  { %228 = vst [vmem:[#allocation3 + $0x140] sm:$0xff] %v227_v12  ;;  %v355_v12 = vld [vmem:[%s14669_s7 + $0x340] sm:$0xff] }
  0x50   :  { %230 = vst [vmem:[#allocation3 + $0x148] sm:$0xff] %v229_v13  ;;  %v357_v13 = vld [vmem:[%s14669_s7 + $0x348] sm:$0xff] }
  0x51   :  { %232 = vst [vmem:[#allocation3 + $0x150] sm:$0xff] %v231_v14  ;;  %v359_v14 = vld [vmem:[%s14669_s7 + $0x350] sm:$0xff] }
  0x52   :  { %234 = vst [vmem:[#allocation3 + $0x158] sm:$0xff] %v233_v15  ;;  %v361_v15 = vld [vmem:[%s14669_s7 + $0x358] sm:$0xff] }
  0x53   :  { %236 = vst [vmem:[#allocation3 + $0x160] sm:$0xff] %v235_v16  ;;  %v363_v16 = vld [vmem:[%s14669_s7 + $0x360] sm:$0xff] }
  0x54   :  { %238 = vst [vmem:[#allocation3 + $0x168] sm:$0xff] %v237_v17  ;;  %v365_v17 = vld [vmem:[%s14669_s7 + $0x368] sm:$0xff] }
  0x55   :  { %240 = vst [vmem:[#allocation3 + $0x170] sm:$0xff] %v239_v18  ;;  %v367_v18 = vld [vmem:[%s14669_s7 + $0x370] sm:$0xff] }
  0x56   :  { %242 = vst [vmem:[#allocation3 + $0x178] sm:$0xff] %v241_v19  ;;  %v369_v19 = vld [vmem:[%s14669_s7 + $0x378] sm:$0xff] }
  0x57   :  { %244 = vst [vmem:[#allocation3 + $0x180] sm:$0xff] %v243_v20  ;;  %v371_v20 = vld [vmem:[%s14669_s7 + $0x380] sm:$0xff] }
  0x58   :  { %246 = vst [vmem:[#allocation3 + $0x188] sm:$0xff] %v245_v21  ;;  %v373_v21 = vld [vmem:[%s14669_s7 + $0x388] sm:$0xff] }
  0x59   :  { %248 = vst [vmem:[#allocation3 + $0x190] sm:$0xff] %v247_v22  ;;  %v375_v22 = vld [vmem:[%s14669_s7 + $0x390] sm:$0xff] }
  0x5a   :  { %250 = vst [vmem:[#allocation3 + $0x198] sm:$0xff] %v249_v23  ;;  %v377_v23 = vld [vmem:[%s14669_s7 + $0x398] sm:$0xff] }
  0x5b   :  { %252 = vst [vmem:[#allocation3 + $0x1a0] sm:$0xff] %v251_v24  ;;  %v379_v24 = vld [vmem:[%s14669_s7 + $0x3a0] sm:$0xff] }
  0x5c   :  { %254 = vst [vmem:[#allocation3 + $0x1a8] sm:$0xff] %v253_v25  ;;  %v381_v25 = vld [vmem:[%s14669_s7 + $0x3a8] sm:$0xff] }
  0x5d   :  { %256 = vst [vmem:[#allocation3 + $0x1b0] sm:$0xff] %v255_v26  ;;  %v383_v26 = vld [vmem:[%s14669_s7 + $0x3b0] sm:$0xff] }
  0x5e   :  { %258 = vst [vmem:[#allocation3 + $0x1b8] sm:$0xff] %v257_v27  ;;  %v385_v27 = vld [vmem:[%s14669_s7 + $0x3b8] sm:$0xff] }
  0x5f   :  { %260 = vst [vmem:[#allocation3 + $0x1c0] sm:$0xff] %v259_v28  ;;  %v387_v28 = vld [vmem:[%s14669_s7 + $0x3c0] sm:$0xff] }
  0x60   :  { %262 = vst [vmem:[#allocation3 + $0x1c8] sm:$0xff] %v261_v29  ;;  %v389_v29 = vld [vmem:[%s14669_s7 + $0x3c8] sm:$0xff] }
  0x61   :  { %264 = vst [vmem:[#allocation3 + $0x1d0] sm:$0xff] %v263_v30  ;;  %v391_v30 = vld [vmem:[%s14669_s7 + $0x3d0] sm:$0xff] }
  0x62   :  { %266 = vst [vmem:[#allocation3 + $0x1d8] sm:$0xff] %v265_v31  ;;  %v393_v31 = vld [vmem:[%s14669_s7 + $0x3d8] sm:$0xff] }
  0x63   :  { %268 = vst [vmem:[#allocation3 + $0x1e0] sm:$0xff] %v267_v32  ;;  %v395_v32 = vld [vmem:[%s14669_s7 + $0x3e0] sm:$0xff] }
  0x64   :  { %270 = vst [vmem:[#allocation3 + $0x1e8] sm:$0xff] %v269_v33  ;;  %v397_v33 = vld [vmem:[%s14669_s7 + $0x3e8] sm:$0xff] }
  0x65   :  { %272 = vst [vmem:[#allocation3 + $0x1f0] sm:$0xff] %v271_v34  ;;  %v399_v34 = vld [vmem:[%s14669_s7 + $0x3f0] sm:$0xff] }
  0x66   :  { %274 = vst [vmem:[#allocation3 + $0x1f8] sm:$0xff] %v273_v35  ;;  %v401_v35 = vld [vmem:[%s14669_s7 + $0x3f8] sm:$0xff] }
  0x67   :  { %276 = vst [vmem:[#allocation3 + $0x200] sm:$0xff] %v275_v36  ;;  %v403_v36 = vld [vmem:[%s14669_s7 + $0x400] sm:$0xff] }
  0x68   :  { %278 = vst [vmem:[#allocation3 + $0x208] sm:$0xff] %v277_v37  ;;  %v405_v37 = vld [vmem:[%s14669_s7 + $0x408] sm:$0xff] }
  0x69   :  { %280 = vst [vmem:[#allocation3 + $0x210] sm:$0xff] %v279_v38  ;;  %v407_v38 = vld [vmem:[%s14669_s7 + $0x410] sm:$0xff] }
  0x6a   :  { %282 = vst [vmem:[#allocation3 + $0x218] sm:$0xff] %v281_v39  ;;  %v409_v39 = vld [vmem:[%s14669_s7 + $0x418] sm:$0xff] }
  0x6b   :  { %284 = vst [vmem:[#allocation3 + $0x220] sm:$0xff] %v283_v40  ;;  %v411_v40 = vld [vmem:[%s14669_s7 + $0x420] sm:$0xff] }
  0x6c   :  { %286 = vst [vmem:[#allocation3 + $0x228] sm:$0xff] %v285_v41  ;;  %v413_v41 = vld [vmem:[%s14669_s7 + $0x428] sm:$0xff] }
  0x6d   :  { %288 = vst [vmem:[#allocation3 + $0x230] sm:$0xff] %v287_v42  ;;  %v415_v42 = vld [vmem:[%s14669_s7 + $0x430] sm:$0xff] }
  0x6e   :  { %290 = vst [vmem:[#allocation3 + $0x238] sm:$0xff] %v289_v43  ;;  %v417_v43 = vld [vmem:[%s14669_s7 + $0x438] sm:$0xff] }
  0x6f   :  { %292 = vst [vmem:[#allocation3 + $0x240] sm:$0xff] %v291_v44  ;;  %v419_v44 = vld [vmem:[%s14669_s7 + $0x440] sm:$0xff] }
  0x70   :  { %294 = vst [vmem:[#allocation3 + $0x248] sm:$0xff] %v293_v45  ;;  %v421_v45 = vld [vmem:[%s14669_s7 + $0x448] sm:$0xff] }
  0x71   :  { %296 = vst [vmem:[#allocation3 + $0x250] sm:$0xff] %v295_v46  ;;  %v423_v46 = vld [vmem:[%s14669_s7 + $0x450] sm:$0xff] }
  0x72   :  { %298 = vst [vmem:[#allocation3 + $0x258] sm:$0xff] %v297_v47  ;;  %v425_v47 = vld [vmem:[%s14669_s7 + $0x458] sm:$0xff] }
  0x73   :  { %300 = vst [vmem:[#allocation3 + $0x260] sm:$0xff] %v299_v48  ;;  %v427_v48 = vld [vmem:[%s14669_s7 + $0x460] sm:$0xff] }
  0x74   :  { %302 = vst [vmem:[#allocation3 + $0x268] sm:$0xff] %v301_v49  ;;  %v429_v49 = vld [vmem:[%s14669_s7 + $0x468] sm:$0xff] }
  0x75   :  { %304 = vst [vmem:[#allocation3 + $0x270] sm:$0xff] %v303_v50  ;;  %v431_v50 = vld [vmem:[%s14669_s7 + $0x470] sm:$0xff] }
  0x76   :  { %306 = vst [vmem:[#allocation3 + $0x278] sm:$0xff] %v305_v51  ;;  %v433_v51 = vld [vmem:[%s14669_s7 + $0x478] sm:$0xff] }
  0x77   :  { %308 = vst [vmem:[#allocation3 + $0x280] sm:$0xff] %v307_v52  ;;  %v435_v52 = vld [vmem:[%s14669_s7 + $0x480] sm:$0xff] }
  0x78   :  { %310 = vst [vmem:[#allocation3 + $0x288] sm:$0xff] %v309_v53  ;;  %v437_v53 = vld [vmem:[%s14669_s7 + $0x488] sm:$0xff] }
  0x79   :  { %312 = vst [vmem:[#allocation3 + $0x290] sm:$0xff] %v311_v54  ;;  %v439_v54 = vld [vmem:[%s14669_s7 + $0x490] sm:$0xff] }
  0x7a   :  { %314 = vst [vmem:[#allocation3 + $0x298] sm:$0xff] %v313_v55  ;;  %v441_v55 = vld [vmem:[%s14669_s7 + $0x498] sm:$0xff] }
  0x7b   :  { %316 = vst [vmem:[#allocation3 + $0x2a0] sm:$0xff] %v315_v56  ;;  %v443_v56 = vld [vmem:[%s14669_s7 + $0x4a0] sm:$0xff] }
  0x7c   :  { %318 = vst [vmem:[#allocation3 + $0x2a8] sm:$0xff] %v317_v57  ;;  %v445_v57 = vld [vmem:[%s14669_s7 + $0x4a8] sm:$0xff] }
  0x7d   :  { %320 = vst [vmem:[#allocation3 + $0x2b0] sm:$0xff] %v319_v58  ;;  %v447_v58 = vld [vmem:[%s14669_s7 + $0x4b0] sm:$0xff] }
  0x7e   :  { %322 = vst [vmem:[#allocation3 + $0x2b8] sm:$0xff] %v321_v59  ;;  %v449_v59 = vld [vmem:[%s14669_s7 + $0x4b8] sm:$0xff] }
  0x7f   :  { %324 = vst [vmem:[#allocation3 + $0x2c0] sm:$0xff] %v323_v60  ;;  %v451_v60 = vld [vmem:[%s14669_s7 + $0x4c0] sm:$0xff] }
  0x80   :  { %326 = vst [vmem:[#allocation3 + $0x2c8] sm:$0xff] %v325_v61  ;;  %v453_v61 = vld [vmem:[%s14669_s7 + $0x4c8] sm:$0xff] }
  0x81   :  { %328 = vst [vmem:[#allocation3 + $0x2d0] sm:$0xff] %v327_v62  ;;  %v455_v62 = vld [vmem:[%s14669_s7 + $0x4d0] sm:$0xff] }
  0x82   :  { %330 = vst [vmem:[#allocation3 + $0x2d8] sm:$0xff] %v329_v63  ;;  %v457_v63 = vld [vmem:[%s14669_s7 + $0x4d8] sm:$0xff] }
  0x83   :  { %332 = vst [vmem:[#allocation3 + $0x2e0] sm:$0xff] %v331_v0  ;;  %v459_v0 = vld [vmem:[%s14669_s7 + $0x4e0] sm:$0xff] }
  0x84   :  { %334 = vst [vmem:[#allocation3 + $0x2e8] sm:$0xff] %v333_v1  ;;  %v461_v1 = vld [vmem:[%s14669_s7 + $0x4e8] sm:$0xff] }
  0x85   :  { %336 = vst [vmem:[#allocation3 + $0x2f0] sm:$0xff] %v335_v2  ;;  %v463_v2 = vld [vmem:[%s14669_s7 + $0x4f0] sm:$0xff] }
  0x86   :  { %338 = vst [vmem:[#allocation3 + $0x2f8] sm:$0xff] %v337_v3  ;;  %v465_v3 = vld [vmem:[%s14669_s7 + $0x4f8] sm:$0xff] }
  0x87   :  { %340 = vst [vmem:[#allocation3 + $0x300] sm:$0xff] %v339_v4  ;;  %v467_v4 = vld [vmem:[%s14669_s7 + $0x500] sm:$0xff] }
  0x88   :  { %342 = vst [vmem:[#allocation3 + $0x308] sm:$0xff] %v341_v5  ;;  %v469_v5 = vld [vmem:[%s14669_s7 + $0x508] sm:$0xff] }
  0x89   :  { %344 = vst [vmem:[#allocation3 + $0x310] sm:$0xff] %v343_v6  ;;  %v471_v6 = vld [vmem:[%s14669_s7 + $0x510] sm:$0xff] }
  0x8a   :  { %346 = vst [vmem:[#allocation3 + $0x318] sm:$0xff] %v345_v7  ;;  %v473_v7 = vld [vmem:[%s14669_s7 + $0x518] sm:$0xff] }
  0x8b   :  { %348 = vst [vmem:[#allocation3 + $0x320] sm:$0xff] %v347_v8  ;;  %v475_v8 = vld [vmem:[%s14669_s7 + $0x520] sm:$0xff] }
  0x8c   :  { %350 = vst [vmem:[#allocation3 + $0x328] sm:$0xff] %v349_v9  ;;  %v477_v9 = vld [vmem:[%s14669_s7 + $0x528] sm:$0xff] }
  0x8d   :  { %352 = vst [vmem:[#allocation3 + $0x330] sm:$0xff] %v351_v10  ;;  %v479_v10 = vld [vmem:[%s14669_s7 + $0x530] sm:$0xff] }
  0x8e   :  { %354 = vst [vmem:[#allocation3 + $0x338] sm:$0xff] %v353_v11  ;;  %v481_v11 = vld [vmem:[%s14669_s7 + $0x538] sm:$0xff] }
  0x8f   :  { %356 = vst [vmem:[#allocation3 + $0x340] sm:$0xff] %v355_v12  ;;  %v483_v12 = vld [vmem:[%s14669_s7 + $0x540] sm:$0xff] }
  0x90   :  { %358 = vst [vmem:[#allocation3 + $0x348] sm:$0xff] %v357_v13  ;;  %v485_v13 = vld [vmem:[%s14669_s7 + $0x548] sm:$0xff] }
  0x91   :  { %360 = vst [vmem:[#allocation3 + $0x350] sm:$0xff] %v359_v14  ;;  %v487_v14 = vld [vmem:[%s14669_s7 + $0x550] sm:$0xff] }
  0x92   :  { %362 = vst [vmem:[#allocation3 + $0x358] sm:$0xff] %v361_v15  ;;  %v489_v15 = vld [vmem:[%s14669_s7 + $0x558] sm:$0xff] }
  0x93   :  { %364 = vst [vmem:[#allocation3 + $0x360] sm:$0xff] %v363_v16  ;;  %v491_v16 = vld [vmem:[%s14669_s7 + $0x560] sm:$0xff] }
  0x94   :  { %366 = vst [vmem:[#allocation3 + $0x368] sm:$0xff] %v365_v17  ;;  %v493_v17 = vld [vmem:[%s14669_s7 + $0x568] sm:$0xff] }
  0x95   :  { %368 = vst [vmem:[#allocation3 + $0x370] sm:$0xff] %v367_v18  ;;  %v495_v18 = vld [vmem:[%s14669_s7 + $0x570] sm:$0xff] }
  0x96   :  { %370 = vst [vmem:[#allocation3 + $0x378] sm:$0xff] %v369_v19  ;;  %v497_v19 = vld [vmem:[%s14669_s7 + $0x578] sm:$0xff] }
  0x97   :  { %372 = vst [vmem:[#allocation3 + $0x380] sm:$0xff] %v371_v20  ;;  %v499_v20 = vld [vmem:[%s14669_s7 + $0x580] sm:$0xff] }
  0x98   :  { %374 = vst [vmem:[#allocation3 + $0x388] sm:$0xff] %v373_v21  ;;  %v501_v21 = vld [vmem:[%s14669_s7 + $0x588] sm:$0xff] }
  0x99   :  { %376 = vst [vmem:[#allocation3 + $0x390] sm:$0xff] %v375_v22  ;;  %v503_v22 = vld [vmem:[%s14669_s7 + $0x590] sm:$0xff] }
  0x9a   :  { %378 = vst [vmem:[#allocation3 + $0x398] sm:$0xff] %v377_v23  ;;  %v505_v23 = vld [vmem:[%s14669_s7 + $0x598] sm:$0xff] }
  0x9b   :  { %380 = vst [vmem:[#allocation3 + $0x3a0] sm:$0xff] %v379_v24  ;;  %v507_v24 = vld [vmem:[%s14669_s7 + $0x5a0] sm:$0xff] }
  0x9c   :  { %382 = vst [vmem:[#allocation3 + $0x3a8] sm:$0xff] %v381_v25  ;;  %v509_v25 = vld [vmem:[%s14669_s7 + $0x5a8] sm:$0xff] }
  0x9d   :  { %384 = vst [vmem:[#allocation3 + $0x3b0] sm:$0xff] %v383_v26  ;;  %v511_v26 = vld [vmem:[%s14669_s7 + $0x5b0] sm:$0xff] }
  0x9e   :  { %386 = vst [vmem:[#allocation3 + $0x3b8] sm:$0xff] %v385_v27  ;;  %v513_v27 = vld [vmem:[%s14669_s7 + $0x5b8] sm:$0xff] }
  0x9f   :  { %388 = vst [vmem:[#allocation3 + $0x3c0] sm:$0xff] %v387_v28  ;;  %v515_v28 = vld [vmem:[%s14669_s7 + $0x5c0] sm:$0xff] }
  0xa0   :  { %390 = vst [vmem:[#allocation3 + $0x3c8] sm:$0xff] %v389_v29  ;;  %v517_v29 = vld [vmem:[%s14669_s7 + $0x5c8] sm:$0xff] }
  0xa1   :  { %392 = vst [vmem:[#allocation3 + $0x3d0] sm:$0xff] %v391_v30  ;;  %v519_v30 = vld [vmem:[%s14669_s7 + $0x5d0] sm:$0xff] }
  0xa2   :  { %394 = vst [vmem:[#allocation3 + $0x3d8] sm:$0xff] %v393_v31  ;;  %v521_v31 = vld [vmem:[%s14669_s7 + $0x5d8] sm:$0xff] }
  0xa3   :  { %396 = vst [vmem:[#allocation3 + $0x3e0] sm:$0xff] %v395_v32  ;;  %v523_v32 = vld [vmem:[%s14669_s7 + $0x5e0] sm:$0xff] }
  0xa4   :  { %398 = vst [vmem:[#allocation3 + $0x3e8] sm:$0xff] %v397_v33  ;;  %v525_v33 = vld [vmem:[%s14669_s7 + $0x5e8] sm:$0xff] }
  0xa5   :  { %400 = vst [vmem:[#allocation3 + $0x3f0] sm:$0xff] %v399_v34  ;;  %v527_v34 = vld [vmem:[%s14669_s7 + $0x5f0] sm:$0xff] }
  0xa6   :  { %402 = vst [vmem:[#allocation3 + $0x3f8] sm:$0xff] %v401_v35  ;;  %v529_v35 = vld [vmem:[%s14669_s7 + $0x5f8] sm:$0xff] }
  0xa7   :  { %404 = vst [vmem:[#allocation3 + $0x400] sm:$0xff] %v403_v36  ;;  %v531_v36 = vld [vmem:[%s14669_s7 + $0x600] sm:$0xff] }
  0xa8   :  { %406 = vst [vmem:[#allocation3 + $0x408] sm:$0xff] %v405_v37  ;;  %v533_v37 = vld [vmem:[%s14669_s7 + $0x608] sm:$0xff] }
  0xa9   :  { %408 = vst [vmem:[#allocation3 + $0x410] sm:$0xff] %v407_v38  ;;  %v535_v38 = vld [vmem:[%s14669_s7 + $0x610] sm:$0xff] }
  0xaa   :  { %410 = vst [vmem:[#allocation3 + $0x418] sm:$0xff] %v409_v39  ;;  %v537_v39 = vld [vmem:[%s14669_s7 + $0x618] sm:$0xff] }
  0xab   :  { %412 = vst [vmem:[#allocation3 + $0x420] sm:$0xff] %v411_v40  ;;  %v539_v40 = vld [vmem:[%s14669_s7 + $0x620] sm:$0xff] }
  0xac   :  { %414 = vst [vmem:[#allocation3 + $0x428] sm:$0xff] %v413_v41  ;;  %v541_v41 = vld [vmem:[%s14669_s7 + $0x628] sm:$0xff] }
  0xad   :  { %416 = vst [vmem:[#allocation3 + $0x430] sm:$0xff] %v415_v42  ;;  %v543_v42 = vld [vmem:[%s14669_s7 + $0x630] sm:$0xff] }
  0xae   :  { %418 = vst [vmem:[#allocation3 + $0x438] sm:$0xff] %v417_v43  ;;  %v545_v43 = vld [vmem:[%s14669_s7 + $0x638] sm:$0xff] }
  0xaf   :  { %420 = vst [vmem:[#allocation3 + $0x440] sm:$0xff] %v419_v44  ;;  %v547_v44 = vld [vmem:[%s14669_s7 + $0x640] sm:$0xff] }
  0xb0   :  { %422 = vst [vmem:[#allocation3 + $0x448] sm:$0xff] %v421_v45  ;;  %v549_v45 = vld [vmem:[%s14669_s7 + $0x648] sm:$0xff] }
  0xb1   :  { %424 = vst [vmem:[#allocation3 + $0x450] sm:$0xff] %v423_v46  ;;  %v551_v46 = vld [vmem:[%s14669_s7 + $0x650] sm:$0xff] }
  0xb2   :  { %426 = vst [vmem:[#allocation3 + $0x458] sm:$0xff] %v425_v47  ;;  %v553_v47 = vld [vmem:[%s14669_s7 + $0x658] sm:$0xff] }
  0xb3   :  { %428 = vst [vmem:[#allocation3 + $0x460] sm:$0xff] %v427_v48  ;;  %v555_v48 = vld [vmem:[%s14669_s7 + $0x660] sm:$0xff] }
  0xb4   :  { %430 = vst [vmem:[#allocation3 + $0x468] sm:$0xff] %v429_v49  ;;  %v557_v49 = vld [vmem:[%s14669_s7 + $0x668] sm:$0xff] }
  0xb5   :  { %432 = vst [vmem:[#allocation3 + $0x470] sm:$0xff] %v431_v50  ;;  %v559_v50 = vld [vmem:[%s14669_s7 + $0x670] sm:$0xff] }
  0xb6   :  { %434 = vst [vmem:[#allocation3 + $0x478] sm:$0xff] %v433_v51  ;;  %v561_v51 = vld [vmem:[%s14669_s7 + $0x678] sm:$0xff] }
  0xb7   :  { %436 = vst [vmem:[#allocation3 + $0x480] sm:$0xff] %v435_v52  ;;  %v563_v52 = vld [vmem:[%s14669_s7 + $0x680] sm:$0xff] }
  0xb8   :  { %438 = vst [vmem:[#allocation3 + $0x488] sm:$0xff] %v437_v53  ;;  %v565_v53 = vld [vmem:[%s14669_s7 + $0x688] sm:$0xff] }
  0xb9   :  { %440 = vst [vmem:[#allocation3 + $0x490] sm:$0xff] %v439_v54  ;;  %v567_v54 = vld [vmem:[%s14669_s7 + $0x690] sm:$0xff] }
  0xba   :  { %442 = vst [vmem:[#allocation3 + $0x498] sm:$0xff] %v441_v55  ;;  %v569_v55 = vld [vmem:[%s14669_s7 + $0x698] sm:$0xff] }
  0xbb   :  { %444 = vst [vmem:[#allocation3 + $0x4a0] sm:$0xff] %v443_v56  ;;  %v571_v56 = vld [vmem:[%s14669_s7 + $0x6a0] sm:$0xff] }
  0xbc   :  { %446 = vst [vmem:[#allocation3 + $0x4a8] sm:$0xff] %v445_v57  ;;  %v573_v57 = vld [vmem:[%s14669_s7 + $0x6a8] sm:$0xff] }
  0xbd   :  { %448 = vst [vmem:[#allocation3 + $0x4b0] sm:$0xff] %v447_v58  ;;  %v575_v58 = vld [vmem:[%s14669_s7 + $0x6b0] sm:$0xff] }
  0xbe   :  { %450 = vst [vmem:[#allocation3 + $0x4b8] sm:$0xff] %v449_v59  ;;  %v577_v59 = vld [vmem:[%s14669_s7 + $0x6b8] sm:$0xff] }
  0xbf   :  { %452 = vst [vmem:[#allocation3 + $0x4c0] sm:$0xff] %v451_v60  ;;  %v579_v60 = vld [vmem:[%s14669_s7 + $0x6c0] sm:$0xff] }
  0xc0   :  { %454 = vst [vmem:[#allocation3 + $0x4c8] sm:$0xff] %v453_v61  ;;  %v581_v61 = vld [vmem:[%s14669_s7 + $0x6c8] sm:$0xff] }
  0xc1   :  { %456 = vst [vmem:[#allocation3 + $0x4d0] sm:$0xff] %v455_v62  ;;  %v583_v62 = vld [vmem:[%s14669_s7 + $0x6d0] sm:$0xff] }
  0xc2   :  { %458 = vst [vmem:[#allocation3 + $0x4d8] sm:$0xff] %v457_v63  ;;  %v585_v63 = vld [vmem:[%s14669_s7 + $0x6d8] sm:$0xff] }
  0xc3   :  { %460 = vst [vmem:[#allocation3 + $0x4e0] sm:$0xff] %v459_v0  ;;  %v587_v0 = vld [vmem:[%s14669_s7 + $0x6e0] sm:$0xff] }
  0xc4   :  { %462 = vst [vmem:[#allocation3 + $0x4e8] sm:$0xff] %v461_v1  ;;  %v589_v1 = vld [vmem:[%s14669_s7 + $0x6e8] sm:$0xff] }
  0xc5   :  { %464 = vst [vmem:[#allocation3 + $0x4f0] sm:$0xff] %v463_v2  ;;  %v591_v2 = vld [vmem:[%s14669_s7 + $0x6f0] sm:$0xff] }
  0xc6   :  { %466 = vst [vmem:[#allocation3 + $0x4f8] sm:$0xff] %v465_v3  ;;  %v593_v3 = vld [vmem:[%s14669_s7 + $0x6f8] sm:$0xff] }
  0xc7   :  { %468 = vst [vmem:[#allocation3 + $0x500] sm:$0xff] %v467_v4 }
  0xc8   :  { %470 = vst [vmem:[#allocation3 + $0x508] sm:$0xff] %v469_v5 }
  0xc9   :  { %472 = vst [vmem:[#allocation3 + $0x510] sm:$0xff] %v471_v6 }
  0xca   :  { %474 = vst [vmem:[#allocation3 + $0x518] sm:$0xff] %v473_v7 }
  0xcb   :  { %476 = vst [vmem:[#allocation3 + $0x520] sm:$0xff] %v475_v8 }
  0xcc   :  { %478 = vst [vmem:[#allocation3 + $0x528] sm:$0xff] %v477_v9 }
  0xcd   :  { %480 = vst [vmem:[#allocation3 + $0x530] sm:$0xff] %v479_v10 }
  0xce   :  { %482 = vst [vmem:[#allocation3 + $0x538] sm:$0xff] %v481_v11 }
  0xcf   :  { %484 = vst [vmem:[#allocation3 + $0x540] sm:$0xff] %v483_v12 }
  0xd0   :  { %486 = vst [vmem:[#allocation3 + $0x548] sm:$0xff] %v485_v13 }
  0xd1   :  { %488 = vst [vmem:[#allocation3 + $0x550] sm:$0xff] %v487_v14 }
  0xd2   :  { %490 = vst [vmem:[#allocation3 + $0x558] sm:$0xff] %v489_v15 }
  0xd3   :  { %492 = vst [vmem:[#allocation3 + $0x560] sm:$0xff] %v491_v16 }
  0xd4   :  { %494 = vst [vmem:[#allocation3 + $0x568] sm:$0xff] %v493_v17 }
  0xd5   :  { %496 = vst [vmem:[#allocation3 + $0x570] sm:$0xff] %v495_v18 }
  0xd6   :  { %498 = vst [vmem:[#allocation3 + $0x578] sm:$0xff] %v497_v19 }
  0xd7   :  { %500 = vst [vmem:[#allocation3 + $0x580] sm:$0xff] %v499_v20 }
  0xd8   :  { %502 = vst [vmem:[#allocation3 + $0x588] sm:$0xff] %v501_v21 }
  0xd9   :  { %504 = vst [vmem:[#allocation3 + $0x590] sm:$0xff] %v503_v22 }
  0xda   :  { %506 = vst [vmem:[#allocation3 + $0x598] sm:$0xff] %v505_v23 }
  0xdb   :  { %508 = vst [vmem:[#allocation3 + $0x5a0] sm:$0xff] %v507_v24 }
  0xdc   :  { %510 = vst [vmem:[#allocation3 + $0x5a8] sm:$0xff] %v509_v25 }
  0xdd   :  { %512 = vst [vmem:[#allocation3 + $0x5b0] sm:$0xff] %v511_v26 }
  0xde   :  { %514 = vst [vmem:[#allocation3 + $0x5b8] sm:$0xff] %v513_v27 }
  0xdf   :  { %516 = vst [vmem:[#allocation3 + $0x5c0] sm:$0xff] %v515_v28 }
  0xe0   :  { %518 = vst [vmem:[#allocation3 + $0x5c8] sm:$0xff] %v517_v29 }
  0xe1   :  { %520 = vst [vmem:[#allocation3 + $0x5d0] sm:$0xff] %v519_v30 }
  0xe2   :  { %522 = vst [vmem:[#allocation3 + $0x5d8] sm:$0xff] %v521_v31 }
  0xe3   :  { %524 = vst [vmem:[#allocation3 + $0x5e0] sm:$0xff] %v523_v32 }
  0xe4   :  { %526 = vst [vmem:[#allocation3 + $0x5e8] sm:$0xff] %v525_v33 }
  0xe5   :  { %528 = vst [vmem:[#allocation3 + $0x5f0] sm:$0xff] %v527_v34 }
  0xe6   :  { %530 = vst [vmem:[#allocation3 + $0x5f8] sm:$0xff] %v529_v35 }
  0xe7   :  { %532 = vst [vmem:[#allocation3 + $0x600] sm:$0xff] %v531_v36 }
  0xe8   :  { %534 = vst [vmem:[#allocation3 + $0x608] sm:$0xff] %v533_v37 }
  0xe9   :  { %536 = vst [vmem:[#allocation3 + $0x610] sm:$0xff] %v535_v38 }
  0xea   :  { %538 = vst [vmem:[#allocation3 + $0x618] sm:$0xff] %v537_v39 }
  0xeb   :  { %540 = vst [vmem:[#allocation3 + $0x620] sm:$0xff] %v539_v40 }
  0xec   :  { %542 = vst [vmem:[#allocation3 + $0x628] sm:$0xff] %v541_v41 }
  0xed   :  { %544 = vst [vmem:[#allocation3 + $0x630] sm:$0xff] %v543_v42 }
  0xee   :  { %546 = vst [vmem:[#allocation3 + $0x638] sm:$0xff] %v545_v43 }
  0xef   :  { %548 = vst [vmem:[#allocation3 + $0x640] sm:$0xff] %v547_v44 }
  0xf0   :  { %550 = vst [vmem:[#allocation3 + $0x648] sm:$0xff] %v549_v45 }
  0xf1   :  { %552 = vst [vmem:[#allocation3 + $0x650] sm:$0xff] %v551_v46 }
  0xf2   :  { %554 = vst [vmem:[#allocation3 + $0x658] sm:$0xff] %v553_v47 }
  0xf3   :  { %556 = vst [vmem:[#allocation3 + $0x660] sm:$0xff] %v555_v48 }
  0xf4   :  { %558 = vst [vmem:[#allocation3 + $0x668] sm:$0xff] %v557_v49 }
  0xf5   :  { %560 = vst [vmem:[#allocation3 + $0x670] sm:$0xff] %v559_v50 }
  0xf6   :  { %562 = vst [vmem:[#allocation3 + $0x678] sm:$0xff] %v561_v51 }
  0xf7   :  { %564 = vst [vmem:[#allocation3 + $0x680] sm:$0xff] %v563_v52 }
  0xf8   :  { %566 = vst [vmem:[#allocation3 + $0x688] sm:$0xff] %v565_v53 }
  0xf9   :  { %568 = vst [vmem:[#allocation3 + $0x690] sm:$0xff] %v567_v54 }
  0xfa   :  { %570 = vst [vmem:[#allocation3 + $0x698] sm:$0xff] %v569_v55 }
  0xfb   :  { %572 = vst [vmem:[#allocation3 + $0x6a0] sm:$0xff] %v571_v56 }
  0xfc   :  { %574 = vst [vmem:[#allocation3 + $0x6a8] sm:$0xff] %v573_v57 }
  0xfd   :  { %576 = vst [vmem:[#allocation3 + $0x6b0] sm:$0xff] %v575_v58 }
  0xfe   :  { %578 = vst [vmem:[#allocation3 + $0x6b8] sm:$0xff] %v577_v59 }
  0xff   :  { %580 = vst [vmem:[#allocation3 + $0x6c0] sm:$0xff] %v579_v60 }
 0x100   :  { %582 = vst [vmem:[#allocation3 + $0x6c8] sm:$0xff] %v581_v61 }
 0x101   :  { %584 = vst [vmem:[#allocation3 + $0x6d0] sm:$0xff] %v583_v62 }
 0x102   :  { %586 = vst [vmem:[#allocation3 + $0x6d8] sm:$0xff] %v585_v63 }
 0x103   :  { %588 = vst [vmem:[#allocation3 + $0x6e0] sm:$0xff] %v587_v0 }
 0x104   :  { %590 = vst [vmem:[#allocation3 + $0x6e8] sm:$0xff] %v589_v1 }
 0x105   :  { %592 = vst [vmem:[#allocation3 + $0x6f0] sm:$0xff] %v591_v2 }
 0x106   :  { %594 = vst [vmem:[#allocation3 + $0x6f8] sm:$0xff] %v593_v3 }
 0x107   :  { %600 = vsyncadd [#allocation4 + $0x1], 28672  ;;  %v9327_v4 = vld [vmem:[%s14663_s1] sm:$0xff]  ;;  %vm809_vm0 = vcmask 130048   ;;  %v9300_v6 = vld [vmem:[%s14662_s0 + $0x8] sm:$0xff]  ;;  %vm1545_vm1 = vcmask 1046528  }
 0x108   :  { %v9299_v5 = vld [vmem:[%s14662_s0] sm:$0xff]  ;;  %901 = vmatpush.bf16.msra.mxu0 %v9327_v4  ;;  %v9301_v7 = vld [vmem:[%s14662_s0 + $0x10] sm:$0xff]  ;;  %v9302_v8 = vld [vmem:[%s14662_s0 + $0x18] sm:$0xff]  ;;  %s9661_s24 = smov 64   ;;  %vm1992_vm2 = vcmask 1045504   ;;  %s9662_s25 = smov 32  }
 0x109   :  { %v9303_v9 = vld [vmem:[%s14662_s0 + $0x20] sm:$0xff]  ;;  %v9304_v10 = vld [vmem:[%s14662_s0 + $0x28] sm:$0xff]  ;;  %v9305_v11 = vld [vmem:[%s14662_s0 + $0x30] sm:$0xff]  ;;  %s9663_s26 = smov 96   ;;  %vm1767_vm3 = vsmask.f32 6400 }
 0x10a   :  { %v9306_v12 = vld [vmem:[%s14662_s0 + $0x38] sm:$0xff]  ;;  %v9307_v13 = vld [vmem:[%s14662_s0 + $0x40] sm:$0xff]  ;;  %v9345_v17 = vld [vmem:[%s14665_s3 + $0x88] sm:$0xff]  ;;  %vm2349_vm4 = vcmask 1044480   ;;  %vm2399_vm5 = vcmask 261120   ;;  %vm2448_vm8 = vcmask 523264  }
 0x10b   :  { %8049 = vmatmul.msk.bf16.vlgmr.msra.gmra.mxu0 %vm809_vm0, %v9299_v5  ;;  %v10567_v16 = vld [vmem:[%s14664_s2] ss:$0 sm:$0xff]  ;;  %v9308_v19 = vld [vmem:[%s14662_s0 + $0x48] sm:$0xff]  ;;  %3209 = vmatpush.bf16.msra.mxu3 %v9345_v17  ;;  %v9309_v39 = vld [vmem:[%s14662_s0 + $0x50] sm:$0xff]  ;;  %vm2191_vm6 = vsmask.f32 5376 }
 0x10c   :  { %v9344_v22 = vld [vmem:[%s14665_s3 + $0x80] sm:$0xff]  ;;  %vm1300_vm7 = vsmask.f32 7424  ;;  %vm2497_vm9 = vcmask 785408  }
 0x10f   :  { %3210 = vmatpush.bf16.msra.mxu3 %v9344_v22 }
 0x11b   :  { %8050 = vmatmul.msk.bf16.gmra.mxu0 %vm809_vm0, %v9300_v6  ;;  %v9310_v6 = vld [vmem:[%s14662_s0 + $0x58] sm:$0xff] }
 0x12b   :  { %8051 = vmatmul.msk.bf16.gmra.mxu0 %vm809_vm0, %v9301_v7 }
 0x13b   :  { %8052 = vmatmul.msk.bf16.gmra.mxu0 %vm809_vm0, %v9302_v8 }
 0x14b   :  { %8053 = vmatmul.msk.bf16.gmra.mxu0 %vm809_vm0, %v9303_v9 }
 0x15b   :  { %8054 = vmatmul.msk.bf16.gmra.mxu0 %vm809_vm0, %v9304_v10 }
 0x16b   :  { %8055 = vmatmul.msk.bf16.gmra.mxu0 %vm809_vm0, %v9305_v11 }
 0x17b   :  { %8056 = vmatmul.msk.bf16.gmra.mxu0 %vm809_vm0, %v9306_v12 }
 0x188   :  { %v903_v14 = vpop.f32.mrf.mxu0 }
 0x189   :  { %v904_v21 = vadd.f32 %v10567_v16, %v903_v14 }
 0x18b   :  { %8057 = vmatmul.msk.bf16.gmra.mxu0 %vm809_vm0, %v9307_v13  ;;  %v1038_v25 = vmax.f32 %v904_v21, 0.0 }
 0x18d   :  { %v1126_v29 = vpack.c.bf16 %v1038_v25, %v1038_v25 }
 0x18f   :  { %v1225_v34 = vunpack.c.l.b16 %v1126_v29 }
 0x190   :  { %v905_v15 = vpop.f32.mrf.mxu0 }
 0x191   :  { %v906_v18 = vadd.f32 %v10567_v16, %v905_v15 }
 0x193   :  { %v1039_v23 = vmax.f32 %v906_v18, 0.0 }
 0x195   :  { %v1127_v26 = vpack.c.bf16 %v1039_v23, %v1039_v23 }
 0x197   :  { %v1226_v31 = vunpack.c.l.b16 %v1127_v26 }
 0x198   :  { %v908_v20 = vpop.f32.mrf.mxu0 }
 0x199   :  { %v909_v24 = vadd.f32 %v10567_v16, %v908_v20  ;;  %v10583_v36 = vpack.c.b16 %v1226_v31, %v1225_v34 }
 0x19b   :  { %8058 = vmatmul.msk.bf16.gmra.mxu0 %vm809_vm0, %v9308_v19  ;;  %v1040_v27 = vmax.f32 %v909_v24, 0.0  ;;  %v1546_v44 = vrot.slane %v10583_v36, 1  ;;  %v1304_v34 = vshll.u32 %v10583_v36, 16 }
 0x19d   :  { %v1128_v32 = vpack.c.bf16 %v1040_v27, %v1040_v27 }
 0x19f   :  { %v1227_v37 = vunpack.c.l.b16 %v1128_v32 }
 0x1a0   :  { %v910_v28 = vpop.f32.mrf.mxu0 }
 0x1a1   :  { %v911_v30 = vadd.f32 %v10567_v16, %v910_v28  ;;  %v1645_v46 = vpack.c.b16 %v1227_v37, %v1226_v31 }
 0x1a3   :  { %v1041_v33 = vmax.f32 %v911_v30, 0.0  ;;  %v1769_v51 = vshrl.u32 %v1645_v46, 16  ;;  %v1772_v52 = vshll.u32 %v1645_v46, 16  ;;  %v1993_v55 = vrot.slane %v1645_v46, 2 }
 0x1a4   :  { %v1670_v56 = vrot.slane %v1645_v46, 1 }
 0x1a5   :  { %v1129_v35 = vpack.c.bf16 %v1041_v33, %v1041_v33  ;;  %v1771_v62 = vrot.slane %v1769_v51, 1  ;;  %v1774_v63 = vrot.slane %v1772_v52, 2 }
 0x1a7   :  { %v1228_v38 = vunpack.c.l.b16 %v1129_v35  ;;  %v1775_v11 = vor.u32 %v1774_v63, %v1771_v62 }
 0x1a8   :  { %v913_v40 = vpop.f32.mrf.mxu0 }
 0x1a9   :  { %v10588_v41 = vpack.c.b16 %v1228_v38, %v1227_v37  ;;  %v914_v42 = vadd.f32 %v10567_v16, %v913_v40 }
 0x1ab   :  { %v1042_v43 = vmax.f32 %v914_v42, 0.0  ;;  %8059 = vmatmul.msk.bf16.gmra.mxu0 %vm809_vm0, %v9309_v39  ;;  %v1547_v45 = vrot.slane %v10588_v41, 1  ;;  %v1309_v8 = vshll.u32 %v10588_v41, 16  ;;  %v1313_v9 = vshrl.u32 %v10588_v41, 16 }
 0x1ac   :  { %v2350_v14 = vrot.slane %v10588_v41, 3  ;;  %v2094_v15 = vrot.slane %v10588_v41, 2 }
 0x1ad   :  { %v1130_v47 = vpack.c.bf16 %v1042_v43, %v1042_v43  ;;  %v1548_v48 = vsel %vm1545_vm1, %v1546_v44, %v1547_v45  ;;  %v2192_v23 = vrot.slane %v1313_v9, 2  ;;  %v2193_v24 = vrot.slane %v1309_v8, 3 }
 0x1ae   :  { %1595 = vrot.lane.b32.xlu2 %v1548_v48, %s9661_s24  ;;  %v1306_v43 = vrot.slane %v1304_v34, 1 }
 0x1af   :  { %v1229_v49 = vunpack.c.l.b16 %v1130_v47  ;;  %v2194_v32 = vor.u32 %v2193_v24, %v2192_v23 }
 0x1b0   :  { %v915_v50 = vpop.f32.mrf.mxu0 }
 0x1b1   :  { %v10598_v53 = vpack.c.b16 %v1229_v49, %v1228_v38  ;;  %v916_v54 = vadd.f32 %v10567_v16, %v915_v50  ;;  %v1311_v50 = vrot.slane %v1309_v8, 1 }
 0x1b3   :  { %v1043_v57 = vmax.f32 %v916_v54, 0.0  ;;  %v1994_v58 = vrot.slane %v10598_v53, 2  ;;  %v1671_v59 = vrot.slane %v10598_v53, 1  ;;  %v1777_v60 = vshrl.u32 %v10598_v53, 16  ;;  %v9311_v54 = vld [vmem:[%s14662_s0 + $0x60] sm:$0xff] }
 0x1b4   :  { %v1780_v61 = vshll.u32 %v10598_v53, 16  ;;  %v1315_v63 = vor.u32 %v1313_v9, %v1311_v50 }
 0x1b5   :  { %v1131_v0 = vpack.c.bf16 %v1043_v57, %v1043_v57  ;;  %v1995_v1 = vsel %vm1992_vm2, %v1993_v55, %v1994_v58  ;;  %v1672_v2 = vsel %vm1545_vm1, %v1670_v56, %v1671_v59  ;;  %v1779_v3 = vrot.slane %v1777_v60, 1 }
 0x1b6   :  { %2042 = vrot.lane.b32.xlu0 %v1995_v1, %s9662_s25  ;;  %1719 = vrot.lane.b32.xlu2 %v1672_v2, %s9663_s26  ;;  %v1782_v4 = vrot.slane %v1780_v61, 2 }
 0x1b7   :  { %v1230_v5 = vunpack.c.l.b16 %v1131_v0 }
 0x1b8   :  { %v918_v7 = vpop.f32.mrf.mxu0  ;;  %v1783_v10 = vor.u32 %v1782_v4, %v1779_v3 }
 0x1b9   :  { %v10616_v12 = vpack.c.b16 %v1230_v5, %v1229_v49  ;;  %v919_v13 = vadd.f32 %v10567_v16, %v918_v7  ;;  %v1302_v49 = vshrl.u32 %v10583_v36, 16 }
 0x1ba   :  { %v10622_v17 = vsel %vm1767_vm3, %v1775_v11, %v1783_v10 }
 0x1bb   :  { %v1044_v18 = vmax.f32 %v919_v13, 0.0  ;;  %8060 = vmatmul.msk.bf16.gmra.mxu0 %vm809_vm0, %v9310_v6  ;;  %v2351_v19 = vrot.slane %v10616_v12, 3  ;;  %v2095_v20 = vrot.slane %v10616_v12, 2  ;;  %v1317_v21 = vshll.u32 %v10616_v12, 16 }
 0x1bc   :  { %v1321_v22 = vshrl.u32 %v10616_v12, 16  ;;  %v1307_v56 = vor.u32 %v1306_v43, %v1302_v49 }
 0x1bd   :  { %v1132_v25 = vpack.c.bf16 %v1044_v18, %v1044_v18  ;;  %v2352_v26 = vsel %vm2349_vm4, %v2350_v14, %v2351_v19  ;;  %v2096_v27 = vsel %vm1992_vm2, %v2094_v15, %v2095_v20  ;;  %v2196_v28 = vrot.slane %v1317_v21, 3 }
 0x1be   :  { %8149 = vmatmul.msk.bf16.vlgmr.msra.gmra.mxu3 %vm2399_vm5, %v2352_v26  ;;  %2143 = vrot.lane.b32.xlu0 %v2096_v27, %s9661_s24  ;;  %v2195_v29 = vrot.slane %v1321_v22, 2  ;;  %v1319_v57 = vrot.slane %v1317_v21, 1  ;;  %v1312_v62 = vsel %vm1300_vm7, %v1307_v56, %v1311_v50 }
 0x1bf   :  { %v1231_v30 = vunpack.c.l.b16 %v1132_v25 }
 0x1c0   :  { %v920_v31 = vpop.f32.mrf.mxu0  ;;  %v2197_v33 = vor.u32 %v2196_v28, %v2195_v29  ;;  %v1323_v43 = vor.u32 %v1321_v22, %v1319_v57 }
 0x1c1   :  { %v10638_v35 = vpack.c.b16 %v1231_v30, %v1230_v5  ;;  %v921_v37 = vadd.f32 %v10567_v16, %v920_v31  ;;  %v1320_v5 = vsel %vm1300_vm7, %v1315_v63, %v1319_v57  ;;  %v1549_v31 = vrot.slane %v10616_v12, 1 }
 0x1c2   :  { %v2198_v38 = vsel %vm2191_vm6, %v2194_v32, %v2197_v33 }
 0x1c3   :  { %v1045_v39 = vmax.f32 %v921_v37, 0.0  ;;  %2301 = vrot.lane.b32.xlu1 %v2198_v38, %s9663_s26  ;;  %v1996_v40 = vrot.slane %v10638_v35, 2  ;;  %v1786_v42 = vshrl.u32 %v10638_v35, 16  ;;  %v1789_v44 = vshll.u32 %v10638_v35, 16 }
 0x1c4   :  { %v1673_v29 = vrot.slane %v10638_v35, 1 }
 0x1c5   :  { %v1133_v46 = vpack.c.bf16 %v1045_v39, %v1045_v39  ;;  %v1997_v47 = vsel %vm1992_vm2, %v1994_v58, %v1996_v40  ;;  %v1788_v48 = vrot.slane %v1786_v42, 1  ;;  %v1791_v51 = vrot.slane %v1789_v44, 2 }
 0x1c6   :  { %2044 = vrot.lane.b32.xlu0 %v1997_v47, %s9662_s25  ;;  %v1674_v35 = vsel %vm1545_vm1, %v1671_v59, %v1673_v29  ;;  %v1550_v42 = vsel %vm1545_vm1, %v1547_v45, %v1549_v31 }
 0x1c7   :  { %v1232_v52 = vunpack.c.l.b16 %v1133_v46  ;;  %v1792_v60 = vor.u32 %v1791_v51, %v1788_v48 }
 0x1c8   :  { %v923_v55 = vpop.f32.mrf.mxu0 }
 0x1c9   :  { %v10652_v61 = vpack.c.b16 %v1232_v52, %v1231_v30  ;;  %v924_v58 = vadd.f32 %v10567_v16, %v923_v55  ;;  %v10657_v0 = vsel %vm1767_vm3, %v1783_v10, %v1792_v60 }
 0x1cb   :  { %v1046_v1 = vmax.f32 %v924_v58, 0.0  ;;  %1497 = vrot.lane.b32.xlu1 %v1312_v62, %s9662_s25  ;;  %8061 = vmatmul.msk.bf16.gmra.mxu0 %vm809_vm0, %v9311_v54  ;;  %v2353_v2 = vrot.slane %v10652_v61, 3  ;;  %v1325_v3 = vshll.u32 %v10652_v61, 16  ;;  %v1329_v4 = vshrl.u32 %v10652_v61, 16 }
 0x1cc   :  { %v2097_v10 = vrot.slane %v10652_v61, 2 }
 0x1cd   :  { %v1134_v6 = vpack.c.bf16 %v1046_v1, %v1046_v1  ;;  %v2354_v7 = vsel %vm2349_vm4, %v2351_v19, %v2353_v2  ;;  %v2199_v8 = vrot.slane %v1329_v4, 2  ;;  %v2200_v9 = vrot.slane %v1325_v3, 3 }
 0x1ce   :  { %8150 = vmatmul.msk.bf16.gmra.mxu3 %vm2399_vm5, %v2354_v7  ;;  %1499 = vrot.lane.b32.xlu0 %v1320_v5, %s9662_s25  ;;  %v2098_v19 = vsel %vm1992_vm2, %v2095_v20, %v2097_v10  ;;  %v1327_v37 = vrot.slane %v1325_v3, 1 }
 0x1cf   :  { %v1233_v11 = vunpack.c.l.b16 %v1134_v6  ;;  %v2201_v13 = vor.u32 %v2200_v9, %v2199_v8  ;;  %v1551_v8 = vrot.slane %v10652_v61, 1 }
 0x1d0   :  { %v925_v14 = vpop.f32.mrf.mxu0  ;;  %v1328_v48 = vsel %vm1300_vm7, %v1323_v43, %v1327_v37 }
 0x1d1   :  { %v10671_v15 = vpack.c.b16 %v1233_v11, %v1232_v52  ;;  %v926_v18 = vadd.f32 %v10567_v16, %v925_v14  ;;  %v2202_v21 = vsel %vm2191_vm6, %v2197_v33, %v2201_v13  ;;  %v9312_v33 = vld [vmem:[%s14662_s0 + $0x68] sm:$0xff] }
 0x1d2   :  { %2303 = vrot.lane.b32.xlu2 %v2202_v21, %s9663_s26 }
 0x1d3   :  { %v1047_v23 = vmax.f32 %v926_v18, 0.0  ;;  %2145 = vrot.lane.b32.xlu1 %v2098_v19, %s9661_s24  ;;  %v1998_v24 = vrot.slane %v10671_v15, 2  ;;  %v1795_v25 = vshrl.u32 %v10671_v15, 16  ;;  %v1798_v26 = vshll.u32 %v10671_v15, 16 }
 0x1d4   :  { %v1675_v6 = vrot.slane %v10671_v15, 1 }
 0x1d5   :  { %v1135_v27 = vpack.c.bf16 %v1047_v23, %v1047_v23  ;;  %v1999_v28 = vsel %vm1992_vm2, %v1996_v40, %v1998_v24  ;;  %v1797_v30 = vrot.slane %v1795_v25, 1  ;;  %v1800_v20 = vrot.slane %v1798_v26, 2 }
 0x1d6   :  { %2046 = vrot.lane.b32.xlu0 %v1999_v28, %s9662_s25  ;;  %v1676_v15 = vsel %vm1545_vm1, %v1673_v29, %v1675_v6  ;;  %v1552_v23 = vsel %vm1545_vm1, %v1549_v31, %v1551_v8 }
 0x1d7   :  { %v1234_v32 = vunpack.c.l.b16 %v1135_v27  ;;  %v1801_v38 = vor.u32 %v1800_v20, %v1797_v30 }
 0x1d8   :  { %v928_v34 = vpop.f32.mrf.mxu0 }
 0x1d9   :  { %v10690_v39 = vpack.c.b16 %v1234_v32, %v1233_v11  ;;  %v929_v40 = vadd.f32 %v10567_v16, %v928_v34  ;;  %v10703_v44 = vsel %vm1767_vm3, %v1792_v60, %v1801_v38  ;;  %v9313_v11 = vld [vmem:[%s14662_s0 + $0x70] sm:$0xff] }
 0x1da   :  { %1721 = vrot.lane.b32.xlu2 %v1674_v35, %s9663_s26 }
 0x1db   :  { %v1048_v46 = vmax.f32 %v929_v40, 0.0  ;;  %1597 = vrot.lane.b32.xlu1 %v1550_v42, %s9661_s24  ;;  %8062 = vmatmul.msk.bf16.gmra.mxu0 %vm809_vm0, %v9312_v33  ;;  %v2355_v53 = vrot.slane %v10690_v39, 3  ;;  %v1333_v59 = vshll.u32 %v10690_v39, 16  ;;  %v1337_v47 = vshrl.u32 %v10690_v39, 16 }
 0x1dc   :  { %v2099_v51 = vrot.slane %v10690_v39, 2 }
 0x1dd   :  { %v1136_v45 = vpack.c.bf16 %v1048_v46, %v1048_v46  ;;  %v2356_v49 = vsel %vm2349_vm4, %v2353_v2, %v2355_v53  ;;  %v2203_v22 = vrot.slane %v1337_v47, 2  ;;  %v2204_v50 = vrot.slane %v1333_v59, 3 }
 0x1de   :  { %8151 = vmatmul.msk.bf16.gmra.mxu3 %vm2399_vm5, %v2356_v49  ;;  %1501 = vrot.lane.b32.xlu0 %v1328_v48, %s9662_s25  ;;  %v2100_v58 = vsel %vm1992_vm2, %v2097_v10, %v2099_v51  ;;  %v1335_v14 = vrot.slane %v1333_v59, 1 }
 0x1df   :  { %v1235_v52 = vunpack.c.l.b16 %v1136_v45  ;;  %v2205_v54 = vor.u32 %v2204_v50, %v2203_v22 }
 0x1e0   :  { %v930_v55 = vpop.f32.mrf.mxu0 }
 0x1e1   :  { %v10717_v56 = vpack.c.b16 %v1235_v52, %v1234_v32  ;;  %v931_v57 = vadd.f32 %v10567_v16, %v930_v55  ;;  %v2206_v60 = vsel %vm2191_vm6, %v2201_v13, %v2205_v54 }
 0x1e2   :  { %2305 = vrot.lane.b32.xlu2 %v2206_v60, %s9663_s26 }
 0x1e3   :  { %v1049_v62 = vmax.f32 %v931_v57, 0.0  ;;  %2147 = vrot.lane.b32.xlu1 %v2100_v58, %s9661_s24  ;;  %v2000_v63 = vrot.slane %v10717_v56, 2  ;;  %v1804_v1 = vshrl.u32 %v10717_v56, 16  ;;  %v1807_v2 = vshll.u32 %v10717_v56, 16  ;;  %v9314_v57 = vld [vmem:[%s14662_s0 + $0x78] sm:$0xff] }
 0x1e4   :  { %v1677_v22 = vrot.slane %v10717_v56, 1 }
 0x1e5   :  { %v1137_v3 = vpack.c.bf16 %v1049_v62, %v1049_v62  ;;  %v2001_v5 = vsel %vm1992_vm2, %v1998_v24, %v2000_v63  ;;  %v1806_v7 = vrot.slane %v1804_v1, 1  ;;  %v1809_v9 = vrot.slane %v1807_v2, 2 }
 0x1e6   :  { %2048 = vrot.lane.b32.xlu0 %v2001_v5, %s9662_s25  ;;  %v1331_v24 = vor.u32 %v1329_v4, %v1327_v37  ;;  %v1678_v2 = vsel %vm1545_vm1, %v1675_v6, %v1677_v22  ;;  %v1339_v5 = vor.u32 %v1337_v47, %v1335_v14 }
 0x1e7   :  { %v1236_v10 = vunpack.c.l.b16 %v1137_v3  ;;  %v1810_v18 = vor.u32 %v1809_v9, %v1806_v7  ;;  %v9342_v7 = vld [vmem:[%s14665_s3 + $0x70] sm:$0xff] }
 0x1e8   :  { %v933_v13 = vpop.f32.mrf.mxu0  ;;  %v1336_v30 = vsel %vm1300_vm7, %v1331_v24, %v1335_v14 }
 0x1e9   :  { %v10734_v21 = vpack.c.b16 %v1236_v10, %v1235_v52  ;;  %v934_v19 = vadd.f32 %v10567_v16, %v933_v13  ;;  %v10743_v25 = vsel %vm1767_vm3, %v1801_v38, %v1810_v18  ;;  %v1553_v52 = vrot.slane %v10690_v39, 1 }
 0x1ea   :  { %1723 = vrot.lane.b32.xlu2 %v1676_v15, %s9663_s26 }
 0x1eb   :  { %v1050_v26 = vmax.f32 %v934_v19, 0.0  ;;  %1599 = vrot.lane.b32.xlu1 %v1552_v23, %s9661_s24  ;;  %8063 = vmatmul.msk.bf16.gmra.mxu0 %vm809_vm0, %v9313_v11  ;;  %v2357_v27 = vrot.slane %v10734_v21, 3  ;;  %v1341_v28 = vshll.u32 %v10734_v21, 16  ;;  %v1345_v29 = vshrl.u32 %v10734_v21, 16  ;;  %v9341_v23 = vld [vmem:[%s14665_s3 + $0x68] sm:$0xff] }
 0x1ec   :  { %v2101_v33 = vrot.slane %v10734_v21, 2  ;;  %v1554_v3 = vsel %vm1545_vm1, %v1551_v8, %v1553_v52 }
 0x1ed   :  { %v1138_v31 = vpack.c.bf16 %v1050_v26, %v1050_v26  ;;  %v2358_v20 = vsel %vm2349_vm4, %v2355_v53, %v2357_v27  ;;  %v2207_v4 = vrot.slane %v1345_v29, 2  ;;  %v2208_v32 = vrot.slane %v1341_v28, 3 }
 0x1ee   :  { %8152 = vmatmul.msk.bf16.gmra.mxu3 %vm2399_vm5, %v2358_v20  ;;  %1503 = vrot.lane.b32.xlu0 %v1336_v30, %s9662_s25  ;;  %v2102_v43 = vsel %vm1992_vm2, %v2099_v51, %v2101_v33  ;;  %v9343_v51 = vld [vmem:[%s14665_s3 + $0x78] sm:$0xff]  ;;  %v10777_v58 = vrot.slane %v1341_v28, 1 }
 0x1ef   :  { %v1237_v34 = vunpack.c.l.b16 %v1138_v31  ;;  %v2209_v37 = vor.u32 %v2208_v32, %v2207_v4  ;;  %3074 = vmatpush.bf16.msra.mxu2 %v9343_v51  ;;  %v9340_v32 = vld [vmem:[%s14665_s3 + $0x60] sm:$0xff] }
 0x1f0   :  { %v935_v38 = vpop.f32.mrf.mxu0  ;;  %v1344_v47 = vsel %vm1300_vm7, %v1339_v5, %v10777_v58  ;;  %v9315_v51 = vld [vmem:[%s14662_s0 + $0x80] sm:$0xff]  ;;  %v1347_v5 = vor.u32 %v1345_v29, %v10777_v58 }
 0x1f1   :  { %v10757_v40 = vpack.c.b16 %v1237_v34, %v1236_v10  ;;  %v936_v35 = vadd.f32 %v10567_v16, %v935_v38  ;;  %v2210_v42 = vsel %vm2191_vm6, %v2205_v54, %v2209_v37 }
 0x1f2   :  { %2307 = vrot.lane.b32.xlu2 %v2210_v42, %s9663_s26 }
 0x1f3   :  { %v1051_v46 = vmax.f32 %v936_v35, 0.0  ;;  %2149 = vrot.lane.b32.xlu1 %v2102_v43, %s9661_s24  ;;  %v2002_v53 = vrot.slane %v10757_v40, 2  ;;  %v1813_v59 = vshrl.u32 %v10757_v40, 16  ;;  %v1816_v48 = vshll.u32 %v10757_v40, 16  ;;  %3075 = vmatpush.bf16.msra.mxu2 %v9342_v7  ;;  %v9338_v7 = vld [vmem:[%s14665_s3 + $0x50] sm:$0xff] }
 0x1f5   :  { %v1139_v45 = vpack.c.bf16 %v1051_v46, %v1051_v46  ;;  %v2003_v49 = vsel %vm1992_vm2, %v2000_v63, %v2002_v53  ;;  %v1815_v50 = vrot.slane %v1813_v59, 1  ;;  %v1818_v54 = vrot.slane %v1816_v48, 2 }
 0x1f6   :  { %2050 = vrot.lane.b32.xlu0 %v2003_v49, %s9662_s25  ;;  %v1679_v46 = vrot.slane %v10757_v40, 1  ;;  %v1555_v48 = vrot.slane %v10734_v21, 1 }
 0x1f7   :  { %v1238_v55 = vunpack.c.l.b16 %v1139_v45  ;;  %v10779_v62 = vor.u32 %v1818_v54, %v1815_v50  ;;  %3076 = vmatpush.bf16.msra.mxu2 %v9341_v23  ;;  %v9339_v45 = vld [vmem:[%s14665_s3 + $0x58] sm:$0xff] }
 0x1f8   :  { %v938_v60 = vpop.f32.mrf.mxu0 }
 0x1f9   :  { %v10781_v63 = vpack.c.b16 %v1238_v55, %v1237_v34  ;;  %v939_v1 = vadd.f32 %v10567_v16, %v938_v60  ;;  %v10798_v9 = vsel %vm1767_vm3, %v1810_v18, %v10779_v62 }
 0x1fa   :  { %1725 = vrot.lane.b32.xlu2 %v1678_v2, %s9663_s26  ;;  %v1680_v2 = vsel %vm1545_vm1, %v1677_v22, %v1679_v46 }
 0x1fb   :  { %v1052_v10 = vmax.f32 %v939_v1, 0.0  ;;  %1601 = vrot.lane.b32.xlu1 %v1554_v3, %s9661_s24  ;;  %8064 = vmatmul.msk.bf16.gmra.mxu0 %vm809_vm0, %v9314_v57  ;;  %v2359_v6 = vrot.slane %v10781_v63, 3  ;;  %v1349_v8 = vshll.u32 %v10781_v63, 16  ;;  %v1353_v11 = vshrl.u32 %v10781_v63, 16 }
 0x1fc   :  { %v2103_v15 = vrot.slane %v10781_v63, 2  ;;  %3077 = vmatpush.bf16.msra.mxu2 %v9340_v32  ;;  %v1556_v3 = vsel %vm1545_vm1, %v1553_v52, %v1555_v48  ;;  %v9336_v32 = vld [vmem:[%s14665_s3 + $0x40] sm:$0xff] }
 0x1fd   :  { %v1140_v13 = vpack.c.bf16 %v1052_v10, %v1052_v10  ;;  %v2360_v14 = vsel %vm2349_vm4, %v2357_v27, %v2359_v6  ;;  %v2211_v18 = vrot.slane %v1353_v11, 2  ;;  %v2212_v19 = vrot.slane %v1349_v8, 3  ;;  %v9335_v27 = vld [vmem:[%s14665_s3 + $0x38] sm:$0xff] }
 0x1fe   :  { %8153 = vmatmul.msk.bf16.gmra.mxu3 %vm2399_vm5, %v2360_v14  ;;  %1505 = vrot.lane.b32.xlu0 %v1344_v47, %s9662_s25  ;;  %v2104_v4 = vsel %vm1992_vm2, %v2101_v33, %v2103_v15 }
 0x1ff   :  { %v1239_v24 = vunpack.c.l.b16 %v1140_v13  ;;  %v10818_v26 = vor.u32 %v2212_v19, %v2211_v18  ;;  %2945 = vmatpush.bf16.msra.mxu1 %v9335_v27  ;;  %v9337_v19 = vld [vmem:[%s14665_s3 + $0x48] sm:$0xff] }
 0x200   :  { %v940_v28 = vpop.f32.mrf.mxu0  ;;  %3078 = vmatpush.bf16.msra.mxu2 %v9339_v45 }
 0x201   :  { %v10823_v30 = vpack.c.b16 %v1239_v24, %v1238_v55  ;;  %v941_v31 = vadd.f32 %v10567_v16, %v940_v28  ;;  %v2214_v20 = vsel %vm2191_vm6, %v2209_v37, %v10818_v26  ;;  %v9334_v37 = vld [vmem:[%s14665_s3 + $0x30] sm:$0xff]  ;;  %v9333_v55 = vld [vmem:[%s14665_s3 + $0x28] sm:$0xff] }
 0x202   :  { %2309 = vrot.lane.b32.xlu2 %v2214_v20, %s9663_s26 }
 0x203   :  { %v1053_v34 = vmax.f32 %v941_v31, 0.0  ;;  %2151 = vrot.lane.b32.xlu1 %v2104_v4, %s9661_s24  ;;  %v2004_v38 = vrot.slane %v10823_v30, 2  ;;  %v1822_v35 = vshrl.u32 %v10823_v30, 16  ;;  %v1825_v42 = vshll.u32 %v10823_v30, 16  ;;  %2946 = vmatpush.bf16.msra.mxu1 %v9334_v37  ;;  %v9330_v37 = vld [vmem:[%s14665_s3 + $0x10] sm:$0xff] }
 0x204   :  { %3079 = vmatpush.bf16.msra.mxu2 %v9338_v7 }
 0x205   :  { %v1141_v33 = vpack.c.bf16 %v1053_v34, %v1053_v34  ;;  %v2005_v43 = vsel %vm1992_vm2, %v2002_v53, %v2004_v38  ;;  %v1824_v59 = vrot.slane %v1822_v35, 1  ;;  %v1827_v49 = vrot.slane %v1825_v42, 2 }
 0x206   :  { %2052 = vrot.lane.b32.xlu0 %v2005_v43, %s9662_s25  ;;  %v10854_v53 = vrot.slane %v1349_v8, 1  ;;  %v1681_v43 = vrot.slane %v10823_v30, 1 }
 0x207   :  { %v1240_v50 = vunpack.c.l.b16 %v1141_v33  ;;  %v10859_v57 = vor.u32 %v1827_v49, %v1824_v59  ;;  %2947 = vmatpush.bf16.msra.mxu1 %v9333_v55  ;;  %v1557_v59 = vrot.slane %v10781_v63, 1 }
 0x208   :  { %v943_v54 = vpop.f32.mrf.mxu0  ;;  %v1352_v58 = vsel %vm1300_vm7, %v1347_v5, %v10854_v53  ;;  %3080 = vmatpush.bf16.msra.mxu2 %v9337_v19  ;;  %v1682_v5 = vsel %vm1545_vm1, %v1679_v46, %v1681_v43  ;;  %v10956_v7 = vpop.permute.xlu2 %1595 }
 0x209   :  { %v10861_v60 = vpack.c.b16 %v1240_v50, %v1239_v24  ;;  %v944_v1 = vadd.f32 %v10567_v16, %v943_v54  ;;  %v10884_v56 = vsel %vm1767_vm3, %v10779_v62, %v10859_v57  ;;  %v9332_v62 = vld [vmem:[%s14665_s3 + $0x20] sm:$0xff] }
 0x20a   :  { %1727 = vrot.lane.b32.xlu2 %v1680_v2, %s9663_s26 }
 0x20b   :  { %v1054_v22 = vmax.f32 %v944_v1, 0.0  ;;  %1603 = vrot.lane.b32.xlu1 %v1556_v3, %s9661_s24  ;;  %8065 = vmatmul.msk.bf16.gmra.mxu0 %vm809_vm0, %v9315_v51  ;;  %v2361_v52 = vrot.slane %v10861_v60, 3  ;;  %v1357_v10 = vshll.u32 %v10861_v60, 16  ;;  %v1361_v29 = vshrl.u32 %v10861_v60, 16  ;;  %v9316_v51 = vld [vmem:[%s14662_s0 + $0x88] sm:$0xff] }
 0x20c   :  { %v2105_v18 = vrot.slane %v10861_v60, 2  ;;  %2948 = vmatpush.bf16.msra.mxu1 %v9332_v62  ;;  %3081 = vmatpush.bf16.msra.mxu2 %v9336_v32 }
 0x20d   :  { %v1142_v8 = vpack.c.bf16 %v1054_v22, %v1054_v22  ;;  %v2362_v47 = vsel %vm2349_vm4, %v2359_v6, %v2361_v52  ;;  %v2215_v13 = vrot.slane %v1361_v29, 2  ;;  %v2216_v14 = vrot.slane %v1357_v10, 3  ;;  %v9331_v6 = vld [vmem:[%s14665_s3 + $0x18] sm:$0xff] }
 0x20e   :  { %8154 = vmatmul.msk.bf16.gmra.mxu3 %vm2399_vm5, %v2362_v47  ;;  %1507 = vrot.lane.b32.xlu0 %v1352_v58, %s9662_s25  ;;  %v2106_v4 = vsel %vm1992_vm2, %v2103_v15, %v2105_v18  ;;  %v1359_v55 = vrot.slane %v1357_v10, 1  ;;  %v1558_v22 = vsel %vm1545_vm1, %v1555_v48, %v1557_v59  ;;  %v1355_v10 = vor.u32 %v1353_v11, %v10854_v53  ;;  %v9328_v11 = vld [vmem:[%s14665_s3] sm:$0xff] }
 0x20f   :  { %v1241_v23 = vunpack.c.l.b16 %v1142_v8  ;;  %v10909_v24 = vor.u32 %v2216_v14, %v2215_v13 }
 0x210   :  { %v945_v28 = vpop.f32.mrf.mxu0  ;;  %2949 = vmatpush.bf16.msra.mxu1 %v9331_v6  ;;  %v1360_v48 = vsel %vm1300_vm7, %v1355_v10, %v1359_v55 }
 0x211   :  { %v10914_v27 = vpack.c.b16 %v1241_v23, %v1240_v50  ;;  %v946_v31 = vadd.f32 %v10567_v16, %v945_v28  ;;  %v2218_v20 = vsel %vm2191_vm6, %v10818_v26, %v10909_v24 }
 0x212   :  { %2311 = vrot.lane.b32.xlu2 %v2218_v20, %s9663_s26 }
 0x213   :  { %v1055_v34 = vmax.f32 %v946_v31, 0.0  ;;  %2153 = vrot.lane.b32.xlu1 %v2106_v4, %s9661_s24  ;;  %v2006_v35 = vrot.slane %v10914_v27, 2  ;;  %v1831_v26 = vshrl.u32 %v10914_v27, 16  ;;  %v1834_v42 = vshll.u32 %v10914_v27, 16 }
 0x214   :  { %2950 = vmatpush.bf16.msra.mxu1 %v9330_v37 }
 0x215   :  { %v1143_v15 = vpack.c.bf16 %v1055_v34, %v1055_v34  ;;  %v2007_v33 = vsel %vm1992_vm2, %v2004_v38, %v2006_v35  ;;  %v1833_v45 = vrot.slane %v1831_v26, 1  ;;  %v1836_v49 = vrot.slane %v1834_v42, 2  ;;  %v9329_v38 = vld [vmem:[%s14665_s3 + $0x8] sm:$0xff]  ;;  %v11000_v26 = vpop.permute.xlu2 %1719 }
 0x216   :  { %2054 = vrot.lane.b32.xlu0 %v2007_v33, %s9662_s25 }
 0x217   :  { %v1242_v50 = vunpack.c.l.b16 %v1143_v15  ;;  %v1837_v1 = vor.u32 %v1836_v49, %v1833_v45  ;;  %v1683_v15 = vrot.slane %v10914_v27, 1 }
 0x218   :  { %v948_v54 = vpop.f32.mrf.mxu0  ;;  %2951 = vmatpush.bf16.msra.mxu1 %v9329_v38 }
 0x219   :  { %v10948_v2 = vpack.c.b16 %v1242_v50, %v1241_v23  ;;  %v949_v3 = vadd.f32 %v10567_v16, %v948_v54  ;;  %v10969_v58 = vsel %vm1767_vm3, %v10859_v57, %v1837_v1 }
 0x21a   :  { %1729 = vrot.lane.b32.xlu2 %v1682_v5, %s9663_s26 }
 0x21b   :  { %v1056_v40 = vmax.f32 %v949_v3, 0.0  ;;  %1605 = vrot.lane.b32.xlu1 %v1558_v22, %s9661_s24  ;;  %8066 = vmatmul.msk.bf16.gmra.mxu0 %vm809_vm0, %v9316_v51  ;;  %v2363_v46 = vrot.slane %v10948_v2, 3  ;;  %v1365_v62 = vshll.u32 %v10948_v2, 16  ;;  %v1369_v8 = vshrl.u32 %v10948_v2, 16 }
 0x21c   :  { %v2107_v14 = vrot.slane %v10948_v2, 2  ;;  %2952 = vmatpush.bf16.msra.mxu1 %v9328_v11  ;;  %v1684_v22 = vsel %vm1545_vm1, %v1681_v43, %v1683_v15 }
 0x21d   :  { %v1144_v53 = vpack.c.bf16 %v1056_v40, %v1056_v40  ;;  %v2364_v57 = vsel %vm2349_vm4, %v2361_v52, %v2363_v46  ;;  %v2219_v47 = vrot.slane %v1369_v8, 2  ;;  %v2220_v13 = vrot.slane %v1365_v62, 3 }
 0x21e   :  { %8155 = vmatmul.msk.bf16.gmra.mxu3 %vm2399_vm5, %v2364_v57  ;;  %1509 = vrot.lane.b32.xlu0 %v1360_v48, %s9662_s25  ;;  %v2108_v20 = vsel %vm1992_vm2, %v2105_v18, %v2107_v14  ;;  %v1559_v18 = vrot.slane %v10861_v60, 1  ;;  %v11010_v38 = vrot.slane %v1365_v62, 1  ;;  %v1363_v40 = vor.u32 %v1361_v29, %v1359_v55 }
 0x21f   :  { %v1243_v19 = vunpack.c.l.b16 %v1144_v53  ;;  %v2221_v23 = vor.u32 %v2220_v13, %v2219_v47 }
 0x220   :  { %v950_v28 = vpop.f32.mrf.mxu0  ;;  %v1560_v10 = vsel %vm1545_vm1, %v1557_v59, %v1559_v18  ;;  %v1368_v29 = vsel %vm1300_vm7, %v1363_v40, %v11010_v38  ;;  %v9318_v40 = vld [vmem:[%s14662_s0 + $0x98] sm:$0xff] }
 0x221   :  { %v10988_v6 = vpack.c.b16 %v1243_v19, %v1242_v50  ;;  %v951_v31 = vadd.f32 %v10567_v16, %v950_v28  ;;  %v2222_v52 = vsel %vm2191_vm6, %v10909_v24, %v2221_v23  ;;  %v9317_v50 = vld [vmem:[%s14662_s0 + $0x90] sm:$0xff] }
 0x222   :  { %2313 = vrot.lane.b32.xlu2 %v2222_v52, %s9663_s26 }
 0x223   :  { %v1057_v4 = vmax.f32 %v951_v31, 0.0  ;;  %2155 = vrot.lane.b32.xlu1 %v2108_v20, %s9661_s24  ;;  %v2008_v32 = vrot.slane %v10988_v6, 2  ;;  %v1840_v34 = vshrl.u32 %v10988_v6, 16  ;;  %v1843_v37 = vshll.u32 %v10988_v6, 16 }
 0x225   :  { %v1145_v42 = vpack.c.bf16 %v1057_v4, %v1057_v4  ;;  %v2009_v24 = vsel %vm1992_vm2, %v2006_v35, %v2008_v32  ;;  %v1842_v33 = vrot.slane %v1840_v34, 1  ;;  %v1845_v45 = vrot.slane %v1843_v37, 2 }
 0x226   :  { %2056 = vrot.lane.b32.xlu0 %v2009_v24, %s9662_s25 }
 0x227   :  { %v1244_v49 = vunpack.c.l.b16 %v1145_v42  ;;  %v11012_v3 = vor.u32 %v1845_v45, %v1842_v33 }
 0x228   :  { %v953_v51 = vpop.f32.mrf.mxu0  ;;  %v2043_v54 = vpop.permute.xlu0 %2042 }
 0x229   :  { %v11014_v35 = vpack.c.b16 %v1244_v49, %v1243_v19  ;;  %v954_v5 = vadd.f32 %v10567_v16, %v953_v51  ;;  %v11032_v62 = vsel %vm1767_vm3, %v1837_v1, %v11012_v3  ;;  %v2572_v24 = vsel %vm2399_vm5, %v10622_v17, %v2043_v54 }
 0x22a   :  { %1731 = vrot.lane.b32.xlu2 %v1684_v22, %s9663_s26  ;;  %v1561_v17 = vrot.slane %v10948_v2, 1 }
 0x22b   :  { %v1058_v48 = vmax.f32 %v954_v5, 0.0  ;;  %1607 = vrot.lane.b32.xlu1 %v1560_v10, %s9661_s24  ;;  %8067 = vmatmul.msk.bf16.gmra.mxu0 %vm809_vm0, %v9317_v50  ;;  %v2365_v30 = vrot.slane %v11014_v35, 3  ;;  %v1373_v43 = vshll.u32 %v11014_v35, 16  ;;  %v1377_v11 = vshrl.u32 %v11014_v35, 16 }
 0x22c   :  { %v11039_v53 = vpop.permute.xlu2 %2303  ;;  %v2109_v47 = vrot.slane %v11014_v35, 2 }
 0x22d   :  { %v1146_v59 = vpack.c.bf16 %v1058_v48, %v1058_v48  ;;  %v2366_v55 = vsel %vm2349_vm4, %v2363_v46, %v2365_v30  ;;  %v2223_v1 = vrot.slane %v1377_v11, 2  ;;  %v2224_v57 = vrot.slane %v1373_v43, 3 }
 0x22e   :  { %8156 = vmatmul.msk.bf16.gmra.mxu3 %vm2399_vm5, %v2366_v55  ;;  %1511 = vrot.lane.b32.xlu0 %v1368_v29, %s9662_s25  ;;  %v2110_v4 = vsel %vm1992_vm2, %v2107_v14, %v2109_v47 }
 0x22f   :  { %v1245_v13 = vunpack.c.l.b16 %v1146_v59  ;;  %v11051_v19 = vor.u32 %v2224_v57, %v2223_v1  ;;  %v11081_v59 = vrot.slane %v1373_v43, 1  ;;  %v1562_v43 = vsel %vm1545_vm1, %v1559_v18, %v1561_v17 }
 0x230   :  { %v955_v28 = vpop.f32.mrf.mxu0  ;;  %v2144_v31 = vpop.permute.xlu0 %2143 }
 0x231   :  { %v11053_v52 = vpack.c.b16 %v1245_v13, %v1244_v49  ;;  %v956_v20 = vadd.f32 %v10567_v16, %v955_v28  ;;  %v2226_v46 = vsel %vm2191_vm6, %v2221_v23, %v11051_v19  ;;  %v1685_v23 = vrot.slane %v10988_v6, 1 }
 0x232   :  { %2315 = vrot.lane.b32.xlu2 %v2226_v46, %s9663_s26  ;;  %v2643_v14 = vsel %vm2448_vm8, %v2572_v24, %v2144_v31 }
 0x233   :  { %v1059_v34 = vmax.f32 %v956_v20, 0.0  ;;  %2157 = vrot.lane.b32.xlu1 %v2110_v4, %s9661_s24  ;;  %v2010_v37 = vrot.slane %v11053_v52, 2  ;;  %v1849_v42 = vshrl.u32 %v11053_v52, 16  ;;  %v1852_v45 = vshll.u32 %v11053_v52, 16 }
 0x234   :  { %v11067_v33 = vpop.permute.xlu2 %1721  ;;  %v1686_v57 = vsel %vm1545_vm1, %v1683_v15, %v1685_v23 }
 0x235   :  { %v1147_v49 = vpack.c.bf16 %v1059_v34, %v1059_v34  ;;  %v2302_v50 = vpop.permute.xlu1 %2301  ;;  %v2011_v51 = vsel %vm1992_vm2, %v2008_v32, %v2010_v37  ;;  %v1851_v5 = vrot.slane %v1849_v42, 1  ;;  %v1854_v54 = vrot.slane %v1852_v45, 2 }
 0x236   :  { %2058 = vrot.lane.b32.xlu0 %v2011_v51, %s9662_s25  ;;  %v2691_v22 = vsel %vm2497_vm9, %v2643_v14, %v2302_v50 }
 0x237   :  { %v1246_v10 = vunpack.c.l.b16 %v1147_v49  ;;  %3082 = vmatmul.bf16.vlgmr.msra.gmra.mxu2 %v2691_v22  ;;  %v11083_v55 = vor.u32 %v1854_v54, %v1851_v5 }
 0x238   :  { %v958_v48 = vpop.f32.mrf.mxu0  ;;  %v2045_v29 = vpop.permute.xlu0 %2044 }
 0x239   :  { %v11085_v32 = vpack.c.b16 %v1246_v10, %v1245_v13  ;;  %v959_v1 = vadd.f32 %v10567_v16, %v958_v48  ;;  %v1371_v13 = vor.u32 %v1369_v8, %v11010_v38  ;;  %v11105_v16 = vsel %vm1767_vm3, %v11012_v3, %v11083_v55 }
 0x23a   :  { %1733 = vrot.lane.b32.xlu2 %v1686_v57, %s9663_s26  ;;  %v1687_v48 = vrot.slane %v11053_v52, 1 }
 0x23b   :  { %v1060_v27 = vmax.f32 %v959_v1, 0.0  ;;  %1609 = vrot.lane.b32.xlu1 %v1562_v43, %s9661_s24  ;;  %8068 = vmatmul.msk.bf16.gmra.mxu0 %vm809_vm0, %v9318_v40  ;;  %v2367_v15 = vrot.slane %v11085_v32, 3  ;;  %v1381_v28 = vshll.u32 %v11085_v32, 16  ;;  %v1385_v18 = vshrl.u32 %v11085_v32, 16 }
 0x23c   :  { %v11112_v31 = vpop.permute.xlu2 %2305  ;;  %v1376_v8 = vsel %vm1300_vm7, %v1371_v13, %v11081_v59  ;;  %v2111_v42 = vrot.slane %v11085_v32, 2  ;;  %v2575_v1 = vsel %vm2399_vm5, %v10657_v0, %v2045_v29  ;;  %v9319_v29 = vld [vmem:[%s14662_s0 + $0xa0] sm:$0xff] }
 0x23d   :  { %v1148_v38 = vpack.c.bf16 %v1060_v27, %v1060_v27  ;;  %v1498_v20 = vpop.permute.xlu1 %1497  ;;  %v2368_v3 = vsel %vm2349_vm4, %v2365_v30, %v2367_v15  ;;  %v2227_v46 = vrot.slane %v1385_v18, 2  ;;  %v2228_v4 = vrot.slane %v1381_v28, 3 }
 0x23e   :  { %v2401_v34 = vsel %vm2399_vm5, %v10583_v36, %v1498_v20  ;;  %8157 = vmatmul.msk.bf16.gmra.mxu3 %vm2399_vm5, %v2368_v3  ;;  %1513 = vrot.lane.b32.xlu0 %v1376_v8, %s9662_s25  ;;  %v11139_v36 = vld [vmem:[%s14664_s2] ss:$0 sm:$0xff]  ;;  %v1563_v8 = vrot.slane %v11014_v35, 1 }
 0x23f   :  { %v1247_v24 = vunpack.c.l.b16 %v1148_v38  ;;  %v2450_v45 = vsel %vm2448_vm8, %v2401_v34, %v10956_v7  ;;  %v11130_v49 = vor.u32 %v2228_v4, %v2227_v46  ;;  %v11175_v4 = vrot.slane %v1381_v28, 1 }
 0x240   :  { %v960_v30 = vpop.f32.mrf.mxu0  ;;  %v1500_v14 = vpop.permute.xlu0 %1499  ;;  %v2499_v50 = vsel %vm2497_vm9, %v2450_v45, %v11000_v26  ;;  %v2112_v26 = vsel %vm1992_vm2, %v2109_v47, %v2111_v42  ;;  %v1564_v28 = vsel %vm1545_vm1, %v1561_v17, %v1563_v8 }
 0x241   :  { %v11134_v51 = vpack.c.b16 %v1247_v24, %v1246_v10  ;;  %v961_v5 = vadd.f32 %v11139_v36, %v960_v30  ;;  %2953 = vmatmul.bf16.vlgmr.msra.gmra.mxu1 %v2499_v50  ;;  %v2230_v7 = vsel %vm2191_vm6, %v11051_v19, %v11130_v49  ;;  %v11168_v3 = vpop.f32.mrf.mxu3 }
 0x242   :  { %2317 = vrot.lane.b32.xlu2 %v2230_v7, %s9663_s26  ;;  %v2403_v7 = vsel %vm2399_vm5, %v10588_v41, %v1500_v14 }
 0x243   :  { %v1061_v22 = vmax.f32 %v961_v5, 0.0  ;;  %2159 = vrot.lane.b32.xlu1 %v2112_v26, %s9661_s24  ;;  %v2012_v54 = vrot.slane %v11134_v51, 2  ;;  %v1858_v10 = vshrl.u32 %v11134_v51, 16  ;;  %v1861_v19 = vshll.u32 %v11134_v51, 16 }
 0x244   :  { %v11154_v40 = vpop.permute.xlu2 %1723 }
 0x245   :  { %v1149_v57 = vpack.c.bf16 %v1061_v22, %v1061_v22  ;;  %v2146_v43 = vpop.permute.xlu1 %2145  ;;  %v2013_v47 = vsel %vm1992_vm2, %v2010_v37, %v2012_v54  ;;  %v1860_v13 = vrot.slane %v1858_v10, 1  ;;  %v1863_v38 = vrot.slane %v1861_v19, 2 }
 0x246   :  { %v2645_v27 = vsel %vm2448_vm8, %v2575_v1, %v2146_v43  ;;  %2060 = vrot.lane.b32.xlu0 %v2013_v47, %s9662_s25 }
 0x247   :  { %v1248_v20 = vunpack.c.l.b16 %v1149_v57  ;;  %v2694_v0 = vsel %vm2497_vm9, %v2645_v27, %v11039_v53  ;;  %v11177_v34 = vor.u32 %v1863_v38, %v1860_v13  ;;  %v1688_v53 = vsel %vm1545_vm1, %v1685_v23, %v1687_v48 }
 0x248   :  { %3087 = vmatmul.bf16.gmra.mxu2 %v2694_v0  ;;  %v963_v37 = vpop.f32.mrf.mxu0  ;;  %v2047_v46 = vpop.permute.xlu0 %2046 }
 0x249   :  { %v11179_v45 = vpack.c.b16 %v1248_v20, %v1247_v24  ;;  %v964_v30 = vadd.f32 %v11139_v36, %v963_v37  ;;  %v1379_v24 = vor.u32 %v1377_v11, %v11081_v59  ;;  %v11199_v50 = vsel %vm1767_vm3, %v11083_v55, %v11177_v34  ;;  %v11229_v27 = vpop.f32.mrf.mxu3 }
 0x24a   :  { %1735 = vrot.lane.b32.xlu2 %v1688_v53, %s9663_s26  ;;  %v1689_v53 = vrot.slane %v11134_v51, 1 }
 0x24b   :  { %v1062_v6 = vmax.f32 %v964_v30, 0.0  ;;  %1611 = vrot.lane.b32.xlu1 %v1564_v28, %s9661_s24  ;;  %8069 = vmatmul.msk.bf16.gmra.mxu0 %vm809_vm0, %v9319_v29  ;;  %v2369_v23 = vrot.slane %v11179_v45, 3  ;;  %v1389_v5 = vshll.u32 %v11179_v45, 16  ;;  %v1393_v17 = vshrl.u32 %v11179_v45, 16 }
 0x24c   :  { %v11208_v11 = vpop.permute.xlu2 %2307  ;;  %v1384_v59 = vsel %vm1300_vm7, %v1379_v24, %v11175_v4  ;;  %v2113_v41 = vrot.slane %v11179_v45, 2  ;;  %v2578_v28 = vsel %vm2399_vm5, %v10703_v44, %v2047_v46  ;;  %v9320_v46 = vld [vmem:[%s14662_s0 + $0xa8] sm:$0xff] }
 0x24d   :  { %v1150_v55 = vpack.c.bf16 %v1062_v6, %v1062_v6  ;;  %v1598_v26 = vpop.permute.xlu1 %1597  ;;  %v2370_v22 = vsel %vm2349_vm4, %v2367_v15, %v2369_v23  ;;  %v2231_v10 = vrot.slane %v1393_v17, 2  ;;  %v2232_v19 = vrot.slane %v1389_v5, 3 }
 0x24e   :  { %v2452_v1 = vsel %vm2448_vm8, %v2403_v7, %v1598_v26  ;;  %8158 = vmatmul.msk.bf16.gmra.mxu3 %vm2399_vm5, %v2370_v22  ;;  %1515 = vrot.lane.b32.xlu0 %v1384_v59, %s9662_s25 }
 0x24f   :  { %v1249_v14 = vunpack.c.l.b16 %v1150_v55  ;;  %v2502_v57 = vsel %vm2497_vm9, %v2452_v1, %v11067_v33  ;;  %v11225_v43 = vor.u32 %v2232_v19, %v2231_v10  ;;  %v2114_v33 = vsel %vm1992_vm2, %v2111_v42, %v2113_v41 }
 0x250   :  { %v965_v47 = vpop.f32.mrf.mxu0  ;;  %v1502_v15 = vpop.permute.xlu0 %1501  ;;  %v1565_v55 = vrot.slane %v11085_v32, 1 }
 0x251   :  { %v11227_v13 = vpack.c.b16 %v1249_v14, %v1248_v20  ;;  %v966_v38 = vadd.f32 %v11139_v36, %v965_v47  ;;  %2958 = vmatmul.bf16.gmra.mxu1 %v2502_v57  ;;  %v2234_v0 = vsel %vm2191_vm6, %v11130_v49, %v11225_v43  ;;  %v11289_v52 = vpop.f32.mrf.mxu3 }
 0x252   :  { %2319 = vrot.lane.b32.xlu2 %v2234_v0, %s9663_s26 }
 0x253   :  { %v1063_v29 = vmax.f32 %v966_v38, 0.0  ;;  %2161 = vrot.lane.b32.xlu1 %v2114_v33, %s9661_s24  ;;  %v2014_v20 = vrot.slane %v11227_v13, 2  ;;  %v1867_v37 = vshrl.u32 %v11227_v13, 16  ;;  %v1870_v49 = vshll.u32 %v11227_v13, 16 }
 0x254   :  { %v11244_v30 = vpop.permute.xlu2 %1725 }
 0x255   :  { %v1151_v24 = vpack.c.bf16 %v1063_v29, %v1063_v29  ;;  %v2148_v6 = vpop.permute.xlu1 %2147  ;;  %v2015_v42 = vsel %vm1992_vm2, %v2012_v54, %v2014_v20  ;;  %v1869_v7 = vrot.slane %v1867_v37, 1  ;;  %v1872_v26 = vrot.slane %v1870_v49, 2 }
 0x256   :  { %v2647_v59 = vsel %vm2448_vm8, %v2578_v28, %v2148_v6  ;;  %2062 = vrot.lane.b32.xlu0 %v2015_v42, %s9662_s25  ;;  %v11263_v54 = vrot.slane %v1389_v5, 1  ;;  %v1566_v5 = vsel %vm1545_vm1, %v1563_v8, %v1565_v55 }
 0x257   :  { %v1250_v22 = vunpack.c.l.b16 %v1151_v24  ;;  %v2697_v44 = vsel %vm2497_vm9, %v2647_v59, %v11112_v31  ;;  %v11265_v1 = vor.u32 %v1872_v26, %v1869_v7  ;;  %v1690_v31 = vsel %vm1545_vm1, %v1687_v48, %v1689_v53 }
 0x258   :  { %3092 = vmatmul.bf16.gmra.mxu2 %v2697_v44  ;;  %v968_v10 = vpop.f32.mrf.mxu0  ;;  %v2049_v19 = vpop.permute.xlu0 %2048 }
 0x259   :  { %v11267_v57 = vpack.c.b16 %v1250_v22, %v1249_v14  ;;  %v969_v47 = vadd.f32 %v11139_v36, %v968_v10  ;;  %v1387_v14 = vor.u32 %v1385_v18, %v11175_v4  ;;  %v11287_v38 = vsel %vm1767_vm3, %v11177_v34, %v11265_v1 }
 0x25a   :  { %1737 = vrot.lane.b32.xlu2 %v1690_v31, %s9663_s26  ;;  %v2405_v18 = vsel %vm2399_vm5, %v10616_v12, %v1502_v15 }
 0x25b   :  { %v1064_v48 = vmax.f32 %v969_v47, 0.0  ;;  %1613 = vrot.lane.b32.xlu1 %v1566_v5, %s9661_s24  ;;  %8070 = vmatmul.msk.bf16.gmra.mxu0 %vm809_vm0, %v9320_v46  ;;  %v2371_v0 = vrot.slane %v11267_v57, 3  ;;  %v1397_v8 = vshll.u32 %v11267_v57, 16  ;;  %v1401_v33 = vshrl.u32 %v11267_v57, 16 }
 0x25c   :  { %v11298_v4 = vpop.permute.xlu2 %2309  ;;  %v1392_v34 = vsel %vm1300_vm7, %v1387_v14, %v11263_v54  ;;  %v2115_v12 = vrot.slane %v11267_v57, 2  ;;  %v1691_v5 = vrot.slane %v11227_v13, 1  ;;  %v2581_v14 = vsel %vm2399_vm5, %v10743_v25, %v2049_v19  ;;  %v9321_v19 = vld [vmem:[%s14662_s0 + $0xb0] sm:$0xff] }
 0x25d   :  { %v1152_v29 = vpack.c.bf16 %v1064_v48, %v1064_v48  ;;  %v1600_v37 = vpop.permute.xlu1 %1599  ;;  %v2372_v49 = vsel %vm2349_vm4, %v2369_v23, %v2371_v0  ;;  %v2235_v28 = vrot.slane %v1401_v33, 2  ;;  %v2236_v24 = vrot.slane %v1397_v8, 3  ;;  %v11338_v48 = vpop.f32.mrf.mxu3 }
 0x25e   :  { %v2454_v6 = vsel %vm2448_vm8, %v2405_v18, %v1600_v37  ;;  %8159 = vmatmul.msk.bf16.gmra.mxu3 %vm2399_vm5, %v2372_v49  ;;  %1517 = vrot.lane.b32.xlu0 %v1392_v34, %s9662_s25  ;;  %v1567_v49 = vrot.slane %v11179_v45, 1 }
 0x25f   :  { %v1251_v15 = vunpack.c.l.b16 %v1152_v29  ;;  %v2505_v42 = vsel %vm2497_vm9, %v2454_v6, %v11154_v40  ;;  %v11315_v7 = vor.u32 %v2236_v24, %v2235_v28  ;;  %v2116_v40 = vsel %vm1992_vm2, %v2113_v41, %v2115_v12 }
 0x260   :  { %v970_v59 = vpop.f32.mrf.mxu0  ;;  %v1504_v23 = vpop.permute.xlu0 %1503 }
 0x261   :  { %v11317_v26 = vpack.c.b16 %v1251_v15, %v1250_v22  ;;  %v971_v44 = vadd.f32 %v11139_v36, %v970_v59  ;;  %2963 = vmatmul.bf16.gmra.mxu1 %v2505_v42  ;;  %v2238_v46 = vsel %vm2191_vm6, %v11225_v43, %v11315_v7 }
 0x262   :  { %2321 = vrot.lane.b32.xlu2 %v2238_v46, %s9663_s26 }
 0x263   :  { %v1065_v10 = vmax.f32 %v971_v44, 0.0  ;;  %2163 = vrot.lane.b32.xlu1 %v2116_v40, %s9661_s24  ;;  %v2016_v22 = vrot.slane %v11317_v26, 2  ;;  %v1876_v47 = vshrl.u32 %v11317_v26, 16  ;;  %v1879_v43 = vshll.u32 %v11317_v26, 16 }
 0x264   :  { %v11332_v31 = vpop.permute.xlu2 %1727 }
 0x265   :  { %v1153_v18 = vpack.c.bf16 %v1065_v10, %v1065_v10  ;;  %v2150_v41 = vpop.permute.xlu1 %2149  ;;  %v2017_v34 = vsel %vm1992_vm2, %v2014_v20, %v2016_v22  ;;  %v1878_v29 = vrot.slane %v1876_v47, 1  ;;  %v1881_v28 = vrot.slane %v1879_v43, 2 }
 0x266   :  { %v2649_v37 = vsel %vm2448_vm8, %v2581_v14, %v2150_v41  ;;  %2064 = vrot.lane.b32.xlu0 %v2017_v34, %s9662_s25  ;;  %v11353_v20 = vrot.slane %v1397_v8, 1  ;;  %v1568_v8 = vsel %vm1545_vm1, %v1565_v55, %v1567_v49  ;;  %v2407_v47 = vsel %vm2399_vm5, %v10652_v61, %v1504_v23  ;;  %v11401_v23 = vpop.f32.mrf.mxu3 }
 0x267   :  { %v1252_v24 = vunpack.c.l.b16 %v1153_v18  ;;  %v2700_v25 = vsel %vm2497_vm9, %v2649_v37, %v11208_v11  ;;  %v11355_v59 = vor.u32 %v1881_v28, %v1878_v29  ;;  %v1692_v11 = vsel %vm1545_vm1, %v1689_v53, %v1691_v5 }
 0x268   :  { %3097 = vmatmul.bf16.gmra.mxu2 %v2700_v25  ;;  %v973_v6 = vpop.f32.mrf.mxu0  ;;  %v2051_v42 = vpop.permute.xlu0 %2050 }
 0x269   :  { %v11357_v44 = vpack.c.b16 %v1252_v24, %v1251_v15  ;;  %v974_v46 = vadd.f32 %v11139_v36, %v973_v6  ;;  %v1395_v15 = vor.u32 %v1393_v17, %v11263_v54  ;;  %v11377_v40 = vsel %vm1767_vm3, %v11265_v1, %v11355_v59 }
 0x26a   :  { %1739 = vrot.lane.b32.xlu2 %v1692_v11, %s9663_s26 }
 0x26b   :  { %v1066_v51 = vmax.f32 %v974_v46, 0.0  ;;  %1615 = vrot.lane.b32.xlu1 %v1568_v8, %s9661_s24  ;;  %8071 = vmatmul.msk.bf16.gmra.mxu0 %vm809_vm0, %v9321_v19  ;;  %v2373_v53 = vrot.slane %v11357_v44, 3  ;;  %v1405_v10 = vshll.u32 %v11357_v44, 16  ;;  %v1409_v55 = vshrl.u32 %v11357_v44, 16 }
 0x26c   :  { %v11386_v17 = vpop.permute.xlu2 %2311  ;;  %v1400_v54 = vsel %vm1300_vm7, %v1395_v15, %v11353_v20  ;;  %v2117_v61 = vrot.slane %v11357_v44, 2 }
 0x26d   :  { %v1154_v1 = vpack.c.bf16 %v1066_v51, %v1066_v51  ;;  %v1602_v43 = vpop.permute.xlu1 %1601  ;;  %v2374_v14 = vsel %vm2349_vm4, %v2371_v0, %v2373_v53  ;;  %v2239_v18 = vrot.slane %v1409_v55, 2  ;;  %v2240_v41 = vrot.slane %v1405_v10, 3 }
 0x26e   :  { %v2456_v34 = vsel %vm2448_vm8, %v2407_v47, %v1602_v43  ;;  %8160 = vmatmul.msk.bf16.gmra.mxu3 %vm2399_vm5, %v2374_v14  ;;  %1519 = vrot.lane.b32.xlu0 %v1400_v54, %s9662_s25  ;;  %v1693_v51 = vrot.slane %v11317_v26, 1  ;;  %v2584_v47 = vsel %vm2399_vm5, %v10798_v9, %v2051_v42  ;;  %v9322_v42 = vld [vmem:[%s14662_s0 + $0xb8] sm:$0xff] }
 0x26f   :  { %v1253_v29 = vunpack.c.l.b16 %v1154_v1  ;;  %v2508_v37 = vsel %vm2497_vm9, %v2456_v34, %v11244_v30  ;;  %v11405_v28 = vor.u32 %v2240_v41, %v2239_v18  ;;  %v2118_v30 = vsel %vm1992_vm2, %v2115_v12, %v2117_v61 }
 0x270   :  { %v975_v0 = vpop.f32.mrf.mxu0  ;;  %v1506_v25 = vpop.permute.xlu0 %1505  ;;  %v1569_v18 = vrot.slane %v11267_v57, 1 }
 0x271   :  { %v11407_v19 = vpack.c.b16 %v1253_v29, %v1252_v24  ;;  %v976_v6 = vadd.f32 %v11139_v36, %v975_v0  ;;  %2968 = vmatmul.bf16.gmra.mxu1 %v2508_v37  ;;  %v2242_v46 = vsel %vm2191_vm6, %v11315_v7, %v11405_v28 }
 0x272   :  { %2323 = vrot.lane.b32.xlu2 %v2242_v46, %s9663_s26  ;;  %v11445_v46 = vpop.f32.mrf.mxu3 }
 0x273   :  { %v1067_v11 = vmax.f32 %v976_v6, 0.0  ;;  %2165 = vrot.lane.b32.xlu1 %v2118_v30, %s9661_s24  ;;  %v2018_v24 = vrot.slane %v11407_v19, 2  ;;  %v1885_v8 = vshrl.u32 %v11407_v19, 16  ;;  %v1888_v7 = vshll.u32 %v11407_v19, 16 }
 0x274   :  { %v11422_v15 = vpop.permute.xlu2 %1729 }
 0x275   :  { %v1155_v54 = vpack.c.bf16 %v1067_v11, %v1067_v11  ;;  %v2152_v1 = vpop.permute.xlu1 %2151  ;;  %v2019_v12 = vsel %vm1992_vm2, %v2016_v22, %v2018_v24  ;;  %v1887_v43 = vrot.slane %v1885_v8, 1  ;;  %v1890_v41 = vrot.slane %v1888_v7, 2 }
 0x276   :  { %v2651_v14 = vsel %vm2448_vm8, %v2584_v47, %v2152_v1  ;;  %2066 = vrot.lane.b32.xlu0 %v2019_v12, %s9662_s25  ;;  %v11441_v22 = vrot.slane %v1405_v10, 1  ;;  %v1570_v10 = vsel %vm1545_vm1, %v1567_v49, %v1569_v18  ;;  %v2409_v47 = vsel %vm2399_vm5, %v10690_v39, %v1506_v25 }
 0x277   :  { %v1254_v34 = vunpack.c.l.b16 %v1155_v54  ;;  %v2703_v9 = vsel %vm2497_vm9, %v2651_v14, %v11298_v4  ;;  %v11443_v6 = vor.u32 %v1890_v41, %v1887_v43  ;;  %v1694_v4 = vsel %vm1545_vm1, %v1691_v5, %v1693_v51 }
 0x278   :  { %3102 = vmatmul.bf16.gmra.mxu2 %v2703_v9  ;;  %v978_v37 = vpop.f32.mrf.mxu0  ;;  %v2053_v0 = vpop.permute.xlu0 %2052 }
 0x279   :  { %v11447_v30 = vpack.c.b16 %v1254_v34, %v1253_v29  ;;  %v979_v11 = vadd.f32 %v11139_v36, %v978_v37  ;;  %v1403_v29 = vor.u32 %v1401_v33, %v11353_v20  ;;  %v11467_v8 = vsel %vm1767_vm3, %v11355_v59, %v11443_v6 }
 0x27a   :  { %1741 = vrot.lane.b32.xlu2 %v1694_v4, %s9663_s26 }
 0x27b   :  { %v1068_v13 = vmax.f32 %v979_v11, 0.0  ;;  %1617 = vrot.lane.b32.xlu1 %v1570_v10, %s9661_s24  ;;  %8072 = vmatmul.msk.bf16.gmra.mxu0 %vm809_vm0, %v9322_v42  ;;  %v2375_v5 = vrot.slane %v11447_v30, 3  ;;  %v1413_v7 = vshll.u32 %v11447_v30, 16  ;;  %v1417_v49 = vshrl.u32 %v11447_v30, 16  ;;  %v11507_v10 = vpop.f32.mrf.mxu3 }
 0x27c   :  { %v11476_v33 = vpop.permute.xlu2 %2313  ;;  %v1408_v20 = vsel %vm1300_vm7, %v1403_v29, %v11441_v22  ;;  %v2119_v39 = vrot.slane %v11447_v30, 2 }
 0x27d   :  { %v1156_v59 = vpack.c.bf16 %v1068_v13, %v1068_v13  ;;  %v1604_v54 = vpop.permute.xlu1 %1603  ;;  %v2376_v1 = vsel %vm2349_vm4, %v2373_v53, %v2375_v5  ;;  %v2243_v12 = vrot.slane %v1417_v49, 2  ;;  %v2244_v43 = vrot.slane %v1413_v7, 3 }
 0x27e   :  { %v2458_v14 = vsel %vm2448_vm8, %v2409_v47, %v1604_v54  ;;  %8161 = vmatmul.msk.bf16.gmra.mxu3 %vm2399_vm5, %v2376_v1  ;;  %1521 = vrot.lane.b32.xlu0 %v1408_v20, %s9662_s25 }
 0x27f   :  { %v1255_v25 = vunpack.c.l.b16 %v1156_v59  ;;  %v2511_v41 = vsel %vm2497_vm9, %v2458_v14, %v11332_v31  ;;  %v11493_v9 = vor.u32 %v2244_v43, %v2243_v12  ;;  %v2120_v31 = vsel %vm1992_vm2, %v2117_v61, %v2119_v39 }
 0x280   :  { %v980_v42 = vpop.f32.mrf.mxu0  ;;  %v1508_v53 = vpop.permute.xlu0 %1507  ;;  %v2587_v59 = vsel %vm2399_vm5, %v10884_v56, %v2053_v0  ;;  %v1571_v14 = vrot.slane %v11357_v44, 1  ;;  %v9323_v0 = vld [vmem:[%s14662_s0 + $0xc0] sm:$0xff] }
 0x281   :  { %v11495_v37 = vpack.c.b16 %v1255_v25, %v1254_v34  ;;  %v981_v11 = vadd.f32 %v11139_v36, %v980_v42  ;;  %2973 = vmatmul.bf16.gmra.mxu1 %v2511_v41  ;;  %v2246_v4 = vsel %vm2191_vm6, %v11405_v28, %v11493_v9  ;;  %v1695_v28 = vrot.slane %v11407_v19, 1 }
 0x282   :  { %2325 = vrot.lane.b32.xlu2 %v2246_v4, %s9663_s26 }
 0x283   :  { %v1069_v29 = vmax.f32 %v981_v11, 0.0  ;;  %2167 = vrot.lane.b32.xlu1 %v2120_v31, %s9661_s24  ;;  %v2020_v34 = vrot.slane %v11495_v37, 2  ;;  %v1894_v13 = vshrl.u32 %v11495_v37, 16  ;;  %v1897_v20 = vshll.u32 %v11495_v37, 16 }
 0x284   :  { %v11512_v47 = vpop.permute.xlu2 %1731 }
 0x285   :  { %v1157_v54 = vpack.c.bf16 %v1069_v29, %v1069_v29  ;;  %v2154_v61 = vpop.permute.xlu1 %2153  ;;  %v2021_v1 = vsel %vm1992_vm2, %v2018_v24, %v2020_v34  ;;  %v1896_v12 = vrot.slane %v1894_v13, 1  ;;  %v1899_v41 = vrot.slane %v1897_v20, 2 }
 0x286   :  { %v2653_v43 = vsel %vm2448_vm8, %v2587_v59, %v2154_v61  ;;  %2068 = vrot.lane.b32.xlu0 %v2021_v1, %s9662_s25  ;;  %v11531_v24 = vrot.slane %v1413_v7, 1  ;;  %v1572_v7 = vsel %vm1545_vm1, %v1569_v18, %v1571_v14 }
 0x287   :  { %v1256_v42 = vunpack.c.l.b16 %v1157_v54  ;;  %v2706_v56 = vsel %vm2497_vm9, %v2653_v43, %v11386_v17  ;;  %v11533_v31 = vor.u32 %v1899_v41, %v1896_v12  ;;  %v1696_v17 = vsel %vm1545_vm1, %v1693_v51, %v1695_v28 }
 0x288   :  { %3107 = vmatmul.bf16.gmra.mxu2 %v2706_v56  ;;  %v983_v11 = vpop.f32.mrf.mxu0  ;;  %v2055_v4 = vpop.permute.xlu0 %2054  ;;  %v2411_v54 = vsel %vm2399_vm5, %v10734_v21, %v1508_v53 }
 0x289   :  { %v11535_v29 = vpack.c.b16 %v1256_v42, %v1255_v25  ;;  %v984_v13 = vadd.f32 %v11139_v36, %v983_v11  ;;  %v1411_v25 = vor.u32 %v1409_v55, %v11441_v22  ;;  %v11555_v20 = vsel %vm1767_vm3, %v11443_v6, %v11533_v31  ;;  %v11568_v6 = vpop.f32.mrf.mxu3 }
 0x28a   :  { %1743 = vrot.lane.b32.xlu2 %v1696_v17, %s9663_s26 }
 0x28b   :  { %v1070_v26 = vmax.f32 %v984_v13, 0.0  ;;  %1619 = vrot.lane.b32.xlu1 %v1572_v7, %s9661_s24  ;;  %8073 = vmatmul.msk.bf16.gmra.mxu0 %vm809_vm0, %v9323_v0  ;;  %v2377_v51 = vrot.slane %v11535_v29, 3  ;;  %v1421_v59 = vshll.u32 %v11535_v29, 16  ;;  %v1425_v18 = vshrl.u32 %v11535_v29, 16 }
 0x28c   :  { %v11564_v55 = vpop.permute.xlu2 %2315  ;;  %v1416_v22 = vsel %vm1300_vm7, %v1411_v25, %v11531_v24  ;;  %v2121_v53 = vrot.slane %v11535_v29, 2 }
 0x28d   :  { %v1158_v61 = vpack.c.bf16 %v1070_v26, %v1070_v26  ;;  %v1606_v1 = vpop.permute.xlu1 %1605  ;;  %v2378_v12 = vsel %vm2349_vm4, %v2375_v5, %v2377_v51  ;;  %v2247_v43 = vrot.slane %v1425_v18, 2  ;;  %v2248_v41 = vrot.slane %v1421_v59, 3 }
 0x28e   :  { %v2460_v21 = vsel %vm2448_vm8, %v2411_v54, %v1606_v1  ;;  %8162 = vmatmul.msk.bf16.gmra.mxu3 %vm2399_vm5, %v2378_v12  ;;  %1523 = vrot.lane.b32.xlu0 %v1416_v22, %s9662_s25  ;;  %v2590_v1 = vsel %vm2399_vm5, %v10969_v58, %v2055_v4  ;;  %v9324_v4 = vld [vmem:[%s14662_s0 + $0xc8] sm:$0xff] }
 0x28f   :  { %v1257_v56 = vunpack.c.l.b16 %v1158_v61  ;;  %v2514_v0 = vsel %vm2497_vm9, %v2460_v21, %v11422_v15  ;;  %v11583_v11 = vor.u32 %v2248_v41, %v2247_v43  ;;  %v2122_v15 = vsel %vm1992_vm2, %v2119_v39, %v2121_v53 }
 0x290   :  { %v985_v13 = vpop.f32.mrf.mxu0  ;;  %v1510_v5 = vpop.permute.xlu0 %1509  ;;  %v1697_v61 = vrot.slane %v11495_v37, 1 }
 0x291   :  { %v11585_v17 = vpack.c.b16 %v1257_v56, %v1256_v42  ;;  %v986_v7 = vadd.f32 %v11139_v36, %v985_v13  ;;  %2978 = vmatmul.bf16.gmra.mxu1 %v2514_v0  ;;  %v2250_v25 = vsel %vm2191_vm6, %v11493_v9, %v11583_v11  ;;  %v1573_v0 = vrot.slane %v11447_v30, 1 }
 0x292   :  { %2327 = vrot.lane.b32.xlu2 %v2250_v25, %s9663_s26 }
 0x293   :  { %v1071_v26 = vmax.f32 %v986_v7, 0.0  ;;  %2169 = vrot.lane.b32.xlu1 %v2122_v15, %s9661_s24  ;;  %v2022_v42 = vrot.slane %v11585_v17, 2  ;;  %v1903_v54 = vshrl.u32 %v11585_v17, 16  ;;  %v1906_v9 = vshll.u32 %v11585_v17, 16  ;;  %v11614_v7 = vpop.f32.mrf.mxu3 }
 0x294   :  { %v11600_v22 = vpop.permute.xlu2 %1733 }
 0x295   :  { %v1159_v12 = vpack.c.bf16 %v1071_v26, %v1071_v26  ;;  %v2156_v43 = vpop.permute.xlu1 %2155  ;;  %v2023_v39 = vsel %vm1992_vm2, %v2020_v34, %v2022_v42  ;;  %v1905_v41 = vrot.slane %v1903_v54, 1  ;;  %v1908_v13 = vrot.slane %v1906_v9, 2 }
 0x296   :  { %v2655_v21 = vsel %vm2448_vm8, %v2590_v1, %v2156_v43  ;;  %2070 = vrot.lane.b32.xlu0 %v2023_v39, %s9662_s25  ;;  %v11621_v26 = vrot.slane %v1421_v59, 1  ;;  %v1574_v59 = vsel %vm1545_vm1, %v1571_v14, %v1573_v0  ;;  %v2413_v39 = vsel %vm2399_vm5, %v10781_v63, %v1510_v5 }
 0x297   :  { %v1258_v25 = vunpack.c.l.b16 %v1159_v12  ;;  %v2709_v58 = vsel %vm2497_vm9, %v2655_v21, %v11476_v33  ;;  %v11623_v54 = vor.u32 %v1908_v13, %v1905_v41  ;;  %v1698_v33 = vsel %vm1545_vm1, %v1695_v28, %v1697_v61 }
 0x298   :  { %3112 = vmatmul.bf16.gmra.mxu2 %v2709_v58  ;;  %v988_v34 = vpop.f32.mrf.mxu0  ;;  %v2057_v15 = vpop.permute.xlu0 %2056 }
 0x299   :  { %v11625_v1 = vpack.c.b16 %v1258_v25, %v1257_v56  ;;  %v989_v9 = vadd.f32 %v11139_v36, %v988_v34  ;;  %v1419_v56 = vor.u32 %v1417_v49, %v11531_v24  ;;  %v11645_v12 = vsel %vm1767_vm3, %v11533_v31, %v11623_v54 }
 0x29a   :  { %1745 = vrot.lane.b32.xlu2 %v1698_v33, %s9663_s26 }
 0x29b   :  { %v1072_v19 = vmax.f32 %v989_v9, 0.0  ;;  %1621 = vrot.lane.b32.xlu1 %v1574_v59, %s9661_s24  ;;  %8074 = vmatmul.msk.bf16.gmra.mxu0 %vm809_vm0, %v9324_v4  ;;  %v2379_v28 = vrot.slane %v11625_v1, 3  ;;  %v1429_v43 = vshll.u32 %v11625_v1, 16  ;;  %v14678_v14 = vshrl.u32 %v11625_v1, 16  ;;  %v11673_v59 = vpop.f32.mrf.mxu3 }
 0x29c   :  { %v11654_v49 = vpop.permute.xlu2 %2317  ;;  %v1424_v24 = vsel %vm1300_vm7, %v1419_v56, %v11621_v26  ;;  %v14679_v63 = vrot.slane %v11625_v1, 2 }
 0x29d   :  { %v1160_v31 = vpack.c.bf16 %v1072_v19, %v1072_v19  ;;  %v1608_v41 = vpop.permute.xlu1 %1607  ;;  %v2380_v21 = vsel %vm2349_vm4, %v2377_v51, %v2379_v28  ;;  %v2251_v13 = vrot.slane %v14678_v14, 2  ;;  %v2252_v58 = vrot.slane %v1429_v43, 3 }
 0x29e   :  { %v2462_v4 = vsel %vm2448_vm8, %v2413_v39, %v1608_v41  ;;  %8163 = vmatmul.msk.bf16.gmra.mxu3 %vm2399_vm5, %v2380_v21  ;;  %1525 = vrot.lane.b32.xlu0 %v1424_v24, %s9662_s25  ;;  %v1699_v21 = vrot.slane %v11585_v17, 1  ;;  %v11706_v14 = vrot.slane %v1429_v43, 1  ;;  %v1427_v43 = vor.u32 %v1425_v18, %v11621_v26 }
 0x29f   :  { %v1259_v5 = vunpack.c.l.b16 %v1160_v31  ;;  %v2517_v34 = vsel %vm2497_vm9, %v2462_v4, %v11512_v47  ;;  %v11671_v9 = vor.u32 %v2252_v58, %v2251_v13  ;;  %v2124_v47 = vsel %vm1992_vm2, %v2121_v53, %v14679_v63 }
 0x2a0   :  { %v990_v33 = vpop.f32.mrf.mxu0  ;;  %v1512_v51 = vpop.permute.xlu0 %1511  ;;  %v2593_v13 = vsel %vm2399_vm5, %v11032_v62, %v2057_v15  ;;  %v1432_v26 = vsel %vm1300_vm7, %v1427_v43, %v11706_v14 }
 0x2a1   :  { %v11675_v56 = vpack.c.b16 %v1259_v5, %v1258_v25  ;;  %v991_v19 = vadd.f32 %v11139_v36, %v990_v33  ;;  %2983 = vmatmul.bf16.gmra.mxu1 %v2517_v34  ;;  %v2254_v39 = vsel %vm2191_vm6, %v11583_v11, %v11671_v9 }
 0x2a2   :  { %2329 = vrot.lane.b32.xlu2 %v2254_v39, %s9663_s26 }
 0x2a3   :  { %v1073_v24 = vmax.f32 %v991_v19, 0.0  ;;  %2171 = vrot.lane.b32.xlu1 %v2124_v47, %s9661_s24  ;;  %v2024_v25 = vrot.slane %v11675_v56, 2  ;;  %v1912_v31 = vshrl.u32 %v11675_v56, 16  ;;  %v1915_v11 = vshll.u32 %v11675_v56, 16  ;;  %v11732_v37 = vpop.f32.mrf.mxu3 }
 0x2a4   :  { %v11690_v41 = vpop.permute.xlu2 %1735  ;;  %v1575_v19 = vrot.slane %v11535_v29, 1 }
 0x2a5   :  { %v1161_v58 = vpack.c.bf16 %v1073_v24, %v1073_v24  ;;  %v2158_v4 = vpop.permute.xlu1 %2157  ;;  %v2025_v53 = vsel %vm1992_vm2, %v2022_v42, %v2024_v25  ;;  %v1914_v34 = vrot.slane %v1912_v31, 1  ;;  %v1917_v39 = vrot.slane %v1915_v11, 2 }
 0x2a6   :  { %v2657_v33 = vsel %vm2448_vm8, %v2593_v13, %v2158_v4  ;;  %2072 = vrot.lane.b32.xlu0 %v2025_v53, %s9662_s25  ;;  %v1700_v11 = vsel %vm1545_vm1, %v1697_v61, %v1699_v21  ;;  %v2415_v4 = vsel %vm2399_vm5, %v10861_v60, %v1512_v51 }
 0x2a7   :  { %v1260_v47 = vunpack.c.l.b16 %v1161_v58  ;;  %v2712_v62 = vsel %vm2497_vm9, %v2657_v33, %v11564_v55  ;;  %v11708_v63 = vor.u32 %v1917_v39, %v1914_v34  ;;  %v1576_v55 = vsel %vm1545_vm1, %v1573_v0, %v1575_v19 }
 0x2a8   :  { %3117 = vmatmul.bf16.gmra.mxu2 %v2712_v62  ;;  %v993_v15 = vpop.f32.mrf.mxu0  ;;  %v2059_v24 = vpop.permute.xlu0 %2058 }
 0x2a9   :  { %v11710_v42 = vpack.c.b16 %v1260_v47, %v1259_v5  ;;  %v994_v31 = vadd.f32 %v11139_v36, %v993_v15  ;;  %v11730_v5 = vsel %vm1767_vm3, %v11623_v54, %v11708_v63 }
 0x2aa   :  { %1747 = vrot.lane.b32.xlu2 %v1700_v11, %s9663_s26 }
 0x2ab   :  { %v1074_v61 = vmax.f32 %v994_v31, 0.0  ;;  %1623 = vrot.lane.b32.xlu1 %v1576_v55, %s9661_s24  ;;  %v14682_v13 = vrot.slane %v11710_v42, 3  ;;  %v1437_v58 = vshll.u32 %v11710_v42, 16  ;;  %v14680_v0 = vshrl.u32 %v11710_v42, 16 }
 0x2ac   :  { %v11740_v18 = vpop.permute.xlu2 %2319  ;;  %v14681_v60 = vrot.slane %v11710_v42, 2 }
 0x2ad   :  { %v1162_v54 = vpack.c.bf16 %v1074_v61, %v1074_v61  ;;  %v1610_v53 = vpop.permute.xlu1 %1609  ;;  %v2382_v34 = vsel %vm2349_vm4, %v2379_v28, %v14682_v13  ;;  %v2255_v33 = vrot.slane %v14680_v0, 2  ;;  %v2256_v39 = vrot.slane %v1437_v58, 3 }
 0x2ae   :  { %v2464_v62 = vsel %vm2448_vm8, %v2415_v4, %v1610_v53  ;;  %8164 = vmatmul.msk.bf16.gmra.mxu3 %vm2399_vm5, %v2382_v34  ;;  %1527 = vrot.lane.b32.xlu0 %v1432_v26, %s9662_s25  ;;  %v14823_v4 = vrot.slane %v11625_v1, 2  ;;  %v14687_v34 = vrot.slane %v11675_v56, 1 }
 0x2af   :  { %v1261_v51 = vunpack.c.l.b16 %v1162_v54  ;;  %v2520_v15 = vsel %vm2497_vm9, %v2464_v62, %v11600_v22  ;;  %v11757_v31 = vor.u32 %v2256_v39, %v2255_v33  ;;  %v11778_v33 = vpop.f32.mrf.mxu3  ;;  %v2596_v39 = vsel %vm2399_vm5, %v11105_v16, %v2059_v24 }
 0x2b0   :  { %v995_v11 = vpop.f32.mrf.mxu0  ;;  %v1514_v28 = vpop.permute.xlu0 %1513  ;;  %v2126_v22 = vsel %vm1992_vm2, %v14823_v4, %v14681_v60  ;;  %v14685_v4 = vrot.slane %v11625_v1, 1  ;;  %v11792_v60 = vrot.slane %v1437_v58, 1  ;;  %v14824_v58 = vshrl.u32 %v11625_v1, 16 }
 0x2b1   :  { %v11759_v55 = vpack.c.b16 %v1261_v51, %v1260_v47  ;;  %v996_v43 = vadd.f32 %v11139_v36, %v995_v11  ;;  %2988 = vmatmul.bf16.gmra.mxu1 %v2520_v15  ;;  %v2258_v61 = vsel %vm2191_vm6, %v11671_v9, %v11757_v31 }
 0x2b2   :  { %2331 = vrot.lane.b32.xlu2 %v2258_v61, %s9663_s26 }
 0x2b3   :  { %v1075_v26 = vmax.f32 %v996_v43, 0.0  ;;  %2173 = vrot.lane.b32.xlu1 %v2126_v22, %s9661_s24  ;;  %v2026_v47 = vrot.slane %v11759_v55, 2  ;;  %v1921_v54 = vshrl.u32 %v11759_v55, 16  ;;  %v1924_v9 = vshll.u32 %v11759_v55, 16 }
 0x2b4   :  { %v11774_v53 = vpop.permute.xlu2 %1737 }
 0x2b5   :  { %v1163_v62 = vpack.c.bf16 %v1075_v26, %v1075_v26  ;;  %v2160_v15 = vpop.permute.xlu1 %2159  ;;  %v2027_v11 = vsel %vm1992_vm2, %v2024_v25, %v2026_v47  ;;  %v1923_v43 = vrot.slane %v1921_v54, 1  ;;  %v1926_v22 = vrot.slane %v1924_v9, 2 }
 0x2b6   :  { %v2659_v61 = vsel %vm2448_vm8, %v2596_v39, %v2160_v15  ;;  %2074 = vrot.lane.b32.xlu0 %v2027_v11, %s9662_s25  ;;  %v1702_v9 = vsel %vm1545_vm1, %v1699_v21, %v14687_v34  ;;  %v11822_v21 = vld [vmem:[%s14666_s4] ss:$0 sm:$0xff] }
 0x2b7   :  { %v1262_v0 = vunpack.c.l.b16 %v1163_v62  ;;  %v2715_v16 = vsel %vm2497_vm9, %v2659_v61, %v11654_v49  ;;  %v11794_v13 = vor.u32 %v1926_v22, %v1923_v43  ;;  %v1578_v49 = vsel %vm1545_vm1, %v1575_v19, %v14685_v4 }
 0x2b8   :  { %3122 = vmatmul.bf16.gmra.mxu2 %v2715_v16  ;;  %v998_v24 = vpop.f32.mrf.mxu0  ;;  %v2061_v26 = vpop.permute.xlu0 %2060  ;;  %v14825_v16 = vrot.slane %v11710_v42, 3 }
 0x2b9   :  { %v11796_v25 = vpack.c.b16 %v1262_v0, %v1261_v51  ;;  %v999_v54 = vadd.f32 %v11139_v36, %v998_v24  ;;  %v1435_v51 = vor.u32 %v14824_v58, %v11706_v14  ;;  %v11816_v62 = vsel %vm1767_vm3, %v11708_v63, %v11794_v13  ;;  %v11844_v58 = vpop.f32.mrf.mxu3 }
 0x2ba   :  { %v3083_v39 = vpop.f32.mrf.mxu2  ;;  %1749 = vrot.lane.b32.xlu2 %v1702_v9, %s9663_s26  ;;  %v2417_v14 = vsel %vm2399_vm5, %v10948_v2, %v1514_v28 }
 0x2bb   :  { %v1076_v17 = vmax.f32 %v999_v54, 0.0  ;;  %1625 = vrot.lane.b32.xlu1 %v1578_v49, %s9661_s24  ;;  %v14683_v15 = vrot.slane %v11796_v25, 3  ;;  %v1445_v19 = vshll.u32 %v11796_v25, 16  ;;  %v14684_v11 = vshrl.u32 %v11796_v25, 16 }
 0x2bc   :  { %v11829_v43 = vpop.permute.xlu2 %2321  ;;  %v1440_v63 = vsel %vm1300_vm7, %v1435_v51, %v11792_v60  ;;  %v14686_v28 = vrot.slane %v11796_v25, 2 }
 0x2bd   :  { %v1164_v61 = vpack.c.bf16 %v1076_v17, %v1076_v17  ;;  %v1612_v22 = vpop.permute.xlu1 %1611  ;;  %v2384_v24 = vsel %vm2349_vm4, %v14825_v16, %v14683_v15  ;;  %v2259_v54 = vrot.slane %v14684_v11, 2  ;;  %v2260_v9 = vrot.slane %v1445_v19, 3 }
 0x2be   :  { %v2466_v49 = vsel %vm2448_vm8, %v2417_v14, %v1612_v22  ;;  %v2954_v2 = vpop.f32.mrf.mxu1  ;;  %8165 = vmatmul.msk.bf16.gmra.mxu3 %vm2399_vm5, %v2384_v24  ;;  %1529 = vrot.lane.b32.xlu0 %v1440_v63, %s9662_s25  ;;  %v11887_v34 = vrot.slane %v1445_v19, 1 }
 0x2bf   :  { %v1263_v51 = vunpack.c.l.b16 %v1164_v61  ;;  %v2955_v17 = vadd.f32 %v11822_v21, %v2954_v2  ;;  %v2523_v16 = vsel %vm2497_vm9, %v2466_v49, %v11690_v41  ;;  %v11849_v15 = vor.u32 %v2260_v9, %v2259_v54 }
 0x2c0   :  { %v1000_v11 = vpop.f32.mrf.mxu0  ;;  %v1516_v4 = vpop.permute.xlu0 %1515  ;;  %v14826_v2 = vrot.slane %v11710_v42, 2  ;;  %v2599_v49 = vsel %vm2399_vm5, %v11199_v50, %v2061_v26 }
 0x2c1   :  { %v11851_v14 = vpack.c.b16 %v1263_v51, %v1262_v0  ;;  %v3084_v22 = vadd.f32 %v3083_v39, %v2955_v17  ;;  %v1001_v24 = vadd.f32 %v11139_v36, %v1000_v11  ;;  %2993 = vmatmul.bf16.gmra.mxu1 %v2523_v16  ;;  %v2262_v61 = vsel %vm2191_vm6, %v11757_v31, %v11849_v15 }
 0x2c2   :  { %v3085_v63 = vpop.f32.mrf.mxu2  ;;  %v2128_v41 = vsel %vm1992_vm2, %v14826_v2, %v14686_v28  ;;  %2333 = vrot.lane.b32.xlu2 %v2262_v61, %s9663_s26  ;;  %v14688_v2 = vrot.slane %v11759_v55, 1 }
 0x2c3   :  { %v11863_v54 = vadd.f32 %v11168_v3, %v3084_v22  ;;  %v1077_v0 = vmax.f32 %v1001_v24, 0.0  ;;  %2175 = vrot.lane.b32.xlu1 %v2128_v41, %s9661_s24  ;;  %v14690_v36 = vrot.slane %v11851_v14, 2  ;;  %v1930_v11 = vshrl.u32 %v11851_v14, 16 }
 0x2c4   :  { %v11868_v39 = vpop.permute.xlu2 %1739  ;;  %v1933_v9 = vshll.u32 %v11851_v14, 16 }
 0x2c5   :  { %14827 = vst [vmem:[#allocation12_spill] sm:$0xff] %v11863_v54  ;;  %v1165_v17 = vpack.c.bf16 %v1077_v0, %v1077_v0  ;;  %v2162_v16 = vpop.permute.xlu1 %2161  ;;  %v2029_v22 = vsel %vm1992_vm2, %v2026_v47, %v14690_v36  ;;  %v1932_v41 = vrot.slane %v1930_v11, 1  ;;  %v11898_v11 = vld [vmem:[%s14664_s2] ss:$0 sm:$0xff] }
 0x2c6   :  { %v2661_v24 = vsel %vm2448_vm8, %v2599_v49, %v2162_v16  ;;  %v2956_v61 = vpop.f32.mrf.mxu1  ;;  %2076 = vrot.lane.b32.xlu0 %v2029_v22, %s9662_s25  ;;  %v1935_v28 = vrot.slane %v1933_v9, 2  ;;  %v11891_v49 = vpop.f32.mrf.mxu3 }
 0x2c7   :  { %v1264_v50 = vunpack.c.l.b16 %v1165_v17  ;;  %v2957_v26 = vadd.f32 %v11822_v21, %v2956_v61  ;;  %v2718_v0 = vsel %vm2497_vm9, %v2661_v24, %v11740_v18  ;;  %v14828_v18 = vrot.slane %v11675_v56, 1 }
 0x2c8   :  { %3127 = vmatmul.bf16.gmra.mxu2 %v2718_v0  ;;  %v1003_v3 = vpop.f32.mrf.mxu0  ;;  %v2063_v31 = vpop.permute.xlu0 %2062  ;;  %v11889_v47 = vor.u32 %v1935_v28, %v1932_v41  ;;  %v14829_v28 = vrot.slane %v11710_v42, 1  ;;  %v14830_v17 = vrot.slane %v11625_v1, 1 }
 0x2c9   :  { %v11893_v16 = vpack.c.b16 %v1264_v50, %v1263_v51  ;;  %v3086_v22 = vadd.f32 %v3085_v63, %v2957_v26  ;;  %v1004_v9 = vadd.f32 %v11898_v11, %v1003_v3  ;;  %v1704_v19 = vsel %vm1545_vm1, %v14828_v18, %v14688_v2 }
 0x2ca   :  { %v1580_v51 = vsel %vm1545_vm1, %v14830_v17, %v14829_v28  ;;  %v14831_v63 = vshrl.u32 %v11710_v42, 16  ;;  %v11917_v3 = vsel %vm1767_vm3, %v11794_v13, %v11889_v47  ;;  %1751 = vrot.lane.b32.xlu2 %v1704_v19, %s9663_s26  ;;  %v14833_v28 = vrot.slane %v11796_v25, 3 }
 0x2cb   :  { %v11920_v61 = vadd.f32 %v11229_v27, %v3086_v22  ;;  %v1078_v56 = vmax.f32 %v1004_v9, 0.0  ;;  %1627 = vrot.lane.b32.xlu1 %v1580_v51, %s9661_s24  ;;  %v3088_v41 = vpop.f32.mrf.mxu2  ;;  %v14689_v26 = vrot.slane %v11893_v16, 3  ;;  %v1453_v0 = vshll.u32 %v11893_v16, 16 }
 0x2cc   :  { %v1443_v24 = vor.u32 %v14831_v63, %v11792_v60  ;;  %v2419_v60 = vsel %vm2399_vm5, %v11014_v35, %v1516_v4  ;;  %v11928_v18 = vpop.permute.xlu2 %2323  ;;  %v14691_v27 = vshrl.u32 %v11893_v16, 16 }
 0x2cd   :  { %14832 = vst [vmem:[#allocation13_spill] sm:$0xff] %v11920_v61  ;;  %v1166_v9 = vpack.c.bf16 %v1078_v56, %v1078_v56  ;;  %v1614_v19 = vpop.permute.xlu1 %1613  ;;  %v2386_v17 = vsel %vm2349_vm4, %v14833_v28, %v14689_v26  ;;  %v2264_v51 = vrot.slane %v1453_v0, 3  ;;  %v11988_v54 = vrot.slane %v1453_v0, 1 }
 0x2ce   :  { %v1448_v13 = vsel %vm1300_vm7, %v1443_v24, %v11887_v34  ;;  %v2468_v35 = vsel %vm2448_vm8, %v2419_v60, %v1614_v19  ;;  %v2959_v4 = vpop.f32.mrf.mxu1  ;;  %8166 = vmatmul.msk.bf16.gmra.mxu3 %vm2399_vm5, %v2386_v17  ;;  %v2263_v63 = vrot.slane %v14691_v27, 2  ;;  %v14692_v24 = vrot.slane %v11893_v16, 2 }
 0x2cf   :  { %1531 = vrot.lane.b32.xlu0 %v1448_v13, %s9662_s25  ;;  %v1265_v56 = vunpack.c.l.b16 %v1166_v9  ;;  %v2960_v22 = vadd.f32 %v11822_v21, %v2959_v4  ;;  %v2526_v2 = vsel %vm2497_vm9, %v2468_v35, %v11774_v53  ;;  %v14834_v9 = vrot.slane %v11796_v25, 2  ;;  %v11961_v35 = vpop.f32.mrf.mxu3 }
 0x2d0   :  { %v1005_v28 = vpop.f32.mrf.mxu0  ;;  %v1518_v26 = vpop.permute.xlu0 %1517  ;;  %v11948_v36 = vor.u32 %v2264_v51, %v2263_v63 }
 0x2d1   :  { %v11950_v60 = vpack.c.b16 %v1265_v56, %v1264_v50  ;;  %v3089_v19 = vadd.f32 %v3088_v41, %v2960_v22  ;;  %v1006_v13 = vadd.f32 %v11898_v11, %v1005_v28  ;;  %2998 = vmatmul.bf16.gmra.mxu1 %v2526_v2  ;;  %v2130_v53 = vsel %vm1992_vm2, %v14834_v9, %v14692_v24 }
 0x2d2   :  { %v2266_v17 = vsel %vm2191_vm6, %v11849_v15, %v11948_v36  ;;  %v14697_v24 = vrot.slane %v11851_v14, 1 }
 0x2d3   :  { %v11964_v51 = vadd.f32 %v11289_v52, %v3089_v19  ;;  %v1079_v50 = vmax.f32 %v1006_v13, 0.0  ;;  %2335 = vrot.lane.b32.xlu2 %v2266_v17, %s9663_s26  ;;  %2177 = vrot.lane.b32.xlu1 %v2130_v53, %s9661_s24  ;;  %v3090_v2 = vpop.f32.mrf.mxu2  ;;  %v2030_v41 = vrot.slane %v11950_v60, 2  ;;  %v1939_v4 = vshrl.u32 %v11950_v60, 16 }
 0x2d4   :  { %v11969_v15 = vpop.permute.xlu2 %1741  ;;  %v1942_v63 = vshll.u32 %v11950_v60, 16  ;;  %v2602_v52 = vsel %vm2399_vm5, %v11287_v38, %v2063_v31  ;;  %v14836_v17 = vrot.slane %v11851_v14, 2 }
 0x2d5   :  { %14835 = vst [vmem:[#allocation14_spill] sm:$0xff] %v11964_v51  ;;  %v1167_v19 = vpack.c.bf16 %v1079_v50, %v1079_v50  ;;  %v2164_v13 = vpop.permute.xlu1 %2163  ;;  %v1941_v22 = vrot.slane %v1939_v4, 1  ;;  %v14837_v4 = vrot.slane %v11759_v55, 1 }
 0x2d6   :  { %v2031_v9 = vsel %vm1992_vm2, %v14836_v17, %v2030_v41  ;;  %v2663_v53 = vsel %vm2448_vm8, %v2602_v52, %v2164_v13  ;;  %v2961_v27 = vpop.f32.mrf.mxu1  ;;  %v1944_v61 = vrot.slane %v1942_v63, 2  ;;  %v14839_v63 = vrot.slane %v11710_v42, 1 }
 0x2d7   :  { %2078 = vrot.lane.b32.xlu0 %v2031_v9, %s9662_s25  ;;  %v1266_v38 = vunpack.c.l.b16 %v1167_v19  ;;  %v2962_v31 = vadd.f32 %v11822_v21, %v2961_v27  ;;  %v2721_v50 = vsel %vm2497_vm9, %v2663_v53, %v11829_v43  ;;  %v1706_v27 = vsel %vm1545_vm1, %v14837_v4, %v14697_v24 }
 0x2d8   :  { %3132 = vmatmul.bf16.gmra.mxu2 %v2721_v50  ;;  %v1008_v28 = vpop.f32.mrf.mxu0  ;;  %v2065_v51 = vpop.permute.xlu0 %2064  ;;  %v11990_v17 = vor.u32 %v1944_v61, %v1941_v22  ;;  %v14838_v43 = vrot.slane %v11796_v25, 1  ;;  %v14840_v61 = vshrl.u32 %v11796_v25, 16 }
 0x2d9   :  { %v11992_v52 = vpack.c.b16 %v1266_v38, %v1265_v56  ;;  %v3091_v13 = vadd.f32 %v3090_v2, %v2962_v31  ;;  %v1009_v9 = vadd.f32 %v11898_v11, %v1008_v28  ;;  %v12027_v50 = vpop.f32.mrf.mxu3 }
 0x2da   :  { %v1582_v0 = vsel %vm1545_vm1, %v14839_v63, %v14838_v43  ;;  %v1451_v56 = vor.u32 %v14840_v61, %v11887_v34  ;;  %v12011_v2 = vsel %vm1767_vm3, %v11889_v47, %v11990_v17  ;;  %v2421_v34 = vsel %vm2399_vm5, %v11085_v32, %v1518_v26 }
 0x2db   :  { %v12014_v22 = vadd.f32 %v11338_v48, %v3091_v13  ;;  %v1080_v55 = vmax.f32 %v1009_v9, 0.0  ;;  %1753 = vrot.lane.b32.xlu2 %v1706_v27, %s9663_s26  ;;  %1629 = vrot.lane.b32.xlu1 %v1582_v0, %s9661_s24  ;;  %v3093_v28 = vpop.f32.mrf.mxu2  ;;  %v14696_v19 = vrot.slane %v11992_v52, 3  ;;  %v1461_v53 = vshll.u32 %v11992_v52, 16 }
 0x2dc   :  { %v12022_v31 = vpop.permute.xlu2 %2325  ;;  %v1456_v47 = vsel %vm1300_vm7, %v1451_v56, %v11988_v54  ;;  %v14698_v48 = vshrl.u32 %v11992_v52, 16  ;;  %v14841_v27 = vrot.slane %v11893_v16, 3  ;;  %v14699_v61 = vrot.slane %v11992_v52, 2 }
 0x2dd   :  { %v1168_v9 = vpack.c.bf16 %v1080_v55, %v1080_v55  ;;  %v1616_v4 = vpop.permute.xlu1 %1615  ;;  %v2268_v32 = vrot.slane %v1461_v53, 3 }
 0x2de   :  { %v2388_v43 = vsel %vm2349_vm4, %v14841_v27, %v14696_v19  ;;  %v2470_v26 = vsel %vm2448_vm8, %v2421_v34, %v1616_v4  ;;  %v2964_v63 = vpop.f32.mrf.mxu1  ;;  %v2267_v0 = vrot.slane %v14698_v48, 2 }
 0x2df   :  { %8167 = vmatmul.msk.bf16.gmra.mxu3 %vm2399_vm5, %v2388_v43  ;;  %1533 = vrot.lane.b32.xlu0 %v1456_v47, %s9662_s25  ;;  %v1267_v56 = vunpack.c.l.b16 %v1168_v9  ;;  %v2965_v55 = vadd.f32 %v11822_v21, %v2964_v63  ;;  %v2529_v13 = vsel %vm2497_vm9, %v2470_v26, %v11868_v39  ;;  %v14842_v9 = vrot.slane %v11893_v16, 2 }
 0x2e0   :  { %v1010_v27 = vpop.f32.mrf.mxu0  ;;  %v1520_v19 = vpop.permute.xlu0 %1519  ;;  %v12044_v24 = vor.u32 %v2268_v32, %v2267_v0 }
 0x2e1   :  { %v12046_v34 = vpack.c.b16 %v1267_v56, %v1266_v38  ;;  %v3094_v4 = vadd.f32 %v3093_v28, %v2965_v55  ;;  %v1011_v47 = vadd.f32 %v11898_v11, %v1010_v27  ;;  %3003 = vmatmul.bf16.gmra.mxu1 %v2529_v13  ;;  %v2132_v39 = vsel %vm1992_vm2, %v14842_v9, %v14699_v61 }
 0x2e2   :  { %v2270_v43 = vsel %vm2191_vm6, %v11948_v36, %v12044_v24 }
 0x2e3   :  { %v12058_v26 = vadd.f32 %v11401_v23, %v3094_v4  ;;  %v1081_v32 = vmax.f32 %v1011_v47, 0.0  ;;  %2337 = vrot.lane.b32.xlu2 %v2270_v43, %s9663_s26  ;;  %2179 = vrot.lane.b32.xlu1 %v2132_v39, %s9661_s24  ;;  %v3095_v38 = vpop.f32.mrf.mxu2  ;;  %v14700_v28 = vrot.slane %v12046_v34, 2  ;;  %v1948_v63 = vshrl.u32 %v12046_v34, 16 }
 0x2e4   :  { %v12063_v13 = vpop.permute.xlu2 %1743  ;;  %v1951_v0 = vshll.u32 %v12046_v34, 16  ;;  %v2605_v23 = vsel %vm2399_vm5, %v11377_v40, %v2065_v51  ;;  %v14702_v39 = vrot.slane %v11950_v60, 1  ;;  %v12079_v40 = vpop.f32.mrf.mxu3 }
 0x2e5   :  { %14843 = vst [vmem:[#allocation15_spill] sm:$0xff] %v12058_v26  ;;  %v1169_v27 = vpack.c.bf16 %v1081_v32, %v1081_v32  ;;  %v2166_v4 = vpop.permute.xlu1 %2165  ;;  %v2033_v47 = vsel %vm1992_vm2, %v2030_v41, %v14700_v28  ;;  %v1950_v48 = vrot.slane %v1948_v63, 1  ;;  %v12084_v28 = vrot.slane %v1461_v53, 1 }
 0x2e6   :  { %v2665_v43 = vsel %vm2448_vm8, %v2605_v23, %v2166_v4  ;;  %v2966_v9 = vpop.f32.mrf.mxu1  ;;  %v1953_v61 = vrot.slane %v1951_v0, 2  ;;  %v14844_v0 = vrot.slane %v11851_v14, 1 }
 0x2e7   :  { %2080 = vrot.lane.b32.xlu0 %v2033_v47, %s9662_s25  ;;  %v1268_v51 = vunpack.c.l.b16 %v1169_v27  ;;  %v2967_v32 = vadd.f32 %v11822_v21, %v2966_v9  ;;  %v2724_v55 = vsel %vm2497_vm9, %v2665_v43, %v11928_v18  ;;  %v14845_v18 = vrot.slane %v11893_v16, 1 }
 0x2e8   :  { %3137 = vmatmul.bf16.gmra.mxu2 %v2724_v55  ;;  %v1013_v36 = vpop.f32.mrf.mxu0  ;;  %v2067_v41 = vpop.permute.xlu0 %2066  ;;  %v12086_v23 = vor.u32 %v1953_v61, %v1950_v48  ;;  %v1708_v27 = vsel %vm1545_vm1, %v14844_v0, %v14702_v39  ;;  %v14846_v55 = vrot.slane %v11796_v25, 1  ;;  %v14847_v48 = vshrl.u32 %v11893_v16, 16 }
 0x2e9   :  { %v12088_v4 = vpack.c.b16 %v1268_v51, %v1267_v56  ;;  %v3096_v47 = vadd.f32 %v3095_v38, %v2967_v32  ;;  %v1014_v63 = vadd.f32 %v11898_v11, %v1013_v36 }
 0x2ea   :  { %v1584_v53 = vsel %vm1545_vm1, %v14846_v55, %v14845_v18  ;;  %v1459_v61 = vor.u32 %v14847_v48, %v11988_v54  ;;  %v12107_v56 = vsel %vm1767_vm3, %v11990_v17, %v12086_v23  ;;  %v2423_v54 = vsel %vm2399_vm5, %v11179_v45, %v1520_v19 }
 0x2eb   :  { %v12110_v38 = vadd.f32 %v11445_v46, %v3096_v47  ;;  %v1082_v14 = vmax.f32 %v1014_v63, 0.0  ;;  %1755 = vrot.lane.b32.xlu2 %v1708_v27, %s9663_s26  ;;  %1631 = vrot.lane.b32.xlu1 %v1584_v53, %s9661_s24  ;;  %v3098_v36 = vpop.f32.mrf.mxu2  ;;  %v14701_v43 = vrot.slane %v12088_v4, 3  ;;  %v1469_v9 = vshll.u32 %v12088_v4, 16 }
 0x2ec   :  { %v12118_v32 = vpop.permute.xlu2 %2327  ;;  %v1464_v17 = vsel %vm1300_vm7, %v1459_v61, %v12084_v28  ;;  %v14703_v46 = vshrl.u32 %v12088_v4, 16  ;;  %v14849_v27 = vrot.slane %v11992_v52, 3  ;;  %v14704_v48 = vrot.slane %v12088_v4, 2 }
 0x2ed   :  { %14848 = vst [vmem:[#allocation16_spill] sm:$0xff] %v12110_v38  ;;  %v1170_v63 = vpack.c.bf16 %v1082_v14, %v1082_v14  ;;  %v1618_v0 = vpop.permute.xlu1 %1617  ;;  %v2272_v55 = vrot.slane %v1469_v9, 3  ;;  %v12178_v26 = vrot.slane %v1469_v9, 1 }
 0x2ee   :  { %v2390_v18 = vsel %vm2349_vm4, %v14849_v27, %v14701_v43  ;;  %v2472_v45 = vsel %vm2448_vm8, %v2423_v54, %v1618_v0  ;;  %v2969_v19 = vpop.f32.mrf.mxu1  ;;  %v2271_v53 = vrot.slane %v14703_v46, 2  ;;  %v12140_v54 = vpop.f32.mrf.mxu3 }
 0x2ef   :  { %8168 = vmatmul.msk.bf16.gmra.mxu3 %vm2399_vm5, %v2390_v18  ;;  %1535 = vrot.lane.b32.xlu0 %v1464_v17, %s9662_s25  ;;  %v1269_v61 = vunpack.c.l.b16 %v1170_v63  ;;  %v2970_v14 = vadd.f32 %v11822_v21, %v2969_v19  ;;  %v2532_v47 = vsel %vm2497_vm9, %v2472_v45, %v11969_v15  ;;  %v14850_v15 = vrot.slane %v11992_v52, 2 }
 0x2f0   :  { %v1015_v27 = vpop.f32.mrf.mxu0  ;;  %v1522_v43 = vpop.permute.xlu0 %1521  ;;  %v12138_v39 = vor.u32 %v2272_v55, %v2271_v53 }
 0x2f1   :  { %v12142_v0 = vpack.c.b16 %v1269_v61, %v1268_v51  ;;  %v3099_v17 = vadd.f32 %v3098_v36, %v2970_v14  ;;  %v1016_v18 = vadd.f32 %v11898_v11, %v1015_v27  ;;  %3008 = vmatmul.bf16.gmra.mxu1 %v2532_v47  ;;  %v2134_v45 = vsel %vm1992_vm2, %v14850_v15, %v14704_v48 }
 0x2f2   :  { %v2274_v63 = vsel %vm2191_vm6, %v12044_v24, %v12138_v39  ;;  %v14709_v48 = vrot.slane %v12046_v34, 1 }
 0x2f3   :  { %v12154_v55 = vadd.f32 %v11507_v10, %v3099_v17  ;;  %v1083_v19 = vmax.f32 %v1016_v18, 0.0  ;;  %2339 = vrot.lane.b32.xlu2 %v2274_v63, %s9663_s26  ;;  %2181 = vrot.lane.b32.xlu1 %v2134_v45, %s9661_s24  ;;  %v3100_v51 = vpop.f32.mrf.mxu2  ;;  %v2034_v36 = vrot.slane %v12142_v0, 2  ;;  %v1957_v53 = vshrl.u32 %v12142_v0, 16 }
 0x2f4   :  { %v12159_v47 = vpop.permute.xlu2 %1745  ;;  %v1960_v14 = vshll.u32 %v12142_v0, 16  ;;  %v2608_v10 = vsel %vm2399_vm5, %v11467_v8, %v2067_v41  ;;  %v14852_v63 = vrot.slane %v12046_v34, 2 }
 0x2f5   :  { %14851 = vst [vmem:[#allocation17_spill] sm:$0xff] %v12154_v55  ;;  %v1171_v17 = vpack.c.bf16 %v1083_v19, %v1083_v19  ;;  %v2168_v18 = vpop.permute.xlu1 %2167  ;;  %v1959_v24 = vrot.slane %v1957_v53, 1  ;;  %v14853_v53 = vrot.slane %v11950_v60, 1 }
 0x2f6   :  { %v2035_v15 = vsel %vm1992_vm2, %v14852_v63, %v2034_v36  ;;  %v2667_v45 = vsel %vm2448_vm8, %v2608_v10, %v2168_v18  ;;  %v2971_v46 = vpop.f32.mrf.mxu1  ;;  %v1962_v38 = vrot.slane %v1960_v14, 2  ;;  %v14855_v14 = vrot.slane %v11893_v16, 1 }
 0x2f7   :  { %2082 = vrot.lane.b32.xlu0 %v2035_v15, %s9662_s25  ;;  %v1270_v8 = vunpack.c.l.b16 %v1171_v17  ;;  %v2972_v41 = vadd.f32 %v11822_v21, %v2971_v46  ;;  %v2727_v19 = vsel %vm2497_vm9, %v2667_v45, %v12022_v31  ;;  %v1710_v46 = vsel %vm1545_vm1, %v14853_v53, %v14709_v48 }
 0x2f8   :  { %3142 = vmatmul.bf16.gmra.mxu2 %v2727_v19  ;;  %v1018_v27 = vpop.f32.mrf.mxu0  ;;  %v2069_v55 = vpop.permute.xlu0 %2068  ;;  %v12180_v63 = vor.u32 %v1962_v38, %v1959_v24  ;;  %v14854_v31 = vrot.slane %v11992_v52, 1  ;;  %v14856_v38 = vshrl.u32 %v11992_v52, 16 }
 0x2f9   :  { %v12182_v10 = vpack.c.b16 %v1270_v8, %v1269_v61  ;;  %v3101_v18 = vadd.f32 %v3100_v51, %v2972_v41  ;;  %v1019_v15 = vadd.f32 %v11898_v11, %v1018_v27  ;;  %v12203_v24 = vpop.f32.mrf.mxu3  ;;  %v2425_v41 = vsel %vm2399_vm5, %v11267_v57, %v1522_v43 }
 0x2fa   :  { %v1586_v9 = vsel %vm1545_vm1, %v14855_v14, %v14854_v31  ;;  %v1467_v61 = vor.u32 %v14856_v38, %v12084_v28  ;;  %v12201_v51 = vsel %vm1767_vm3, %v12086_v23, %v12180_v63 }
 0x2fb   :  { %v12206_v60 = vadd.f32 %v11568_v6, %v3101_v18  ;;  %v1084_v27 = vmax.f32 %v1019_v15, 0.0  ;;  %1757 = vrot.lane.b32.xlu2 %v1710_v46, %s9663_s26  ;;  %1633 = vrot.lane.b32.xlu1 %v1586_v9, %s9661_s24  ;;  %v3103_v17 = vpop.f32.mrf.mxu2  ;;  %v14708_v45 = vrot.slane %v12182_v10, 3  ;;  %v1477_v28 = vshll.u32 %v12182_v10, 16 }
 0x2fc   :  { %v12214_v23 = vpop.permute.xlu2 %2329  ;;  %v1472_v19 = vsel %vm1300_vm7, %v1467_v61, %v12178_v26  ;;  %v14710_v6 = vshrl.u32 %v12182_v10, 16  ;;  %v14858_v46 = vrot.slane %v12088_v4, 3  ;;  %v14711_v38 = vrot.slane %v12182_v10, 2 }
 0x2fd   :  { %14857 = vst [vmem:[#allocation18_spill] sm:$0xff] %v12206_v60  ;;  %v1172_v15 = vpack.c.bf16 %v1084_v27, %v1084_v27  ;;  %v1620_v53 = vpop.permute.xlu1 %1619  ;;  %v2276_v14 = vrot.slane %v1477_v28, 3  ;;  %v12274_v60 = vrot.slane %v1477_v28, 1 }
 0x2fe   :  { %v2392_v31 = vsel %vm2349_vm4, %v14858_v46, %v14708_v45  ;;  %v2474_v57 = vsel %vm2448_vm8, %v2425_v41, %v1620_v53  ;;  %v2974_v43 = vpop.f32.mrf.mxu1  ;;  %v2275_v9 = vrot.slane %v14710_v6, 2  ;;  %v14718_v6 = vrot.slane %v12142_v0, 1 }
 0x2ff   :  { %8169 = vmatmul.msk.bf16.gmra.mxu3 %vm2399_vm5, %v2392_v31  ;;  %1537 = vrot.lane.b32.xlu0 %v1472_v19, %s9662_s25  ;;  %v1271_v61 = vunpack.c.l.b16 %v1172_v15  ;;  %v2975_v27 = vadd.f32 %v11822_v21, %v2974_v43  ;;  %v2535_v18 = vsel %vm2497_vm9, %v2474_v57, %v12063_v13  ;;  %v14859_v15 = vrot.slane %v12088_v4, 2 }
 0x300   :  { %v1020_v46 = vpop.f32.mrf.mxu0  ;;  %v1524_v45 = vpop.permute.xlu0 %1523  ;;  %v12234_v48 = vor.u32 %v2276_v14, %v2275_v9 }
 0x301   :  { %v12236_v41 = vpack.c.b16 %v1271_v61, %v1270_v8  ;;  %v3104_v53 = vadd.f32 %v3103_v17, %v2975_v27  ;;  %v1021_v19 = vadd.f32 %v11898_v11, %v1020_v46  ;;  %3013 = vmatmul.bf16.gmra.mxu1 %v2535_v18  ;;  %v2136_v13 = vsel %vm1992_vm2, %v14859_v15, %v14711_v38  ;;  %v12258_v27 = vpop.f32.mrf.mxu3 }
 0x302   :  { %v2278_v31 = vsel %vm2191_vm6, %v12138_v39, %v12234_v48 }
 0x303   :  { %v12248_v57 = vadd.f32 %v11614_v7, %v3104_v53  ;;  %v1085_v14 = vmax.f32 %v1021_v19, 0.0  ;;  %2341 = vrot.lane.b32.xlu2 %v2278_v31, %s9663_s26  ;;  %2183 = vrot.lane.b32.xlu1 %v2136_v13, %s9661_s24  ;;  %v3105_v8 = vpop.f32.mrf.mxu2  ;;  %v2036_v17 = vrot.slane %v12236_v41, 2  ;;  %v1966_v43 = vshrl.u32 %v12236_v41, 16 }
 0x304   :  { %v12253_v18 = vpop.permute.xlu2 %1747  ;;  %v1969_v9 = vshll.u32 %v12236_v41, 16  ;;  %v2611_v7 = vsel %vm2399_vm5, %v11555_v20, %v2069_v55 }
 0x305   :  { %14860 = vst [vmem:[#allocation19_spill] sm:$0xff] %v12248_v57  ;;  %v1173_v53 = vpack.c.bf16 %v1085_v14, %v1085_v14  ;;  %v2170_v19 = vpop.permute.xlu1 %2169  ;;  %v2037_v31 = vsel %vm1992_vm2, %v2034_v36, %v2036_v17  ;;  %v1968_v38 = vrot.slane %v1966_v43, 1  ;;  %v14861_v43 = vrot.slane %v12046_v34, 1 }
 0x306   :  { %v2669_v15 = vsel %vm2448_vm8, %v2611_v7, %v2170_v19  ;;  %v2976_v13 = vpop.f32.mrf.mxu1  ;;  %v1971_v39 = vrot.slane %v1969_v9, 2 }
 0x307   :  { %2084 = vrot.lane.b32.xlu0 %v2037_v31, %s9662_s25  ;;  %v1272_v20 = vunpack.c.l.b16 %v1173_v53  ;;  %v2977_v55 = vadd.f32 %v11822_v21, %v2976_v13  ;;  %v2730_v14 = vsel %vm2497_vm9, %v2669_v15, %v12118_v32  ;;  %v1712_v9 = vsel %vm1545_vm1, %v14861_v43, %v14718_v6 }
 0x308   :  { %3147 = vmatmul.bf16.gmra.mxu2 %v2730_v14  ;;  %v1023_v46 = vpop.f32.mrf.mxu0  ;;  %v2071_v57 = vpop.permute.xlu0 %2070  ;;  %v12276_v36 = vor.u32 %v1971_v39, %v1968_v38  ;;  %v14862_v32 = vrot.slane %v12088_v4, 1  ;;  %v14863_v53 = vrot.slane %v11992_v52, 1  ;;  %v14864_v38 = vshrl.u32 %v12088_v4, 16 }
 0x309   :  { %v12278_v7 = vpack.c.b16 %v1272_v20, %v1271_v61  ;;  %v3106_v19 = vadd.f32 %v3105_v8, %v2977_v55  ;;  %v1024_v31 = vadd.f32 %v11898_v11, %v1023_v46  ;;  %v14865_v43 = vrot.slane %v12182_v10, 3 }
 0x30a   :  { %v1588_v28 = vsel %vm1545_vm1, %v14863_v53, %v14862_v32  ;;  %v1475_v61 = vor.u32 %v14864_v38, %v12178_v26  ;;  %v12297_v8 = vsel %vm1767_vm3, %v12180_v63, %v12276_v36  ;;  %v2427_v26 = vsel %vm2399_vm5, %v11357_v44, %v1524_v45  ;;  %v12325_v38 = vpop.f32.mrf.mxu3 }
 0x30b   :  { %v12300_v39 = vadd.f32 %v11673_v59, %v3106_v19  ;;  %v1086_v34 = vmax.f32 %v1024_v31, 0.0  ;;  %1759 = vrot.lane.b32.xlu2 %v1712_v9, %s9663_s26  ;;  %1635 = vrot.lane.b32.xlu1 %v1588_v28, %s9661_s24  ;;  %v3108_v46 = vpop.f32.mrf.mxu2  ;;  %v14716_v15 = vrot.slane %v12278_v7, 3  ;;  %v1485_v13 = vshll.u32 %v12278_v7, 16 }
 0x30c   :  { %v12308_v55 = vpop.permute.xlu2 %2331  ;;  %v1480_v63 = vsel %vm1300_vm7, %v1475_v61, %v12274_v60  ;;  %v14714_v59 = vshrl.u32 %v12278_v7, 16  ;;  %v14715_v28 = vrot.slane %v12278_v7, 2 }
 0x30d   :  { %v1174_v19 = vpack.c.bf16 %v1086_v34, %v1086_v34  ;;  %v1622_v31 = vpop.permute.xlu1 %1621  ;;  %v2394_v9 = vsel %vm2349_vm4, %v14865_v43, %v14716_v15  ;;  %v2280_v32 = vrot.slane %v1485_v13, 3 }
 0x30e   :  { %v2476_v44 = vsel %vm2448_vm8, %v2427_v26, %v1622_v31  ;;  %v2979_v45 = vpop.f32.mrf.mxu1  ;;  %v2279_v53 = vrot.slane %v14714_v59, 2 }
 0x30f   :  { %8170 = vmatmul.msk.bf16.gmra.mxu3 %vm2399_vm5, %v2394_v9  ;;  %1539 = vrot.lane.b32.xlu0 %v1480_v63, %s9662_s25  ;;  %v12327_v61 = vunpack.c.l.b16 %v1174_v19  ;;  %v2980_v34 = vadd.f32 %v11822_v21, %v2979_v45  ;;  %v2538_v43 = vsel %vm2497_vm9, %v2476_v44, %v12159_v47  ;;  %v14866_v45 = vrot.slane %v12182_v10, 2 }
 0x310   :  { %v1025_v26 = vpop.f32.mrf.mxu0  ;;  %v1526_v31 = vpop.permute.xlu0 %1525  ;;  %v12332_v14 = vor.u32 %v2280_v32, %v2279_v53 }
 0x311   :  { %v12335_v63 = vpack.c.b16 %v12327_v61, %v1272_v20  ;;  %v3109_v9 = vadd.f32 %v3108_v46, %v2980_v34  ;;  %v1026_v59 = vadd.f32 %v11898_v11, %v1025_v26  ;;  %3018 = vmatmul.bf16.gmra.mxu1 %v2538_v43  ;;  %v2138_v47 = vsel %vm1992_vm2, %v14866_v45, %v14715_v28 }
 0x312   :  { %v2282_v19 = vsel %vm2191_vm6, %v12234_v48, %v12332_v14  ;;  %v2614_v43 = vsel %vm2399_vm5, %v11645_v12, %v2071_v57  ;;  %v12368_v12 = vrot.slane %v1485_v13, 1  ;;  %v12380_v28 = vpop.f32.mrf.mxu3 }
 0x313   :  { %v12347_v32 = vadd.f32 %v11732_v37, %v3109_v9  ;;  %v1087_v44 = vmax.f32 %v1026_v59, 0.0  ;;  %2343 = vrot.lane.b32.xlu2 %v2282_v19, %s9663_s26  ;;  %2185 = vrot.lane.b32.xlu1 %v2138_v47, %s9661_s24  ;;  %v3110_v20 = vpop.f32.mrf.mxu2  ;;  %v14717_v46 = vrot.slane %v12335_v63, 2  ;;  %v1975_v48 = vshrl.u32 %v12335_v63, 16 }
 0x314   :  { %v12352_v53 = vpop.permute.xlu2 %1749  ;;  %v1978_v34 = vshll.u32 %v12335_v63, 16  ;;  %v14719_v47 = vrot.slane %v12236_v41, 1 }
 0x315   :  { %v1175_v26 = vpack.c.bf16 %v1087_v44, %v1087_v44  ;;  %v2172_v59 = vpop.permute.xlu1 %2171  ;;  %v2039_v9 = vsel %vm1992_vm2, %v2036_v17, %v14717_v46 }
 0x316   :  { %v2671_v19 = vsel %vm2448_vm8, %v2614_v43, %v2172_v59  ;;  %v2981_v45 = vpop.f32.mrf.mxu1  ;;  %v14867_v43 = vshrl.u32 %v12182_v10, 16  ;;  %v1980_v46 = vrot.slane %v1978_v34, 2 }
 0x317   :  { %2086 = vrot.lane.b32.xlu0 %v2039_v9, %s9662_s25  ;;  %v1644_v57 = vunpack.c.l.b16 %v1175_v26  ;;  %v2982_v44 = vadd.f32 %v11822_v21, %v2981_v45  ;;  %v2733_v37 = vsel %vm2497_vm9, %v2671_v19, %v12214_v23  ;;  %v1977_v9 = vrot.slane %v1975_v48, 1 }
 0x318   :  { %3152 = vmatmul.bf16.gmra.mxu2 %v2733_v37  ;;  %v1028_v15 = vpop.f32.mrf.mxu0  ;;  %v2073_v17 = vpop.permute.xlu0 %2072  ;;  %v1483_v59 = vor.u32 %v14867_v43, %v12274_v60  ;;  %v2429_v23 = vsel %vm2399_vm5, %v11447_v30, %v1526_v31  ;;  %v14868_v37 = vrot.slane %v12142_v0, 1  ;;  %v14869_v60 = vrot.slane %v12182_v10, 1 }
 0x319   :  { %v12377_v6 = vpack.c.b16 %v1644_v57, %v12327_v61  ;;  %v3111_v13 = vadd.f32 %v3110_v20, %v2982_v44  ;;  %v1029_v26 = vadd.f32 %v11898_v11, %v1028_v15  ;;  %v14870_v48 = vrot.slane %v12088_v4, 1 }
 0x31a   :  { %v1714_v19 = vsel %vm1545_vm1, %v14868_v37, %v14719_v47  ;;  %v1488_v11 = vsel %vm1300_vm7, %v1483_v59, %v12368_v12  ;;  %v12403_v45 = vpack.c.b16 %v1644_v57, %v1644_v57  ;;  %v1981_v59 = vor.u32 %v1980_v46, %v1977_v9 }
 0x31b   :  { %v1590_v34 = vsel %vm1545_vm1, %v14870_v48, %v14869_v60  ;;  %v12397_v15 = vadd.f32 %v11778_v33, %v3111_v13  ;;  %v1088_v20 = vmax.f32 %v1029_v26, 0.0  ;;  %1761 = vrot.lane.b32.xlu2 %v1714_v19, %s9663_s26  ;;  %v3113_v30 = vpop.f32.mrf.mxu2  ;;  %v14721_v0 = vrot.slane %v12377_v6, 3 }
 0x31c   :  { %1637 = vrot.lane.b32.xlu1 %v1590_v34, %s9661_s24  ;;  %v2284_v31 = vshrl.u32 %v12377_v6, 16  ;;  %v2287_v44 = vshll.u32 %v12377_v6, 16  ;;  %v12408_v26 = vpop.permute.xlu2 %2333  ;;  %v14872_v19 = vrot.slane %v12278_v7, 3 }
 0x31d   :  { %14871 = vst [vmem:[#allocation20_spill] sm:$0xff] %v12397_v15  ;;  %v1176_v13 = vpack.c.bf16 %v1088_v20, %v1088_v20  ;;  %v1624_v37 = vpop.permute.xlu1 %1623 }
 0x31e   :  { %v2396_v60 = vsel %vm2349_vm4, %v14872_v19, %v14721_v0  ;;  %v2286_v48 = vrot.slane %v2284_v31, 2  ;;  %v2478_v57 = vsel %vm2448_vm8, %v2429_v23, %v1624_v37  ;;  %v2984_v34 = vpop.f32.mrf.mxu1  ;;  %v2289_v46 = vrot.slane %v2287_v44, 3 }
 0x31f   :  { %8171 = vmatmul.msk.bf16.gmra.mxu3 %vm2399_vm5, %v2396_v60  ;;  %1541 = vrot.lane.b32.xlu0 %v1488_v11, %s9662_s25  ;;  %v2091_v9 = vunpack.c.l.b16 %v1176_v13  ;;  %v2985_v20 = vadd.f32 %v11822_v21, %v2984_v34  ;;  %v2541_v33 = vsel %vm2497_vm9, %v2478_v57, %v12253_v18  ;;  %v12425_v31 = vsel %vm1767_vm3, %v12276_v36, %v1981_v59 }
 0x320   :  { %v1528_v47 = vpop.permute.xlu0 %1527  ;;  %v12421_v43 = vor.u32 %v2289_v46, %v2286_v48  ;;  %v1030_v15 = vpop.f32.mrf.mxu0  ;;  %v1984_v23 = vshrl.u32 %v12403_v45, 16  ;;  %v1987_v37 = vshll.u32 %v12403_v45, 16  ;;  %v12431_v11 = vpack.c.b16 %v12327_v61, %v12327_v61 }
 0x321   :  { %v3114_v44 = vadd.f32 %v3113_v30, %v2985_v20  ;;  %3023 = vmatmul.bf16.gmra.mxu1 %v2541_v33  ;;  %v14873_v18 = vrot.slane %v12377_v6, 2  ;;  %v14874_v13 = vrot.slane %v12278_v7, 2  ;;  %v2040_v19 = vrot.slane %v12403_v45, 2  ;;  %v12447_v33 = vpop.f32.mrf.mxu3 }
 0x322   :  { %v2093_v36 = vpack.c.b16 %v2091_v9, %v2091_v9  ;;  %v2291_v60 = vsel %vm2191_vm6, %v12332_v14, %v12421_v43  ;;  %v1986_v48 = vrot.slane %v1984_v23, 1  ;;  %v1989_v57 = vrot.slane %v1987_v37, 2 }
 0x323   :  { %v2140_v15 = vsel %vm1992_vm2, %v14874_v13, %v14873_v18  ;;  %v12443_v61 = vadd.f32 %v11844_v58, %v3114_v44  ;;  %2345 = vrot.lane.b32.xlu2 %v2291_v60, %s9663_s26  ;;  %v3115_v30 = vpop.f32.mrf.mxu2  ;;  %v1715_v34 = vrot.slane %v12335_v63, 1  ;;  %v1591_v46 = vrot.slane %v12278_v7, 1 }
 0x324   :  { %2187 = vrot.lane.b32.xlu1 %v2140_v15, %s9661_s24  ;;  %v1990_v9 = vor.u32 %v1989_v57, %v1986_v48  ;;  %v2617_v14 = vsel %vm2399_vm5, %v11730_v5, %v2073_v17  ;;  %v12454_v23 = vpop.permute.xlu2 %1751  ;;  %v14875_v37 = vrot.slane %v12335_v63, 2  ;;  %v1493_v18 = vshll.u32 %v12431_v11, 16 }
 0x325   :  { %v2174_v58 = vpop.permute.xlu1 %2173  ;;  %v2293_v60 = vshrl.u32 %v2093_v36, 16  ;;  %v2296_v48 = vshll.u32 %v2093_v36, 16 }
 0x326   :  { %v2041_v44 = vsel %vm1992_vm2, %v14875_v37, %v2040_v19  ;;  %v2673_v13 = vsel %vm2448_vm8, %v2617_v14, %v2174_v58  ;;  %v2986_v15 = vpop.f32.mrf.mxu1  ;;  %v12463_v5 = vsel %vm1767_vm3, %v1981_v59, %v1990_v9  ;;  %v2397_v37 = vrot.slane %v2093_v36, 3 }
 0x327   :  { %2088 = vrot.lane.b32.xlu0 %v2041_v44, %s9662_s25  ;;  %v2987_v17 = vadd.f32 %v11822_v21, %v2986_v15  ;;  %v2736_v57 = vsel %vm2497_vm9, %v2673_v13, %v12308_v55  ;;  %v1495_v0 = vrot.slane %v1493_v18, 1  ;;  %v14876_v14 = vrot.slane %v12236_v41, 1 }
 0x328   :  { %3157 = vmatmul.bf16.gmra.mxu2 %v2736_v57  ;;  %v2075_v20 = vpop.permute.xlu0 %2074  ;;  %v14877_v59 = vrot.slane %v12182_v10, 1  ;;  %v2295_v9 = vrot.slane %v2293_v60, 2  ;;  %v2298_v44 = vrot.slane %v2296_v48, 3  ;;  %v14878_v41 = vshrl.u32 %v12278_v7, 16 }
 0x329   :  { %v3116_v19 = vadd.f32 %v3115_v30, %v2987_v17  ;;  %v1716_v58 = vsel %vm1545_vm1, %v14876_v14, %v1715_v34  ;;  %v2431_v13 = vsel %vm2399_vm5, %v11535_v29, %v1528_v47  ;;  %v14879_v48 = vrot.slane %v12377_v6, 3 }
 0x32a   :  { %v1592_v21 = vsel %vm1545_vm1, %v14877_v59, %v1591_v46  ;;  %v1491_v18 = vor.u32 %v14878_v41, %v12368_v12  ;;  %v2299_v29 = vor.u32 %v2298_v44, %v2295_v9  ;;  %v2141_v47 = vrot.slane %v2093_v36, 2  ;;  %v12501_v12 = vld [vmem:[%s14666_s4] ss:$0 sm:$0xff] }
 0x32b   :  { %v12479_v55 = vadd.f32 %v11891_v49, %v3116_v19  ;;  %1763 = vrot.lane.b32.xlu2 %v1716_v58, %s9663_s26  ;;  %v3118_v30 = vpop.f32.mrf.mxu2  ;;  %v2398_v49 = vsel %vm2349_vm4, %v14879_v48, %v2397_v37  ;;  %v12493_v19 = vpop.f32.mrf.mxu3  ;;  %v1717_v48 = vrot.slane %v12403_v45, 1 }
 0x32c   :  { %1639 = vrot.lane.b32.xlu1 %v1592_v21, %s9661_s24  ;;  %v1496_v57 = vsel %vm1300_vm7, %v1491_v18, %v1495_v0  ;;  %v2300_v41 = vsel %vm2191_vm6, %v12421_v43, %v2299_v29  ;;  %v14880_v18 = vrot.slane %v12377_v6, 2 }
 0x32d   :  { %v3345_v15 = vmax.f32 %v12479_v55, 0.0  ;;  %v2336_v17 = vpop.permute.xlu2 %2335  ;;  %v1626_v60 = vpop.permute.xlu1 %1625 }
 0x32e   :  { %v2480_v14 = vsel %vm2448_vm8, %v2431_v13, %v1626_v60  ;;  %v2989_v58 = vpop.f32.mrf.mxu1  ;;  %v2142_v36 = vsel %vm1992_vm2, %v14880_v18, %v2141_v47 }
 0x32f   :  { %8172 = vmatmul.msk.bf16.gmra.mxu3 %vm2399_vm5, %v2398_v49  ;;  %1543 = vrot.lane.b32.xlu0 %v1496_v57, %s9662_s25  ;;  %v2990_v37 = vadd.f32 %v12501_v12, %v2989_v58  ;;  %v2544_v0 = vsel %vm2497_vm9, %v2480_v14, %v12352_v53  ;;  %v2620_v53 = vsel %vm2399_vm5, %v11816_v62, %v2075_v20 }
 0x330   :  { %v1530_v59 = vpop.permute.xlu0 %1529  ;;  %v1718_v62 = vsel %vm1545_vm1, %v1715_v34, %v1717_v48 }
 0x331   :  { %v3119_v21 = vadd.f32 %v3118_v30, %v2990_v37  ;;  %3028 = vmatmul.bf16.gmra.mxu1 %v2544_v0 }
 0x333   :  { %v12512_v9 = vadd.f32 %v11961_v35, %v3119_v21  ;;  %2347 = vrot.lane.b32.xlu2 %v2300_v41, %s9663_s26  ;;  %v3120_v44 = vpop.f32.mrf.mxu2  ;;  %v1593_v35 = vrot.slane %v12431_v11, 1 }
 0x334   :  { %2189 = vrot.lane.b32.xlu1 %v2142_v36, %s9661_s24 }
 0x335   :  { %v3346_v30 = vmax.f32 %v12512_v9, 0.0  ;;  %v2176_v13 = vpop.permute.xlu1 %2175  ;;  %v1754_v60 = vpop.permute.xlu2 %1753  ;;  %v1594_v20 = vsel %vm1545_vm1, %v1591_v46, %v1593_v35 }
 0x336   :  { %v2675_v43 = vsel %vm2448_vm8, %v2620_v53, %v2176_v13  ;;  %v2991_v6 = vpop.f32.mrf.mxu1 }
 0x337   :  { %v2992_v49 = vadd.f32 %v12501_v12, %v2991_v6  ;;  %v2739_v57 = vsel %vm2497_vm9, %v2675_v43, %v12408_v26  ;;  %v2433_v26 = vsel %vm2399_vm5, %v11625_v1, %v1530_v59 }
 0x338   :  { %3162 = vmatmul.bf16.gmra.mxu2 %v2739_v57  ;;  %v2077_v14 = vpop.permute.xlu0 %2076 }
 0x339   :  { %v3121_v58 = vadd.f32 %v3120_v44, %v2992_v49  ;;  %v2623_v1 = vsel %vm2399_vm5, %v11917_v3, %v2077_v14 }
 0x33b   :  { %v12532_v45 = vadd.f32 %v12027_v50, %v3121_v58  ;;  %1765 = vrot.lane.b32.xlu2 %v1718_v62, %s9663_s26  ;;  %v3123_v11 = vpop.f32.mrf.mxu2 }
 0x33c   :  { %1641 = vrot.lane.b32.xlu1 %v1594_v20, %s9661_s24 }
 0x33d   :  { %v1628_v63 = vpop.permute.xlu1 %1627  ;;  %v2338_v46 = vpop.permute.xlu2 %2337 }
 0x33e   :  { %v2482_v34 = vsel %vm2448_vm8, %v2433_v26, %v1628_v63  ;;  %v2994_v47 = vpop.f32.mrf.mxu1  ;;  %v12561_v26 = vpop.f32.mrf.mxu3 }
 0x33f   :  { %v2995_v37 = vadd.f32 %v12501_v12, %v2994_v47  ;;  %v2547_v50 = vsel %vm2497_vm9, %v2482_v34, %v12454_v23 }
 0x341   :  { %v1532_v0 = vpop.permute.xlu0 %1531  ;;  %v3124_v21 = vadd.f32 %v3123_v11, %v2995_v37  ;;  %3033 = vmatmul.bf16.gmra.mxu1 %v2547_v50 }
 0x342   :  { %v2435_v3 = vsel %vm2399_vm5, %v11710_v42, %v1532_v0 }
 0x343   :  { %v12544_v41 = vadd.f32 %v12079_v40, %v3124_v21  ;;  %v3125_v18 = vpop.f32.mrf.mxu2 }
 0x345   :  { %v2178_v36 = vpop.permute.xlu1 %2177  ;;  %v1756_v48 = vpop.permute.xlu2 %1755 }
 0x346   :  { %v2677_v44 = vsel %vm2448_vm8, %v2623_v1, %v2178_v36  ;;  %v2996_v53 = vpop.f32.mrf.mxu1 }
 0x347   :  { %v2997_v13 = vadd.f32 %v12501_v12, %v2996_v53  ;;  %v2742_v23 = vsel %vm2497_vm9, %v2677_v44, %v2336_v17  ;;  %v12575_v44 = vpop.f32.mrf.mxu3 }
 0x348   :  { %3167 = vmatmul.bf16.gmra.mxu2 %v2742_v23 }
 0x349   :  { %v2079_v43 = vpop.permute.xlu0 %2078  ;;  %v3126_v6 = vadd.f32 %v3125_v18, %v2997_v13 }
 0x34a   :  { %v2626_v34 = vsel %vm2399_vm5, %v12011_v2, %v2079_v43 }
 0x34b   :  { %v12553_v40 = vadd.f32 %v12140_v54, %v3126_v6  ;;  %v3128_v35 = vpop.f32.mrf.mxu2 }
 0x34d   :  { %v1630_v57 = vpop.permute.xlu1 %1629  ;;  %v2340_v42 = vpop.permute.xlu2 %2339 }
 0x34e   :  { %v2484_v14 = vsel %vm2448_vm8, %v2435_v3, %v1630_v57  ;;  %v2999_v58 = vpop.f32.mrf.mxu1 }
 0x34f   :  { %v3000_v62 = vadd.f32 %v12501_v12, %v2999_v58  ;;  %v2550_v17 = vsel %vm2497_vm9, %v2484_v14, %v1754_v60 }
 0x351   :  { %v1534_v20 = vpop.permute.xlu0 %1533  ;;  %v3129_v11 = vadd.f32 %v3128_v35, %v3000_v62  ;;  %3038 = vmatmul.bf16.gmra.mxu1 %v2550_v17 }
 0x352   :  { %v2437_v2 = vsel %vm2399_vm5, %v11796_v25, %v1534_v20 }
 0x353   :  { %v12564_v54 = vadd.f32 %v12203_v24, %v3129_v11  ;;  %v3130_v63 = vpop.f32.mrf.mxu2  ;;  %v12590_v11 = vpop.f32.mrf.mxu3 }
 0x355   :  { %v2180_v37 = vpop.permute.xlu1 %2179  ;;  %v1758_v23 = vpop.permute.xlu2 %1757 }
 0x356   :  { %v2679_v50 = vsel %vm2448_vm8, %v2626_v34, %v2180_v37  ;;  %v3001_v0 = vpop.f32.mrf.mxu1 }
 0x357   :  { %v3002_v60 = vadd.f32 %v12501_v12, %v3001_v0  ;;  %v2745_v21 = vsel %vm2497_vm9, %v2679_v50, %v2338_v46 }
 0x358   :  { %3172 = vmatmul.bf16.gmra.mxu2 %v2745_v21 }
 0x359   :  { %v2081_v18 = vpop.permute.xlu0 %2080  ;;  %v3131_v1 = vadd.f32 %v3130_v63, %v3002_v60 }
 0x35a   :  { %v2629_v25 = vsel %vm2399_vm5, %v12107_v56, %v2081_v18 }
 0x35b   :  { %v12573_v24 = vadd.f32 %v12258_v27, %v3131_v1  ;;  %v3133_v36 = vpop.f32.mrf.mxu2 }
 0x35d   :  { %v1632_v13 = vpop.permute.xlu1 %1631  ;;  %v2342_v34 = vpop.permute.xlu2 %2341 }
 0x35e   :  { %v2486_v43 = vsel %vm2448_vm8, %v2437_v2, %v1632_v13  ;;  %v3004_v6 = vpop.f32.mrf.mxu1  ;;  %v12603_v13 = vpop.f32.mrf.mxu3 }
 0x35f   :  { %v3005_v46 = vadd.f32 %v12501_v12, %v3004_v6  ;;  %v2553_v35 = vsel %vm2497_vm9, %v2486_v43, %v1756_v48 }
 0x361   :  { %v1536_v3 = vpop.permute.xlu0 %1535  ;;  %v3134_v27 = vadd.f32 %v3133_v36, %v3005_v46  ;;  %3043 = vmatmul.bf16.gmra.mxu1 %v2553_v35  ;;  %v14885_v35 = vld [vmem:[#allocation13_spill] sm:$0xff] }
 0x362   :  { %v2439_v0 = vsel %vm2399_vm5, %v11893_v16, %v1536_v3 }
 0x363   :  { %v12584_v57 = vadd.f32 %v12325_v38, %v3134_v27  ;;  %v3135_v14 = vpop.f32.mrf.mxu2 }
 0x365   :  { %v2182_v62 = vpop.permute.xlu1 %2181 }
 0x366   :  { %v2681_v17 = vsel %vm2448_vm8, %v2629_v25, %v2182_v62  ;;  %v3006_v20 = vpop.f32.mrf.mxu1 }
 0x367   :  { %v3007_v48 = vadd.f32 %v12501_v12, %v3006_v20  ;;  %v2748_v63 = vsel %vm2497_vm9, %v2681_v17, %v2340_v42  ;;  %v12614_v20 = vpop.f32.mrf.mxu3 }
 0x368   :  { %3177 = vmatmul.bf16.gmra.mxu2 %v2748_v63 }
 0x369   :  { %v2083_v38 = vpop.permute.xlu0 %2082  ;;  %v3136_v37 = vadd.f32 %v3135_v14, %v3007_v48 }
 0x36a   :  { %v2632_v46 = vsel %vm2399_vm5, %v12201_v51, %v2083_v38 }
 0x36b   :  { %v12595_v50 = vadd.f32 %v12380_v28, %v3136_v37  ;;  %v3138_v56 = vpop.f32.mrf.mxu2  ;;  %v1760_v28 = vpop.permute.xlu2 %1759 }
 0x36d   :  { %v1634_v21 = vpop.permute.xlu1 %1633 }
 0x36e   :  { %v2488_v18 = vsel %vm2448_vm8, %v2439_v0, %v1634_v21  ;;  %v3009_v1 = vpop.f32.mrf.mxu1 }
 0x36f   :  { %v3010_v36 = vadd.f32 %v12501_v12, %v3009_v1  ;;  %v2556_v42 = vsel %vm2497_vm9, %v2488_v18, %v1758_v23 }
 0x371   :  { %v1538_v2 = vpop.permute.xlu0 %1537  ;;  %v3139_v43 = vadd.f32 %v3138_v56, %v3010_v36  ;;  %3048 = vmatmul.bf16.gmra.mxu1 %v2556_v42  ;;  %v12631_v42 = vpop.f32.mrf.mxu3 }
 0x372   :  { %v2441_v63 = vsel %vm2399_vm5, %v11992_v52, %v1538_v2  ;;  %v9325_v52 = vld [vmem:[%s14662_s0 + $0xd0] sm:$0xff] }
 0x373   :  { %v12606_v6 = vadd.f32 %v12447_v33, %v3139_v43  ;;  %v3140_v16 = vpop.f32.mrf.mxu2  ;;  %v2344_v51 = vpop.permute.xlu2 %2343  ;;  %8075 = vmatmul.msk.bf16.gmra.mxu0 %vm809_vm0, %v9325_v52 }
 0x375   :  { %v2184_v3 = vpop.permute.xlu1 %2183 }
 0x376   :  { %v2683_v27 = vsel %vm2448_vm8, %v2632_v46, %v2184_v3  ;;  %v3011_v14 = vpop.f32.mrf.mxu1 }
 0x377   :  { %v3012_v23 = vadd.f32 %v12501_v12, %v3011_v14  ;;  %v2751_v25 = vsel %vm2497_vm9, %v2683_v27, %v2342_v34 }
 0x378   :  { %3182 = vmatmul.bf16.gmra.mxu2 %v2751_v25 }
 0x379   :  { %v2085_v62 = vpop.permute.xlu0 %2084  ;;  %v3141_v17 = vadd.f32 %v3140_v16, %v3012_v23 }
 0x37a   :  { %v2635_v2 = vsel %vm2399_vm5, %v12297_v8, %v2085_v62 }
 0x37b   :  { %v12617_v33 = vadd.f32 %v12493_v19, %v3141_v17  ;;  %v3143_v48 = vpop.f32.mrf.mxu2 }
 0x37d   :  { %v1636_v37 = vpop.permute.xlu1 %1635 }
 0x37e   :  { %v2490_v56 = vsel %vm2448_vm8, %v2441_v63, %v1636_v37  ;;  %v3014_v0 = vpop.f32.mrf.mxu1 }
 0x37f   :  { %v3015_v34 = vadd.f32 %v12501_v12, %v3014_v0  ;;  %v2559_v21 = vsel %vm2497_vm9, %v2490_v56, %v1760_v28  ;;  %v1762_v28 = vpop.permute.xlu2 %1761  ;;  %v3287_v56 = vpop.f32.mrf.mxu3 }
 0x381   :  { %v3144_v18 = vadd.f32 %v3143_v48, %v3015_v34  ;;  %3053 = vmatmul.bf16.gmra.mxu1 %v2559_v21  ;;  %v1540_v1 = vpop.permute.xlu0 %1539 }
 0x382   :  { %v2443_v62 = vsel %vm2399_vm5, %v12088_v4, %v1540_v1  ;;  %v9326_v4 = vld [vmem:[%s14662_s0 + $0xd8] sm:$0xff] }
 0x383   :  { %v12626_v19 = vadd.f32 %v12561_v26, %v3144_v18  ;;  %v3145_v36 = vpop.f32.mrf.mxu2  ;;  %8076 = vmatmul.msk.bf16.gmra.mxu0 %vm809_vm0, %v9326_v4 }
 0x385   :  { %v2186_v16 = vpop.permute.xlu1 %2185 }
 0x386   :  { %v2685_v46 = vsel %vm2448_vm8, %v2635_v2, %v2186_v16  ;;  %v3016_v3 = vpop.f32.mrf.mxu1 }
 0x387   :  { %v3017_v26 = vadd.f32 %v12501_v12, %v3016_v3  ;;  %v2754_v27 = vsel %vm2497_vm9, %v2685_v46, %v2344_v51  ;;  %v2346_v34 = vpop.permute.xlu2 %2345  ;;  %v3289_v3 = vpop.f32.mrf.mxu3 }
 0x388   :  { %3187 = vmatmul.bf16.gmra.mxu2 %v2754_v27 }
 0x389   :  { %v3146_v14 = vadd.f32 %v3145_v36, %v3017_v26  ;;  %v2087_v8 = vpop.permute.xlu0 %2086 }
 0x38a   :  { %v2638_v1 = vsel %vm2399_vm5, %v12425_v31, %v2087_v8 }
 0x38b   :  { %v12641_v23 = vadd.f32 %v12575_v44, %v3146_v14  ;;  %v3148_v25 = vpop.f32.mrf.mxu2 }
 0x38e   :  { %v1638_v48 = vpop.permute.xlu1 %1637  ;;  %v3019_v37 = vpop.f32.mrf.mxu1 }
 0x38f   :  { %v2492_v63 = vsel %vm2448_vm8, %v2443_v62, %v1638_v48  ;;  %v3020_v0 = vadd.f32 %v12501_v12, %v3019_v37  ;;  %v1764_v27 = vpop.permute.xlu2 %1763 }
 0x390   :  { %v2562_v51 = vsel %vm2497_vm9, %v2492_v63, %v1762_v28 }
 0x391   :  { %v3149_v21 = vadd.f32 %v3148_v25, %v3020_v0  ;;  %3058 = vmatmul.bf16.gmra.mxu1 %v2562_v51  ;;  %v1542_v2 = vpop.permute.xlu0 %1541 }
 0x392   :  { %v2445_v25 = vsel %vm2399_vm5, %v12182_v10, %v1542_v2 }
 0x393   :  { %v12650_v44 = vadd.f32 %v12590_v11, %v3149_v21  ;;  %v3150_v18 = vpop.f32.mrf.mxu2  ;;  %v3292_v21 = vpop.f32.mrf.mxu3 }
 0x396   :  { %v2188_v52 = vpop.permute.xlu1 %2187  ;;  %v3021_v28 = vpop.f32.mrf.mxu1 }
 0x397   :  { %v2687_v16 = vsel %vm2448_vm8, %v2638_v1, %v2188_v52  ;;  %v3022_v11 = vadd.f32 %v12501_v12, %v3021_v28  ;;  %v2348_v4 = vpop.permute.xlu2 %2347 }
 0x398   :  { %v2757_v46 = vsel %vm2497_vm9, %v2687_v16, %v2346_v34 }
 0x399   :  { %3192 = vmatmul.bf16.gmra.mxu2 %v2757_v46  ;;  %v3151_v26 = vadd.f32 %v3150_v18, %v3022_v11  ;;  %v2089_v51 = vpop.permute.xlu0 %2088 }
 0x39a   :  { %v2641_v10 = vsel %vm2399_vm5, %v12463_v5, %v2089_v51 }
 0x39b   :  { %v12663_v14 = vadd.f32 %v12603_v13, %v3151_v26  ;;  %v3153_v31 = vpop.f32.mrf.mxu2 }
 0x39e   :  { %v1640_v62 = vpop.permute.xlu1 %1639  ;;  %v3024_v63 = vpop.f32.mrf.mxu1 }
 0x39f   :  { %v2494_v48 = vsel %vm2448_vm8, %v2445_v25, %v1640_v62  ;;  %v3025_v37 = vadd.f32 %v12501_v12, %v3024_v63 }
 0x3a0   :  { %v2565_v0 = vsel %vm2497_vm9, %v2494_v48, %v1764_v27  ;;  %v1766_v48 = vpop.permute.xlu2 %1765 }
 0x3a1   :  { %v3154_v34 = vadd.f32 %v3153_v31, %v3025_v37  ;;  %3063 = vmatmul.bf16.gmra.mxu1 %v2565_v0  ;;  %v1544_v26 = vpop.permute.xlu0 %1543  ;;  %v3294_v31 = vpop.f32.mrf.mxu3 }
 0x3a2   :  { %v2447_v5 = vsel %vm2399_vm5, %v12278_v7, %v1544_v26 }
 0x3a3   :  { %v12672_v13 = vadd.f32 %v12614_v20, %v3154_v34  ;;  %v3155_v18 = vpop.f32.mrf.mxu2 }
 0x3a6   :  { %v2190_v52 = vpop.permute.xlu1 %2189  ;;  %v3026_v16 = vpop.f32.mrf.mxu1 }
 0x3a7   :  { %v2689_v2 = vsel %vm2448_vm8, %v2641_v10, %v2190_v52  ;;  %v3027_v28 = vadd.f32 %v12501_v12, %v3026_v16 }
 0x3a8   :  { %v2760_v11 = vsel %vm2497_vm9, %v2689_v2, %v2348_v4 }
 0x3a9   :  { %3197 = vmatmul.bf16.gmra.mxu2 %v2760_v11  ;;  %v3156_v46 = vadd.f32 %v3155_v18, %v3027_v28  ;;  %v3297_v52 = vpop.f32.mrf.mxu3 }
 0x3ab   :  { %v12681_v20 = vadd.f32 %v12631_v42, %v3156_v46  ;;  %v3158_v27 = vpop.f32.mrf.mxu2 }
 0x3ae   :  { %v1642_v62 = vpop.permute.xlu1 %1641  ;;  %v3029_v37 = vpop.f32.mrf.mxu1 }
 0x3af   :  { %v2496_v63 = vsel %vm2448_vm8, %v2447_v5, %v1642_v62  ;;  %v3030_v0 = vadd.f32 %v12501_v12, %v3029_v37 }
 0x3b0   :  { %v2568_v51 = vsel %vm2497_vm9, %v2496_v63, %v1766_v48 }
 0x3b1   :  { %v3159_v34 = vadd.f32 %v3158_v27, %v3030_v0  ;;  %3068 = vmatmul.bf16.gmra.mxu1 %v2568_v51  ;;  %v3299_v5 = vpop.f32.mrf.mxu3 }
 0x3b3   :  { %v12689_v42 = vadd.f32 %v3287_v56, %v3159_v34  ;;  %v3160_v18 = vpop.f32.mrf.mxu2 }
 0x3b6   :  { %v3031_v10 = vpop.f32.mrf.mxu1 }
 0x3b7   :  { %v3032_v7 = vadd.f32 %v12501_v12, %v3031_v10 }
 0x3b9   :  { %v3161_v2 = vadd.f32 %v3160_v18, %v3032_v7  ;;  %v3302_v34 = vpop.f32.mrf.mxu3 }
 0x3bb   :  { %v12693_v16 = vadd.f32 %v3289_v3, %v3161_v2  ;;  %v3163_v28 = vpop.f32.mrf.mxu2 }
 0x3be   :  { %v3034_v46 = vpop.f32.mrf.mxu1 }
 0x3bf   :  { %v3035_v26 = vadd.f32 %v12501_v12, %v3034_v46 }
 0x3c1   :  { %v3164_v27 = vadd.f32 %v3163_v28, %v3035_v26  ;;  %v3304_v26 = vpop.f32.mrf.mxu3 }
 0x3c3   :  { %v12697_v56 = vadd.f32 %v3292_v21, %v3164_v27  ;;  %v3165_v62 = vpop.f32.mrf.mxu2 }
 0x3c6   :  { %v3036_v63 = vpop.f32.mrf.mxu1 }
 0x3c7   :  { %v3037_v37 = vadd.f32 %v12501_v12, %v3036_v63 }
 0x3c9   :  { %v3166_v0 = vadd.f32 %v3165_v62, %v3037_v37 }
 0x3cb   :  { %v12701_v51 = vadd.f32 %v3294_v31, %v3166_v0  ;;  %v3168_v3 = vpop.f32.mrf.mxu2 }
 0x3ce   :  { %v3039_v10 = vpop.f32.mrf.mxu1 }
 0x3cf   :  { %v3040_v7 = vadd.f32 %v12501_v12, %v3039_v10  ;;  %v3307_v10 = vpop.f32.mrf.mxu3 }
 0x3d1   :  { %v3169_v2 = vadd.f32 %v3168_v3, %v3040_v7 }
 0x3d3   :  { %v12705_v28 = vadd.f32 %v3297_v52, %v3169_v2  ;;  %v3170_v21 = vpop.f32.mrf.mxu2 }
 0x3d6   :  { %v3041_v27 = vpop.f32.mrf.mxu1 }
 0x3d7   :  { %v3042_v63 = vadd.f32 %v12501_v12, %v3041_v27 }
 0x3d9   :  { %v3171_v62 = vadd.f32 %v3170_v21, %v3042_v63  ;;  %v3309_v21 = vpop.f32.mrf.mxu3 }
 0x3db   :  { %v12709_v31 = vadd.f32 %v3299_v5, %v3171_v62  ;;  %v3173_v37 = vpop.f32.mrf.mxu2 }
 0x3de   :  { %v3044_v18 = vpop.f32.mrf.mxu1 }
 0x3df   :  { %v3045_v48 = vadd.f32 %v12501_v12, %v3044_v18 }
 0x3e1   :  { %v3174_v3 = vadd.f32 %v3173_v37, %v3045_v48  ;;  %v3312_v37 = vpop.f32.mrf.mxu3 }
 0x3e3   :  { %v12713_v52 = vadd.f32 %v3302_v34, %v3174_v3  ;;  %v3175_v7 = vpop.f32.mrf.mxu2 }
 0x3e6   :  { %v3046_v46 = vpop.f32.mrf.mxu1 }
 0x3e7   :  { %v3047_v11 = vadd.f32 %v12501_v12, %v3046_v46 }
 0x3e9   :  { %v3176_v27 = vadd.f32 %v3175_v7, %v3047_v11  ;;  %v3314_v62 = vpop.f32.mrf.mxu3 }
 0x3eb   :  { %v12717_v5 = vadd.f32 %v3304_v26, %v3176_v27  ;;  %v3178_v63 = vpop.f32.mrf.mxu2 }
 0x3ee   :  { %v3049_v0 = vpop.f32.mrf.mxu1 }
 0x3ef   :  { %v3050_v18 = vadd.f32 %v12501_v12, %v3049_v0 }
 0x3f1   :  { %v3179_v4 = vadd.f32 %v3178_v63, %v3050_v18  ;;  %v1032_v18 = vpop.f32.mrf.mxu0 }
 0x3f3   :  { %v12721_v48 = vadd.f32 %v3307_v10, %v3179_v4  ;;  %v3180_v34 = vpop.f32.mrf.mxu2 }
 0x3f6   :  { %v3051_v2 = vpop.f32.mrf.mxu1 }
 0x3f7   :  { %v3052_v46 = vadd.f32 %v12501_v12, %v3051_v2 }
 0x3f9   :  { %v3181_v11 = vadd.f32 %v3180_v34, %v3052_v46  ;;  %v3317_v34 = vpop.f32.mrf.mxu3  ;;  %v1033_v27 = vpop.f32.mrf.mxu0 }
 0x3fb   :  { %v12725_v7 = vadd.f32 %v3309_v21, %v3181_v11  ;;  %v3183_v26 = vpop.f32.mrf.mxu2 }
 0x3fe   :  { %v3054_v25 = vpop.f32.mrf.mxu1 }
 0x3ff   :  { %v3055_v0 = vadd.f32 %v12501_v12, %v3054_v25 }
 0x401   :  { %v3184_v63 = vadd.f32 %v3183_v26, %v3055_v0  ;;  %v3319_v26 = vpop.f32.mrf.mxu3  ;;  %v1035_v18 = vpop.f32.mrf.mxu0 }
 0x403   :  { %v12729_v4 = vadd.f32 %v3312_v37, %v3184_v63  ;;  %v3185_v10 = vpop.f32.mrf.mxu2 }
 0x406   :  { %v3056_v1 = vpop.f32.mrf.mxu1 }
 0x407   :  { %v3057_v2 = vadd.f32 %v12501_v12, %v3056_v1 }
 0x409   :  { %v3186_v21 = vadd.f32 %v3185_v10, %v3057_v2  ;;  %v3322_v8 = vpop.f32.mrf.mxu3 }
 0x40b   :  { %v12733_v46 = vadd.f32 %v3314_v62, %v3186_v21  ;;  %v3188_v11 = vpop.f32.mrf.mxu2  ;;  %v1036_v21 = vpop.f32.mrf.mxu0 }
 0x40e   :  { %v3059_v36 = vpop.f32.mrf.mxu1 }
 0x40f   :  { %v3060_v25 = vadd.f32 %v12501_v12, %v3059_v36 }
 0x411   :  { %v3189_v37 = vadd.f32 %v3188_v11, %v3060_v25  ;;  %v3324_v3 = vpop.f32.mrf.mxu3 }
 0x413   :  { %v12737_v0 = vadd.f32 %v3317_v34, %v3189_v37  ;;  %v3190_v63 = vpop.f32.mrf.mxu2 }
 0x416   :  { %v3061_v1 = vpop.f32.mrf.mxu1 }
 0x417   :  { %v3062_v10 = vadd.f32 %v12501_v12, %v3061_v1 }
 0x419   :  { %v3191_v62 = vadd.f32 %v3190_v63, %v3062_v10 }
 0x41b   :  { %v12741_v2 = vadd.f32 %v3319_v26, %v3191_v62 }
 0x41c   :  { %v3193_v27 = vpop.f32.mrf.mxu2 }
 0x41e   :  { %v3064_v36 = vpop.f32.mrf.mxu1 }
 0x41f   :  { %v3065_v11 = vadd.f32 %v12501_v12, %v3064_v36  ;;  %v3327_v36 = vpop.f32.mrf.mxu3 }
 0x421   :  { %v3194_v34 = vadd.f32 %v3193_v27, %v3065_v11 }
 0x423   :  { %v12745_v25 = vadd.f32 %v3322_v8, %v3194_v34 }
 0x424   :  { %v3195_v37 = vpop.f32.mrf.mxu2 }
 0x426   :  { %v3066_v43 = vpop.f32.mrf.mxu1 }
 0x427   :  { %v3067_v63 = vadd.f32 %v12501_v12, %v3066_v43 }
 0x429   :  { %v3196_v26 = vadd.f32 %v3195_v37, %v3067_v63  ;;  %v3329_v37 = vpop.f32.mrf.mxu3 }
 0x42b   :  { %v12749_v1 = vadd.f32 %v3324_v3, %v3196_v26  ;;  %v14883_v26 = vld [vmem:[#allocation12_spill] sm:$0xff] }
 0x42c   :  { %v3198_v62 = vpop.f32.mrf.mxu2  ;;  %v14884_v10 = vmax.f32 %v14883_v26, 0.0 }
 0x42e   :  { %v3069_v21 = vpop.f32.mrf.mxu1 }
 0x42f   :  { %v3070_v17 = vadd.f32 %v12501_v12, %v3069_v21  ;;  %v3457_v21 = vpack.c.bf16 %v14884_v10, %v14884_v10 }
 0x431   :  { %v3199_v27 = vadd.f32 %v3198_v62, %v3070_v17  ;;  %v14886_v17 = vmax.f32 %v14885_v35, 0.0 }
 0x433   :  { %v12753_v8 = vadd.f32 %v3327_v36, %v3199_v27  ;;  %v12766_v62 = vpack.c.bf16 %v14886_v17, %v14886_v17  ;;  %v14887_v36 = vld [vmem:[#allocation14_spill] sm:$0xff] }
 0x434   :  { %v3200_v38 = vpop.f32.mrf.mxu2  ;;  %v14888_v27 = vmax.f32 %v14887_v36, 0.0 }
 0x435   :  { %14881 = vst [vmem:[#allocation21_spill] sm:$0xff] %v12753_v8 }
 0x436   :  { %v3071_v34 = vpop.f32.mrf.mxu1 }
 0x437   :  { %v3072_v18 = vadd.f32 %v12501_v12, %v3071_v34  ;;  %v12771_v12 = vpack.c.bf16 %v14888_v27, %v14888_v27 }
 0x439   :  { %v3201_v43 = vadd.f32 %v3200_v38, %v3072_v18  ;;  %v14889_v38 = vmax.f32 %v12014_v22, 0.0 }
 0x43b   :  { %v12757_v3 = vadd.f32 %v3329_v37, %v3201_v43  ;;  %v12776_v18 = vpack.c.bf16 %v14889_v38, %v14889_v38 }
 0x43d   :  { %14882 = vst [vmem:[#allocation22_spill] sm:$0xff] %v12757_v3 }
 0x43e   :  { %9655 = dma.done.wait [#allocation4], 4608 }
 0x43f   :  { %9656 = vsyncadd [#allocation4], 4294962688  ;;  %v14890_v34 = vld [vmem:[#allocation15_spill] sm:$0xff]  ;;  %v14892_v35 = vld [vmem:[#allocation16_spill] sm:$0xff]  ;;  %v3550_v11 = vunpack.c.l.b16 %v3457_v21  ;;  %v14901_v47 = vmax.f32 %v12300_v39, 0.0  ;;  %v12845_v39 = vpack.c.bf16 %v3345_v15, %v3345_v15  ;;  %vm5915_vm10 = vcmask 1041408  }
 0x440   :  { %v14891_v43 = vmax.f32 %v14890_v34, 0.0  ;;  %v14893_v37 = vmax.f32 %v14892_v35, 0.0  ;;  %v14894_v17 = vld [vmem:[#allocation17_spill] sm:$0xff]  ;;  %v14896_v22 = vld [vmem:[#allocation18_spill] sm:$0xff]  ;;  %v14728_v34 = vunpack.c.l.b16 %v12766_v62  ;;  %v14722_v35 = vunpack.c.l.b16 %v12776_v18 }
 0x441   :  { %v14895_v36 = vmax.f32 %v14894_v17, 0.0  ;;  %v14897_v38 = vmax.f32 %v14896_v22, 0.0  ;;  %v12823_v49 = vpack.c.bf16 %v14901_v47, %v14901_v47 }
 0x442   :  { %v12781_v10 = vpack.c.bf16 %v14891_v43, %v14891_v43  ;;  %v12786_v26 = vpack.c.bf16 %v14893_v37, %v14893_v37  ;;  %v14725_v43 = vunpack.c.l.b16 %v12771_v12  ;;  %v12807_v22 = vpack.c.b16 %v14728_v34, %v3550_v11 }
 0x443   :  { %v12791_v27 = vpack.c.bf16 %v14895_v36, %v14895_v36  ;;  %v12796_v63 = vpack.c.bf16 %v14897_v38, %v14897_v38  ;;  %v14899_v38 = vld [vmem:[#allocation19_spill] sm:$0xff]  ;;  %14902 = vst [vmem:[#allocation13_spill] sm:$0xff] %v12823_v49 }
 0x444   :  { %v14724_v37 = vunpack.c.l.b16 %v12781_v10  ;;  %v14723_v60 = vunpack.c.l.b16 %v12786_v26  ;;  %14898 = vst [vmem:[#allocation12_spill] sm:$0xff] %v12807_v22  ;;  %v12813_v21 = vpack.c.b16 %v14722_v35, %v14725_v43  ;;  %v14900_v58 = vmax.f32 %v14899_v38, 0.0 }
 0x445   :  { %v14727_v17 = vunpack.c.l.b16 %v12791_v27  ;;  %v14726_v36 = vunpack.c.l.b16 %v12796_v63  ;;  %v3622_v47 = vshrl.u32 %v12807_v22, 16 }
 0x446   :  { %v12818_v53 = vpack.c.bf16 %v14900_v58, %v14900_v58  ;;  %v12829_v11 = vpack.c.b16 %v14723_v60, %v14724_v37  ;;  %v14903_v58 = vmax.f32 %v12443_v61, 0.0  ;;  %v3624_v60 = vshll.u32 %v12807_v22, 16 }
 0x447   :  { %v12835_v35 = vpack.c.b16 %v14726_v36, %v14727_v17  ;;  %v14729_v37 = vshll.u32 %v12813_v21, 16  ;;  %v12866_v61 = vpack.c.bf16 %v3346_v30, %v3346_v30  ;;  %v14907_v34 = vshrl.u32 %v12813_v21, 16 }
 0x448   :  { %v12840_v38 = vpack.c.bf16 %v14903_v58, %v14903_v58  ;;  %v14731_v36 = vshll.u32 %v12829_v11, 16  ;;  %v3626_v55 = vrot.slane %v3624_v60, 1  ;;  %v14905_v60 = vmax.f32 %v12532_v45, 0.0 }
 0x449   :  { %v14733_v58 = vshll.u32 %v12835_v35, 16  ;;  %v3631_v15 = vrot.slane %v14729_v37, 1  ;;  %14904 = vst [vmem:[#allocation14_spill] sm:$0xff] %v12866_v61  ;;  %v14908_v3 = vunpack.c.l.b16 %v12818_v53  ;;  %v14911_v30 = vshrl.u32 %v12829_v11, 16 }
 0x44a   :  { %v3639_v29 = vrot.slane %v14731_v36, 1  ;;  %v12871_v17 = vpack.c.bf16 %v14905_v60, %v14905_v60  ;;  %v3627_v37 = vor.u32 %v3626_v55, %v3622_v47  ;;  %v14909_v36 = vunpack.c.l.b16 %v12823_v49 }
 0x44b   :  { %v3647_v43 = vrot.slane %v14733_v58, 1  ;;  %v3635_v59 = vor.u32 %v14907_v34, %v3631_v15  ;;  %v14740_v9 = vunpack.c.l.b16 %v12840_v38  ;;  %v14912_v45 = vshrl.u32 %v12835_v35, 16 }
 0x44c   :  { %14906 = vst [vmem:[#allocation15_spill] sm:$0xff] %v12871_v17  ;;  %v12879_v8 = vpack.c.b16 %v14909_v36, %v14908_v3  ;;  %v3643_v58 = vor.u32 %v14911_v30, %v3639_v29  ;;  %v14737_v60 = vunpack.c.l.b16 %v12845_v39  ;;  %v14739_v47 = vunpack.c.l.b16 %v12866_v61 }
 0x44d   :  { %v3651_v22 = vor.u32 %v14912_v45, %v3647_v43  ;;  %v3632_v34 = vsel %vm1300_vm7, %v3627_v37, %v3631_v15  ;;  %v3640_v55 = vsel %vm1300_vm7, %v3635_v59, %v3639_v29  ;;  %v14738_v3 = vunpack.c.l.b16 %v12871_v17 }
 0x44e   :  { %14910 = vst [vmem:[#allocation16_spill] sm:$0xff] %v12879_v8  ;;  %v14741_v49 = vshll.u32 %v12879_v8, 16  ;;  %3804 = vrot.lane.b32.xlu0 %v3632_v34, %s9661_s24  ;;  %v3648_v36 = vsel %vm1300_vm7, %v3643_v58, %v3647_v43  ;;  %v12898_v30 = vpack.c.b16 %v14737_v60, %v14740_v9  ;;  %v14914_v45 = vmax.f32 %v12544_v41, 0.0 }
 0x44f   :  { %v14916_v29 = vmax.f32 %v12553_v40, 0.0  ;;  %3808 = vrot.lane.b32.xlu1 %v3648_v36, %s9661_s24  ;;  %v12917_v58 = vpack.c.b16 %v14738_v3, %v14739_v47  ;;  %v14919_v41 = vmax.f32 %v12564_v54, 0.0  ;;  %v14921_v40 = vmax.f32 %v12573_v24, 0.0 }
 0x450   :  { %14913 = vst [vmem:[#allocation17_spill] sm:$0xff] %v12898_v30  ;;  %v12903_v37 = vpack.c.bf16 %v14914_v45, %v14914_v45  ;;  %v3655_v43 = vrot.slane %v14741_v49, 1  ;;  %v14742_v36 = vshll.u32 %v12898_v30, 16  ;;  %v14923_v47 = vmax.f32 %v12584_v57, 0.0  ;;  %v14930_v57 = vld [vmem:[#allocation20_spill] sm:$0xff] }
 0x451   :  { %v12908_v59 = vpack.c.bf16 %v14916_v29, %v14916_v29  ;;  %14918 = vst [vmem:[#allocation23_spill] sm:$0xff] %v12917_v58  ;;  %v12922_v15 = vpack.c.bf16 %v14919_v41, %v14919_v41  ;;  %v12927_v34 = vpack.c.bf16 %v14921_v40, %v14921_v40  ;;  %v14747_v54 = vshll.u32 %v12917_v58, 16 }
 0x452   :  { %14915 = vst [vmem:[#allocation18_spill] sm:$0xff] %v12903_v37  ;;  %v14745_v29 = vunpack.c.l.b16 %v12903_v37  ;;  %v3656_v3 = vsel %vm1300_vm7, %v3651_v22, %v3655_v43  ;;  %v12939_v24 = vpack.c.bf16 %v14923_v47, %v14923_v47  ;;  %v12943_v40 = vrot.slane %v14742_v36, 1 }
 0x453   :  { %14917 = vst [vmem:[#allocation19_spill] sm:$0xff] %v12908_v59  ;;  %v14744_v60 = vunpack.c.l.b16 %v12908_v59  ;;  %v14926_v22 = vmax.f32 %v12595_v50, 0.0  ;;  %v3679_v47 = vrot.slane %v14747_v54, 1  ;;  %v14928_v45 = vmax.f32 %v12347_v32, 0.0 }
 0x454   :  { %14920 = vst [vmem:[#allocation24_spill] sm:$0xff] %v12922_v15  ;;  %v14929_v50 = vshrl.u32 %v12898_v30, 16  ;;  %v14931_v37 = vmax.f32 %v14930_v57, 0.0  ;;  %v14932_v36 = vshrl.u32 %v12917_v58, 16  ;;  %v14933_v32 = vunpack.c.l.b16 %v12922_v15 }
 0x455   :  { %14922 = vst [vmem:[#allocation25_spill] sm:$0xff] %v12927_v34  ;;  %v12949_v9 = vpack.c.b16 %v14744_v60, %v14745_v29  ;;  %v12954_v49 = vpack.c.bf16 %v14926_v22, %v14926_v22  ;;  %v12964_v59 = vpack.c.bf16 %v14928_v45, %v14928_v45  ;;  %v14934_v45 = vunpack.c.l.b16 %v12927_v34 }
 0x456   :  { %14924 = vst [vmem:[#allocation26_spill] sm:$0xff] %v12939_v24  ;;  %v3675_v60 = vor.u32 %v14929_v50, %v12943_v40  ;;  %v12974_v54 = vpack.c.bf16 %v14931_v37, %v14931_v37  ;;  %v3683_v41 = vor.u32 %v14932_v36, %v3679_v47  ;;  %v14752_v22 = vshrl.u32 %v12879_v8, 16  ;;  %3806 = vrot.lane.b32.xlu0 %v3640_v55, %s9661_s24 }
 0x457   :  { %14925 = vst [vmem:[#allocation27_spill] sm:$0xff] %v12949_v9  ;;  %v12982_v17 = vpack.c.b16 %v14934_v45, %v14933_v32  ;;  %v14936_v37 = vshll.u32 %v12949_v9, 16  ;;  %v14937_v58 = vunpack.c.l.b16 %v12939_v24  ;;  %v14938_v36 = vunpack.c.l.b16 %v12954_v49  ;;  %3810 = vrot.lane.b32.xlu1 %v3656_v3, %s9661_s24 }
 0x458   :  { %14927 = vst [vmem:[#allocation28_spill] sm:$0xff] %v12954_v49  ;;  %v3680_v57 = vsel %vm1300_vm7, %v3675_v60, %v3679_v47  ;;  %v14753_v32 = vunpack.c.l.b16 %v12974_v54  ;;  %v3659_v60 = vor.u32 %v14752_v22, %v3655_v43  ;;  %v14940_v55 = vmax.f32 %v12606_v6, 0.0 }
 0x459   :  { %14935 = vst [vmem:[#allocation20_spill] sm:$0xff] %v12982_v17  ;;  %v3687_v29 = vrot.slane %v14936_v37, 1  ;;  %v12994_v15 = vpack.c.b16 %v14938_v36, %v14937_v58  ;;  %v14941_v36 = vunpack.c.l.b16 %v12964_v59  ;;  %v14943_v50 = vmax.f32 %v12617_v33, 0.0 }
 0x45a   :  { %v13005_v47 = vpack.c.bf16 %v14940_v55, %v14940_v55  ;;  %v14944_v6 = vshll.u32 %v12982_v17, 16  ;;  %v14945_v22 = vmax.f32 %v12626_v19, 0.0  ;;  %v14947_v49 = vmax.f32 %v12641_v23, 0.0 }
 0x45b   :  { %14939 = vst [vmem:[#allocation29_spill] sm:$0xff] %v12994_v15  ;;  %v3688_v37 = vsel %vm1300_vm7, %v3683_v41, %v3687_v29  ;;  %v13013_v3 = vpack.c.b16 %v14753_v32, %v14941_v36  ;;  %v13018_v45 = vpack.c.bf16 %v14943_v50, %v14943_v50  ;;  %v14946_v36 = vshll.u32 %v12994_v15, 16 }
 0x45c   :  { %v3695_v43 = vrot.slane %v14944_v6, 1  ;;  %v13027_v58 = vpack.c.bf16 %v14945_v22, %v14945_v22  ;;  %v13036_v6 = vpack.c.bf16 %v14947_v49, %v14947_v49  ;;  %v14948_v55 = vshrl.u32 %v12982_v17, 16 }
 0x45d   :  { %14942 = vst [vmem:[#allocation30_spill] sm:$0xff] %v13013_v3  ;;  %v3703_v32 = vrot.slane %v14946_v36, 1  ;;  %v14760_v33 = vshll.u32 %v13013_v3, 16  ;;  %v14949_v19 = vmax.f32 %v12650_v44, 0.0  ;;  %v14951_v24 = vmax.f32 %v12663_v14, 0.0 }
 0x45e   :  { %v3699_v41 = vor.u32 %v14948_v55, %v3695_v43  ;;  %v14953_v49 = vunpack.c.l.b16 %v13005_v47  ;;  %v14954_v34 = vunpack.c.l.b16 %v13018_v45  ;;  %v14956_v44 = vshrl.u32 %v12994_v15, 16  ;;  %3816 = vrot.lane.b32.xlu0 %v3680_v57, %s9661_s24 }
 0x45f   :  { %v13043_v22 = vpack.c.bf16 %v14949_v19, %v14949_v19  ;;  %v13048_v36 = vpack.c.bf16 %v14951_v24, %v14951_v24  ;;  %v3663_v23 = vrot.slane %v14760_v33, 1  ;;  %v14761_v17 = vunpack.c.l.b16 %v13036_v6  ;;  %3818 = vrot.lane.b32.xlu1 %v3688_v37, %s9661_s24 }
 0x460   :  { %v13057_v55 = vpack.c.b16 %v14954_v34, %v14953_v49  ;;  %v3707_v19 = vor.u32 %v14956_v44, %v3703_v32  ;;  %v3704_v14 = vsel %vm1300_vm7, %v3699_v41, %v3703_v32  ;;  %v14764_v61 = vshrl.u32 %v13013_v3, 16 }
 0x461   :  { %14950 = vst [vmem:[#allocation31_spill] sm:$0xff] %v13043_v22  ;;  %v14763_v24 = vunpack.c.l.b16 %v13043_v22  ;;  %v14762_v50 = vunpack.c.l.b16 %v13048_v36  ;;  %v3664_v33 = vsel %vm1300_vm7, %v3659_v60, %v3663_v23  ;;  %v14957_v49 = vunpack.c.l.b16 %v13027_v58 }
 0x462   :  { %14952 = vst [vmem:[#allocation32_spill] sm:$0xff] %v13048_v36  ;;  %v14765_v34 = vshll.u32 %v13057_v55, 16  ;;  %v14958_v32 = vmax.f32 %v12672_v13, 0.0  ;;  %3812 = vrot.lane.b32.xlu2 %v3664_v33, %s9661_s24  ;;  %v3667_v60 = vor.u32 %v14764_v61, %v3663_v23 }
 0x463   :  { %14955 = vst [vmem:[#allocation33_spill] sm:$0xff] %v13057_v55  ;;  %v13073_v44 = vpack.c.b16 %v14761_v17, %v14957_v49  ;;  %v13086_v57 = vpack.c.b16 %v14762_v50, %v14763_v24  ;;  %v14960_v49 = vmax.f32 %v12681_v20, 0.0  ;;  %v14963_v50 = vmax.f32 %v12693_v16, 0.0 }
 0x464   :  { %v13078_v41 = vpack.c.bf16 %v14958_v32, %v14958_v32  ;;  %v3711_v37 = vrot.slane %v14765_v34, 1  ;;  %v3672_v23 = vsel %vm1300_vm7, %v3667_v60, %v12943_v40  ;;  %v14962_v32 = vmax.f32 %v12689_v42, 0.0 }
 0x465   :  { %v13093_v13 = vpack.c.bf16 %v14960_v49, %v14960_v49  ;;  %v14766_v33 = vshll.u32 %v13073_v44, 16  ;;  %v13119_v24 = vpack.c.bf16 %v14963_v50, %v14963_v50  ;;  %v14964_v40 = vshll.u32 %v13086_v57, 16 }
 0x466   :  { %14959 = vst [vmem:[#allocation34_spill] sm:$0xff] %v13078_v41  ;;  %v3712_v61 = vsel %vm1300_vm7, %v3707_v19, %v3711_v37  ;;  %v13114_v17 = vpack.c.bf16 %v14962_v32, %v14962_v32  ;;  %v14965_v49 = vunpack.c.l.b16 %v13078_v41  ;;  %v14967_v32 = vmax.f32 %v12701_v51, 0.0  ;;  %3822 = vrot.lane.b32.xlu0 %v3704_v14, %s9661_s24 }
 0x467   :  { %14961 = vst [vmem:[#allocation35_spill] sm:$0xff] %v13093_v13  ;;  %v14769_v20 = vunpack.c.l.b16 %v13093_v13  ;;  %v13109_v34 = vrot.slane %v14766_v33, 1  ;;  %v3727_v60 = vrot.slane %v14964_v40, 1  ;;  %v14966_v33 = vmax.f32 %v12697_v56, 0.0  ;;  %3824 = vrot.lane.b32.xlu1 %v3712_v61, %s9661_s24 }
 0x468   :  { %v13137_v16 = vpack.c.bf16 %v14967_v32, %v14967_v32  ;;  %v14968_v50 = vshrl.u32 %v13073_v44, 16  ;;  %v14775_v41 = vunpack.c.l.b16 %v13114_v17  ;;  %v14772_v13 = vunpack.c.l.b16 %v13119_v24 }
 0x469   :  { %v13127_v19 = vpack.c.b16 %v14769_v20, %v14965_v49  ;;  %v13132_v42 = vpack.c.bf16 %v14966_v33, %v14966_v33  ;;  %v14969_v49 = vshrl.u32 %v12949_v9, 16  ;;  %v14970_v56 = vshrl.u32 %v13086_v57, 16 }
 0x46a   :  { %v3723_v40 = vor.u32 %v14968_v50, %v13109_v34  ;;  %v14773_v32 = vunpack.c.l.b16 %v13137_v16  ;;  %v13157_v22 = vpack.c.b16 %v14772_v13, %v14775_v41  ;;  %3814 = vrot.lane.b32.xlu2 %v3672_v23, %s9661_s24  ;;  %v14976_v13 = vmax.f32 %v12717_v5, 0.0 }
 0x46b   :  { %v3691_v20 = vor.u32 %v14969_v49, %v3687_v29  ;;  %v3731_v33 = vor.u32 %v14970_v56, %v3727_v60  ;;  %v14776_v36 = vshll.u32 %v13127_v19, 16  ;;  %v14774_v51 = vunpack.c.l.b16 %v13132_v42 }
 0x46c   :  { %v3728_v50 = vsel %vm1300_vm7, %v3723_v40, %v3727_v60  ;;  %v14971_v49 = vmax.f32 %v12705_v28, 0.0  ;;  %v14777_v23 = vshll.u32 %v13157_v22, 16  ;;  %v14978_v41 = vmax.f32 %v12721_v48, 0.0 }
 0x46d   :  { %v3696_v29 = vsel %vm1300_vm7, %v3691_v20, %v3695_v43  ;;  %v3735_v14 = vrot.slane %v14776_v36, 1  ;;  %v13173_v60 = vpack.c.b16 %v14773_v32, %v14774_v51  ;;  %v14973_v43 = vmax.f32 %v12709_v31, 0.0 }
 0x46e   :  { %v13163_v56 = vpack.c.bf16 %v14971_v49, %v14971_v49  ;;  %v14975_v20 = vmax.f32 %v12713_v52, 0.0  ;;  %v13191_v32 = vpack.c.bf16 %v14976_v13, %v14976_v13  ;;  %v13199_v51 = vrot.slane %v14777_v23, 1  ;;  %3828 = vrot.lane.b32.xlu0 %v3728_v50, %s9661_s24 }
 0x46f   :  { %v13178_v28 = vpack.c.bf16 %v14973_v43, %v14973_v43  ;;  %v3736_v31 = vsel %vm1300_vm7, %v3731_v33, %v3735_v14  ;;  %v14778_v43 = vshll.u32 %v13173_v60, 16  ;;  %v13204_v36 = vpack.c.bf16 %v14978_v41, %v14978_v41 }
 0x470   :  { %14972 = vst [vmem:[#allocation36_spill] sm:$0xff] %v13163_v56  ;;  %v13183_v61 = vpack.c.bf16 %v14975_v20, %v14975_v20  ;;  %v14781_v49 = vunpack.c.l.b16 %v13163_v56  ;;  %v14980_v5 = vmax.f32 %v12725_v7, 0.0  ;;  %v14786_v48 = vunpack.c.l.b16 %v13191_v32  ;;  %3830 = vrot.lane.b32.xlu1 %v3736_v31, %s9661_s24 }
 0x471   :  { %14974 = vst [vmem:[#allocation37_spill] sm:$0xff] %v13178_v28  ;;  %v14780_v52 = vunpack.c.l.b16 %v13178_v28  ;;  %v3751_v40 = vrot.slane %v14778_v43, 1  ;;  %v14982_v7 = vshrl.u32 %v13157_v22, 16  ;;  %v14785_v20 = vunpack.c.l.b16 %v13204_v36 }
 0x472   :  { %14977 = vst [vmem:[#allocation38_spill] sm:$0xff] %v13191_v32  ;;  %v13209_v13 = vpack.c.bf16 %v14980_v5, %v14980_v5  ;;  %v14983_v43 = vmax.f32 %v12729_v4, 0.0  ;;  %v14988_v4 = vshrl.u32 %v13057_v55, 16  ;;  %v14989_v28 = vmax.f32 %v12733_v46, 0.0  ;;  %3820 = vrot.lane.b32.xlu2 %v3696_v29, %s9661_s24 }
 0x473   :  { %14979 = vst [vmem:[#allocation39_spill] sm:$0xff] %v13204_v36  ;;  %v13218_v23 = vpack.c.b16 %v14780_v52, %v14781_v49  ;;  %v3747_v5 = vor.u32 %v14982_v7, %v13199_v51  ;;  %v14985_v49 = vunpack.c.l.b16 %v13183_v61 }
 0x474   :  { %14981 = vst [vmem:[#allocation40_spill] sm:$0xff] %v13209_v13  ;;  %v14784_v33 = vunpack.c.l.b16 %v13209_v13  ;;  %v13230_v56 = vpack.c.bf16 %v14983_v43, %v14983_v43  ;;  %v3715_v43 = vor.u32 %v14988_v4, %v3711_v37  ;;  %v13251_v52 = vpack.c.bf16 %v14989_v28, %v14989_v28 }
 0x475   :  { %v13237_v41 = vpack.c.b16 %v14786_v48, %v14985_v49  ;;  %v3752_v50 = vsel %vm1300_vm7, %v3747_v5, %v3751_v40  ;;  %v14991_v49 = vshrl.u32 %v13173_v60, 16  ;;  %v14992_v37 = vshll.u32 %v13218_v23, 16 }
 0x476   :  { %14984 = vst [vmem:[#allocation41_spill] sm:$0xff] %v13230_v56  ;;  %v13244_v7 = vpack.c.b16 %v14784_v33, %v14785_v20  ;;  %v14789_v32 = vunpack.c.l.b16 %v13230_v56  ;;  %v14788_v28 = vunpack.c.l.b16 %v13251_v52  ;;  %v14993_v48 = vmax.f32 %v12737_v0, 0.0  ;;  %3834 = vrot.lane.b32.xlu0 %v3752_v50, %s9661_s24 }
 0x477   :  { %14986 = vst [vmem:[#allocation42_spill] sm:$0xff] %v13237_v41  ;;  %v3755_v33 = vor.u32 %v14991_v49, %v3751_v40  ;;  %v14787_v20 = vshll.u32 %v13237_v41, 16  ;;  %v13262_v4 = vrot.slane %v14992_v37, 1  ;;  %v14995_v5 = vmax.f32 %v12741_v2, 0.0 }
 0x478   :  { %14987 = vst [vmem:[#allocation43_spill] sm:$0xff] %v13244_v7  ;;  %v13269_v31 = vpack.c.bf16 %v14993_v48, %v14993_v48  ;;  %v14997_v37 = vmax.f32 %v12745_v25, 0.0  ;;  %v3720_v0 = vsel %vm1300_vm7, %v3715_v43, %v13109_v34  ;;  %v13290_v48 = vpack.c.b16 %v14788_v28, %v14789_v32 }
 0x479   :  { %14990 = vst [vmem:[#allocation44_spill] sm:$0xff] %v13251_v52  ;;  %v13273_v29 = vrot.slane %v14787_v20, 1  ;;  %v13279_v49 = vpack.c.bf16 %v14995_v5, %v14995_v5  ;;  %v14999_v20 = vmax.f32 %v12749_v1, 0.0  ;;  %v3760_v43 = vsel %vm1300_vm7, %v3755_v33, %v13262_v4 }
 0x47a   :  { %14994 = vst [vmem:[#allocation45_spill] sm:$0xff] %v13269_v31  ;;  %v3501_v46 = vpack.c.bf16 %v14997_v37, %v14997_v37  ;;  %v15003_v32 = vunpack.c.l.b16 %v12771_v12  ;;  %v15004_v25 = vshrl.u32 %v13237_v41, 16  ;;  %v15005_v37 = vshll.u32 %v13244_v7, 16  ;;  %3836 = vrot.lane.b32.xlu1 %v3760_v43, %s9661_s24  ;;  %3826 = vrot.lane.b32.xlu2 %v3720_v0, %s9661_s24 }
 0x47b   :  { %14996 = vst [vmem:[#allocation46_spill] sm:$0xff] %v13279_v49  ;;  %v13295_v2 = vpack.c.bf16 %v14999_v20, %v14999_v20  ;;  %v15002_v20 = vunpack.c.l.b16 %v12766_v62  ;;  %v15006_v52 = vunpack.c.l.b16 %v13269_v31  ;;  %v15007_v33 = vunpack.c.l.b16 %v13279_v49 }
 0x47c   :  { %14998 = vst [vmem:[#allocation47_spill] sm:$0xff] %v13290_v48  ;;  %v13300_v40 = vunpack.c.l.b16 %v3501_v46  ;;  %v3771_v46 = vor.u32 %v15004_v25, %v13273_v29  ;;  %v3775_v34 = vrot.slane %v15005_v37, 1  ;;  %v15009_v1 = vunpack.c.l.b16 %v12776_v18 }
 0x47d   :  { %15000 = vst [vmem:[#allocation48_spill] sm:$0xff] %v13295_v2  ;;  %v13311_v5 = vpack.c.b16 %v15003_v32, %v15002_v20  ;;  %v13322_v28 = vpack.c.b16 %v15007_v33, %v15006_v52  ;;  %v15010_v62 = vunpack.c.l.b16 %v12781_v10  ;;  %v15011_v32 = vshrl.u32 %v13127_v19, 16  ;;  %v9353_v20 = vld [vmem:[#allocation2 + $0x18] sm:$0xff] }
 0x47e   :  { %15001 = vst [vmem:[#allocation49_spill] sm:$0xff] %v13300_v40  ;;  %v15012_v37 = vunpack.c.l.b16 %v13295_v2  ;;  %v15014_v10 = vshrl.u32 %v13244_v7, 16  ;;  %v15015_v50 = vshll.u32 %v13290_v48, 16  ;;  %v15016_v0 = vshrl.u32 %v12813_v21, 16  ;;  %5177 = vmatpush.bf16.msrb.mxu3 %v9353_v20  ;;  %v9352_v2 = vld [vmem:[#allocation2 + $0x30] sm:$0xff] }
 0x47f   :  { %15008 = vst [vmem:[#allocation50_spill] sm:$0xff] %v13322_v28  ;;  %v13328_v12 = vpack.c.b16 %v15010_v62, %v15009_v1  ;;  %v3739_v25 = vor.u32 %v15011_v32, %v3735_v14  ;;  %v3776_v14 = vsel %vm1300_vm7, %v3771_v46, %v3775_v34  ;;  %v15017_v32 = vshll.u32 %v12813_v21, 16 }
 0x480   :  { %v13338_v52 = vpack.c.b16 %v15012_v37, %v13300_v40  ;;  %v3779_v1 = vor.u32 %v15014_v10, %v3775_v34  ;;  %v3783_v33 = vrot.slane %v15015_v50, 1  ;;  %v4356_v62 = vrot.slane %v15016_v0, 2  ;;  %3840 = vrot.lane.b32.xlu0 %v3776_v14, %s9661_s24 }
 0x481   :  { %v4357_v37 = vrot.slane %v15017_v32, 3  ;;  %v3744_v10 = vsel %vm1300_vm7, %v3739_v25, %v13199_v51  ;;  %v15018_v40 = vshrl.u32 %v12829_v11, 16  ;;  %v15019_v34 = vshll.u32 %v12829_v11, 16 }
 0x482   :  { %15013 = vst [vmem:[#allocation51_spill] sm:$0xff] %v13338_v52  ;;  %v15020_v43 = vshll.u32 %v13322_v28, 16  ;;  %v14798_v0 = vshll.u32 %v13338_v52, 16  ;;  %v15021_v20 = vunpack.c.l.b16 %v12786_v26  ;;  %v15022_v32 = vunpack.c.l.b16 %v12791_v27  ;;  %5178 = vmatpush.bf16.msrb.mxu3 %v9352_v2  ;;  %3832 = vrot.lane.b32.xlu2 %v3744_v10, %s9661_s24 }
 0x483   :  { %v4359_v50 = vrot.slane %v15018_v40, 2  ;;  %v4360_v46 = vrot.slane %v15019_v34, 3  ;;  %v4358_v31 = vor.u32 %v4357_v37, %v4356_v62  ;;  %v3784_v51 = vsel %vm1300_vm7, %v3779_v1, %v3783_v33 }
 0x484   :  { %v3791_v49 = vrot.slane %v15020_v43, 1  ;;  %v13365_v18 = vpack.c.b16 %v15022_v32, %v15021_v20  ;;  %v15023_v40 = vshrl.u32 %v12835_v35, 16  ;;  %v15024_v34 = vshll.u32 %v12835_v35, 16  ;;  %v9351_v43 = vld [vmem:[#allocation2 + $0x68] sm:$0xff]  ;;  %3842 = vrot.lane.b32.xlu1 %v3784_v51, %s9661_s24 }
 0x485   :  { %v4361_v25 = vor.u32 %v4360_v46, %v4359_v50  ;;  %v14799_v62 = vshrl.u32 %v13338_v52, 16  ;;  %v15025_v37 = vunpack.c.l.b16 %v12796_v63  ;;  %v15026_v1 = vunpack.c.l.b16 %v12818_v53  ;;  %v9350_v51 = vld [vmem:[#allocation2 + $0x108] sm:$0xff]  ;;  %v9374_v52 = vld [vmem:[#allocation2 + $0x50] sm:$0xff] }
 0x486   :  { %v4363_v56 = vrot.slane %v15023_v40, 2  ;;  %v4364_v13 = vrot.slane %v15024_v34, 3  ;;  %v15027_v46 = vshrl.u32 %v13322_v28, 16  ;;  %v3799_v2 = vrot.slane %v14798_v0, 1  ;;  %5179 = vmatpush.bf16.msrb.mxu3 %v9351_v43  ;;  %v15031_v34 = vld [vmem:[#allocation13_spill] sm:$0xff] }
 0x487   :  { %v4362_v26 = vsel %vm2191_vm6, %v4358_v31, %v4361_v25  ;;  %v13379_v50 = vpack.c.b16 %v15026_v1, %v15025_v37  ;;  %v15028_v14 = vshrl.u32 %v12879_v8, 16  ;;  %v15030_v53 = vshrl.u32 %v13218_v23, 16  ;;  %v9349_v43 = vld [vmem:[#allocation2 + $0x48] sm:$0xff] }
 0x488   :  { %v4365_v27 = vor.u32 %v4364_v13, %v4363_v56  ;;  %v3795_v20 = vor.u32 %v15027_v46, %v3791_v49  ;;  %v15029_v56 = vshll.u32 %v12879_v8, 16  ;;  %v15032_v37 = vunpack.c.l.b16 %v15031_v34 }
 0x489   :  { %v4367_v31 = vrot.slane %v15028_v14, 2  ;;  %v3763_v13 = vor.u32 %v15030_v53, %v13262_v4  ;;  %v15033_v1 = vunpack.c.l.b16 %v12964_v59  ;;  %v3803_v14 = vor.u32 %v14799_v62, %v3799_v2 }
 0x48a   :  { %v4368_v63 = vrot.slane %v15029_v56, 3  ;;  %v4366_v32 = vsel %vm2191_vm6, %v4361_v25, %v4365_v27  ;;  %v3800_v46 = vsel %vm1300_vm7, %v3795_v20, %v3799_v2  ;;  %v14800_v25 = vshrl.u32 %v13290_v48, 16  ;;  %5180 = vmatpush.bf16.msrb.mxu3 %v9350_v51  ;;  %v9348_v2 = vld [vmem:[#allocation2 + $0x10] sm:$0xff]  ;;  %v15059_v48 = vld [vmem:[#allocation20_spill] sm:$0xff] }
 0x48b   :  { %v13399_v10 = vpack.c.b16 %v15033_v1, %v15032_v37  ;;  %v3768_v4 = vsel %vm1300_vm7, %v3763_v13, %v13273_v29  ;;  %3846 = vrot.lane.b32.xlu0 %v3800_v46, %s9661_s24  ;;  %v3920_v59 = vrot.slane %v13311_v5, 1  ;;  %v3921_v20 = vrot.slane %v13328_v12, 1  ;;  %v9346_v51 = vld [vmem:[#allocation2 + $0xb0] sm:$0xff] }
 0x48c   :  { %v4369_v40 = vor.u32 %v4368_v63, %v4367_v31  ;;  %3848 = vrot.lane.b32.xlu1 %v3803_v14, %s9661_s24  ;;  %3838 = vrot.lane.b32.xlu2 %v3768_v4, %s9661_s24  ;;  %v9347_v63 = vld [vmem:[#allocation2 + $0xd0] sm:$0xff]  ;;  %v3923_v53 = vrot.slane %v13365_v18, 1  ;;  %v4217_v13 = vrot.slane %v13311_v5, 2  ;;  %v4220_v37 = vrot.slane %v13365_v18, 2 }
 0x48d   :  { %v3922_v29 = vsel %vm1545_vm1, %v3920_v59, %v3921_v20  ;;  %v15034_v14 = vshrl.u32 %v13013_v3, 16  ;;  %v15051_v0 = vshrl.u32 %v12949_v9, 16  ;;  %v15061_v36 = vshll.u32 %v15059_v48, 16 }
 0x48e   :  { %v4370_v56 = vsel %vm2191_vm6, %v4365_v27, %v4369_v40  ;;  %v3787_v27 = vor.u32 %v14800_v25, %v3783_v33  ;;  %5181 = vmatpush.bf16.msrb.mxu3 %v9349_v43  ;;  %v4218_v33 = vrot.slane %v13328_v12, 2  ;;  %v3924_v34 = vsel %vm1545_vm1, %v3921_v20, %v3923_v53 }
 0x48f   :  { %v4371_v4 = vrot.slane %v15034_v14, 2  ;;  %v15035_v43 = vshll.u32 %v13013_v3, 16  ;;  %v15040_v14 = vunpack.c.l.b16 %v12845_v39  ;;  %v4383_v62 = vrot.slane %v15051_v0, 2 }
 0x490   :  { %v3792_v31 = vsel %vm1300_vm7, %v3787_v27, %v3791_v49  ;;  %v4219_v49 = vsel %vm1992_vm2, %v4217_v13, %v4218_v33  ;;  %v4221_v46 = vsel %vm1992_vm2, %v4218_v33, %v4220_v37  ;;  %v4222_v27 = vrot.slane %v13379_v50, 2 }
 0x491   :  { %v4372_v59 = vrot.slane %v15035_v43, 3  ;;  %v15052_v25 = vshll.u32 %v12949_v9, 16 }
 0x492   :  { %5182 = vmatpush.bf16.msrb.mxu3 %v9348_v2  ;;  %v9381_v2 = vld [vmem:[#allocation2 + $0xe8] sm:$0xff] }
 0x493   :  { %3965 = vrot.lane.b32.xlu0 %v3922_v29, %s9661_s24  ;;  %v4373_v20 = vor.u32 %v4372_v59, %v4371_v4  ;;  %v15041_v4 = vld [vmem:[#allocation14_spill] sm:$0xff] }
 0x494   :  { %4452 = vrot.lane.b32.xlu1 %v4362_v26, %s9661_s24  ;;  %3844 = vrot.lane.b32.xlu2 %v3792_v31, %s9661_s24  ;;  %v3925_v26 = vrot.slane %v13379_v50, 1  ;;  %v15042_v43 = vunpack.c.l.b16 %v15041_v4  ;;  %v9377_v4 = vld [vmem:[#allocation2 + $0x28] sm:$0xff] }
 0x495   :  { %v4374_v31 = vsel %vm2191_vm6, %v4369_v40, %v4373_v20  ;;  %v15038_v40 = vshrl.u32 %v12898_v30, 16  ;;  %5513 = vmatpush.bf16.msrb.mxu0 %v9377_v4  ;;  %v9375_v4 = vld [vmem:[#allocation2 + $0xf0] sm:$0xff] }
 0x496   :  { %5183 = vmatpush.bf16.msrb.mxu3 %v9347_v63  ;;  %v3926_v1 = vsel %vm1545_vm1, %v3923_v53, %v3925_v26  ;;  %v4223_v63 = vsel %vm1992_vm2, %v4220_v37, %v4222_v27  ;;  %v15037_v53 = vunpack.c.l.b16 %v12840_v38  ;;  %v13471_v59 = vpack.c.b16 %v15042_v43, %v15040_v14  ;;  %v9368_v14 = vld [vmem:[#allocation2 + $0xe0] sm:$0xff]  ;;  %v9360_v43 = vld [vmem:[#allocation2 + $0x8] sm:$0xff] }
 0x49a   :  { %5184 = vmatpush.bf16.msrb.mxu3 %v9346_v51 }
 0x49b   :  { %3967 = vrot.lane.b32.xlu0 %v3924_v34, %s9661_s24  ;;  %v4375_v34 = vrot.slane %v15038_v40, 2  ;;  %v15046_v40 = vld [vmem:[#allocation12_spill] sm:$0xff] }
 0x49c   :  { %4454 = vrot.lane.b32.xlu1 %v4366_v32, %s9661_s24  ;;  %4262 = vrot.lane.b32.xlu2 %v4219_v49, %s9661_s24  ;;  %v3927_v32 = vrot.slane %v13399_v10, 1  ;;  %v15039_v49 = vshll.u32 %v12898_v30, 16 }
 0x49e   :  { %v3928_v29 = vsel %vm1545_vm1, %v3925_v26, %v3927_v32  ;;  %5629 = vmatpush.bf16.msra.mxu3 %v9381_v2  ;;  %v4376_v26 = vrot.slane %v15039_v49, 3  ;;  %v3931_v2 = vrot.slane %v13471_v59, 1 }
 0x4a0   :  { %v4377_v37 = vor.u32 %v4376_v26, %v4375_v34 }
 0x4a3   :  { %3969 = vrot.lane.b32.xlu0 %v3926_v1, %s9661_s24  ;;  %v4224_v1 = vrot.slane %v13399_v10, 2 }
 0x4a4   :  { %4456 = vrot.lane.b32.xlu1 %v4370_v56, %s9661_s24  ;;  %4264 = vrot.lane.b32.xlu2 %v4221_v46, %s9661_s24  ;;  %v15036_v56 = vunpack.c.l.b16 %v12974_v54  ;;  %v4378_v54 = vsel %vm2191_vm6, %v4373_v20, %v4377_v37 }
 0x4a5   :  { %v4225_v38 = vsel %vm1992_vm2, %v4222_v27, %v4224_v1 }
 0x4a6   :  { %v13451_v13 = vpack.c.b16 %v15037_v53, %v15036_v56 }
 0x4a8   :  { %v3929_v33 = vrot.slane %v13451_v13, 1  ;;  %v4226_v39 = vrot.slane %v13451_v13, 2 }
 0x4aa   :  { %v3930_v51 = vsel %vm1545_vm1, %v3927_v32, %v3929_v33  ;;  %v9369_v32 = vld [vmem:[#allocation2 + $0x60] sm:$0xff]  ;;  %v3932_v20 = vsel %vm1545_vm1, %v3929_v33, %v3931_v2 }
 0x4ab   :  { %3971 = vrot.lane.b32.xlu0 %v3928_v29, %s9661_s24  ;;  %5401 = vmatpush.bf16.msrb.mxu2 %v9369_v32  ;;  %v15043_v29 = vld [vmem:[#allocation23_spill] sm:$0xff] }
 0x4ac   :  { %4458 = vrot.lane.b32.xlu1 %v4374_v31, %s9661_s24  ;;  %4266 = vrot.lane.b32.xlu2 %v4223_v63, %s9661_s24  ;;  %v15044_v27 = vshrl.u32 %v15043_v29, 16  ;;  %v15045_v63 = vshll.u32 %v15043_v29, 16  ;;  %v9367_v32 = vld [vmem:[#allocation2 + $0x58] sm:$0xff] }
 0x4ae   :  { %v4379_v31 = vrot.slane %v15044_v27, 2  ;;  %v4380_v56 = vrot.slane %v15045_v63, 3  ;;  %v9376_v63 = vld [vmem:[#allocation2 + $0xb8] sm:$0xff] }
 0x4af   :  { %5402 = vmatpush.bf16.msrb.mxu2 %v9368_v14  ;;  %5514 = vmatpush.bf16.msrb.mxu0 %v9376_v63  ;;  %v9358_v14 = vld [vmem:[#allocation2 + $0xf8] sm:$0xff] }
 0x4b0   :  { %v4381_v53 = vor.u32 %v4380_v56, %v4379_v31  ;;  %v9366_v31 = vld [vmem:[#allocation2 + $0x70] sm:$0xff]  ;;  %v15047_v56 = vld [vmem:[#allocation15_spill] sm:$0xff] }
 0x4b2   :  { %v4382_v33 = vsel %vm2191_vm6, %v4377_v37, %v4381_v53 }
 0x4b3   :  { %3973 = vrot.lane.b32.xlu0 %v3930_v51, %s9661_s24  ;;  %5403 = vmatpush.bf16.msrb.mxu2 %v9367_v32 }
 0x4b4   :  { %4460 = vrot.lane.b32.xlu1 %v4378_v54, %s9661_s24  ;;  %4268 = vrot.lane.b32.xlu2 %v4225_v38, %s9661_s24  ;;  %v4227_v54 = vsel %vm1992_vm2, %v4224_v1, %v4226_v39  ;;  %v9361_v38 = vld [vmem:[#allocation2 + $0x78] sm:$0xff] }
 0x4b5   :  { %5289 = vmatpush.bf16.msrb.mxu1 %v9361_v38  ;;  %v9359_v1 = vld [vmem:[#allocation2 + $0x38] sm:$0xff]  ;;  %5515 = vmatpush.bf16.msrb.mxu0 %v9375_v4 }
 0x4b7   :  { %5404 = vmatpush.bf16.msrb.mxu2 %v9366_v31 }
 0x4b9   :  { %5290 = vmatpush.bf16.msrb.mxu1 %v9360_v43  ;;  %v9365_v43 = vld [vmem:[#allocation2 + $0xa0] sm:$0xff]  ;;  %5516 = vmatpush.bf16.msrb.mxu0 %v9374_v52 }
 0x4bb   :  { %3975 = vrot.lane.b32.xlu0 %v3932_v20, %s9661_s24  ;;  %5405 = vmatpush.bf16.msrb.mxu2 %v9365_v43  ;;  %v9355_v43 = vld [vmem:[#allocation2 + $0x110] sm:$0xff] }
 0x4bc   :  { %v13465_v46 = vpop.permute.xlu2 %3812  ;;  %4462 = vrot.lane.b32.xlu1 %v4382_v33, %s9661_s24  ;;  %4270 = vrot.lane.b32.xlu2 %v4227_v54, %s9661_s24 }
 0x4bd   :  { %5291 = vmatpush.bf16.msrb.mxu1 %v9359_v1 }
 0x4c0   :  { %v3805_v51 = vpop.permute.xlu0 %3804 }
 0x4c1   :  { %v4544_v34 = vsel %vm2448_vm8, %v15046_v40, %v3805_v51  ;;  %v13483_v49 = vpop.permute.xlu1 %3808  ;;  %v15048_v51 = vunpack.c.l.b16 %v15047_v56  ;;  %v4384_v56 = vrot.slane %v15052_v25, 3  ;;  %5292 = vmatpush.bf16.msrb.mxu1 %v9358_v14  ;;  %v9373_v14 = vld [vmem:[#allocation2 + $0xc0] sm:$0xff] }
 0x4c2   :  { %5185 = vmatmul.bf16.vlgmr.msrb.gmra.mxu3 %v4544_v34  ;;  %v15049_v34 = vld [vmem:[#allocation18_spill] sm:$0xff]  ;;  %5517 = vmatpush.bf16.msrb.mxu0 %v9373_v14 }
 0x4c3   :  { %v15050_v33 = vunpack.c.l.b16 %v15049_v34  ;;  %v4385_v63 = vor.u32 %v4384_v56, %v4383_v62  ;;  %v9356_v62 = vld [vmem:[#allocation2 + $0x118] sm:$0xff]  ;;  %v9362_v56 = vld [vmem:[#allocation2 + $0x20] sm:$0xff] }
 0x4c4   :  { %v13485_v26 = vpop.permute.xlu2 %3814 }
 0x4c5   :  { %v13499_v54 = vpack.c.b16 %v15050_v33, %v15048_v51  ;;  %v4228_v51 = vrot.slane %v13471_v59, 2  ;;  %v4386_v0 = vsel %vm2191_vm6, %v4381_v53, %v4385_v63  ;;  %v9357_v33 = vld [vmem:[#allocation2 + $0x98] sm:$0xff] }
 0x4c6   :  { %4464 = vrot.lane.b32.xlu1 %v4386_v0, %s9661_s24  ;;  %5293 = vmatpush.bf16.msrb.mxu1 %v9357_v33  ;;  %v15055_v0 = vld [vmem:[#allocation19_spill] sm:$0xff]  ;;  %v15057_v33 = vld [vmem:[#allocation24_spill] sm:$0xff] }
 0x4c7   :  { %v3933_v38 = vrot.slane %v13499_v54, 1  ;;  %v4229_v25 = vsel %vm1992_vm2, %v4226_v39, %v4228_v51  ;;  %v15058_v28 = vunpack.c.l.b16 %v15057_v33  ;;  %v4012_v33 = vshrl.u32 %v13311_v5, 16 }
 0x4c8   :  { %v3807_v20 = vpop.permute.xlu0 %3806  ;;  %4272 = vrot.lane.b32.xlu2 %v4229_v25, %s9661_s24  ;;  %v15056_v25 = vunpack.c.l.b16 %v15055_v0 }
 0x4c9   :  { %v13491_v27 = vpop.permute.xlu1 %3810  ;;  %v3934_v32 = vsel %vm1545_vm1, %v3931_v2, %v3933_v38  ;;  %v4547_v1 = vsel %vm2448_vm8, %v12813_v21, %v3807_v20  ;;  %v9363_v20 = vld [vmem:[#allocation2 + $0xc8] sm:$0xff] }
 0x4ca   :  { %3977 = vrot.lane.b32.xlu0 %v3934_v32, %s9661_s24  ;;  %v9364_v32 = vld [vmem:[#allocation2 + $0x90] sm:$0xff]  ;;  %5294 = vmatpush.bf16.msrb.mxu1 %v9356_v62  ;;  %v9354_v62 = vld [vmem:[#allocation2 + $0x80] sm:$0xff] }
 0x4cb   :  { %5406 = vmatpush.bf16.msrb.mxu2 %v9364_v32  ;;  %v13531_v32 = vpack.c.b16 %v15058_v28, %v15056_v25  ;;  %v4550_v28 = vsel %vm2448_vm8, %v12829_v11, %v13483_v49  ;;  %v9370_v25 = vld [vmem:[#allocation2 + $0xa8] sm:$0xff]  ;;  %v4020_v49 = vshrl.u32 %v13328_v12, 16 }
 0x4cc   :  { %v13493_v37 = vpop.permute.xlu2 %3820 }
 0x4cd   :  { %v3935_v52 = vrot.slane %v13531_v32, 1 }
 0x4ce   :  { %5295 = vmatpush.bf16.msrb.mxu1 %v9355_v43 }
 0x4cf   :  { %5407 = vmatpush.bf16.msrb.mxu2 %v9363_v20  ;;  %v9371_v20 = vld [vmem:[#allocation2 + $0x88] sm:$0xff]  ;;  %v3936_v14 = vsel %vm1545_vm1, %v3933_v38, %v3935_v52 }
 0x4d0   :  { %v13511_v31 = vpop.permute.xlu0 %3816 }
 0x4d1   :  { %v13513_v2 = vpop.permute.xlu1 %3818 }
 0x4d2   :  { %5190 = vmatmul.bf16.gmra.mxu3 %v4547_v1  ;;  %v9372_v1 = vld [vmem:[#allocation2 + $0xd8] sm:$0xff]  ;;  %3979 = vrot.lane.b32.xlu0 %v3936_v14, %s9661_s24 }
 0x4d3   :  { %5408 = vmatpush.bf16.msrb.mxu2 %v9362_v56  ;;  %5518 = vmatpush.bf16.msrb.mxu0 %v9372_v1  ;;  %v4230_v56 = vrot.slane %v13499_v54, 2  ;;  %v15067_v14 = vld [vmem:[#allocation26_spill] sm:$0xff] }
 0x4d4   :  { %v13515_v34 = vpop.permute.xlu2 %3826  ;;  %5296 = vmatpush.bf16.msrb.mxu1 %v9354_v62  ;;  %v15065_v62 = vld [vmem:[#allocation25_spill] sm:$0xff] }
 0x4d5   :  { %15053 = vst [vmem:[#allocation13_spill] sm:$0xff] %v13515_v34  ;;  %v4388_v34 = vrot.slane %v15061_v36, 3  ;;  %v4231_v36 = vsel %vm1992_vm2, %v4228_v51, %v4230_v56 }
 0x4d6   :  { %4274 = vrot.lane.b32.xlu2 %v4231_v36, %s9661_s24 }
 0x4d7   :  { %5519 = vmatpush.bf16.msrb.mxu0 %v9371_v20  ;;  %v15066_v20 = vunpack.c.l.b16 %v15065_v62  ;;  %v15070_v62 = vshll.u32 %v12994_v15, 16 }
 0x4d8   :  { %v13521_v4 = vpop.permute.xlu0 %3822 }
 0x4d9   :  { %v13523_v53 = vpop.permute.xlu1 %3824 }
 0x4db   :  { %5520 = vmatpush.bf16.msrb.mxu0 %v9370_v25  ;;  %v4232_v25 = vrot.slane %v13531_v32, 2 }
 0x4dc   :  { %v13525_v39 = vpop.permute.xlu2 %3832 }
 0x4dd   :  { %15054 = vst [vmem:[#allocation14_spill] sm:$0xff] %v13525_v39  ;;  %v15060_v39 = vshrl.u32 %v15059_v48, 16 }
 0x4df   :  { %v4387_v7 = vrot.slane %v15060_v39, 2 }
 0x4e0   :  { %v13544_v1 = vpop.permute.xlu0 %3828 }
 0x4e1   :  { %v4389_v43 = vor.u32 %v4388_v34, %v4387_v7  ;;  %15062 = vst [vmem:[#allocation12_spill] sm:$0xff] %v13544_v1  ;;  %v4015_v7 = vshll.u32 %v13311_v5, 16  ;;  %v4023_v34 = vshll.u32 %v13328_v12, 16  ;;  %v15069_v12 = vshrl.u32 %v12994_v15, 16 }
 0x4e2   :  { %v13546_v38 = vpop.permute.xlu1 %3830  ;;  %5195 = vmatmul.bf16.gmra.mxu3 %v4550_v28  ;;  %v4014_v28 = vrot.slane %v4012_v33, 1 }
 0x4e3   :  { %15063 = vst [vmem:[#allocation15_spill] sm:$0xff] %v13546_v38  ;;  %v4390_v39 = vsel %vm2191_vm6, %v4385_v63, %v4389_v43  ;;  %v15068_v63 = vunpack.c.l.b16 %v15067_v14  ;;  %v4017_v38 = vrot.slane %v4015_v7, 2  ;;  %v4025_v1 = vrot.slane %v4023_v34, 2 }
 0x4e4   :  { %4466 = vrot.lane.b32.xlu1 %v4390_v39, %s9661_s24  ;;  %v4022_v39 = vrot.slane %v4020_v49, 1  ;;  %v4391_v36 = vrot.slane %v15069_v12, 2  ;;  %v4233_v49 = vsel %vm1992_vm2, %v4230_v56, %v4232_v25  ;;  %v4029_v56 = vshrl.u32 %v13365_v18, 16 }
 0x4e5   :  { %4276 = vrot.lane.b32.xlu2 %v4233_v49, %s9661_s24  ;;  %v15077_v49 = vshrl.u32 %v13057_v55, 16 }
 0x4e6   :  { %v13548_v0 = vpop.permute.xlu2 %3838  ;;  %v4026_v34 = vor.u32 %v4025_v1, %v4022_v39  ;;  %v4032_v1 = vshll.u32 %v13365_v18, 16  ;;  %v15076_v39 = vunpack.c.l.b16 %v13005_v47  ;;  %v4031_v18 = vrot.slane %v4029_v56, 1 }
 0x4e7   :  { %15064 = vst [vmem:[#allocation18_spill] sm:$0xff] %v13548_v0  ;;  %v13562_v0 = vpack.c.b16 %v15068_v63, %v15066_v20  ;;  %v4392_v20 = vrot.slane %v15070_v62, 3 }
 0x4e8   :  { %v13566_v41 = vpop.permute.xlu0 %3834 }
 0x4e9   :  { %v3937_v51 = vrot.slane %v13562_v0, 1  ;;  %v4393_v7 = vor.u32 %v4392_v20, %v4391_v36  ;;  %v9380_v20 = vld [vmem:[#allocation2 + $0x40] sm:$0xff] }
 0x4ea   :  { %5630 = vmatpush.bf16.msra.mxu3 %v9380_v20 }
 0x4eb   :  { %v3938_v5 = vsel %vm1545_vm1, %v3935_v52, %v3937_v51  ;;  %v4018_v52 = vor.u32 %v4017_v38, %v4014_v28  ;;  %v4394_v63 = vsel %vm2191_vm6, %v4389_v43, %v4393_v7  ;;  %v15074_v38 = vld [vmem:[#allocation28_spill] sm:$0xff] }
 0x4ec   :  { %3981 = vrot.lane.b32.xlu0 %v3938_v5, %s9661_s24  ;;  %v13574_v14 = vpop.permute.xlu1 %3836  ;;  %4468 = vrot.lane.b32.xlu1 %v4394_v63, %s9661_s24  ;;  %v4553_v5 = vsel %vm2448_vm8, %v12835_v35, %v13491_v27  ;;  %v15075_v28 = vunpack.c.l.b16 %v15074_v38  ;;  %v15078_v63 = vshll.u32 %v13057_v55, 16 }
 0x4ed   :  { %v4027_v12 = vsel %vm1767_vm3, %v4018_v52, %v4026_v34  ;;  %v4395_v52 = vrot.slane %v15077_v49, 2 }
 0x4ee   :  { %v13576_v33 = vpop.permute.xlu2 %3844  ;;  %v13597_v27 = vpack.c.b16 %v15076_v39, %v15075_v28 }
 0x4ef   :  { %15071 = vst [vmem:[#allocation19_spill] sm:$0xff] %v13576_v33 }
 0x4f2   :  { %v13586_v62 = vpop.permute.xlu0 %3840  ;;  %5200 = vmatmul.bf16.gmra.mxu3 %v4553_v5  ;;  %v4034_v5 = vrot.slane %v4032_v1, 2  ;;  %v3850_v1 = vrot.slane %v15046_v40, 1 }
 0x4f3   :  { %15072 = vst [vmem:[#allocation24_spill] sm:$0xff] %v13586_v62  ;;  %v4234_v62 = vrot.slane %v13562_v0, 2 }
 0x4f4   :  { %v4035_v56 = vor.u32 %v4034_v5, %v4031_v18 }
 0x4f6   :  { %v13588_v33 = vpop.permute.xlu1 %3842  ;;  %v4263_v36 = vpop.permute.xlu2 %4262  ;;  %v4036_v49 = vsel %vm1767_vm3, %v4026_v34, %v4035_v56 }
 0x4f7   :  { %15073 = vst [vmem:[#allocation25_spill] sm:$0xff] %v13588_v33  ;;  %v4707_v43 = vsel %vm2448_vm8, %v4027_v12, %v4263_v36  ;;  %v4396_v33 = vrot.slane %v15078_v63, 3  ;;  %v3939_v12 = vrot.slane %v13597_v27, 1 }
 0x4f8   :  { %5409 = vmatmul.bf16.vlgmr.msrb.gmra.mxu2 %v4707_v43  ;;  %v4235_v43 = vsel %vm1992_vm2, %v4232_v25, %v4234_v62  ;;  %v4311_v25 = vrot.slane %v12813_v21, 2 }
 0x4f9   :  { %v4397_v36 = vor.u32 %v4396_v33, %v4395_v52  ;;  %v3940_v47 = vsel %vm1545_vm1, %v3937_v51, %v3939_v12  ;;  %4278 = vrot.lane.b32.xlu2 %v4235_v43, %s9661_s24  ;;  %v3851_v33 = vrot.slane %v12813_v21, 1  ;;  %v4312_v51 = vrot.slane %v12829_v11, 2 }
 0x4fa   :  { %3983 = vrot.lane.b32.xlu0 %v3940_v47, %s9661_s24  ;;  %v4038_v47 = vshrl.u32 %v13379_v50, 16 }
 0x4fb   :  { %v4398_v28 = vsel %vm2191_vm6, %v4393_v7, %v4397_v36  ;;  %v3852_v52 = vsel %vm1545_vm1, %v3850_v1, %v3851_v33  ;;  %v4556_v7 = vsel %vm2448_vm8, %v12879_v8, %v13465_v46  ;;  %v4313_v63 = vsel %vm1992_vm2, %v4311_v25, %v4312_v51 }
 0x4fc   :  { %4470 = vrot.lane.b32.xlu1 %v4398_v28, %s9661_s24  ;;  %v4041_v28 = vshll.u32 %v13379_v50, 16  ;;  %v15079_v46 = vunpack.c.l.b16 %v13018_v45  ;;  %v15080_v1 = vunpack.c.l.b16 %v13027_v58  ;;  %v4236_v50 = vrot.slane %v13597_v27, 2 }
 0x4fd   :  { %v13608_v38 = vpop.permute.xlu0 %3846  ;;  %v3853_v58 = vrot.slane %v12829_v11, 1 }
 0x4fe   :  { %v13612_v39 = vpop.permute.xlu1 %3848  ;;  %v4265_v20 = vpop.permute.xlu2 %4264  ;;  %v13634_v25 = vpack.c.b16 %v15080_v1, %v15079_v46  ;;  %v4314_v46 = vrot.slane %v12835_v35, 2 }
 0x4ff   :  { %v4711_v40 = vsel %vm2448_vm8, %v4036_v49, %v4265_v20  ;;  %v15081_v20 = vshrl.u32 %v13073_v44, 16 }
 0x501   :  { %v4399_v49 = vrot.slane %v15081_v20, 2 }
 0x502   :  { %5205 = vmatmul.bf16.gmra.mxu3 %v4556_v7  ;;  %v4040_v7 = vrot.slane %v4038_v47, 1 }
 0x505   :  { %v3966_v18 = vpop.permute.xlu0 %3965 }
 0x506   :  { %v4615_v5 = vsel %vm2448_vm8, %v3852_v52, %v3966_v18  ;;  %v4453_v43 = vpop.permute.xlu1 %4452  ;;  %v15082_v52 = vshll.u32 %v13073_v44, 16 }
 0x507   :  { %5297 = vmatmul.bf16.vlgmr.msrb.gmra.mxu1 %v4615_v5  ;;  %v4799_v34 = vsel %vm2448_vm8, %v4313_v63, %v4453_v43  ;;  %v4043_v5 = vrot.slane %v4041_v28, 2  ;;  %v3941_v63 = vrot.slane %v13634_v25, 1  ;;  %v3854_v28 = vsel %vm1545_vm1, %v3851_v33, %v3853_v58 }
 0x508   :  { %5521 = vmatmul.bf16.vlgmr.msrb.gmra.mxu0 %v4799_v34  ;;  %5414 = vmatmul.bf16.gmra.mxu2 %v4711_v40  ;;  %v4400_v18 = vrot.slane %v15082_v52, 3  ;;  %v4237_v40 = vsel %vm1992_vm2, %v4234_v62, %v4236_v50  ;;  %v4315_v62 = vsel %vm1992_vm2, %v4312_v51, %v4314_v46  ;;  %v4559_v52 = vsel %vm2448_vm8, %v13013_v3, %v13485_v26  ;;  %v15084_v51 = vld [vmem:[#allocation31_spill] sm:$0xff] }
 0x509   :  { %v3942_v45 = vsel %vm1545_vm1, %v3939_v12, %v3941_v63  ;;  %4280 = vrot.lane.b32.xlu2 %v4237_v40, %s9661_s24  ;;  %v4044_v1 = vor.u32 %v4043_v5, %v4040_v7  ;;  %v4267_v12 = vpop.permute.xlu2 %4266  ;;  %v4047_v5 = vshrl.u32 %v13399_v10, 16  ;;  %v4050_v33 = vshll.u32 %v13399_v10, 16 }
 0x50a   :  { %v4401_v43 = vor.u32 %v4400_v18, %v4399_v49  ;;  %3985 = vrot.lane.b32.xlu0 %v3942_v45, %s9661_s24  ;;  %v15085_v40 = vunpack.c.l.b16 %v15084_v51  ;;  %v15086_v26 = vshrl.u32 %v13086_v57, 16 }
 0x50b   :  { %v4045_v49 = vsel %vm1767_vm3, %v4035_v56, %v4044_v1  ;;  %v15083_v56 = vunpack.c.l.b16 %v13036_v6  ;;  %v4052_v10 = vrot.slane %v4050_v33, 2 }
 0x50c   :  { %v4402_v34 = vsel %vm2191_vm6, %v4397_v36, %v4401_v43  ;;  %v4715_v7 = vsel %vm2448_vm8, %v4045_v49, %v4267_v12 }
 0x50d   :  { %4472 = vrot.lane.b32.xlu1 %v4402_v34, %s9661_s24  ;;  %v3968_v47 = vpop.permute.xlu0 %3967  ;;  %v13665_v45 = vpack.c.b16 %v15085_v40, %v15083_v56  ;;  %v4403_v34 = vrot.slane %v15086_v26, 2  ;;  %v4562_v26 = vsel %vm2448_vm8, %v12898_v30, %v13511_v31  ;;  %v4318_v31 = vrot.slane %v13013_v3, 2 }
 0x50e   :  { %v4455_v20 = vpop.permute.xlu1 %4454  ;;  %v4619_v36 = vsel %vm2448_vm8, %v3854_v28, %v3968_v47  ;;  %v15087_v47 = vshll.u32 %v13086_v57, 16 }
 0x50f   :  { %v4803_v18 = vsel %vm2448_vm8, %v4315_v62, %v4455_v20  ;;  %v4238_v20 = vrot.slane %v13634_v25, 2  ;;  %v4049_v62 = vrot.slane %v4047_v5, 1  ;;  %v3943_v12 = vrot.slane %v13665_v45, 1 }
 0x510   :  { %v4404_v28 = vrot.slane %v15087_v47, 3 }
 0x511   :  { %v3944_v6 = vsel %vm1545_vm1, %v3941_v63, %v3943_v12  ;;  %v4053_v56 = vor.u32 %v4052_v10, %v4049_v62  ;;  %v4269_v63 = vpop.permute.xlu2 %4268  ;;  %v3857_v62 = vrot.slane %v12879_v8, 1 }
 0x512   :  { %5210 = vmatmul.bf16.gmra.mxu3 %v4559_v52  ;;  %v4405_v49 = vor.u32 %v4404_v28, %v4403_v34  ;;  %v4239_v52 = vsel %vm1992_vm2, %v4236_v50, %v4238_v20  ;;  %3987 = vrot.lane.b32.xlu0 %v3944_v6, %s9661_s24  ;;  %v4056_v28 = vshrl.u32 %v13451_v13, 16 }
 0x513   :  { %4282 = vrot.lane.b32.xlu2 %v4239_v52, %s9661_s24  ;;  %v4054_v40 = vsel %vm1767_vm3, %v4044_v1, %v4053_v56  ;;  %v15088_v52 = vld [vmem:[#allocation32_spill] sm:$0xff] }
 0x514   :  { %v4719_v47 = vsel %vm2448_vm8, %v4054_v40, %v4269_v63  ;;  %v15089_v6 = vunpack.c.l.b16 %v15088_v52 }
 0x515   :  { %v3970_v5 = vpop.permute.xlu0 %3969 }
 0x516   :  { %v4457_v51 = vpop.permute.xlu1 %4456 }
 0x517   :  { %5302 = vmatmul.bf16.gmra.mxu1 %v4619_v36  ;;  %v3855_v36 = vrot.slane %v12835_v35, 1 }
 0x518   :  { %5526 = vmatmul.bf16.gmra.mxu0 %v4803_v18  ;;  %5419 = vmatmul.bf16.gmra.mxu2 %v4715_v7  ;;  %v4406_v18 = vsel %vm2191_vm6, %v4401_v43, %v4405_v49  ;;  %v4316_v7 = vrot.slane %v12879_v8, 2 }
 0x519   :  { %4474 = vrot.lane.b32.xlu1 %v4406_v18, %s9661_s24  ;;  %v3856_v33 = vsel %vm1545_vm1, %v3853_v58, %v3855_v36  ;;  %v4059_v58 = vshll.u32 %v13451_v13, 16  ;;  %v15090_v18 = vld [vmem:[#allocation34_spill] sm:$0xff] }
 0x51a   :  { %v4317_v50 = vsel %vm1992_vm2, %v4314_v46, %v4316_v7  ;;  %v4623_v43 = vsel %vm2448_vm8, %v3856_v33, %v3970_v5  ;;  %v4058_v46 = vrot.slane %v4056_v28, 1  ;;  %v15091_v5 = vunpack.c.l.b16 %v15090_v18 }
 0x51b   :  { %v4807_v34 = vsel %vm2448_vm8, %v4317_v50, %v4457_v51  ;;  %v4061_v1 = vrot.slane %v4059_v58, 2  ;;  %v3858_v50 = vsel %vm1545_vm1, %v3855_v36, %v3857_v62  ;;  %v4319_v63 = vsel %vm1992_vm2, %v4316_v7, %v4318_v31 }
 0x51c   :  { %v13698_v33 = vpack.c.b16 %v15091_v5, %v15089_v6  ;;  %v15093_v58 = vshll.u32 %v13127_v19, 16  ;;  %v4565_v36 = vsel %vm2448_vm8, %v15043_v29, %v13513_v2  ;;  %v4065_v18 = vshrl.u32 %v13471_v59, 16 }
 0x51d   :  { %v4062_v10 = vor.u32 %v4061_v1, %v4058_v46  ;;  %v3972_v13 = vpop.permute.xlu0 %3971  ;;  %v4240_v1 = vrot.slane %v13665_v45, 2  ;;  %v4068_v5 = vshll.u32 %v13471_v59, 16  ;;  %v15096_v59 = vunpack.c.l.b16 %v13114_v17 }
 0x51e   :  { %v3945_v51 = vrot.slane %v13698_v33, 1  ;;  %v4459_v40 = vpop.permute.xlu1 %4458  ;;  %v4408_v46 = vrot.slane %v15093_v58, 3  ;;  %v4627_v7 = vsel %vm2448_vm8, %v3858_v50, %v3972_v13  ;;  %v4067_v2 = vrot.slane %v4065_v18, 1 }
 0x51f   :  { %v4241_v6 = vsel %vm1992_vm2, %v4238_v20, %v4240_v1  ;;  %v4070_v13 = vrot.slane %v4068_v5, 2  ;;  %v3859_v50 = vrot.slane %v13013_v3, 1  ;;  %v4320_v20 = vrot.slane %v12898_v30, 2 }
 0x520   :  { %4284 = vrot.lane.b32.xlu2 %v4241_v6, %s9661_s24  ;;  %v15098_v17 = vshll.u32 %v13157_v22, 16  ;;  %v4242_v5 = vrot.slane %v13698_v33, 2 }
 0x521   :  { %v4321_v58 = vsel %vm1992_vm2, %v4318_v31, %v4320_v20 }
 0x522   :  { %5215 = vmatmul.bf16.gmra.mxu3 %v4562_v26  ;;  %v4271_v26 = vpop.permute.xlu2 %4270  ;;  %v4412_v18 = vrot.slane %v15098_v17, 3 }
 0x527   :  { %5307 = vmatmul.bf16.gmra.mxu1 %v4623_v43  ;;  %v4063_v43 = vsel %vm1767_vm3, %v4053_v56, %v4062_v10  ;;  %v4811_v56 = vsel %vm2448_vm8, %v4319_v63, %v4459_v40  ;;  %v4071_v63 = vor.u32 %v4070_v13, %v4067_v2  ;;  %v15094_v40 = vld [vmem:[#allocation35_spill] sm:$0xff]  ;;  %v4243_v2 = vsel %vm1992_vm2, %v4240_v1, %v4242_v5 }
 0x528   :  { %5531 = vmatmul.bf16.gmra.mxu0 %v4807_v34  ;;  %5424 = vmatmul.bf16.gmra.mxu2 %v4719_v47  ;;  %v3946_v34 = vsel %vm1545_vm1, %v3943_v12, %v3945_v51  ;;  %v15092_v47 = vshrl.u32 %v13127_v19, 16  ;;  %v4723_v12 = vsel %vm2448_vm8, %v4063_v43, %v4271_v26  ;;  %v15095_v26 = vunpack.c.l.b16 %v15094_v40 }
 0x529   :  { %3989 = vrot.lane.b32.xlu0 %v3946_v34, %s9661_s24  ;;  %v4074_v13 = vshrl.u32 %v13499_v54, 16  ;;  %v4077_v40 = vshll.u32 %v13499_v54, 16  ;;  %4286 = vrot.lane.b32.xlu2 %v4243_v2, %s9661_s24  ;;  %v3861_v1 = vrot.slane %v12898_v30, 1  ;;  %v15099_v54 = vunpack.c.l.b16 %v13119_v24 }
 0x52a   :  { %v4407_v28 = vrot.slane %v15092_v47, 2  ;;  %v3974_v47 = vpop.permute.xlu0 %3973  ;;  %v15101_v24 = vshrl.u32 %v13173_v60, 16 }
 0x52c   :  { %v4409_v52 = vor.u32 %v4408_v46, %v4407_v28  ;;  %v3860_v28 = vsel %vm1545_vm1, %v3857_v62, %v3859_v50  ;;  %v4461_v46 = vpop.permute.xlu1 %4460  ;;  %v4568_v62 = vsel %vm2448_vm8, %v12949_v9, %v13493_v37 }
 0x52d   :  { %v4631_v31 = vsel %vm2448_vm8, %v3860_v28, %v3974_v47  ;;  %v4079_v47 = vrot.slane %v4077_v40, 2  ;;  %v4322_v28 = vrot.slane %v15043_v29, 2 }
 0x52e   :  { %v4410_v34 = vsel %vm2191_vm6, %v4405_v49, %v4409_v52  ;;  %v13729_v49 = vpack.c.b16 %v15096_v59, %v15095_v26  ;;  %v4076_v59 = vrot.slane %v4074_v13, 1 }
 0x52f   :  { %4476 = vrot.lane.b32.xlu1 %v4410_v34, %s9661_s24 }
 0x530   :  { %v3947_v43 = vrot.slane %v13729_v49, 1 }
 0x532   :  { %5220 = vmatmul.bf16.gmra.mxu3 %v4565_v36  ;;  %v4273_v36 = vpop.permute.xlu2 %4272 }
 0x537   :  { %5312 = vmatmul.bf16.gmra.mxu1 %v4627_v7  ;;  %v4072_v7 = vsel %vm1767_vm3, %v4062_v10, %v4071_v63  ;;  %v4815_v10 = vsel %vm2448_vm8, %v4321_v58, %v4461_v46  ;;  %v4080_v58 = vor.u32 %v4079_v47, %v4076_v59  ;;  %v4086_v59 = vshll.u32 %v13531_v32, 16 }
 0x538   :  { %5536 = vmatmul.bf16.gmra.mxu0 %v4811_v56  ;;  %5429 = vmatmul.bf16.gmra.mxu2 %v4723_v12  ;;  %v3948_v56 = vsel %vm1545_vm1, %v3945_v51, %v3947_v43  ;;  %v15097_v12 = vshrl.u32 %v13157_v22, 16  ;;  %v4727_v51 = vsel %vm2448_vm8, %v4072_v7, %v4273_v36  ;;  %v3976_v7 = vpop.permute.xlu0 %3975 }
 0x539   :  { %3991 = vrot.lane.b32.xlu0 %v3948_v56, %s9661_s24  ;;  %v3862_v56 = vsel %vm1545_vm1, %v3859_v50, %v3861_v1  ;;  %v4244_v50 = vrot.slane %v13729_v49, 2 }
 0x53a   :  { %v4411_v6 = vrot.slane %v15097_v12, 2  ;;  %v4463_v12 = vpop.permute.xlu1 %4462  ;;  %v4635_v2 = vsel %vm2448_vm8, %v3862_v56, %v3976_v7  ;;  %v9379_v7 = vld [vmem:[#allocation2] sm:$0xff]  ;;  %v4324_v56 = vrot.slane %v12949_v9, 2 }
 0x53b   :  { %v4245_v40 = vsel %vm1992_vm2, %v4242_v5, %v4244_v50  ;;  %v3863_v5 = vrot.slane %v15043_v29, 1  ;;  %5631 = vmatpush.bf16.msra.mxu3 %v9379_v7 }
 0x53c   :  { %v4413_v34 = vor.u32 %v4412_v18, %v4411_v6  ;;  %v4323_v6 = vsel %vm1992_vm2, %v4320_v20, %v4322_v28  ;;  %v4275_v18 = vpop.permute.xlu2 %4274  ;;  %v4571_v20 = vsel %vm2448_vm8, %v15059_v48, %v13521_v4  ;;  %4288 = vrot.lane.b32.xlu2 %v4245_v40, %s9661_s24  ;;  %v15107_v40 = vshll.u32 %v13218_v23, 16 }
 0x53e   :  { %v4414_v26 = vsel %vm2191_vm6, %v4409_v52, %v4413_v34  ;;  %v15100_v52 = vunpack.c.l.b16 %v13132_v42  ;;  %v4415_v42 = vrot.slane %v15101_v24, 2  ;;  %v3864_v24 = vsel %vm1545_vm1, %v3861_v1, %v3863_v5 }
 0x53f   :  { %4478 = vrot.lane.b32.xlu1 %v4414_v26, %s9661_s24  ;;  %v4083_v26 = vshrl.u32 %v13531_v32, 16  ;;  %v4574_v1 = vsel %vm2448_vm8, %v12994_v15, %v13523_v53 }
 0x540   :  { %v13762_v46 = vpack.c.b16 %v15100_v52, %v15099_v54  ;;  %v4088_v52 = vrot.slane %v4086_v59, 2 }
 0x541   :  { %v4085_v54 = vrot.slane %v4083_v26, 1  ;;  %v4420_v26 = vrot.slane %v15107_v40, 3 }
 0x542   :  { %5225 = vmatmul.bf16.gmra.mxu3 %v4568_v62  ;;  %v3949_v36 = vrot.slane %v13762_v46, 1  ;;  %v4081_v62 = vsel %vm1767_vm3, %v4071_v63, %v4080_v58  ;;  %v4819_v63 = vsel %vm2448_vm8, %v4323_v6, %v4463_v12  ;;  %v15104_v12 = vld [vmem:[#allocation36_spill] sm:$0xff] }
 0x543   :  { %v4089_v32 = vor.u32 %v4088_v52, %v4085_v54  ;;  %v15105_v6 = vunpack.c.l.b16 %v15104_v12  ;;  %v4092_v54 = vshrl.u32 %v13562_v0, 16  ;;  %v4095_v52 = vshll.u32 %v13562_v0, 16 }
 0x544   :  { %v4326_v0 = vrot.slane %v15059_v48, 2 }
 0x545   :  { %v13754_v37 = vpop.f32.mrf.mxu3  ;;  %v4094_v12 = vrot.slane %v4092_v54, 1 }
 0x547   :  { %5317 = vmatmul.bf16.gmra.mxu1 %v4631_v31  ;;  %v3950_v31 = vsel %vm1545_vm1, %v3947_v43, %v3949_v36  ;;  %v4731_v43 = vsel %vm2448_vm8, %v4081_v62, %v4275_v18 }
 0x548   :  { %5541 = vmatmul.bf16.gmra.mxu0 %v4815_v10  ;;  %5434 = vmatmul.bf16.gmra.mxu2 %v4727_v51  ;;  %v15102_v10 = vshll.u32 %v13173_v60, 16 }
 0x549   :  { %3993 = vrot.lane.b32.xlu0 %v3950_v31, %s9661_s24  ;;  %v3978_v31 = vpop.permute.xlu0 %3977 }
 0x54a   :  { %v4416_v51 = vrot.slane %v15102_v10, 3  ;;  %v4325_v10 = vsel %vm1992_vm2, %v4322_v28, %v4324_v56  ;;  %v4639_v28 = vsel %vm2448_vm8, %v3864_v24, %v3978_v31  ;;  %v3865_v31 = vrot.slane %v12949_v9, 1 }
 0x54c   :  { %v4417_v13 = vor.u32 %v4416_v51, %v4415_v42  ;;  %v4465_v42 = vpop.permute.xlu1 %4464 }
 0x54d   :  { %v13767_v17 = vpop.f32.mrf.mxu3 }
 0x54e   :  { %v4418_v47 = vsel %vm2191_vm6, %v4413_v34, %v4417_v13  ;;  %v15103_v34 = vunpack.c.l.b16 %v13137_v16  ;;  %v15106_v16 = vshrl.u32 %v13218_v23, 16 }
 0x54f   :  { %4480 = vrot.lane.b32.xlu1 %v4418_v47, %s9661_s24  ;;  %v4246_v47 = vrot.slane %v13762_v46, 2 }
 0x550   :  { %v13797_v18 = vpack.c.b16 %v15105_v6, %v15103_v34  ;;  %v4097_v6 = vrot.slane %v4095_v52, 2 }
 0x551   :  { %v4247_v34 = vsel %vm1992_vm2, %v4244_v50, %v4246_v47  ;;  %v15110_v50 = vunpack.c.l.b16 %v13183_v61 }
 0x552   :  { %5229 = vmatmul.bf16.gmra.mxu3 %v4571_v20  ;;  %v3951_v62 = vrot.slane %v13797_v18, 1  ;;  %v4277_v20 = vpop.permute.xlu2 %4276  ;;  %4290 = vrot.lane.b32.xlu2 %v4247_v34, %s9661_s24  ;;  %v4098_v24 = vor.u32 %v4097_v6, %v4094_v12  ;;  %v4248_v12 = vrot.slane %v13797_v18, 2  ;;  %v4101_v6 = vshrl.u32 %v13597_v27, 16 }
 0x555   :  { %v13789_v4 = vpop.f32.mrf.mxu3 }
 0x557   :  { %5322 = vmatmul.bf16.gmra.mxu1 %v4635_v2  ;;  %v4090_v2 = vsel %vm1767_vm3, %v4080_v58, %v4089_v32  ;;  %v4823_v58 = vsel %vm2448_vm8, %v4325_v10, %v4465_v42 }
 0x558   :  { %5546 = vmatmul.bf16.gmra.mxu0 %v4819_v63  ;;  %5439 = vmatmul.bf16.gmra.mxu2 %v4731_v43  ;;  %v3952_v63 = vsel %vm1545_vm1, %v3949_v36, %v3951_v62  ;;  %v4419_v43 = vrot.slane %v15106_v16, 2  ;;  %v4735_v36 = vsel %vm2448_vm8, %v4090_v2, %v4277_v20  ;;  %v3980_v2 = vpop.permute.xlu0 %3979  ;;  %v4467_v16 = vpop.permute.xlu1 %4466 }
 0x559   :  { %3995 = vrot.lane.b32.xlu0 %v3952_v63, %s9661_s24  ;;  %v3866_v63 = vsel %vm1545_vm1, %v3863_v5, %v3865_v31 }
 0x55a   :  { %v4421_v59 = vor.u32 %v4420_v26, %v4419_v43  ;;  %v4327_v43 = vsel %vm1992_vm2, %v4324_v56, %v4326_v0  ;;  %v4279_v26 = vpop.permute.xlu2 %4278  ;;  %v4643_v56 = vsel %vm2448_vm8, %v3866_v63, %v3980_v2  ;;  %v4103_v63 = vrot.slane %v4101_v6, 1 }
 0x55c   :  { %v4422_v7 = vsel %vm2191_vm6, %v4417_v13, %v4421_v59  ;;  %v15108_v13 = vld [vmem:[#allocation37_spill] sm:$0xff] }
 0x55d   :  { %v13802_v51 = vpop.f32.mrf.mxu3  ;;  %4482 = vrot.lane.b32.xlu1 %v4422_v7, %s9661_s24  ;;  %v15109_v42 = vunpack.c.l.b16 %v15108_v13  ;;  %v15114_v7 = vld [vmem:[#allocation13_spill] sm:$0xff]  ;;  %v4104_v13 = vshll.u32 %v13597_v27, 16  ;;  %v4328_v27 = vrot.slane %v12994_v15, 2 }
 0x55e   :  { %v4577_v5 = vsel %vm2448_vm8, %v13057_v55, %v15114_v7 }
 0x55f   :  { %v13832_v10 = vpack.c.b16 %v15110_v50, %v15109_v42  ;;  %v4249_v50 = vsel %vm1992_vm2, %v4246_v47, %v4248_v12 }
 0x560   :  { %4292 = vrot.lane.b32.xlu2 %v4249_v50, %s9661_s24  ;;  %v3982_v7 = vpop.permute.xlu0 %3981  ;;  %v15119_v50 = vld [vmem:[#allocation43_spill] sm:$0xff] }
 0x561   :  { %v3953_v20 = vrot.slane %v13832_v10, 1  ;;  %v4250_v9 = vrot.slane %v13832_v10, 2 }
 0x562   :  { %5232 = vmatmul.bf16.gmra.mxu3 %v4574_v1  ;;  %v4099_v1 = vsel %vm1767_vm3, %v4089_v32, %v4098_v24  ;;  %v4827_v32 = vsel %vm2448_vm8, %v4327_v43, %v4467_v16  ;;  %v4106_v16 = vrot.slane %v4104_v13, 2 }
 0x563   :  { %v4281_v6 = vpop.permute.xlu2 %4280 }
 0x565   :  { %v13824_v53 = vpop.f32.mrf.mxu3 }
 0x567   :  { %5327 = vmatmul.bf16.gmra.mxu1 %v4639_v28  ;;  %v3954_v28 = vsel %vm1545_vm1, %v3951_v62, %v3953_v20  ;;  %v4739_v62 = vsel %vm2448_vm8, %v4099_v1, %v4279_v26  ;;  %v3867_v26 = vrot.slane %v15059_v48, 1  ;;  %v15115_v1 = vld [vmem:[#allocation38_spill] sm:$0xff] }
 0x568   :  { %5551 = vmatmul.bf16.gmra.mxu0 %v4823_v58  ;;  %5444 = vmatmul.bf16.gmra.mxu2 %v4735_v36  ;;  %v15111_v58 = vld [vmem:[#allocation42_spill] sm:$0xff]  ;;  %v15116_v47 = vunpack.c.l.b16 %v15115_v1  ;;  %v15121_v1 = vshll.u32 %v15119_v50, 16 }
 0x569   :  { %v15112_v36 = vshrl.u32 %v15111_v58, 16  ;;  %v15113_v54 = vshll.u32 %v15111_v58, 16  ;;  %3997 = vrot.lane.b32.xlu0 %v3954_v28, %s9661_s24  ;;  %v15117_v28 = vld [vmem:[#allocation39_spill] sm:$0xff] }
 0x56b   :  { %v4423_v61 = vrot.slane %v15112_v36, 2  ;;  %v4424_v52 = vrot.slane %v15113_v54, 3  ;;  %v15118_v36 = vunpack.c.l.b16 %v15117_v28  ;;  %v13872_v54 = vld [vmem:[%s14668_s6] ss:$0 sm:$0xff] }
 0x56c   :  { %v5187_v28 = vadd.f32 %v13872_v54, %v13754_v37  ;;  %v4110_v37 = vshrl.u32 %v13634_v25, 16 }
 0x56d   :  { %v13837_v40 = vpop.f32.mrf.mxu3  ;;  %v4425_v34 = vor.u32 %v4424_v52, %v4423_v61  ;;  %v13867_v61 = vpack.c.b16 %v15118_v36, %v15116_v47  ;;  %v4428_v47 = vrot.slane %v15121_v1, 3 }
 0x56f   :  { %v4426_v42 = vsel %vm2191_vm6, %v4421_v59, %v4425_v34  ;;  %v4107_v59 = vor.u32 %v4106_v16, %v4103_v63  ;;  %v3955_v52 = vrot.slane %v13867_v61, 1  ;;  %v15120_v63 = vshrl.u32 %v15119_v50, 16 }
 0x570   :  { %4484 = vrot.lane.b32.xlu1 %v4426_v42, %s9661_s24 }
 0x571   :  { %v4108_v13 = vsel %vm1767_vm3, %v4098_v24, %v4107_v59  ;;  %v3956_v42 = vsel %vm1545_vm1, %v3953_v20, %v3955_v52  ;;  %v4427_v16 = vrot.slane %v15120_v63, 2 }
 0x572   :  { %5235 = vmatmul.bf16.gmra.mxu3 %v4577_v5  ;;  %v3868_v5 = vsel %vm1545_vm1, %v3865_v31, %v3867_v26  ;;  %3999 = vrot.lane.b32.xlu0 %v3956_v42, %s9661_s24  ;;  %v4743_v30 = vsel %vm2448_vm8, %v4108_v13, %v4281_v6  ;;  %v4113_v42 = vshll.u32 %v13634_v25, 16  ;;  %v5189_v25 = vadd.f32 %v13872_v54, %v13767_v17  ;;  %v15126_v13 = vld [vmem:[#allocation41_spill] sm:$0xff]  ;;  %v3984_v17 = vpop.permute.xlu0 %3983 }
 0x573   :  { %v4647_v24 = vsel %vm2448_vm8, %v3868_v5, %v3982_v7  ;;  %v4429_v20 = vor.u32 %v4428_v47, %v4427_v16  ;;  %v4112_v5 = vrot.slane %v4110_v37, 1  ;;  %v3869_v6 = vrot.slane %v12994_v15, 1 }
 0x574   :  { %v15127_v16 = vunpack.c.l.b16 %v15126_v13 }
 0x575   :  { %v13859_v2 = vpop.f32.mrf.mxu3  ;;  %v4430_v3 = vsel %vm2191_vm6, %v4425_v34, %v4429_v20 }
 0x577   :  { %5332 = vmatmul.bf16.gmra.mxu1 %v4643_v56  ;;  %v4469_v56 = vpop.permute.xlu1 %4468 }
 0x578   :  { %5556 = vmatmul.bf16.gmra.mxu0 %v4827_v32  ;;  %5449 = vmatmul.bf16.gmra.mxu2 %v4739_v62  ;;  %v4329_v32 = vsel %vm1992_vm2, %v4326_v0, %v4328_v27  ;;  %v15122_v0 = vld [vmem:[#allocation12_spill] sm:$0xff] }
 0x579   :  { %v4580_v36 = vsel %vm2448_vm8, %v13073_v44, %v15122_v0  ;;  %v4831_v1 = vsel %vm2448_vm8, %v4329_v32, %v4469_v56  ;;  %v4251_v0 = vsel %vm1992_vm2, %v4248_v12, %v4250_v9  ;;  %4486 = vrot.lane.b32.xlu1 %v4430_v3, %s9661_s24  ;;  %v4115_v56 = vrot.slane %v4113_v42, 2 }
 0x57a   :  { %4294 = vrot.lane.b32.xlu2 %v4251_v0, %s9661_s24  ;;  %v4283_v0 = vpop.permute.xlu2 %4282 }
 0x57b   :  { %v5410_v43 = vpop.f32.mrf.mxu2 }
 0x57d   :  { %v13877_v62 = vpop.f32.mrf.mxu3 }
 0x582   :  { %5238 = vmatmul.bf16.gmra.mxu3 %v4580_v36 }
 0x583   :  { %v5412_v31 = vpop.f32.mrf.mxu2 }
 0x584   :  { %v5298_v48 = vpop.f32.mrf.mxu1 }
 0x585   :  { %v5299_v63 = vadd.f32 %v5298_v48, %v5187_v28  ;;  %v5522_v29 = vpop.f32.mrf.mxu0  ;;  %v13903_v48 = vpop.f32.mrf.mxu3 }
 0x587   :  { %v5411_v8 = vadd.f32 %v5410_v43, %v5299_v63  ;;  %5337 = vmatmul.bf16.gmra.mxu1 %v4647_v24  ;;  %v3870_v63 = vsel %vm1545_vm1, %v3867_v26, %v3869_v6 }
 0x588   :  { %5561 = vmatmul.bf16.gmra.mxu0 %v4831_v1  ;;  %5453 = vmatmul.bf16.gmra.mxu2 %v4743_v30  ;;  %v4116_v30 = vor.u32 %v4115_v56, %v4112_v5  ;;  %v4471_v1 = vpop.permute.xlu1 %4470 }
 0x589   :  { %v13899_v7 = vadd.f32 %v5522_v29, %v5411_v8  ;;  %v4330_v8 = vrot.slane %v13057_v55, 2  ;;  %v15124_v29 = vld [vmem:[#allocation40_spill] sm:$0xff] }
 0x58a   :  { %v15125_v3 = vunpack.c.l.b16 %v15124_v29  ;;  %v4117_v5 = vsel %vm1767_vm3, %v4107_v59, %v4116_v30  ;;  %v5192_v29 = vadd.f32 %v13872_v54, %v13789_v4  ;;  %v4651_v59 = vsel %vm2448_vm8, %v3870_v63, %v3984_v17 }
 0x58b   :  { %15123 = vst [vmem:[#allocation26_spill] sm:$0xff] %v13899_v7  ;;  %v5415_v34 = vpop.f32.mrf.mxu2  ;;  %v4331_v37 = vsel %vm1992_vm2, %v4328_v27, %v4330_v8  ;;  %v15132_v27 = vld [vmem:[#allocation15_spill] sm:$0xff]  ;;  %v4119_v4 = vshrl.u32 %v13665_v45, 16 }
 0x58c   :  { %v5300_v12 = vpop.f32.mrf.mxu1  ;;  %v13913_v47 = vpack.c.b16 %v15127_v16, %v15125_v3  ;;  %v4583_v3 = vsel %vm2448_vm8, %v13086_v57, %v15132_v27  ;;  %v4252_v16 = vrot.slane %v13867_v61, 2 }
 0x58d   :  { %v5301_v43 = vadd.f32 %v5300_v12, %v5189_v25  ;;  %v5524_v32 = vpop.f32.mrf.mxu0  ;;  %v13920_v42 = vpop.f32.mrf.mxu3  ;;  %v15129_v25 = vld [vmem:[#allocation47_spill] sm:$0xff] }
 0x58e   :  { %v3957_v36 = vrot.slane %v13913_v47, 1  ;;  %v15130_v12 = vshrl.u32 %v15129_v25, 16  ;;  %v4253_v27 = vsel %vm1992_vm2, %v4250_v9, %v4252_v16 }
 0x58f   :  { %v5413_v28 = vadd.f32 %v5412_v31, %v5301_v43  ;;  %v15131_v43 = vshll.u32 %v15129_v25, 16  ;;  %4296 = vrot.lane.b32.xlu2 %v4253_v27, %s9661_s24  ;;  %v4285_v27 = vpop.permute.xlu2 %4284 }
 0x590   :  { %v3958_v56 = vsel %vm1545_vm1, %v3955_v52, %v3957_v36  ;;  %v4431_v31 = vrot.slane %v15130_v12, 2 }
 0x591   :  { %v13916_v24 = vadd.f32 %v5524_v32, %v5413_v28  ;;  %v4432_v32 = vrot.slane %v15131_v43, 3  ;;  %4001 = vrot.lane.b32.xlu0 %v3958_v56, %s9661_s24  ;;  %v4835_v43 = vsel %vm2448_vm8, %v4331_v37, %v4471_v1  ;;  %v4122_v56 = vshll.u32 %v13665_v45, 16 }
 0x592   :  { %5241 = vmatmul.bf16.gmra.mxu3 %v4583_v3  ;;  %v4121_v1 = vrot.slane %v4119_v4, 1  ;;  %v5194_v45 = vadd.f32 %v13872_v54, %v13802_v51  ;;  %v3986_v51 = vpop.permute.xlu0 %3985 }
 0x593   :  { %15128 = vst [vmem:[#allocation28_spill] sm:$0xff] %v13916_v24  ;;  %v5417_v26 = vpop.f32.mrf.mxu2  ;;  %v4433_v52 = vor.u32 %v4432_v32, %v4431_v31  ;;  %v4747_v24 = vsel %vm2448_vm8, %v4117_v5, %v4283_v0  ;;  %v4124_v37 = vrot.slane %v4122_v56, 2  ;;  %v3871_v5 = vrot.slane %v13057_v55, 1  ;;  %v15134_v31 = vld [vmem:[#allocation44_spill] sm:$0xff]  ;;  %v15136_v32 = vld [vmem:[#allocation45_spill] sm:$0xff] }
 0x594   :  { %v5303_v13 = vpop.f32.mrf.mxu1 }
 0x595   :  { %v5304_v28 = vadd.f32 %v5303_v13, %v5192_v29  ;;  %v5527_v12 = vpop.f32.mrf.mxu0  ;;  %v4434_v7 = vsel %vm2191_vm6, %v4429_v20, %v4433_v52  ;;  %v13946_v63 = vpop.f32.mrf.mxu3  ;;  %v15137_v29 = vunpack.c.l.b16 %v15136_v32 }
 0x596   :  { %4488 = vrot.lane.b32.xlu1 %v4434_v7, %s9661_s24  ;;  %v15135_v7 = vunpack.c.l.b16 %v15134_v31  ;;  %v5197_v31 = vadd.f32 %v13872_v54, %v13824_v53  ;;  %v4128_v53 = vshrl.u32 %v13698_v33, 16 }
 0x597   :  { %v5416_v15 = vadd.f32 %v5415_v34, %v5304_v28  ;;  %5341 = vmatmul.bf16.gmra.mxu1 %v4651_v59 }
 0x598   :  { %5565 = vmatmul.bf16.gmra.mxu0 %v4835_v43  ;;  %5456 = vmatmul.bf16.gmra.mxu2 %v4747_v24  ;;  %v4125_v24 = vor.u32 %v4124_v37, %v4121_v1  ;;  %v13956_v3 = vpack.c.b16 %v15137_v29, %v15135_v7  ;;  %v4473_v43 = vpop.permute.xlu1 %4472  ;;  %v4254_v29 = vrot.slane %v13913_v47, 2 }
 0x599   :  { %v13942_v17 = vadd.f32 %v5527_v12, %v5416_v15  ;;  %v4332_v15 = vrot.slane %v13073_v44, 2  ;;  %v3872_v12 = vsel %vm1545_vm1, %v3869_v6, %v3871_v5 }
 0x59a   :  { %v3959_v59 = vrot.slane %v13956_v3, 1  ;;  %v4126_v1 = vsel %vm1767_vm3, %v4116_v30, %v4125_v24  ;;  %v4655_v30 = vsel %vm2448_vm8, %v3872_v12, %v3986_v51 }
 0x59b   :  { %15133 = vst [vmem:[#allocation31_spill] sm:$0xff] %v13942_v17  ;;  %v5420_v20 = vpop.f32.mrf.mxu2  ;;  %v4333_v4 = vsel %vm1992_vm2, %v4330_v8, %v4332_v15  ;;  %v15142_v8 = vld [vmem:[#allocation14_spill] sm:$0xff] }
 0x59c   :  { %v5305_v9 = vpop.f32.mrf.mxu1  ;;  %v3960_v37 = vsel %vm1545_vm1, %v3957_v36, %v3959_v59  ;;  %v4586_v7 = vsel %vm2448_vm8, %v13127_v19, %v15142_v8  ;;  %v4255_v8 = vsel %vm1992_vm2, %v4252_v16, %v4254_v29 }
 0x59d   :  { %v5306_v34 = vadd.f32 %v5305_v9, %v5194_v45  ;;  %v5529_v0 = vpop.f32.mrf.mxu0  ;;  %v13963_v56 = vpop.f32.mrf.mxu3  ;;  %v15139_v45 = vld [vmem:[#allocation50_spill] sm:$0xff]  ;;  %4003 = vrot.lane.b32.xlu0 %v3960_v37, %s9661_s24  ;;  %v4131_v37 = vshll.u32 %v13698_v33, 16  ;;  %4298 = vrot.lane.b32.xlu2 %v4255_v8, %s9661_s24  ;;  %v5199_v33 = vadd.f32 %v13872_v54, %v13837_v40 }
 0x59e   :  { %v15140_v9 = vshrl.u32 %v15139_v45, 16  ;;  %v3988_v40 = vpop.permute.xlu0 %3987 }
 0x59f   :  { %v5418_v13 = vadd.f32 %v5417_v26, %v5306_v34  ;;  %v15141_v34 = vshll.u32 %v15139_v45, 16 }
 0x5a0   :  { %v4435_v26 = vrot.slane %v15140_v9, 2 }
 0x5a1   :  { %v13959_v28 = vadd.f32 %v5529_v0, %v5418_v13  ;;  %v4436_v0 = vrot.slane %v15141_v34, 3  ;;  %v4839_v34 = vsel %vm2448_vm8, %v4333_v4, %v4473_v43  ;;  %v4130_v43 = vrot.slane %v4128_v53, 1 }
 0x5a2   :  { %5244 = vmatmul.bf16.gmra.mxu3 %v4586_v7  ;;  %v4133_v4 = vrot.slane %v4131_v37, 2 }
 0x5a3   :  { %15138 = vst [vmem:[#allocation32_spill] sm:$0xff] %v13959_v28  ;;  %v5422_v6 = vpop.f32.mrf.mxu2  ;;  %v4437_v36 = vor.u32 %v4436_v0, %v4435_v26  ;;  %v4751_v28 = vsel %vm2448_vm8, %v4126_v1, %v4285_v27  ;;  %v3873_v1 = vrot.slane %v13073_v44, 1  ;;  %v15145_v0 = vld [vmem:[#allocation49_spill] sm:$0xff] }
 0x5a4   :  { %v5308_v32 = vpop.f32.mrf.mxu1 }
 0x5a5   :  { %v5309_v13 = vadd.f32 %v5308_v32, %v5197_v31  ;;  %v5532_v9 = vpop.f32.mrf.mxu0  ;;  %v4438_v17 = vsel %vm2191_vm6, %v4433_v52, %v4437_v36  ;;  %v13989_v12 = vpop.f32.mrf.mxu3 }
 0x5a6   :  { %4490 = vrot.lane.b32.xlu1 %v4438_v17, %s9661_s24  ;;  %v15143_v17 = vld [vmem:[#allocation46_spill] sm:$0xff] }
 0x5a7   :  { %v5421_v55 = vadd.f32 %v5420_v20, %v5309_v13  ;;  %5344 = vmatmul.bf16.gmra.mxu1 %v4655_v30  ;;  %v15144_v26 = vunpack.c.l.b16 %v15143_v17  ;;  %v3874_v13 = vsel %vm1545_vm1, %v3871_v5, %v3873_v1 }
 0x5a8   :  { %5568 = vmatmul.bf16.gmra.mxu0 %v4839_v34  ;;  %5459 = vmatmul.bf16.gmra.mxu2 %v4751_v28  ;;  %v13995_v28 = vor.u32 %v4133_v4, %v4130_v43  ;;  %v15146_v43 = vld [vmem:[#allocation51_spill] sm:$0xff]  ;;  %v4659_v17 = vsel %vm2448_vm8, %v3874_v13, %v3988_v40 }
 0x5a9   :  { %v13985_v51 = vadd.f32 %v5532_v9, %v5421_v55  ;;  %v4334_v55 = vrot.slane %v13086_v57, 2  ;;  %v14000_v31 = vpack.c.b16 %v15145_v0, %v15144_v26  ;;  %v4475_v9 = vpop.permute.xlu1 %4474  ;;  %v15147_v4 = vshrl.u32 %v15146_v43, 16 }
 0x5aa   :  { %v4135_v37 = vsel %vm1767_vm3, %v4125_v24, %v13995_v28  ;;  %v15148_v5 = vshll.u32 %v15146_v43, 16  ;;  %v4589_v24 = vsel %vm2448_vm8, %v13157_v22, %v13566_v41  ;;  %v14822_v26 = vrot.slane %v13956_v3, 2 }
 0x5ab   :  { %v5425_v52 = vpop.f32.mrf.mxu2  ;;  %v14820_v32 = vrot.slane %v14000_v31, 1  ;;  %v4335_v34 = vsel %vm1992_vm2, %v4332_v15, %v4334_v55 }
 0x5ac   :  { %v5310_v16 = vpop.f32.mrf.mxu1  ;;  %v4257_v40 = vsel %vm1992_vm2, %v4254_v29, %v14822_v26  ;;  %v4258_v26 = vrot.slane %v14000_v31, 2 }
 0x5ad   :  { %v5311_v20 = vadd.f32 %v5310_v16, %v5199_v33  ;;  %v5534_v27 = vpop.f32.mrf.mxu0  ;;  %v14011_v53 = vpop.f32.mrf.mxu3  ;;  %v3962_v8 = vsel %vm1545_vm1, %v3959_v59, %v14820_v32  ;;  %v4439_v33 = vrot.slane %v15147_v4, 2  ;;  %v4440_v16 = vrot.slane %v15148_v5, 3  ;;  %4300 = vrot.lane.b32.xlu2 %v4257_v40, %s9661_s24  ;;  %v15154_v40 = vld [vmem:[#allocation48_spill] sm:$0xff] }
 0x5ae   :  { %4005 = vrot.lane.b32.xlu0 %v3962_v8, %s9661_s24  ;;  %v4843_v5 = vsel %vm2448_vm8, %v4335_v34, %v4475_v9  ;;  %v4137_v32 = vshrl.u32 %v13729_v49, 16  ;;  %v4140_v8 = vshll.u32 %v13729_v49, 16 }
 0x5af   :  { %v5423_v7 = vadd.f32 %v5422_v6, %v5311_v20  ;;  %v4287_v6 = vpop.permute.xlu2 %4286  ;;  %v5202_v20 = vadd.f32 %v13872_v54, %v13859_v2  ;;  %v14029_v59 = vor.u32 %v4440_v16, %v4439_v33 }
 0x5b0   :  { %v4755_v2 = vsel %vm2448_vm8, %v4135_v37, %v4287_v6  ;;  %v4139_v49 = vrot.slane %v4137_v32, 1  ;;  %v4142_v34 = vrot.slane %v4140_v8, 2  ;;  %v15150_v37 = vld [vmem:[#allocation21_spill] sm:$0xff]  ;;  %v14821_v8 = vrot.slane %v13127_v19, 2 }
 0x5b1   :  { %v14003_v30 = vadd.f32 %v5534_v27, %v5423_v7  ;;  %v4442_v41 = vsel %vm2191_vm6, %v4437_v36, %v14029_v59  ;;  %v9378_v36 = vld [vmem:[#allocation2 + $0x100] sm:$0xff]  ;;  %v15151_v6 = vmax.f32 %v15150_v37, 0.0 }
 0x5b2   :  { %5249 = vmatmul.bf16.gmra.mxu3 %v4589_v24  ;;  %4492 = vrot.lane.b32.xlu1 %v4442_v41, %s9661_s24  ;;  %v5204_v24 = vadd.f32 %v13872_v54, %v13877_v62  ;;  %v14057_v41 = vor.u32 %v4142_v34, %v4139_v49  ;;  %v3990_v34 = vpop.permute.xlu0 %3989 }
 0x5b3   :  { %v5427_v15 = vpop.f32.mrf.mxu2  ;;  %v3503_v29 = vpack.c.bf16 %v15151_v6, %v15151_v6  ;;  %5632 = vmatpush.bf16.msra.mxu3 %v9378_v36 }
 0x5b4   :  { %v5313_v27 = vpop.f32.mrf.mxu1 }
 0x5b5   :  { %v5314_v7 = vadd.f32 %v5313_v27, %v5202_v20  ;;  %v5537_v4 = vpop.f32.mrf.mxu0  ;;  %v14045_v9 = vpop.f32.mrf.mxu3 }
 0x5b7   :  { %v5426_v13 = vadd.f32 %v5425_v52, %v5314_v7  ;;  %5347 = vmatmul.bf16.gmra.mxu1 %v4659_v17  ;;  %v15152_v52 = vld [vmem:[#allocation22_spill] sm:$0xff]  ;;  %v3896_v7 = vunpack.c.l.b16 %v3503_v29 }
 0x5b8   :  { %5571 = vmatmul.bf16.gmra.mxu0 %v4843_v5  ;;  %5462 = vmatmul.bf16.gmra.mxu2 %v4755_v2  ;;  %v15153_v16 = vmax.f32 %v15152_v52, 0.0  ;;  %v3875_v2 = vrot.slane %v13086_v57, 1 }
 0x5b9   :  { %v14041_v33 = vadd.f32 %v5537_v4, %v5426_v13  ;;  %v15155_v13 = vunpack.c.l.b16 %v15154_v40  ;;  %v5207_v40 = vadd.f32 %v13872_v54, %v13903_v48  ;;  %v4146_v48 = vshrl.u32 %v13762_v46, 16 }
 0x5ba   :  { %v3504_v20 = vpack.c.bf16 %v15153_v16, %v15153_v16  ;;  %v3876_v49 = vsel %vm1545_vm1, %v3873_v1, %v3875_v2 }
 0x5bb   :  { %15149 = vst [vmem:[#allocation34_spill] sm:$0xff] %v14041_v33  ;;  %v5430_v27 = vpop.f32.mrf.mxu2  ;;  %v14061_v37 = vpack.c.b16 %v3896_v7, %v15155_v13 }
 0x5bc   :  { %v5315_v17 = vpop.f32.mrf.mxu1  ;;  %v4309_v4 = vunpack.c.l.b16 %v3504_v20  ;;  %v4337_v20 = vsel %vm1992_vm2, %v4334_v55, %v14821_v8  ;;  %v4592_v55 = vsel %vm2448_vm8, %v13173_v60, %v13574_v14  ;;  %v15158_v14 = vrot.slane %v13956_v3, 2 }
 0x5bd   :  { %v5316_v5 = vadd.f32 %v5315_v17, %v5204_v24  ;;  %v5539_v32 = vpop.f32.mrf.mxu0  ;;  %v3963_v52 = vrot.slane %v14061_v37, 1  ;;  %v14078_v24 = vpop.f32.mrf.mxu3  ;;  %v4144_v17 = vsel %vm1767_vm3, %v13995_v28, %v14057_v41  ;;  %v4663_v28 = vsel %vm2448_vm8, %v3876_v49, %v3990_v34 }
 0x5be   :  { %v14063_v6 = vpack.c.b16 %v4309_v4, %v3896_v7  ;;  %v4289_v7 = vpop.permute.xlu2 %4288  ;;  %v15157_v4 = vrot.slane %v14000_v31, 1  ;;  %v4259_v49 = vsel %vm1992_vm2, %v15158_v14, %v4258_v26 }
 0x5bf   :  { %v5428_v62 = vadd.f32 %v5427_v15, %v5316_v5  ;;  %v4477_v15 = vpop.permute.xlu1 %4476  ;;  %4302 = vrot.lane.b32.xlu2 %v4259_v49, %s9661_s24  ;;  %v15160_v49 = vld [vmem:[#allocation18_spill] sm:$0xff] }
 0x5c0   :  { %v4444_v36 = vshrl.u32 %v14063_v6, 16  ;;  %v4447_v29 = vshll.u32 %v14063_v6, 16  ;;  %v3964_v5 = vsel %vm1545_vm1, %v15157_v4, %v3963_v52 }
 0x5c1   :  { %v14068_v16 = vadd.f32 %v5539_v32, %v5428_v62  ;;  %4007 = vrot.lane.b32.xlu0 %v3964_v5, %s9661_s24  ;;  %v4149_v5 = vshll.u32 %v13762_v46, 16  ;;  %v4148_v46 = vrot.slane %v4146_v48, 1 }
 0x5c2   :  { %v4446_v1 = vrot.slane %v4444_v36, 2  ;;  %v4449_v32 = vrot.slane %v4447_v29, 3  ;;  %v4847_v36 = vsel %vm2448_vm8, %v4337_v20, %v4477_v15  ;;  %v4759_v29 = vsel %vm2448_vm8, %v4144_v17, %v4289_v7  ;;  %5254 = vmatmul.bf16.gmra.mxu3 %v4592_v55 }
 0x5c3   :  { %15156 = vst [vmem:[#allocation35_spill] sm:$0xff] %v14068_v16  ;;  %v5432_v13 = vpop.f32.mrf.mxu2  ;;  %v4151_v15 = vrot.slane %v4149_v5, 2 }
 0x5c4   :  { %v5318_v62 = vpop.f32.mrf.mxu1  ;;  %v4450_v8 = vor.u32 %v4449_v32, %v4446_v1  ;;  %v3877_v32 = vrot.slane %v13127_v19, 1 }
 0x5c5   :  { %v5319_v16 = vadd.f32 %v5318_v62, %v5207_v40  ;;  %v5542_v4 = vpop.f32.mrf.mxu0  ;;  %v14107_v20 = vpop.f32.mrf.mxu3  ;;  %v4338_v40 = vrot.slane %v13157_v22, 2 }
 0x5c6   :  { %v4451_v33 = vsel %vm2191_vm6, %v14029_v59, %v4450_v8  ;;  %v5209_v59 = vadd.f32 %v13872_v54, %v13920_v42  ;;  %v4291_v5 = vpop.permute.xlu2 %4290 }
 0x5c7   :  { %v5431_v34 = vadd.f32 %v5430_v27, %v5319_v16  ;;  %5350 = vmatmul.bf16.gmra.mxu1 %v4663_v28  ;;  %4494 = vrot.lane.b32.xlu1 %v4451_v33, %s9661_s24  ;;  %v4152_v33 = vor.u32 %v4151_v15, %v4148_v46  ;;  %v3878_v28 = vsel %vm1545_vm1, %v3875_v2, %v3877_v32  ;;  %v4260_v46 = vrot.slane %v14061_v37, 2 }
 0x5c8   :  { %5574 = vmatmul.bf16.gmra.mxu0 %v4847_v36  ;;  %5465 = vmatmul.bf16.gmra.mxu2 %v4759_v29  ;;  %v4479_v36 = vpop.permute.xlu1 %4478  ;;  %v4595_v2 = vsel %vm2448_vm8, %v13218_v23, %v15160_v49 }
 0x5c9   :  { %v14103_v1 = vadd.f32 %v5542_v4, %v5431_v34  ;;  %4009 = vrot.lane.b32.xlu0 %v3963_v52, %s9661_s24  ;;  %v3992_v4 = vpop.permute.xlu0 %3991  ;;  %v15159_v52 = vrot.slane %v13127_v19, 2  ;;  %v4153_v48 = vsel %vm1767_vm3, %v14057_v41, %v4152_v33 }
 0x5ca   :  { %v4763_v41 = vsel %vm2448_vm8, %v4153_v48, %v4291_v5 }
 0x5cb   :  { %v5435_v17 = vpop.f32.mrf.mxu2  ;;  %v4339_v29 = vsel %vm1992_vm2, %v15159_v52, %v4338_v40  ;;  %v5214_v52 = vadd.f32 %v13872_v54, %v13963_v56 }
 0x5cc   :  { %v5320_v27 = vpop.f32.mrf.mxu1 }
 0x5cd   :  { %v5321_v16 = vadd.f32 %v5320_v27, %v5209_v59  ;;  %v5544_v7 = vpop.f32.mrf.mxu0  ;;  %v5228_v42 = vpop.f32.mrf.mxu3  ;;  %v4851_v27 = vsel %vm2448_vm8, %v4339_v29, %v4479_v36 }
 0x5cf   :  { %v5433_v55 = vadd.f32 %v5432_v13, %v5321_v16  ;;  %4496 = vrot.lane.b32.xlu1 %v4450_v8, %s9661_s24  ;;  %v5212_v13 = vadd.f32 %v13872_v54, %v13946_v63  ;;  %v4667_v8 = vsel %vm2448_vm8, %v3878_v28, %v3992_v4  ;;  %v4155_v16 = vshrl.u32 %v13797_v18, 16 }
 0x5d0   :  { %v4158_v63 = vshll.u32 %v13797_v18, 16 }
 0x5d1   :  { %v14114_v62 = vadd.f32 %v5544_v7, %v5433_v55  ;;  %v4261_v7 = vsel %vm1992_vm2, %v4258_v26, %v4260_v46  ;;  %v4157_v42 = vrot.slane %v4155_v16, 1  ;;  %v3879_v26 = vrot.slane %v13157_v22, 1 }
 0x5d2   :  { %5259 = vmatmul.bf16.gmra.mxu3 %v4595_v2  ;;  %4304 = vrot.lane.b32.xlu2 %v4261_v7, %s9661_s24  ;;  %v4160_v36 = vrot.slane %v4158_v63, 2  ;;  %v5217_v16 = vadd.f32 %v13872_v54, %v13989_v12  ;;  %v15161_v7 = vld [vmem:[#allocation24_spill] sm:$0xff] }
 0x5d3   :  { %v5437_v14 = vpop.f32.mrf.mxu2 }
 0x5d4   :  { %v5323_v34 = vpop.f32.mrf.mxu1 }
 0x5d5   :  { %v5324_v15 = vadd.f32 %v5323_v34, %v5212_v13  ;;  %v5547_v59 = vpop.f32.mrf.mxu0  ;;  %v5230_v4 = vpop.f32.mrf.mxu3  ;;  %v4161_v13 = vor.u32 %v4160_v36, %v4157_v42  ;;  %v3880_v34 = vsel %vm1545_vm1, %v3877_v32, %v3879_v26  ;;  %v4167_v36 = vshll.u32 %v13832_v10, 16 }
 0x5d7   :  { %v5436_v55 = vadd.f32 %v5435_v17, %v5324_v15  ;;  %5353 = vmatmul.bf16.gmra.mxu1 %v4667_v8  ;;  %v4340_v17 = vrot.slane %v13173_v60, 2  ;;  %v3994_v8 = vpop.permute.xlu0 %3993  ;;  %v4481_v15 = vpop.permute.xlu1 %4480 }
 0x5d8   :  { %5577 = vmatmul.bf16.gmra.mxu0 %v4851_v27  ;;  %5468 = vmatmul.bf16.gmra.mxu2 %v4763_v41  ;;  %v4162_v27 = vsel %vm1767_vm3, %v4152_v33, %v4161_v13  ;;  %v4293_v41 = vpop.permute.xlu2 %4292  ;;  %v4671_v32 = vsel %vm2448_vm8, %v3880_v34, %v3994_v8  ;;  %v4164_v33 = vshrl.u32 %v13832_v10, 16  ;;  %v4342_v10 = vrot.slane %v13218_v23, 2 }
 0x5d9   :  { %v14135_v28 = vadd.f32 %v5547_v59, %v5436_v55  ;;  %v4341_v56 = vsel %vm1992_vm2, %v4338_v40, %v4340_v17  ;;  %v4767_v40 = vsel %vm2448_vm8, %v4162_v27, %v4293_v41 }
 0x5da   :  { %4306 = vrot.lane.b32.xlu2 %v4260_v46, %s9661_s24  ;;  %v4855_v46 = vsel %vm2448_vm8, %v4341_v56, %v4481_v15  ;;  %v3881_v56 = vrot.slane %v13173_v60, 1 }
 0x5db   :  { %v5440_v29 = vpop.f32.mrf.mxu2 }
 0x5dc   :  { %v5325_v48 = vpop.f32.mrf.mxu1 }
 0x5dd   :  { %v5326_v18 = vadd.f32 %v5325_v48, %v5214_v52  ;;  %v5549_v5 = vpop.f32.mrf.mxu0  ;;  %v5231_v59 = vpop.f32.mrf.mxu3 }
 0x5df   :  { %v5438_v49 = vadd.f32 %v5437_v14, %v5326_v18  ;;  %v4598_v14 = vsel %vm2448_vm8, %v15111_v58, %v15161_v7  ;;  %v4166_v18 = vrot.slane %v4164_v33, 1  ;;  %v3996_v7 = vpop.permute.xlu0 %3995 }
 0x5e1   :  { %v14142_v2 = vadd.f32 %v5549_v5, %v5438_v49  ;;  %v4169_v5 = vrot.slane %v4167_v36, 2  ;;  %v5219_v49 = vadd.f32 %v13872_v54, %v14011_v53 }
 0x5e2   :  { %5264 = vmatmul.bf16.gmra.mxu3 %v4598_v14  ;;  %v4483_v14 = vpop.permute.xlu1 %4482 }
 0x5e3   :  { %v5442_v63 = vpop.f32.mrf.mxu2 }
 0x5e4   :  { %v5328_v55 = vpop.f32.mrf.mxu1 }
 0x5e5   :  { %v5329_v4 = vadd.f32 %v5328_v55, %v5217_v16  ;;  %v5552_v42 = vpop.f32.mrf.mxu0  ;;  %v5233_v48 = vpop.f32.mrf.mxu3  ;;  %v3882_v16 = vsel %vm1545_vm1, %v3879_v26, %v3881_v56 }
 0x5e6   :  { %v4675_v36 = vsel %vm2448_vm8, %v3882_v16, %v3996_v7 }
 0x5e7   :  { %v5441_v52 = vadd.f32 %v5440_v29, %v5329_v4  ;;  %5356 = vmatmul.bf16.gmra.mxu1 %v4671_v32  ;;  %v4170_v29 = vor.u32 %v4169_v5, %v4166_v18  ;;  %v4343_v32 = vsel %vm1992_vm2, %v4340_v17, %v4342_v10  ;;  %v4295_v4 = vpop.permute.xlu2 %4294  ;;  %v4176_v18 = vshll.u32 %v13867_v61, 16 }
 0x5e8   :  { %5580 = vmatmul.bf16.gmra.mxu0 %v4855_v46  ;;  %5473 = vmatmul.bf16.gmra.mxu2 %v4767_v40  ;;  %v15162_v40 = vld [vmem:[#allocation25_spill] sm:$0xff]  ;;  %v4859_v48 = vsel %vm2448_vm8, %v4343_v32, %v4483_v14 }
 0x5e9   :  { %v14158_v12 = vadd.f32 %v5552_v42, %v5441_v52  ;;  %v4171_v53 = vsel %vm1767_vm3, %v4161_v13, %v4170_v29  ;;  %v5222_v42 = vadd.f32 %v13872_v54, %v14045_v9  ;;  %v4173_v13 = vshrl.u32 %v13867_v61, 16 }
 0x5ea   :  { %v4771_v17 = vsel %vm2448_vm8, %v4171_v53, %v4295_v4  ;;  %v4344_v61 = vrot.slane %v15111_v58, 2 }
 0x5eb   :  { %v5445_v34 = vpop.f32.mrf.mxu2 }
 0x5ec   :  { %v5330_v8 = vpop.f32.mrf.mxu1 }
 0x5ed   :  { %v5331_v15 = vadd.f32 %v5330_v8, %v5219_v49  ;;  %v5554_v59 = vpop.f32.mrf.mxu0  ;;  %v5234_v55 = vpop.f32.mrf.mxu3  ;;  %v4175_v8 = vrot.slane %v4173_v13, 1 }
 0x5ee   :  { %v3883_v55 = vrot.slane %v13218_v23, 1 }
 0x5ef   :  { %v5443_v27 = vadd.f32 %v5442_v63, %v5331_v15  ;;  %v4601_v63 = vsel %vm2448_vm8, %v15119_v50, %v15162_v40  ;;  %v4178_v15 = vrot.slane %v4176_v18, 2  ;;  %v4485_v40 = vpop.permute.xlu1 %4484 }
 0x5f0   :  { %v3884_v4 = vsel %vm1545_vm1, %v3881_v56, %v3883_v55 }
 0x5f1   :  { %v14164_v41 = vadd.f32 %v5554_v59, %v5443_v27  ;;  %v5224_v59 = vadd.f32 %v13872_v54, %v14078_v24 }
 0x5f2   :  { %5269 = vmatmul.bf16.gmra.mxu3 %v4601_v63 }
 0x5f3   :  { %v5447_v46 = vpop.f32.mrf.mxu2 }
 0x5f4   :  { %v5333_v33 = vpop.f32.mrf.mxu1 }
 0x5f5   :  { %v5334_v26 = vadd.f32 %v5333_v33, %v5222_v42  ;;  %v5557_v52 = vpop.f32.mrf.mxu0  ;;  %v5236_v49 = vpop.f32.mrf.mxu3  ;;  %v4345_v33 = vsel %vm1992_vm2, %v4342_v10, %v4344_v61 }
 0x5f6   :  { %v3998_v42 = vpop.permute.xlu0 %3997  ;;  %v4185_v49 = vshll.u32 %v13913_v47, 16 }
 0x5f7   :  { %v5446_v5 = vadd.f32 %v5445_v34, %v5334_v26  ;;  %5361 = vmatmul.bf16.gmra.mxu1 %v4675_v36  ;;  %v4179_v34 = vor.u32 %v4178_v15, %v4175_v8  ;;  %v4297_v36 = vpop.permute.xlu2 %4296  ;;  %v5227_v26 = vadd.f32 %v13872_v54, %v14107_v20  ;;  %v4679_v13 = vsel %vm2448_vm8, %v3884_v4, %v3998_v42 }
 0x5f8   :  { %5585 = vmatmul.bf16.gmra.mxu0 %v4859_v48  ;;  %5478 = vmatmul.bf16.gmra.mxu2 %v4771_v17  ;;  %v15163_v48 = vld [vmem:[#allocation19_spill] sm:$0xff]  ;;  %v4346_v4 = vrot.slane %v15119_v50, 2 }
 0x5f9   :  { %v14179_v9 = vadd.f32 %v5557_v52, %v5446_v5  ;;  %v4180_v24 = vsel %vm1767_vm3, %v4170_v29, %v4179_v34  ;;  %v4863_v5 = vsel %vm2448_vm8, %v4345_v33, %v4485_v40  ;;  %v4182_v29 = vshrl.u32 %v13913_v47, 16  ;;  %v4487_v40 = vpop.permute.xlu1 %4486 }
 0x5fa   :  { %v4775_v10 = vsel %vm2448_vm8, %v4180_v24, %v4297_v36  ;;  %v4347_v33 = vsel %vm1992_vm2, %v4344_v61, %v4346_v4  ;;  %v4194_v61 = vshll.u32 %v13956_v3, 16 }
 0x5fb   :  { %v5450_v27 = vpop.f32.mrf.mxu2  ;;  %v4184_v15 = vrot.slane %v4182_v29, 1 }
 0x5fc   :  { %v5335_v16 = vpop.f32.mrf.mxu1 }
 0x5fd   :  { %v5336_v7 = vadd.f32 %v5335_v16, %v5224_v59  ;;  %v5559_v14 = vpop.f32.mrf.mxu0  ;;  %v5237_v63 = vpop.f32.mrf.mxu3  ;;  %v4187_v59 = vrot.slane %v4185_v49, 2  ;;  %v3887_v49 = vrot.slane %v15119_v50, 1 }
 0x5ff   :  { %v5448_v32 = vadd.f32 %v5447_v46, %v5336_v7  ;;  %v4604_v46 = vsel %vm2448_vm8, %v15129_v25, %v15163_v48  ;;  %v4188_v42 = vor.u32 %v4187_v59, %v4184_v15  ;;  %v4299_v36 = vpop.permute.xlu2 %4298  ;;  %v3617_v15 = vpack.c.b16 %v15145_v0, %v15145_v0 }
 0x601   :  { %v14185_v53 = vadd.f32 %v5559_v14, %v5448_v32  ;;  %v3885_v32 = vrot.slane %v15111_v58, 1  ;;  %v4189_v24 = vsel %vm1767_vm3, %v4179_v34, %v4188_v42 }
 0x602   :  { %5274 = vmatmul.bf16.gmra.mxu3 %v4604_v46 }
 0x603   :  { %v5452_v52 = vpop.f32.mrf.mxu2  ;;  %v3886_v47 = vsel %vm1545_vm1, %v3883_v55, %v3885_v32  ;;  %v4779_v55 = vsel %vm2448_vm8, %v4189_v24, %v4299_v36 }
 0x604   :  { %v5338_v17 = vpop.f32.mrf.mxu1  ;;  %v4607_v52 = vsel %vm2448_vm8, %v15139_v45, %v13608_v38 }
 0x605   :  { %v5339_v56 = vadd.f32 %v5338_v17, %v5227_v26  ;;  %v5562_v18 = vpop.f32.mrf.mxu0  ;;  %v5239_v20 = vpop.f32.mrf.mxu3 }
 0x607   :  { %v5451_v8 = vadd.f32 %v5450_v27, %v5339_v56  ;;  %5366 = vmatmul.bf16.gmra.mxu1 %v4679_v13  ;;  %v4000_v27 = vpop.permute.xlu0 %3999  ;;  %v4867_v13 = vsel %vm2448_vm8, %v4347_v33, %v4487_v40  ;;  %v4191_v56 = vshrl.u32 %v13956_v3, 16  ;;  %v3888_v3 = vsel %vm1545_vm1, %v3885_v32, %v3887_v49 }
 0x608   :  { %5590 = vmatmul.bf16.gmra.mxu0 %v4863_v5  ;;  %5483 = vmatmul.bf16.gmra.mxu2 %v4775_v10  ;;  %v4683_v46 = vsel %vm2448_vm8, %v3886_v47, %v4000_v27  ;;  %v4196_v5 = vrot.slane %v4194_v61, 2  ;;  %v4301_v27 = vpop.permute.xlu2 %4300  ;;  %v4498_v61 = vrot.slane %v12813_v21, 3 }
 0x609   :  { %v14200_v54 = vadd.f32 %v5562_v18, %v5451_v8  ;;  %v4193_v18 = vrot.slane %v4191_v56, 1  ;;  %v4348_v8 = vrot.slane %v15129_v25, 2 }
 0x60b   :  { %v5454_v16 = vpop.f32.mrf.mxu2  ;;  %v4197_v20 = vor.u32 %v4196_v5, %v4193_v18 }
 0x60c   :  { %v5340_v7 = vpop.f32.mrf.mxu1  ;;  %v4489_v16 = vpop.permute.xlu1 %4488 }
 0x60d   :  { %v5564_v14 = vpop.f32.mrf.mxu0  ;;  %v5240_v63 = vpop.f32.mrf.mxu3  ;;  %v4198_v47 = vsel %vm1767_vm3, %v4188_v42, %v4197_v20 }
 0x60e   :  { %v4349_v14 = vsel %vm1992_vm2, %v4346_v4, %v4348_v8  ;;  %v4611_v63 = vsel %vm2448_vm8, %v3617_v15, %v13612_v39  ;;  %v4783_v32 = vsel %vm2448_vm8, %v4198_v47, %v4301_v27  ;;  %v4212_v47 = vshll.u32 %v14061_v37, 16 }
 0x60f   :  { %v4002_v59 = vpop.permute.xlu0 %4001  ;;  %v4871_v0 = vsel %vm2448_vm8, %v4349_v14, %v4489_v16  ;;  %v4209_v14 = vshrl.u32 %v14061_v37, 16 }
 0x610   :  { %v4687_v24 = vsel %vm2448_vm8, %v3888_v3, %v4002_v59  ;;  %v4214_v27 = vrot.slane %v4212_v47, 2 }
 0x612   :  { %5279 = vmatmul.bf16.gmra.mxu3 %v4607_v52  ;;  %v4203_v52 = vshll.u32 %v14000_v31, 16 }
 0x613   :  { %v5455_v26 = vpop.f32.mrf.mxu2 }
 0x614   :  { %v5342_v48 = vpop.f32.mrf.mxu1  ;;  %v4200_v26 = vshrl.u32 %v14000_v31, 16  ;;  %v4205_v39 = vrot.slane %v4203_v52, 2  ;;  %v4499_v31 = vrot.slane %v12829_v11, 3 }
 0x615   :  { %v5566_v17 = vpop.f32.mrf.mxu0  ;;  %v5242_v34 = vpop.f32.mrf.mxu3 }
 0x616   :  { %v4202_v42 = vrot.slane %v4200_v26, 1 }
 0x617   :  { %5371 = vmatmul.bf16.gmra.mxu1 %v4683_v46  ;;  %v4004_v18 = vpop.permute.xlu0 %4003 }
 0x618   :  { %5595 = vmatmul.bf16.gmra.mxu0 %v4867_v13  ;;  %5488 = vmatmul.bf16.gmra.mxu2 %v4779_v55  ;;  %v3889_v13 = vrot.slane %v15129_v25, 1  ;;  %v4350_v55 = vrot.slane %v15139_v45, 2  ;;  %v4206_v56 = vor.u32 %v4205_v39, %v4202_v42  ;;  %v4491_v5 = vpop.permute.xlu1 %4490 }
 0x619   :  { %v4303_v15 = vpop.permute.xlu2 %4302 }
 0x61a   :  { %v3890_v34 = vsel %vm1545_vm1, %v3887_v49, %v3889_v13 }
 0x61b   :  { %v5457_v38 = vpop.f32.mrf.mxu2  ;;  %v4691_v16 = vsel %vm2448_vm8, %v3890_v34, %v4004_v18 }
 0x61c   :  { %v5343_v10 = vpop.f32.mrf.mxu1 }
 0x61d   :  { %v5567_v29 = vpop.f32.mrf.mxu0  ;;  %v5243_v7 = vpop.f32.mrf.mxu3  ;;  %v4351_v10 = vsel %vm1992_vm2, %v4348_v8, %v4350_v55 }
 0x61e   :  { %v4207_v29 = vsel %vm1767_vm3, %v4197_v20, %v4206_v56  ;;  %v4500_v7 = vsel %vm2349_vm4, %v4498_v61, %v4499_v31  ;;  %v4875_v11 = vsel %vm2448_vm8, %v4351_v10, %v4491_v5  ;;  %v4211_v20 = vrot.slane %v4209_v14, 1 }
 0x61f   :  { %v4787_v49 = vsel %vm2448_vm8, %v4207_v29, %v4303_v15  ;;  %v3893_v15 = vrot.slane %v15146_v43, 1 }
 0x620   :  { %v4006_v26 = vpop.permute.xlu0 %4005 }
 0x622   :  { %5284 = vmatmul.bf16.gmra.mxu3 %v4611_v63 }
 0x623   :  { %v5458_v40 = vpop.f32.mrf.mxu2 }
 0x624   :  { %v5345_v33 = vpop.f32.mrf.mxu1  ;;  %v4493_v52 = vpop.permute.xlu1 %4492 }
 0x625   :  { %v5569_v36 = vpop.f32.mrf.mxu0  ;;  %v14229_v4 = vpop.f32.mrf.mxu3 }
 0x626   :  { %v4352_v36 = vrot.slane %v15146_v43, 2 }
 0x627   :  { %5376 = vmatmul.bf16.gmra.mxu1 %v4687_v24  ;;  %v3891_v24 = vrot.slane %v15139_v45, 1 }
 0x628   :  { %5600 = vmatmul.bf16.gmra.mxu0 %v4871_v0  ;;  %5493 = vmatmul.bf16.gmra.mxu2 %v4783_v32  ;;  %v4215_v0 = vor.u32 %v4214_v27, %v4211_v20  ;;  %v4501_v32 = vrot.slane %v12835_v35, 3  ;;  %v4353_v39 = vsel %vm1992_vm2, %v4350_v55, %v4352_v36 }
 0x629   :  { %v3892_v37 = vsel %vm1545_vm1, %v3889_v13, %v3891_v24  ;;  %v4879_v35 = vsel %vm2448_vm8, %v4353_v39, %v4493_v52  ;;  %v15165_v39 = vld [vmem:[#allocation30_spill] sm:$0xff] }
 0x62a   :  { %v4695_v34 = vsel %vm2448_vm8, %v3892_v37, %v4006_v26  ;;  %v4502_v18 = vsel %vm2349_vm4, %v4499_v31, %v4501_v32  ;;  %v15164_v31 = vld [vmem:[#allocation16_spill] sm:$0xff] }
 0x62b   :  { %v5460_v48 = vpop.f32.mrf.mxu2 }
 0x62c   :  { %v5346_v46 = vpop.f32.mrf.mxu1  ;;  %v4216_v48 = vsel %vm1767_vm3, %v4206_v56, %v4215_v0 }
 0x62d   :  { %v5570_v17 = vpop.f32.mrf.mxu0  ;;  %v14236_v38 = vpop.f32.mrf.mxu3 }
 0x62e   :  { %v4305_v46 = vpop.permute.xlu2 %4304 }
 0x62f   :  { %v4791_v13 = vsel %vm2448_vm8, %v4216_v48, %v4305_v46  ;;  %v4505_v48 = vrot.slane %v15165_v39, 3 }
 0x632   :  { %8317 = vmatmul.msk.bf16.vlgmr.msra.gmra.mxu3 %vm2448_vm8, %v4500_v7 }
 0x633   :  { %v5461_v3 = vpop.f32.mrf.mxu2  ;;  %v4008_v7 = vpop.permute.xlu0 %4007 }
 0x634   :  { %v5348_v59 = vpop.f32.mrf.mxu1  ;;  %v4354_v3 = vrot.slane %v14063_v6, 2 }
 0x635   :  { %v5572_v21 = vpop.f32.mrf.mxu0  ;;  %v14247_v8 = vpop.f32.mrf.mxu3  ;;  %v4503_v59 = vrot.slane %v15164_v31, 3 }
 0x636   :  { %v4307_v14 = vpop.permute.xlu2 %4306 }
 0x637   :  { %5381 = vmatmul.bf16.gmra.mxu1 %v4691_v16  ;;  %v3894_v16 = vsel %vm1545_vm1, %v3891_v24, %v3893_v15  ;;  %v4795_v37 = vsel %vm2448_vm8, %v4215_v0, %v4307_v14  ;;  %v14284_v0 = vld [vmem:[%s14668_s6] ss:$0 sm:$0xff]  ;;  %v15166_v14 = vld [vmem:[#allocation17_spill] sm:$0xff] }
 0x638   :  { %5605 = vmatmul.bf16.gmra.mxu0 %v4875_v11  ;;  %5498 = vmatmul.bf16.gmra.mxu2 %v4787_v49  ;;  %v4355_v49 = vsel %vm1992_vm2, %v4352_v36, %v4354_v3  ;;  %v4699_v27 = vsel %vm2448_vm8, %v3894_v16, %v4008_v7 }
 0x639   :  { %v4495_v21 = vpop.permute.xlu1 %4494 }
 0x63b   :  { %v5463_v40 = vpop.f32.mrf.mxu2  ;;  %v4010_v46 = vpop.permute.xlu0 %4009 }
 0x63c   :  { %v5349_v63 = vpop.f32.mrf.mxu1  ;;  %v4504_v40 = vsel %vm2349_vm4, %v4501_v32, %v4503_v59 }
 0x63d   :  { %v5573_v33 = vpop.f32.mrf.mxu0  ;;  %v14253_v42 = vpop.f32.mrf.mxu3 }
 0x63e   :  { %v4883_v33 = vsel %vm2448_vm8, %v4355_v49, %v4495_v21  ;;  %v5253_v39 = vadd.f32 %v14284_v0, %v14253_v42 }
 0x641   :  { %v4497_v32 = vpop.permute.xlu1 %4496 }
 0x642   :  { %8318 = vmatmul.msk.bf16.gmra.mxu3 %vm2448_vm8, %v4502_v18 }
 0x643   :  { %v5464_v17 = vpop.f32.mrf.mxu2 }
 0x644   :  { %v5351_v61 = vpop.f32.mrf.mxu1 }
 0x645   :  { %v5575_v5 = vpop.f32.mrf.mxu0  ;;  %v14262_v55 = vpop.f32.mrf.mxu3  ;;  %v5246_v61 = vadd.f32 %v14284_v0, %v14229_v4  ;;  %v5248_v4 = vadd.f32 %v14284_v0, %v14236_v38 }
 0x646   :  { %v4703_v5 = vsel %vm2448_vm8, %v3893_v15, %v4010_v46 }
 0x647   :  { %5386 = vmatmul.bf16.gmra.mxu1 %v4695_v34 }
 0x648   :  { %5610 = vmatmul.bf16.gmra.mxu0 %v4879_v35  ;;  %5503 = vmatmul.bf16.gmra.mxu2 %v4791_v13  ;;  %v4506_v35 = vsel %vm2349_vm4, %v4503_v59, %v4505_v48 }
 0x64b   :  { %v5466_v56 = vpop.f32.mrf.mxu2 }
 0x64c   :  { %v5352_v10 = vpop.f32.mrf.mxu1 }
 0x64d   :  { %v5576_v29 = vpop.f32.mrf.mxu0  ;;  %v14268_v11 = vpop.f32.mrf.mxu3  ;;  %v4887_v10 = vsel %vm2448_vm8, %v4354_v3, %v4497_v32 }
 0x652   :  { %8319 = vmatmul.msk.bf16.gmra.mxu3 %vm2448_vm8, %v4504_v40 }
 0x653   :  { %v5467_v47 = vpop.f32.mrf.mxu2 }
 0x654   :  { %v5354_v20 = vpop.f32.mrf.mxu1  ;;  %v4507_v47 = vrot.slane %v15166_v14, 3 }
 0x655   :  { %v5578_v63 = vpop.f32.mrf.mxu0  ;;  %v14276_v24 = vpop.f32.mrf.mxu3 }
 0x657   :  { %5391 = vmatmul.bf16.gmra.mxu1 %v4699_v27  ;;  %v5251_v27 = vadd.f32 %v14284_v0, %v14247_v8 }
 0x658   :  { %5615 = vmatmul.bf16.gmra.mxu0 %v4883_v33  ;;  %5508 = vmatmul.bf16.gmra.mxu2 %v4795_v37  ;;  %v4508_v33 = vsel %vm2349_vm4, %v4505_v48, %v4507_v47 }
 0x65b   :  { %v5469_v36 = vpop.f32.mrf.mxu2 }
 0x65c   :  { %v5355_v26 = vpop.f32.mrf.mxu1 }
 0x65d   :  { %v5579_v52 = vpop.f32.mrf.mxu0  ;;  %v14279_v17 = vpop.f32.mrf.mxu3 }
 0x662   :  { %8320 = vmatmul.msk.bf16.gmra.mxu3 %vm2448_vm8, %v4506_v35 }
 0x663   :  { %v5471_v34 = vpop.f32.mrf.mxu2 }
 0x664   :  { %v5357_v18 = vpop.f32.mrf.mxu1 }
 0x665   :  { %v5358_v13 = vadd.f32 %v5357_v18, %v5246_v61  ;;  %v5581_v56 = vpop.f32.mrf.mxu0  ;;  %v14294_v16 = vpop.f32.mrf.mxu3  ;;  %v15167_v18 = vld [vmem:[#allocation23_spill] sm:$0xff] }
 0x667   :  { %v5470_v29 = vadd.f32 %v5469_v36, %v5358_v13  ;;  %5396 = vmatmul.bf16.gmra.mxu1 %v4703_v5  ;;  %v4509_v5 = vrot.slane %v15167_v18, 3  ;;  %v5256_v13 = vadd.f32 %v14284_v0, %v14262_v55  ;;  %v5263_v18 = vadd.f32 %v14284_v0, %v14279_v17 }
 0x668   :  { %5620 = vmatmul.bf16.gmra.mxu0 %v4887_v10 }
 0x669   :  { %v14292_v31 = vadd.f32 %v5581_v56, %v5470_v29  ;;  %v4510_v29 = vsel %vm2349_vm4, %v4507_v47, %v4509_v5 }
 0x66b   :  { %v5474_v7 = vpop.f32.mrf.mxu2 }
 0x66c   :  { %v5359_v15 = vpop.f32.mrf.mxu1 }
 0x66d   :  { %v5360_v21 = vadd.f32 %v5359_v15, %v5248_v4  ;;  %v5583_v59 = vpop.f32.mrf.mxu0  ;;  %v14301_v20 = vpop.f32.mrf.mxu3 }
 0x66f   :  { %v5472_v49 = vadd.f32 %v5471_v34, %v5360_v21 }
 0x671   :  { %v14299_v3 = vadd.f32 %v5583_v59, %v5472_v49  ;;  %v5258_v59 = vadd.f32 %v14284_v0, %v14268_v11 }
 0x672   :  { %8321 = vmatmul.msk.bf16.gmra.mxu3 %vm2448_vm8, %v4508_v33 }
 0x673   :  { %v5476_v40 = vpop.f32.mrf.mxu2 }
 0x674   :  { %v5362_v63 = vpop.f32.mrf.mxu1 }
 0x675   :  { %v5363_v37 = vadd.f32 %v5362_v63, %v5251_v27  ;;  %v5586_v38 = vpop.f32.mrf.mxu0  ;;  %v14309_v52 = vpop.f32.mrf.mxu3  ;;  %v15168_v63 = vld [vmem:[#allocation27_spill] sm:$0xff] }
 0x676   :  { %v4511_v33 = vrot.slane %v15168_v63, 3 }
 0x677   :  { %v5475_v36 = vadd.f32 %v5474_v7, %v5363_v37 }
 0x679   :  { %v14307_v26 = vadd.f32 %v5586_v38, %v5475_v36  ;;  %v5261_v38 = vadd.f32 %v14284_v0, %v14276_v24 }
 0x67b   :  { %v5479_v46 = vpop.f32.mrf.mxu2 }
 0x67c   :  { %v5364_v32 = vpop.f32.mrf.mxu1 }
 0x67d   :  { %v5365_v61 = vadd.f32 %v5364_v32, %v5253_v39  ;;  %v5588_v8 = vpop.f32.mrf.mxu0  ;;  %v14316_v35 = vpop.f32.mrf.mxu3 }
 0x67f   :  { %v5477_v34 = vadd.f32 %v5476_v40, %v5365_v61 }
 0x681   :  { %v14314_v48 = vadd.f32 %v5588_v8, %v5477_v34 }
 0x682   :  { %8322 = vmatmul.msk.bf16.gmra.mxu3 %vm2448_vm8, %v4510_v29 }
 0x683   :  { %v5481_v56 = vpop.f32.mrf.mxu2 }
 0x684   :  { %v5367_v10 = vpop.f32.mrf.mxu1 }
 0x685   :  { %v5368_v4 = vadd.f32 %v5367_v10, %v5256_v13  ;;  %v5591_v42 = vpop.f32.mrf.mxu0  ;;  %v14324_v21 = vpop.f32.mrf.mxu3 }
 0x687   :  { %v5480_v7 = vadd.f32 %v5479_v46, %v5368_v4  ;;  %v4512_v46 = vsel %vm2349_vm4, %v4509_v5, %v4511_v33  ;;  %v15169_v4 = vld [vmem:[#allocation20_spill] sm:$0xff] }
 0x689   :  { %v14322_v15 = vadd.f32 %v5591_v42, %v5480_v7  ;;  %v4513_v42 = vrot.slane %v15169_v4, 3 }
 0x68b   :  { %v5484_v49 = vpop.f32.mrf.mxu2 }
 0x68c   :  { %v5369_v14 = vpop.f32.mrf.mxu1 }
 0x68d   :  { %v5370_v27 = vadd.f32 %v5369_v14, %v5258_v59  ;;  %v5593_v55 = vpop.f32.mrf.mxu0  ;;  %v14331_v37 = vpop.f32.mrf.mxu3  ;;  %v5266_v59 = vadd.f32 %v14284_v0, %v14294_v16 }
 0x68f   :  { %v5482_v40 = vadd.f32 %v5481_v56, %v5370_v27  ;;  %v4514_v27 = vsel %vm2349_vm4, %v4511_v33, %v4513_v42 }
 0x691   :  { %v14329_v47 = vadd.f32 %v5593_v55, %v5482_v40 }
 0x692   :  { %8323 = vmatmul.msk.bf16.gmra.mxu3 %vm2448_vm8, %v4512_v46 }
 0x693   :  { %v5486_v36 = vpop.f32.mrf.mxu2 }
 0x694   :  { %v5372_v39 = vpop.f32.mrf.mxu1 }
 0x695   :  { %v5373_v32 = vadd.f32 %v5372_v39, %v5261_v38  ;;  %v5596_v11 = vpop.f32.mrf.mxu0  ;;  %v14339_v34 = vpop.f32.mrf.mxu3 }
 0x697   :  { %v5485_v61 = vadd.f32 %v5484_v49, %v5373_v32 }
 0x699   :  { %v14337_v8 = vadd.f32 %v5596_v11, %v5485_v61  ;;  %v15170_v61 = vld [vmem:[#allocation29_spill] sm:$0xff] }
 0x69b   :  { %v5489_v13 = vpop.f32.mrf.mxu2 }
 0x69c   :  { %v5374_v56 = vpop.f32.mrf.mxu1 }
 0x69d   :  { %v5375_v10 = vadd.f32 %v5374_v56, %v5263_v18  ;;  %v5598_v24 = vpop.f32.mrf.mxu0  ;;  %v14346_v7 = vpop.f32.mrf.mxu3  ;;  %v4515_v18 = vrot.slane %v15170_v61, 3  ;;  %v5276_v61 = vadd.f32 %v14284_v0, %v14324_v21 }
 0x69f   :  { %v5487_v29 = vadd.f32 %v5486_v36, %v5375_v10  ;;  %v5268_v36 = vadd.f32 %v14284_v0, %v14301_v20 }
 0x6a1   :  { %v14344_v5 = vadd.f32 %v5598_v24, %v5487_v29  ;;  %v4516_v29 = vsel %vm2349_vm4, %v4513_v42, %v4515_v18  ;;  %v15172_v42 = vld [vmem:[#allocation33_spill] sm:$0xff] }
 0x6a2   :  { %8324 = vmatmul.msk.bf16.gmra.mxu3 %vm2448_vm8, %v4514_v27  ;;  %v5273_v27 = vadd.f32 %v14284_v0, %v14316_v35 }
 0x6a3   :  { %v5491_v49 = vpop.f32.mrf.mxu2 }
 0x6a4   :  { %v5377_v14 = vpop.f32.mrf.mxu1 }
 0x6a5   :  { %v5378_v55 = vadd.f32 %v5377_v14, %v5266_v59  ;;  %v5601_v17 = vpop.f32.mrf.mxu0  ;;  %v14354_v38 = vpop.f32.mrf.mxu3 }
 0x6a7   :  { %v5490_v40 = vadd.f32 %v5489_v13, %v5378_v55  ;;  %v5271_v13 = vadd.f32 %v14284_v0, %v14309_v52  ;;  %v15171_v55 = vld [vmem:[#allocation26_spill] sm:$0xff] }
 0x6a9   :  { %v14352_v63 = vadd.f32 %v5601_v17, %v5490_v40 }
 0x6ab   :  { %v5494_v39 = vpop.f32.mrf.mxu2 }
 0x6ac   :  { %v5379_v46 = vpop.f32.mrf.mxu1 }
 0x6ad   :  { %v5380_v32 = vadd.f32 %v5379_v46, %v5268_v36  ;;  %v5603_v16 = vpop.f32.mrf.mxu0  ;;  %v5287_v56 = vpop.f32.mrf.mxu3 }
 0x6ae   :  { %v15173_v56 = vld [vmem:[#allocation28_spill] sm:$0xff] }
 0x6af   :  { %v5492_v11 = vadd.f32 %v5491_v49, %v5380_v32 }
 0x6b1   :  { %v14359_v33 = vadd.f32 %v5603_v16, %v5492_v11  ;;  %v4517_v16 = vrot.slane %v15172_v42, 3 }
 0x6b2   :  { %8325 = vmatmul.msk.bf16.gmra.mxu3 %vm2448_vm8, %v4516_v29 }
 0x6b3   :  { %v5496_v10 = vpop.f32.mrf.mxu2  ;;  %v4518_v29 = vsel %vm2349_vm4, %v4515_v18, %v4517_v16  ;;  %v4519_v18 = vrot.slane %v13073_v44, 3 }
 0x6b4   :  { %v5382_v24 = vpop.f32.mrf.mxu1 }
 0x6b5   :  { %v5383_v4 = vadd.f32 %v5382_v24, %v5271_v13  ;;  %v5606_v59 = vpop.f32.mrf.mxu0  ;;  %v5634_v49 = vpop.f32.mrf.mxu3 }
 0x6b6   :  { %v14370_v17 = vadd.f32 %v5634_v49, %v15171_v55  ;;  %v15174_v55 = vld [vmem:[#allocation31_spill] sm:$0xff] }
 0x6b7   :  { %v5495_v20 = vadd.f32 %v5494_v39, %v5383_v4 }
 0x6b9   :  { %v14365_v14 = vadd.f32 %v5606_v59, %v5495_v20 }
 0x6bb   :  { %v5499_v40 = vpop.f32.mrf.mxu2 }
 0x6bc   :  { %v5384_v52 = vpop.f32.mrf.mxu1 }
 0x6bd   :  { %v5385_v36 = vadd.f32 %v5384_v52, %v5273_v27  ;;  %v5608_v46 = vpop.f32.mrf.mxu0  ;;  %v5636_v39 = vpop.f32.mrf.mxu3  ;;  %v5278_v27 = vadd.f32 %v14284_v0, %v14331_v37 }
 0x6be   :  { %v14378_v13 = vadd.f32 %v5636_v39, %v15173_v56  ;;  %v15175_v56 = vld [vmem:[#allocation32_spill] sm:$0xff] }
 0x6bf   :  { %v5497_v32 = vadd.f32 %v5496_v10, %v5385_v36 }
 0x6c1   :  { %v14373_v11 = vadd.f32 %v5608_v46, %v5497_v32 }
 0x6c2   :  { %8326 = vmatmul.msk.bf16.gmra.mxu3 %vm2448_vm8, %v4518_v29 }
 0x6c3   :  { %v5501_v35 = vpop.f32.mrf.mxu2 }
 0x6c4   :  { %v5387_v24 = vpop.f32.mrf.mxu1 }
 0x6c5   :  { %v5388_v4 = vadd.f32 %v5387_v24, %v5276_v61  ;;  %v5611_v59 = vpop.f32.mrf.mxu0  ;;  %v5639_v49 = vpop.f32.mrf.mxu3  ;;  %v5281_v61 = vadd.f32 %v14284_v0, %v14339_v34 }
 0x6c6   :  { %v14387_v21 = vadd.f32 %v5639_v49, %v15174_v55  ;;  %v5283_v55 = vadd.f32 %v14284_v0, %v14346_v7  ;;  %v5286_v7 = vadd.f32 %v14284_v0, %v14354_v38 }
 0x6c7   :  { %v5500_v20 = vadd.f32 %v5499_v40, %v5388_v4  ;;  %v4520_v4 = vsel %vm2349_vm4, %v4517_v16, %v4519_v18 }
 0x6c9   :  { %v14382_v10 = vadd.f32 %v5611_v59, %v5500_v20 }
 0x6cb   :  { %v5504_v52 = vpop.f32.mrf.mxu2 }
 0x6cc   :  { %v5389_v36 = vpop.f32.mrf.mxu1 }
 0x6cd   :  { %v5390_v46 = vadd.f32 %v5389_v36, %v5278_v27  ;;  %v5613_v32 = vpop.f32.mrf.mxu0  ;;  %v5641_v40 = vpop.f32.mrf.mxu3 }
 0x6ce   :  { %v5642_v24 = vadd.f32 %v5641_v40, %v15175_v56 }
 0x6cf   :  { %v5502_v42 = vadd.f32 %v5501_v35, %v5390_v46 }
 0x6d0   :  { %v5740_v35 = vmax.f32 %v5642_v24, 0.0 }
 0x6d1   :  { %v14390_v39 = vadd.f32 %v5613_v32, %v5502_v42 }
 0x6d2   :  { %8327 = vmatmul.msk.bf16.gmra.mxu3 %vm2448_vm8, %v4520_v4  ;;  %v5774_v32 = vpack.c.bf16 %v5740_v35, %v5740_v35 }
 0x6d3   :  { %v5506_v29 = vpop.f32.mrf.mxu2 }
 0x6d4   :  { %v5392_v37 = vpop.f32.mrf.mxu1 }
 0x6d5   :  { %v5393_v59 = vadd.f32 %v5392_v37, %v5281_v61  ;;  %v5616_v20 = vpop.f32.mrf.mxu0  ;;  %v5644_v44 = vpop.f32.mrf.mxu3  ;;  %v5815_v37 = vunpack.c.l.b16 %v5774_v32  ;;  %v15176_v32 = vld [vmem:[#allocation34_spill] sm:$0xff] }
 0x6d6   :  { %v5645_v34 = vadd.f32 %v5644_v44, %v13985_v51 }
 0x6d7   :  { %v5505_v49 = vadd.f32 %v5504_v52, %v5393_v59  ;;  %v4521_v52 = vrot.slane %v13086_v57, 3 }
 0x6d8   :  { %v5741_v42 = vmax.f32 %v5645_v34, 0.0 }
 0x6d9   :  { %v14397_v27 = vadd.f32 %v5616_v20, %v5505_v49  ;;  %v4522_v44 = vsel %vm2349_vm4, %v4519_v18, %v4521_v52 }
 0x6da   :  { %v5775_v61 = vpack.c.bf16 %v5741_v42, %v5741_v42 }
 0x6db   :  { %v5509_v36 = vpop.f32.mrf.mxu2 }
 0x6dc   :  { %v5394_v46 = vpop.f32.mrf.mxu1  ;;  %v5816_v24 = vunpack.c.l.b16 %v5775_v61 }
 0x6dd   :  { %v5395_v40 = vadd.f32 %v5394_v46, %v5283_v55  ;;  %v5618_v16 = vpop.f32.mrf.mxu0  ;;  %v5646_v59 = vpop.f32.mrf.mxu3 }
 0x6de   :  { %v14407_v20 = vpack.c.b16 %v5816_v24, %v5815_v37  ;;  %v14410_v51 = vadd.f32 %v5646_v59, %v14003_v30  ;;  %v4523_v30 = vrot.slane %v13127_v19, 3  ;;  %v4525_v37 = vrot.slane %v13157_v22, 3 }
 0x6df   :  { %v5507_v56 = vadd.f32 %v5506_v29, %v5395_v40  ;;  %v4527_v22 = vrot.slane %v13173_v60, 3 }
 0x6e0   :  { %v4524_v18 = vsel %vm2349_vm4, %v4521_v52, %v4523_v30 }
 0x6e1   :  { %v14403_v4 = vadd.f32 %v5618_v16, %v5507_v56  ;;  %v15177_v16 = vld [vmem:[#allocation35_spill] sm:$0xff] }
 0x6e2   :  { %8328 = vmatmul.msk.bf16.gmra.mxu3 %vm2448_vm8, %v4522_v44 }
 0x6e3   :  { %v5511_v49 = vpop.f32.mrf.mxu2 }
 0x6e4   :  { %v5397_v35 = vpop.f32.mrf.mxu1  ;;  %v4526_v49 = vsel %vm2349_vm4, %v4523_v30, %v4525_v37  ;;  %v4529_v30 = vrot.slane %v13218_v23, 3 }
 0x6e5   :  { %v5398_v29 = vadd.f32 %v5397_v35, %v5286_v7  ;;  %v5621_v55 = vpop.f32.mrf.mxu0  ;;  %v5649_v46 = vpop.f32.mrf.mxu3 }
 0x6e6   :  { %v14417_v42 = vadd.f32 %v5649_v46, %v15176_v32  ;;  %v4528_v32 = vsel %vm2349_vm4, %v4525_v37, %v4527_v22 }
 0x6e7   :  { %v5510_v57 = vadd.f32 %v5509_v36, %v5398_v29 }
 0x6e9   :  { %v14414_v34 = vadd.f32 %v5621_v55, %v5510_v57 }
 0x6ec   :  { %v5399_v0 = vpop.f32.mrf.mxu1 }
 0x6ed   :  { %v5623_v38 = vpop.f32.mrf.mxu0  ;;  %v5651_v40 = vpop.f32.mrf.mxu3 }
 0x6ee   :  { %v14421_v61 = vadd.f32 %v5651_v40, %v15177_v16  ;;  %v4530_v16 = vsel %vm2349_vm4, %v4527_v22, %v4529_v30 }
 0x6f2   :  { %8329 = vmatmul.msk.bf16.gmra.mxu3 %vm2448_vm8, %v4524_v18 }
 0x6f5   :  { %v5654_v36 = vpop.f32.mrf.mxu3 }
 0x6f6   :  { %v5655_v56 = vadd.f32 %v5654_v36, %v14103_v1 }
 0x6f8   :  { %v5745_v24 = vmax.f32 %v5655_v56, 0.0 }
 0x6fa   :  { %v5779_v19 = vpack.c.bf16 %v5745_v24, %v5745_v24  ;;  %v4531_v24 = vrot.slane %v15111_v58, 3 }
 0x6fc   :  { %v5829_v29 = vunpack.c.l.b16 %v5779_v19 }
 0x6fd   :  { %v5656_v59 = vpop.f32.mrf.mxu3 }
 0x6fe   :  { %v5657_v7 = vadd.f32 %v5656_v59, %v14114_v62 }
 0x700   :  { %v5746_v35 = vmax.f32 %v5657_v7, 0.0 }
 0x702   :  { %v5780_v44 = vpack.c.bf16 %v5746_v35, %v5746_v35  ;;  %8330 = vmatmul.msk.bf16.gmra.mxu3 %vm2448_vm8, %v4526_v49  ;;  %v4532_v49 = vsel %vm2349_vm4, %v4529_v30, %v4531_v24  ;;  %v4533_v35 = vrot.slane %v15119_v50, 3 }
 0x704   :  { %v5830_v52 = vunpack.c.l.b16 %v5780_v44  ;;  %v4534_v58 = vsel %vm2349_vm4, %v4531_v24, %v4533_v35 }
 0x705   :  { %v5659_v55 = vpop.f32.mrf.mxu3 }
 0x706   :  { %v14430_v57 = vpack.c.b16 %v5830_v52, %v5829_v29  ;;  %v14433_v1 = vadd.f32 %v5659_v55, %v14135_v28  ;;  %v4535_v52 = vrot.slane %v15129_v25, 3 }
 0x708   :  { %v4536_v55 = vsel %vm2349_vm4, %v4533_v35, %v4535_v52 }
 0x70d   :  { %v5661_v46 = vpop.f32.mrf.mxu3 }
 0x70e   :  { %v14437_v62 = vadd.f32 %v5661_v46, %v14142_v2  ;;  %v4537_v46 = vrot.slane %v15139_v45, 3 }
 0x712   :  { %8331 = vmatmul.msk.bf16.gmra.mxu3 %vm2448_vm8, %v4528_v32  ;;  %v4538_v32 = vsel %vm2349_vm4, %v4535_v52, %v4537_v46 }
 0x715   :  { %v5664_v0 = vpop.f32.mrf.mxu3 }
 0x716   :  { %v14442_v38 = vadd.f32 %v5664_v0, %v14158_v12  ;;  %v4539_v0 = vrot.slane %v15146_v43, 3 }
 0x71d   :  { %v5666_v40 = vpop.f32.mrf.mxu3 }
 0x71e   :  { %v5667_v28 = vadd.f32 %v5666_v40, %v14164_v41  ;;  %v4540_v40 = vsel %vm2349_vm4, %v4537_v46, %v4539_v0 }
 0x720   :  { %v5750_v60 = vmax.f32 %v5667_v28, 0.0  ;;  %v4541_v28 = vrot.slane %v14063_v6, 3 }
 0x722   :  { %8332 = vmatmul.msk.bf16.gmra.mxu3 %vm2448_vm8, %v4530_v16  ;;  %v5784_v36 = vpack.c.bf16 %v5750_v60, %v5750_v60  ;;  %v4542_v60 = vsel %vm2349_vm4, %v4539_v0, %v4541_v28 }
 0x724   :  { %v5843_v12 = vunpack.c.l.b16 %v5784_v36  ;;  %v5737_v36 = vmax.f32 %v14370_v17, 0.0 }
 0x725   :  { %v5669_v2 = vpop.f32.mrf.mxu3 }
 0x726   :  { %v5670_v18 = vadd.f32 %v5669_v2, %v14179_v9  ;;  %v5771_v6 = vpack.c.bf16 %v5737_v36, %v5737_v36 }
 0x728   :  { %v5751_v56 = vmax.f32 %v5670_v18, 0.0 }
 0x72a   :  { %v5785_v37 = vpack.c.bf16 %v5751_v56, %v5751_v56  ;;  %v5738_v56 = vmax.f32 %v14378_v13, 0.0 }
 0x72c   :  { %v5844_v59 = vunpack.c.l.b16 %v5785_v37 }
 0x72d   :  { %v5671_v7 = vpop.f32.mrf.mxu3 }
 0x72e   :  { %v14450_v23 = vpack.c.b16 %v5844_v59, %v5843_v12  ;;  %v14453_v41 = vadd.f32 %v5671_v7, %v14185_v53  ;;  %v5772_v12 = vpack.c.bf16 %v5738_v56, %v5738_v56 }
 0x732   :  { %8333 = vmatmul.msk.bf16.gmra.mxu3 %vm2448_vm8, %v4532_v49  ;;  %v5739_v49 = vmax.f32 %v14387_v21, 0.0 }
 0x735   :  { %v5674_v19 = vpop.f32.mrf.mxu3 }
 0x736   :  { %v14458_v9 = vadd.f32 %v5674_v19, %v14200_v54 }
 0x73d   :  { %v5676_v44 = vpop.f32.mrf.mxu3 }
 0x73e   :  { %v5806_v44 = vunpack.c.l.b16 %v5772_v12  ;;  %v5818_v12 = vrot.slane %v14407_v20, 3 }
 0x742   :  { %8334 = vmatmul.msk.bf16.gmra.mxu3 %vm2448_vm8, %v4534_v58  ;;  %v5773_v58 = vpack.c.bf16 %v5739_v49, %v5739_v49 }
 0x745   :  { %v5678_v29 = vpop.f32.mrf.mxu3 }
 0x746   :  { %v5807_v29 = vpack.c.b16 %v5806_v44, %v5806_v44 }
 0x748   :  { %v5808_v46 = vrot.slane %v5807_v29, 1  ;;  %v5744_v29 = vmax.f32 %v14421_v61, 0.0 }
 0x74d   :  { %v5679_v53 = vpop.f32.mrf.mxu3 }
 0x74e   :  { %v5810_v53 = vunpack.c.l.b16 %v5773_v58 }
 0x750   :  { %v5811_v21 = vpack.c.b16 %v5810_v53, %v5810_v53 }
 0x752   :  { %8335 = vmatmul.msk.bf16.gmra.mxu3 %vm2448_vm8, %v4536_v55 }
 0x755   :  { %v5681_v22 = vpop.f32.mrf.mxu3 }
 0x75d   :  { %v5682_v54 = vpop.f32.mrf.mxu3 }
 0x762   :  { %8336 = vmatmul.msk.bf16.gmra.mxu3 %vm2448_vm8, %v4538_v32 }
 0x765   :  { %v5684_v50 = vpop.f32.mrf.mxu3 }
 0x76d   :  { %v5685_v30 = vpop.f32.mrf.mxu3 }
 0x772   :  { %8337 = vmatmul.msk.bf16.gmra.mxu3 %vm2448_vm8, %v4540_v40  ;;  %v5812_v40 = vrot.slane %v5811_v21, 2 }
 0x775   :  { %v5687_v25 = vpop.f32.mrf.mxu3 }
 0x77d   :  { %v5688_v16 = vpop.f32.mrf.mxu3 }
 0x782   :  { %8338 = vmatmul.msk.bf16.gmra.mxu3 %vm2448_vm8, %v4542_v60 }
 0x785   :  { %v5690_v45 = vpop.f32.mrf.mxu3 }
 0x78d   :  { %v5691_v2 = vpop.f32.mrf.mxu3 }
 0x792   :  { %8339 = vmatmul.msk.bf16.gmra.mxu3 %vm2448_vm8, %v4541_v28 }
 0x795   :  { %v5693_v18 = vpop.f32.mrf.mxu3 }
 0x796   :  { %v5694_v43 = vadd.f32 %v5693_v18, %v14292_v31 }
 0x798   :  { %v5754_v37 = vmax.f32 %v5694_v43, 0.0 }
 0x79a   :  { %v5788_v24 = vpack.c.bf16 %v5754_v37, %v5754_v37 }
 0x79c   :  { %v5901_v59 = vrot.slane %v5788_v24, 6 }
 0x79d   :  { %v5695_v7 = vpop.f32.mrf.mxu3 }
 0x79e   :  { %v14481_v19 = vsel %vm5915_vm10, %v5771_v6, %v5901_v59  ;;  %v5696_v35 = vadd.f32 %v5695_v7, %v14299_v3  ;;  %v5743_v59 = vmax.f32 %v14417_v42, 0.0  ;;  %v5778_v42 = vpack.c.bf16 %v5744_v29, %v5744_v29 }
 0x7a0   :  { %v5755_v31 = vmax.f32 %v5696_v35, 0.0 }
 0x7a2   :  { %v5789_v17 = vpack.c.bf16 %v5755_v31, %v5755_v31  ;;  %v5777_v31 = vpack.c.bf16 %v5743_v59, %v5743_v59  ;;  %v5832_v59 = vrot.slane %v14430_v57, 3 }
 0x7a4   :  { %v5852_v13 = vunpack.c.l.b16 %v5789_v17 }
 0x7a5   :  { %v5698_v52 = vpop.f32.mrf.mxu3 }
 0x7a6   :  { %v5853_v55 = vpack.c.b16 %v5852_v13, %v5852_v13  ;;  %v5699_v22 = vadd.f32 %v5698_v52, %v14307_v26 }
 0x7a8   :  { %v8340_v54 = vrot.slane %v5853_v55, 7  ;;  %v5756_v32 = vmax.f32 %v5699_v22, 0.0 }
 0x7aa   :  { %v14486_v50 = vsel %vm5915_vm10, %v5808_v46, %v8340_v54  ;;  %v5790_v0 = vpack.c.bf16 %v5756_v32, %v5756_v32  ;;  %v5824_v46 = vunpack.c.l.b16 %v5778_v42 }
 0x7ac   :  { %v5856_v3 = vunpack.c.l.b16 %v5790_v0  ;;  %v5825_v61 = vpack.c.b16 %v5824_v46, %v5824_v46 }
 0x7ad   :  { %v5700_v30 = vpop.f32.mrf.mxu3 }
 0x7ae   :  { %v5857_v25 = vpack.c.b16 %v5856_v3, %v5856_v3  ;;  %v5701_v28 = vadd.f32 %v5700_v30, %v14314_v48  ;;  %v5742_v48 = vmax.f32 %v14410_v51, 0.0  ;;  %v5820_v51 = vunpack.c.l.b16 %v5777_v31 }
 0x7b0   :  { %v14490_v16 = vsel %vm5915_vm10, %v5812_v40, %v5857_v25  ;;  %v5757_v60 = vmax.f32 %v5701_v28, 0.0  ;;  %v5776_v44 = vpack.c.bf16 %v5742_v48, %v5742_v48  ;;  %v5821_v53 = vpack.c.b16 %v5820_v51, %v5820_v51 }
 0x7b1   :  { %v5826_v28 = vrot.slane %v5825_v61, 2 }
 0x7b2   :  { %v5791_v2 = vpack.c.bf16 %v5757_v60, %v5757_v60  ;;  %v5822_v21 = vrot.slane %v5821_v53, 1 }
 0x7b4   :  { %v5861_v36 = vunpack.c.l.b16 %v5791_v2 }
 0x7b5   :  { %v5703_v45 = vpop.f32.mrf.mxu3 }
 0x7b6   :  { %v5704_v26 = vadd.f32 %v5703_v45, %v14322_v15 }
 0x7b8   :  { %v5758_v18 = vmax.f32 %v5704_v26, 0.0 }
 0x7ba   :  { %v5792_v43 = vpack.c.bf16 %v5758_v18, %v5758_v18 }
 0x7bc   :  { %v5862_v56 = vunpack.c.l.b16 %v5792_v43 }
 0x7bd   :  { %v5705_v37 = vpop.f32.mrf.mxu3 }
 0x7be   :  { %v5863_v24 = vpack.c.b16 %v5862_v56, %v5861_v36  ;;  %v5706_v6 = vadd.f32 %v5705_v37, %v14329_v47 }
 0x7c0   :  { %v8342_v7 = vrot.slane %v5863_v24, 9  ;;  %v5759_v49 = vmax.f32 %v5706_v6, 0.0 }
 0x7c2   :  { %v14498_v35 = vsel %vm5915_vm10, %v5818_v12, %v8342_v7  ;;  %v5793_v15 = vpack.c.bf16 %v5759_v49, %v5759_v49  ;;  %v5748_v7 = vmax.f32 %v14437_v62, 0.0 }
 0x7c4   :  { %v5905_v58 = vrot.slane %v5793_v15, 6 }
 0x7c5   :  { %v5708_v17 = vpop.f32.mrf.mxu3 }
 0x7c6   :  { %v14502_v47 = vsel %vm5915_vm10, %v5776_v44, %v5905_v58  ;;  %v5709_v20 = vadd.f32 %v5708_v17, %v14337_v8  ;;  %v5782_v58 = vpack.c.bf16 %v5748_v7, %v5748_v7 }
 0x7c8   :  { %v5760_v13 = vmax.f32 %v5709_v20, 0.0  ;;  %v5749_v20 = vmax.f32 %v14442_v38, 0.0 }
 0x7ca   :  { %v5794_v52 = vpack.c.bf16 %v5760_v13, %v5760_v13  ;;  %v5783_v62 = vpack.c.bf16 %v5749_v20, %v5749_v20 }
 0x7cc   :  { %v5866_v55 = vunpack.c.l.b16 %v5794_v52 }
 0x7cd   :  { %v5710_v22 = vpop.f32.mrf.mxu3 }
 0x7ce   :  { %v5867_v54 = vpack.c.b16 %v5866_v55, %v5866_v55  ;;  %v5711_v32 = vadd.f32 %v5710_v22, %v14344_v5  ;;  %v5838_v55 = vunpack.c.l.b16 %v5783_v62 }
 0x7d0   :  { %v8343_v0 = vrot.slane %v5867_v54, 7  ;;  %v5761_v3 = vmax.f32 %v5711_v32, 0.0  ;;  %v5839_v38 = vpack.c.b16 %v5838_v55, %v5838_v55 }
 0x7d2   :  { %v14507_v30 = vsel %vm5915_vm10, %v5822_v21, %v8343_v0  ;;  %v5795_v40 = vpack.c.bf16 %v5761_v3, %v5761_v3 }
 0x7d4   :  { %v5870_v8 = vunpack.c.l.b16 %v5795_v40  ;;  %v5840_v40 = vrot.slane %v5839_v38, 2 }
 0x7d5   :  { %v5713_v25 = vpop.f32.mrf.mxu3 }
 0x7d6   :  { %v5871_v60 = vpack.c.b16 %v5870_v8, %v5870_v8  ;;  %v5714_v45 = vadd.f32 %v5713_v25, %v14352_v63  ;;  %v5747_v63 = vmax.f32 %v14433_v1, 0.0  ;;  %v5834_v1 = vunpack.c.l.b16 %v5782_v58 }
 0x7d8   :  { %v14511_v26 = vsel %vm5915_vm10, %v5826_v28, %v5871_v60  ;;  %v5762_v2 = vmax.f32 %v5714_v45, 0.0  ;;  %v5781_v31 = vpack.c.bf16 %v5747_v63, %v5747_v63  ;;  %v5835_v42 = vpack.c.b16 %v5834_v1, %v5834_v1 }
 0x7da   :  { %v5796_v43 = vpack.c.bf16 %v5762_v2, %v5762_v2  ;;  %v5836_v54 = vrot.slane %v5835_v42, 1 }
 0x7dc   :  { %v5875_v37 = vunpack.c.l.b16 %v5796_v43 }
 0x7dd   :  { %v5715_v18 = vpop.f32.mrf.mxu3 }
 0x7de   :  { %v5716_v5 = vadd.f32 %v5715_v18, %v14359_v33 }
 0x7e0   :  { %v5763_v36 = vmax.f32 %v5716_v5, 0.0 }
 0x7e2   :  { %v5797_v56 = vpack.c.bf16 %v5763_v36, %v5763_v36 }
 0x7e4   :  { %v5876_v24 = vunpack.c.l.b16 %v5797_v56 }
 0x7e5   :  { %v5718_v6 = vpop.f32.mrf.mxu3 }
 0x7e6   :  { %v5877_v12 = vpack.c.b16 %v5876_v24, %v5875_v37  ;;  %v5719_v48 = vadd.f32 %v5718_v6, %v14365_v14  ;;  %v5846_v6 = vrot.slane %v14450_v23, 3 }
 0x7e8   :  { %v8345_v49 = vrot.slane %v5877_v12, 9  ;;  %v5764_v15 = vmax.f32 %v5719_v48, 0.0  ;;  %v5752_v12 = vmax.f32 %v14453_v41, 0.0  ;;  %v5753_v48 = vmax.f32 %v14458_v9, 0.0 }
 0x7ea   :  { %v14519_v44 = vsel %vm5915_vm10, %v5832_v59, %v8345_v49  ;;  %v5798_v33 = vpack.c.bf16 %v5764_v15, %v5764_v15  ;;  %v5786_v7 = vpack.c.bf16 %v5752_v12, %v5752_v12  ;;  %v5787_v49 = vpack.c.bf16 %v5753_v48, %v5753_v48 }
 0x7ec   :  { %v5909_v17 = vrot.slane %v5798_v33, 6  ;;  %v5848_v23 = vunpack.c.l.b16 %v5787_v49 }
 0x7ed   :  { %v5720_v29 = vpop.f32.mrf.mxu3 }
 0x7ee   :  { %v14523_v14 = vsel %vm5915_vm10, %v5781_v31, %v5909_v17  ;;  %v5721_v57 = vadd.f32 %v5720_v29, %v14373_v11  ;;  %v5849_v17 = vpack.c.b16 %v5848_v23, %v5848_v23 }
 0x7f0   :  { %v5765_v51 = vmax.f32 %v5721_v57, 0.0  ;;  %v5850_v57 = vrot.slane %v5849_v17, 1 }
 0x7f2   :  { %v5799_v13 = vpack.c.bf16 %v5765_v51, %v5765_v51 }
 0x7f4   :  { %v5880_v52 = vunpack.c.l.b16 %v5799_v13 }
 0x7f5   :  { %v5723_v53 = vpop.f32.mrf.mxu3 }
 0x7f6   :  { %v5881_v22 = vpack.c.b16 %v5880_v52, %v5880_v52  ;;  %v5724_v46 = vadd.f32 %v5723_v53, %v14382_v10 }
 0x7f8   :  { %v8346_v32 = vrot.slane %v5881_v22, 7  ;;  %v5766_v21 = vmax.f32 %v5724_v46, 0.0 }
 0x7fa   :  { %v14528_v0 = vsel %vm5915_vm10, %v5836_v54, %v8346_v32  ;;  %v5800_v3 = vpack.c.bf16 %v5766_v21, %v5766_v21 }
 0x7fc   :  { %v5884_v11 = vunpack.c.l.b16 %v5800_v3 }
 0x7fd   :  { %v5725_v61 = vpop.f32.mrf.mxu3 }
 0x7fe   :  { %v5885_v8 = vpack.c.b16 %v5884_v11, %v5884_v11  ;;  %v5726_v28 = vadd.f32 %v5725_v61, %v14390_v39 }
 0x800   :  { %v14531_v25 = vsel %vm5915_vm10, %v5840_v40, %v5885_v8  ;;  %v5767_v60 = vmax.f32 %v5726_v28, 0.0 }
 0x802   :  { %v5801_v2 = vpack.c.bf16 %v5767_v60, %v5767_v60 }
 0x804   :  { %v5889_v43 = vunpack.c.l.b16 %v5801_v2 }
 0x805   :  { %v5728_v45 = vpop.f32.mrf.mxu3 }
 0x806   :  { %v5729_v10 = vadd.f32 %v5728_v45, %v14397_v27 }
 0x808   :  { %v5768_v18 = vmax.f32 %v5729_v10, 0.0 }
 0x80a   :  { %v5802_v5 = vpack.c.bf16 %v5768_v18, %v5768_v18 }
 0x80c   :  { %v5890_v36 = vunpack.c.l.b16 %v5802_v5 }
 0x80d   :  { %v5730_v56 = vpop.f32.mrf.mxu3 }
 0x80e   :  { %v5891_v37 = vpack.c.b16 %v5890_v36, %v5889_v43  ;;  %v5731_v24 = vadd.f32 %v5730_v56, %v14403_v4 }
 0x810   :  { %v8348_v39 = vrot.slane %v5891_v37, 9  ;;  %v5769_v59 = vmax.f32 %v5731_v24, 0.0 }
 0x812   :  { %v14540_v63 = vsel %vm5915_vm10, %v5846_v6, %v8348_v39  ;;  %v5803_v27 = vpack.c.bf16 %v5769_v59, %v5769_v59 }
 0x814   :  { %v5913_v15 = vrot.slane %v5803_v27, 6 }
 0x815   :  { %v5733_v33 = vpop.f32.mrf.mxu3 }
 0x816   :  { %v14543_v31 = vsel %vm5915_vm10, %v5786_v7, %v5913_v15  ;;  %v5734_v4 = vadd.f32 %v5733_v33, %v14414_v34 }
 0x818   :  { %v5770_v58 = vmax.f32 %v5734_v4, 0.0 }
 0x81a   :  { %v5804_v41 = vpack.c.bf16 %v5770_v58, %v5770_v58 }
 0x81c   :  { %v5894_v9 = vunpack.c.l.b16 %v5804_v41 }
 0x81d   :  { %v5735_v29 = vpop.f32.mrf.mxu3 }
 0x81e   :  { %v5895_v20 = vpack.c.b16 %v5894_v9, %v5894_v9 }
 0x820   :  { %v8349_v1 = vrot.slane %v5895_v20, 7 }
 0x822   :  { %v14547_v51 = vsel %vm5915_vm10, %v5850_v57, %v8349_v1 }
 0x823   :  { %9657 = dma.done.wait [#allocation4 + $0x1], 28672 }
 0x824   :  { %9658 = vsyncadd [#allocation4 + $0x1], 4294938624  ;;  %v8408_v62 = vld [vmem:[#allocation3 + $0x70] sm:$0xf]  ;;  %v9397_v13 = vld [vmem:[#allocation3 + $0x74] sm:$0xf0] }
 0x825   :  { %v8472_v42 = vld [vmem:[#allocation3 + $0xf0] sm:$0xf]  ;;  %v8409_v52 = vor.u32 %v9397_v13, %v8408_v62  ;;  %v9413_v53 = vld [vmem:[#allocation3 + $0xf4] sm:$0xf0]  ;;  %v8400_v34 = vld [vmem:[#allocation3 + $0x60] sm:$0xf] }
 0x826   :  { %v9395_v55 = vld [vmem:[#allocation3 + $0x64] sm:$0xf0]  ;;  %v8473_v22 = vor.u32 %v9413_v53, %v8472_v42  ;;  %v8464_v46 = vld [vmem:[#allocation3 + $0xe0] sm:$0xf]  ;;  %v8392_v38 = vld [vmem:[#allocation3 + $0x50] sm:$0xf] }
 0x827   :  { %v9411_v54 = vld [vmem:[#allocation3 + $0xe4] sm:$0xf0]  ;;  %7320 = vmatpush.bf16.msra.mxu1 %v8409_v52  ;;  %v8401_v32 = vor.u32 %v9395_v55, %v8400_v34  ;;  %v9393_v3 = vld [vmem:[#allocation3 + $0x54] sm:$0xf0]  ;;  %v8456_v11 = vld [vmem:[#allocation3 + $0xd0] sm:$0xf] }
 0x828   :  { %7333 = vmatpush.bf16.msra.mxu2 %v8473_v22  ;;  %v8465_v21 = vor.u32 %v9411_v54, %v8464_v46  ;;  %v9409_v61 = vld [vmem:[#allocation3 + $0xd4] sm:$0xf0]  ;;  %v8393_v40 = vor.u32 %v9393_v3, %v8392_v38  ;;  %v8384_v28 = vld [vmem:[#allocation3 + $0x40] sm:$0xf]  ;;  %v9391_v60 = vld [vmem:[#allocation3 + $0x44] sm:$0xf0] }
 0x829   :  { %v8457_v8 = vor.u32 %v9409_v61, %v8456_v11  ;;  %v8448_v45 = vld [vmem:[#allocation3 + $0xc0] sm:$0xf]  ;;  %v9407_v10 = vld [vmem:[#allocation3 + $0xc4] sm:$0xf0]  ;;  %v8385_v2 = vor.u32 %v9391_v60, %v8384_v28  ;;  %v8376_v5 = vld [vmem:[#allocation3 + $0x30] sm:$0xf] }
 0x82a   :  { %v8449_v18 = vor.u32 %v9407_v10, %v8448_v45  ;;  %v9389_v43 = vld [vmem:[#allocation3 + $0x34] sm:$0xf0]  ;;  %v8440_v36 = vld [vmem:[#allocation3 + $0xb0] sm:$0xf]  ;;  %v8368_v48 = vld [vmem:[#allocation3 + $0x20] sm:$0xf] }
 0x82b   :  { %7321 = vmatpush.bf16.msra.mxu1 %v8401_v32  ;;  %v9405_v56 = vld [vmem:[#allocation3 + $0xb4] sm:$0xf0]  ;;  %v8664_v37 = vld [vmem:[#allocation3 + $0x270] sm:$0xf]  ;;  %v8377_v24 = vor.u32 %v9389_v43, %v8376_v5  ;;  %v9387_v39 = vld [vmem:[#allocation3 + $0x24] sm:$0xf0] }
 0x82c   :  { %7334 = vmatpush.bf16.msra.mxu2 %v8465_v21  ;;  %v9461_v6 = vld [vmem:[#allocation3 + $0x274] sm:$0xf0]  ;;  %v8441_v12 = vor.u32 %v9405_v56, %v8440_v36  ;;  %v8656_v27 = vld [vmem:[#allocation3 + $0x260] sm:$0xf]  ;;  %v9403_v49 = vld [vmem:[#allocation3 + $0xa4] sm:$0xf0]  ;;  %v8369_v4 = vor.u32 %v9387_v39, %v8368_v48 }
 0x82d   :  { %v8665_v59 = vor.u32 %v9461_v6, %v8664_v37  ;;  %v8432_v7 = vld [vmem:[#allocation3 + $0xa0] sm:$0xf]  ;;  %v9459_v15 = vld [vmem:[#allocation3 + $0x264] sm:$0xf0]  ;;  %v8648_v23 = vld [vmem:[#allocation3 + $0x250] sm:$0xf] }
 0x82e   :  { %v8657_v33 = vor.u32 %v9459_v15, %v8656_v27  ;;  %v9457_v58 = vld [vmem:[#allocation3 + $0x254] sm:$0xf0]  ;;  %v8433_v41 = vor.u32 %v9403_v49, %v8432_v7  ;;  %v8360_v17 = vld [vmem:[#allocation3 + $0x10] sm:$0xf]  ;;  %v8640_v1 = vld [vmem:[#allocation3 + $0x240] sm:$0xf] }
 0x82f   :  { %7322 = vmatpush.bf16.msra.mxu1 %v8393_v40  ;;  %7372 = vmatpush.bf16.msra.mxu0 %v8665_v59  ;;  %v9385_v9 = vld [vmem:[#allocation3 + $0x14] sm:$0xf0]  ;;  %v8424_v29 = vld [vmem:[#allocation3 + $0x90] sm:$0xf]  ;;  %v8649_v57 = vor.u32 %v9457_v58, %v8648_v23  ;;  %v9455_v13 = vld [vmem:[#allocation3 + $0x244] sm:$0xf0] }
 0x830   :  { %7335 = vmatpush.bf16.msra.mxu2 %v8457_v8  ;;  %v9401_v20 = vld [vmem:[#allocation3 + $0x94] sm:$0xf0]  ;;  %v8361_v62 = vor.u32 %v9385_v9, %v8360_v17  ;;  %v8352_v52 = vld [vmem:[#allocation3] sm:$0xf]  ;;  %v9383_v53 = vld [vmem:[#allocation3 + $0x4] sm:$0xf0]  ;;  %v8641_v21 = vor.u32 %v9455_v13, %v8640_v1 }
 0x831   :  { %v8425_v42 = vor.u32 %v9401_v20, %v8424_v29  ;;  %v8416_v34 = vld [vmem:[#allocation3 + $0x80] sm:$0xf]  ;;  %v9399_v55 = vld [vmem:[#allocation3 + $0x84] sm:$0xf0]  ;;  %v8536_v22 = vld [vmem:[#allocation3 + $0x170] sm:$0xf]  ;;  %v8353_v38 = vor.u32 %v9383_v53, %v8352_v52 }
 0x832   :  { %v9429_v46 = vld [vmem:[#allocation3 + $0x174] sm:$0xf0]  ;;  %v8600_v54 = vld [vmem:[#allocation3 + $0x1f0] sm:$0xf]  ;;  %v8417_v61 = vor.u32 %v9399_v55, %v8416_v34  ;;  %v8528_v28 = vld [vmem:[#allocation3 + $0x160] sm:$0xf] }
 0x833   :  { %7323 = vmatpush.bf16.msra.mxu1 %v8385_v2  ;;  %7373 = vmatpush.bf16.msra.mxu0 %v8657_v33  ;;  %v9445_v32 = vld [vmem:[#allocation3 + $0x1f4] sm:$0xf0]  ;;  %v8632_v3 = vld [vmem:[#allocation3 + $0x230] sm:$0xf]  ;;  %v8537_v40 = vor.u32 %v9429_v46, %v8536_v22  ;;  %v9427_v60 = vld [vmem:[#allocation3 + $0x164] sm:$0xf0] }
 0x834   :  { %7336 = vmatpush.bf16.msra.mxu2 %v8449_v18  ;;  %v9453_v11 = vld [vmem:[#allocation3 + $0x234] sm:$0xf0]  ;;  %v8601_v8 = vor.u32 %v9445_v32, %v8600_v54  ;;  %v8592_v45 = vld [vmem:[#allocation3 + $0x1e0] sm:$0xf]  ;;  %v9443_v10 = vld [vmem:[#allocation3 + $0x1e4] sm:$0xf0]  ;;  %v8529_v43 = vor.u32 %v9427_v60, %v8528_v28 }
 0x835   :  { %v8633_v2 = vor.u32 %v9453_v11, %v8632_v3  ;;  %v8624_v18 = vld [vmem:[#allocation3 + $0x220] sm:$0xf]  ;;  %v9451_v5 = vld [vmem:[#allocation3 + $0x224] sm:$0xf0]  ;;  %v8593_v36 = vor.u32 %v9443_v10, %v8592_v45  ;;  %v8520_v56 = vld [vmem:[#allocation3 + $0x150] sm:$0xf] }
 0x836   :  { %v9425_v37 = vld [vmem:[#allocation3 + $0x154] sm:$0xf0]  ;;  %v8616_v48 = vld [vmem:[#allocation3 + $0x210] sm:$0xf]  ;;  %v8512_v7 = vld [vmem:[#allocation3 + $0x140] sm:$0xf] }
 0x837   :  { %7324 = vmatpush.bf16.msra.mxu1 %v8377_v24  ;;  %7374 = vmatpush.bf16.msra.mxu0 %v8649_v57  ;;  %v8584_v24 = vld [vmem:[#allocation3 + $0x1d0] sm:$0xf]  ;;  %v9441_v6 = vld [vmem:[#allocation3 + $0x1d4] sm:$0xf0]  ;;  %v8521_v59 = vor.u32 %v9425_v37, %v8520_v56  ;;  %v9423_v49 = vld [vmem:[#allocation3 + $0x144] sm:$0xf0] }
 0x838   :  { %7337 = vmatpush.bf16.msra.mxu2 %v8441_v12  ;;  %v8625_v12 = vor.u32 %v9451_v5, %v8624_v18  ;;  %v9449_v39 = vld [vmem:[#allocation3 + $0x214] sm:$0xf0]  ;;  %v8585_v27 = vor.u32 %v9441_v6, %v8584_v24  ;;  %v8576_v15 = vld [vmem:[#allocation3 + $0x1c0] sm:$0xf]  ;;  %v9439_v33 = vld [vmem:[#allocation3 + $0x1c4] sm:$0xf0] }
 0x839   :  { %v8608_v23 = vld [vmem:[#allocation3 + $0x200] sm:$0xf]  ;;  %v9447_v58 = vld [vmem:[#allocation3 + $0x204] sm:$0xf0]  ;;  %v8856_v17 = vld [vmem:[#allocation3 + $0x3f0] sm:$0xf]  ;;  %v8577_v29 = vor.u32 %v9439_v33, %v8576_v15 }
 0x83a   :  { %v9509_v9 = vld [vmem:[#allocation3 + $0x3f4] sm:$0xf0]  ;;  %v8504_v20 = vld [vmem:[#allocation3 + $0x130] sm:$0xf]  ;;  %v8609_v13 = vor.u32 %v9447_v58, %v8608_v23  ;;  %v8848_v53 = vld [vmem:[#allocation3 + $0x3e0] sm:$0xf] }
 0x83b   :  { %7325 = vmatpush.bf16.msra.mxu1 %v8369_v4  ;;  %7375 = vmatpush.bf16.msra.mxu0 %v8641_v21  ;;  %v8617_v4 = vor.u32 %v9449_v39, %v8616_v48  ;;  %v9421_v57 = vld [vmem:[#allocation3 + $0x134] sm:$0xf0]  ;;  %v8568_v1 = vld [vmem:[#allocation3 + $0x1b0] sm:$0xf]  ;;  %v9507_v34 = vld [vmem:[#allocation3 + $0x3e4] sm:$0xf0] }
 0x83c   :  { %7338 = vmatpush.bf16.msra.mxu2 %v8433_v41  ;;  %v8513_v41 = vor.u32 %v9423_v49, %v8512_v7  ;;  %v8505_v52 = vor.u32 %v9421_v57, %v8504_v20  ;;  %v8496_v22 = vld [vmem:[#allocation3 + $0x120] sm:$0xf]  ;;  %v9419_v46 = vld [vmem:[#allocation3 + $0x124] sm:$0xf0]  ;;  %v8849_v21 = vor.u32 %v9507_v34, %v8848_v53  ;;  %v8840_v3 = vld [vmem:[#allocation3 + $0x3d0] sm:$0xf] }
 0x83d   :  { %v8560_v54 = vld [vmem:[#allocation3 + $0x1a0] sm:$0xf]  ;;  %v9435_v32 = vld [vmem:[#allocation3 + $0x1a4] sm:$0xf0]  ;;  %v9505_v11 = vld [vmem:[#allocation3 + $0x3d4] sm:$0xf0] }
 0x83e   :  { %v8552_v28 = vld [vmem:[#allocation3 + $0x190] sm:$0xf]  ;;  %v9433_v60 = vld [vmem:[#allocation3 + $0x194] sm:$0xf0]  ;;  %v8841_v45 = vor.u32 %v9505_v11, %v8840_v3  ;;  %v9503_v18 = vld [vmem:[#allocation3 + $0x3c4] sm:$0xf0] }
 0x83f   :  { %7326 = vmatpush.bf16.msra.mxu1 %v8361_v62  ;;  %7376 = vmatpush.bf16.msra.mxu0 %v8633_v2  ;;  %v9437_v62 = vld [vmem:[#allocation3 + $0x1b4] sm:$0xf0]  ;;  %v8832_v2 = vld [vmem:[#allocation3 + $0x3c0] sm:$0xf]  ;;  %v8553_v5 = vor.u32 %v9433_v60, %v8552_v28  ;;  %v9431_v37 = vld [vmem:[#allocation3 + $0x184] sm:$0xf0] }
 0x840   :  { %7339 = vmatpush.bf16.msra.mxu2 %v8425_v42  ;;  %v8857_v42 = vor.u32 %v9509_v9, %v8856_v17  ;;  %v8569_v55 = vor.u32 %v9437_v62, %v8568_v1  ;;  %v8544_v56 = vld [vmem:[#allocation3 + $0x180] sm:$0xf]  ;;  %v8728_v24 = vld [vmem:[#allocation3 + $0x2f0] sm:$0xf]  ;;  %v9477_v6 = vld [vmem:[#allocation3 + $0x2f4] sm:$0xf0]  ;;  %v8833_v39 = vor.u32 %v9503_v18, %v8832_v2 }
 0x841   :  { %v9493_v48 = vld [vmem:[#allocation3 + $0x374] sm:$0xf0]  ;;  %v8545_v49 = vor.u32 %v9431_v37, %v8544_v56  ;;  %v8729_v15 = vor.u32 %v9477_v6, %v8728_v24  ;;  %v9475_v23 = vld [vmem:[#allocation3 + $0x2e4] sm:$0xf0]  ;;  %v8784_v58 = vld [vmem:[#allocation3 + $0x360] sm:$0xf] }
 0x842   :  { %v9501_v7 = vld [vmem:[#allocation3 + $0x3b4] sm:$0xf0]  ;;  %v8816_v9 = vld [vmem:[#allocation3 + $0x3a0] sm:$0xf]  ;;  %v8712_v1 = vld [vmem:[#allocation3 + $0x2d0] sm:$0xf] }
 0x843   :  { %7327 = vmatpush.bf16.msra.mxu1 %v8353_v38  ;;  %7377 = vmatpush.bf16.msra.mxu0 %v8625_v12  ;;  %v8497_v38 = vor.u32 %v9419_v46, %v8496_v22  ;;  %v8792_v12 = vld [vmem:[#allocation3 + $0x370] sm:$0xf]  ;;  %v9473_v62 = vld [vmem:[#allocation3 + $0x2d4] sm:$0xf0]  ;;  %v8704_v46 = vld [vmem:[#allocation3 + $0x2c0] sm:$0xf] }
 0x844   :  { %7340 = vmatpush.bf16.msra.mxu2 %v8417_v61  ;;  %v8561_v61 = vor.u32 %v9435_v32, %v8560_v54  ;;  %v8793_v33 = vor.u32 %v9493_v48, %v8792_v12  ;;  %v8808_v53 = vld [vmem:[#allocation3 + $0x390] sm:$0xf]  ;;  %v9497_v34 = vld [vmem:[#allocation3 + $0x394] sm:$0xf0]  ;;  %v9471_v54 = vld [vmem:[#allocation3 + $0x2c4] sm:$0xf0] }
 0x845   :  { %v8768_v32 = vld [vmem:[#allocation3 + $0x340] sm:$0xf]  ;;  %v9495_v11 = vld [vmem:[#allocation3 + $0x384] sm:$0xf0]  ;;  %v8696_v60 = vld [vmem:[#allocation3 + $0x2b0] sm:$0xf] }
 0x846   :  { %7328 = vmatmul.bf16.vlgmr.msra.gmra.mxu1 %v14481_v19  ;;  %v8800_v3 = vld [vmem:[#allocation3 + $0x380] sm:$0xf]  ;;  %v9485_v2 = vld [vmem:[#allocation3 + $0x334] sm:$0xf0]  ;;  %v9555_v56 = vld [vmem:[#allocation3 + $0x564] sm:$0xf0] }
 0x847   :  { %7346 = vmatpush.bf16.msrb.mxu1 %v8537_v40  ;;  %7341 = vmatmul.bf16.vlgmr.msra.gmra.mxu2 %v14486_v50  ;;  %v8488_v40 = vld [vmem:[#allocation3 + $0x110] sm:$0xf]  ;;  %v8801_v18 = vor.u32 %v9495_v11, %v8800_v3  ;;  %v8688_v24 = vld [vmem:[#allocation3 + $0x2a0] sm:$0xf]  ;;  %v9467_v6 = vld [vmem:[#allocation3 + $0x2a4] sm:$0xf0] }
 0x848   :  { %7359 = vmatpush.bf16.msrb.mxu2 %v8601_v8  ;;  %7378 = vmatpush.bf16.msra.mxu0 %v8617_v4  ;;  %v9417_v8 = vld [vmem:[#allocation3 + $0x114] sm:$0xf0]  ;;  %v8720_v4 = vld [vmem:[#allocation3 + $0x2e0] sm:$0xf]  ;;  %v9483_v48 = vld [vmem:[#allocation3 + $0x324] sm:$0xf0] }
 0x849   :  { %v8489_v10 = vor.u32 %v9417_v8, %v8488_v40  ;;  %v8721_v20 = vor.u32 %v9475_v23, %v8720_v4  ;;  %v9048_v40 = vld [vmem:[#allocation3 + $0x570] sm:$0xf]  ;;  %v9557_v8 = vld [vmem:[#allocation3 + $0x574] sm:$0xf0]  ;;  %v8752_v12 = vld [vmem:[#allocation3 + $0x320] sm:$0xf] }
 0x84a   :  { %v8744_v4 = vld [vmem:[#allocation3 + $0x310] sm:$0xf]  ;;  %v9481_v23 = vld [vmem:[#allocation3 + $0x314] sm:$0xf0]  ;;  %v9523_v3 = vld [vmem:[#allocation3 + $0x464] sm:$0xf0] }
 0x84b   :  { %7347 = vmatpush.bf16.msrb.mxu1 %v8529_v43  ;;  %v8480_v43 = vld [vmem:[#allocation3 + $0x100] sm:$0xf]  ;;  %vm7734_vm11 = vcmask 1040384   ;;  %s9664_s27 = smov [#allocation5]  }
 0x84c   :  { %7360 = vmatpush.bf16.msrb.mxu2 %v8593_v36  ;;  %7379 = vmatpush.bf16.msra.mxu0 %v8609_v13  ;;  %v9415_v36 = vld [vmem:[#allocation3 + $0x104] sm:$0xf0]  ;;  %v8776_v13 = vld [vmem:[#allocation3 + $0x350] sm:$0xf]  ;;  %v8976_v11 = vld [vmem:[#allocation3 + $0x4e0] sm:$0xf] }
 0x84d   :  { %s7901_s3 = sshll.u32 %s9664_s27, 4  ;;  %s7902_s3 = int_to_ptr.vmem [resolvable:$true] %s7901_s3 }
 0x84f   :  { %7348 = vmatpush.bf16.msrb.mxu1 %v8521_v59  ;;  %7380 = vmatmul.bf16.vlgmr.msra.gmra.mxu0 %v14502_v47  ;;  %v8481_v59 = vor.u32 %v9415_v36, %v8480_v43  ;;  %v9040_v36 = vld [vmem:[#allocation3 + $0x560] sm:$0xf] }
 0x850   :  { %7361 = vmatpush.bf16.msrb.mxu2 %v8585_v27  ;;  %7411 = vmatpush.bf16.msrb.mxu0 %v8857_v42  ;;  %v8824_v27 = vld [vmem:[#allocation3 + $0x3b0] sm:$0xf]  ;;  %v9489_v42 = vld [vmem:[#allocation3 + $0x354] sm:$0xf0] }
 0x851   :  { %v8825_v17 = vor.u32 %v9501_v7, %v8824_v27  ;;  %v8777_v22 = vor.u32 %v9489_v42, %v8776_v13  ;;  %v9032_v27 = vld [vmem:[#allocation3 + $0x550] sm:$0xf]  ;;  %v9553_v7 = vld [vmem:[#allocation3 + $0x554] sm:$0xf0] }
 0x852   :  { %v8920_v13 = vld [vmem:[#allocation3 + $0x470] sm:$0xf]  ;;  %v9525_v42 = vld [vmem:[#allocation3 + $0x474] sm:$0xf0] }
 0x853   :  { %7349 = vmatpush.bf16.msrb.mxu1 %v8513_v41  ;;  %v9491_v41 = vld [vmem:[#allocation3 + $0x364] sm:$0xf0] }
 0x854   :  { %7362 = vmatpush.bf16.msrb.mxu2 %v8577_v29  ;;  %7412 = vmatpush.bf16.msrb.mxu0 %v8849_v21  ;;  %v9499_v29 = vld [vmem:[#allocation3 + $0x3a4] sm:$0xf0]  ;;  %v8785_v57 = vor.u32 %v9491_v41, %v8784_v58  ;;  %v9033_v58 = vor.u32 %v9553_v7, %v9032_v27  ;;  %v8992_v27 = vld [vmem:[#allocation3 + $0x500] sm:$0xf] }
 0x855   :  { %v9487_v21 = vld [vmem:[#allocation3 + $0x344] sm:$0xf0] }
 0x856   :  { %v8769_v28 = vor.u32 %v9487_v21, %v8768_v32  ;;  %v8921_v32 = vor.u32 %v9525_v42, %v8920_v13  ;;  %v9543_v7 = vld [vmem:[#allocation3 + $0x504] sm:$0xf0]  ;;  %v8880_v13 = vld [vmem:[#allocation3 + $0x420] sm:$0xf] }
 0x857   :  { %7350 = vmatpush.bf16.msrb.mxu1 %v8505_v52  ;;  %v8817_v52 = vor.u32 %v9499_v29, %v8816_v9  ;;  %v9551_v9 = vld [vmem:[#allocation3 + $0x544] sm:$0xf0]  ;;  %v8745_v29 = vor.u32 %v9481_v23, %v8744_v4  ;;  %v8888_v23 = vld [vmem:[#allocation3 + $0x430] sm:$0xf] }
 0x858   :  { %7363 = vmatpush.bf16.msrb.mxu2 %v8569_v55  ;;  %7413 = vmatpush.bf16.msrb.mxu0 %v8841_v45  ;;  %v8713_v55 = vor.u32 %v9473_v62, %v8712_v1  ;;  %v9469_v45 = vld [vmem:[#allocation3 + $0x2b4] sm:$0xf0]  ;;  %v8736_v1 = vld [vmem:[#allocation3 + $0x300] sm:$0xf]  ;;  %v9479_v62 = vld [vmem:[#allocation3 + $0x304] sm:$0xf0] }
 0x859   :  { %v8697_v43 = vor.u32 %v9469_v45, %v8696_v60  ;;  %v9515_v42 = vld [vmem:[#allocation3 + $0x424] sm:$0xf0] }
 0x85b   :  { %7351 = vmatpush.bf16.msrb.mxu1 %v8497_v38  ;;  %v8809_v38 = vor.u32 %v9497_v34, %v8808_v53  ;;  %v9541_v53 = vld [vmem:[#allocation3 + $0x4f4] sm:$0xf0] }
 0x85c   :  { %7364 = vmatpush.bf16.msrb.mxu2 %v8561_v61  ;;  %7414 = vmatpush.bf16.msrb.mxu0 %v8833_v39  ;;  %v8705_v61 = vor.u32 %v9471_v54, %v8704_v46  ;;  %v9041_v39 = vor.u32 %v9555_v56, %v9040_v36  ;;  %v9549_v46 = vld [vmem:[#allocation3 + $0x534] sm:$0xf0]  ;;  %v8737_v54 = vor.u32 %v9479_v62, %v8736_v1  ;;  %v9000_v36 = vld [vmem:[#allocation3 + $0x510] sm:$0xf]  ;;  %v9603_v1 = vld [vmem:[#allocation3 + $0x6e4] sm:$0xf0] }
 0x85d   :  { %v9545_v56 = vld [vmem:[#allocation3 + $0x514] sm:$0xf0] }
 0x85f   :  { %7352 = vmatpush.bf16.msrb.mxu1 %v8489_v10  ;;  %v8760_v10 = vld [vmem:[#allocation3 + $0x330] sm:$0xf] }
 0x860   :  { %7365 = vmatpush.bf16.msrb.mxu2 %v8553_v5  ;;  %7415 = vmatpush.bf16.msrb.mxu0 %v8825_v17  ;;  %v9049_v5 = vor.u32 %v9557_v8, %v9048_v40  ;;  %v8761_v37 = vor.u32 %v9485_v2, %v8760_v10  ;;  %v9024_v17 = vld [vmem:[#allocation3 + $0x540] sm:$0xf]  ;;  %v8904_v10 = vld [vmem:[#allocation3 + $0x450] sm:$0xf]  ;;  %v9521_v2 = vld [vmem:[#allocation3 + $0x454] sm:$0xf0] }
 0x861   :  { %v9025_v34 = vor.u32 %v9551_v9, %v9024_v17  ;;  %v9008_v8 = vld [vmem:[#allocation3 + $0x520] sm:$0xf]  ;;  %v9533_v17 = vld [vmem:[#allocation3 + $0x4b4] sm:$0xf0]  ;;  %v8993_v9 = vor.u32 %v9543_v7, %v8992_v27  ;;  %v9571_v27 = vld [vmem:[#allocation3 + $0x5e4] sm:$0xf0] }
 0x862   :  { %v9168_v7 = vld [vmem:[#allocation3 + $0x660] sm:$0xf] }
 0x863   :  { %7353 = vmatpush.bf16.msrb.mxu1 %v8481_v59  ;;  %v8689_v59 = vor.u32 %v9467_v6, %v8688_v24  ;;  %v8896_v6 = vld [vmem:[#allocation3 + $0x440] sm:$0xf] }
 0x864   :  { %7366 = vmatpush.bf16.msrb.mxu2 %v8545_v49  ;;  %7416 = vmatpush.bf16.msrb.mxu0 %v8817_v52  ;;  %v8753_v49 = vor.u32 %v9483_v48, %v8752_v12  ;;  %v8984_v52 = vld [vmem:[#allocation3 + $0x4f0] sm:$0xf]  ;;  %v9519_v12 = vld [vmem:[#allocation3 + $0x444] sm:$0xf0]  ;;  %v8960_v48 = vld [vmem:[#allocation3 + $0x4c0] sm:$0xf] }
 0x865   :  { %v8985_v21 = vor.u32 %v9541_v53, %v8984_v52  ;;  %v8944_v52 = vld [vmem:[#allocation3 + $0x4a0] sm:$0xf]  ;;  %v9531_v53 = vld [vmem:[#allocation3 + $0x4a4] sm:$0xf0] }
 0x866   :  { %7354 = vmatmul.bf16.vlgmr.msrb.gmra.mxu1 %v14490_v16 }
 0x867   :  { %7385 = vmatpush.bf16.msra.mxu1 %v8729_v15  ;;  %7367 = vmatmul.bf16.vlgmr.msrb.gmra.mxu2 %v14498_v35  ;;  %v8680_v15 = vld [vmem:[#allocation3 + $0x290] sm:$0xf] }
 0x868   :  { %7398 = vmatpush.bf16.msra.mxu2 %v8793_v33  ;;  %7417 = vmatpush.bf16.msrb.mxu0 %v8809_v38  ;;  %v9465_v33 = vld [vmem:[#allocation3 + $0x294] sm:$0xf0]  ;;  %v8912_v38 = vld [vmem:[#allocation3 + $0x460] sm:$0xf] }
 0x869   :  { %v8681_v41 = vor.u32 %v9465_v33, %v8680_v15  ;;  %v8913_v60 = vor.u32 %v9523_v3, %v8912_v38  ;;  %v9240_v15 = vld [vmem:[#allocation3 + $0x6f0] sm:$0xf]  ;;  %v9605_v33 = vld [vmem:[#allocation3 + $0x6f4] sm:$0xf0] }
 0x86a   :  { %v8936_v38 = vld [vmem:[#allocation3 + $0x490] sm:$0xf]  ;;  %v9529_v3 = vld [vmem:[#allocation3 + $0x494] sm:$0xf0] }
 0x86b   :  { %7386 = vmatpush.bf16.msra.mxu1 %v8721_v20  ;;  %v8672_v20 = vld [vmem:[#allocation3 + $0x280] sm:$0xf] }
 0x86c   :  { %7399 = vmatpush.bf16.msra.mxu2 %v8785_v57  ;;  %7418 = vmatpush.bf16.msrb.mxu0 %v8801_v18  ;;  %v9463_v57 = vld [vmem:[#allocation3 + $0x284] sm:$0xf0]  ;;  %v8968_v18 = vld [vmem:[#allocation3 + $0x4d0] sm:$0xf] }
 0x86f   :  { %7387 = vmatpush.bf16.msra.mxu1 %v8713_v55  ;;  %7419 = vmatmul.bf16.vlgmr.msrb.gmra.mxu0 %v14519_v44  ;;  %v8673_v55 = vor.u32 %v9463_v57, %v8672_v20  ;;  %v9232_v57 = vld [vmem:[#allocation3 + $0x6e0] sm:$0xf] }
 0x870   :  { %7400 = vmatpush.bf16.msra.mxu2 %v8777_v22  ;;  %7450 = vmatpush.bf16.msra.mxu0 %v9049_v5  ;;  %v9016_v22 = vld [vmem:[#allocation3 + $0x530] sm:$0xf]  ;;  %v9537_v5 = vld [vmem:[#allocation3 + $0x4d4] sm:$0xf0] }
 0x871   :  { %v9017_v40 = vor.u32 %v9549_v46, %v9016_v22  ;;  %v8969_v24 = vor.u32 %v9537_v5, %v8968_v18  ;;  %v9224_v22 = vld [vmem:[#allocation3 + $0x6d0] sm:$0xf]  ;;  %v9601_v46 = vld [vmem:[#allocation3 + $0x6d4] sm:$0xf0] }
 0x872   :  { %v9112_v18 = vld [vmem:[#allocation3 + $0x5f0] sm:$0xf]  ;;  %v9573_v5 = vld [vmem:[#allocation3 + $0x5f4] sm:$0xf0] }
 0x873   :  { %7388 = vmatpush.bf16.msra.mxu1 %v8705_v61  ;;  %v9539_v61 = vld [vmem:[#allocation3 + $0x4e4] sm:$0xf0] }
 0x874   :  { %7401 = vmatpush.bf16.msra.mxu2 %v8769_v28  ;;  %7451 = vmatpush.bf16.msra.mxu0 %v9041_v39  ;;  %v9547_v28 = vld [vmem:[#allocation3 + $0x524] sm:$0xf0]  ;;  %v8977_v45 = vor.u32 %v9539_v61, %v8976_v11  ;;  %v9225_v11 = vor.u32 %v9601_v46, %v9224_v22  ;;  %v9184_v22 = vld [vmem:[#allocation3 + $0x680] sm:$0xf] }
 0x875   :  { %v9535_v39 = vld [vmem:[#allocation3 + $0x4c4] sm:$0xf0] }
 0x876   :  { %v8961_v4 = vor.u32 %v9535_v39, %v8960_v48  ;;  %v9113_v48 = vor.u32 %v9573_v5, %v9112_v18  ;;  %v9591_v46 = vld [vmem:[#allocation3 + $0x684] sm:$0xf0]  ;;  %v9072_v18 = vld [vmem:[#allocation3 + $0x5a0] sm:$0xf] }
 0x877   :  { %7389 = vmatpush.bf16.msra.mxu1 %v8697_v43  ;;  %v9009_v43 = vor.u32 %v9547_v28, %v9008_v8  ;;  %v9599_v8 = vld [vmem:[#allocation3 + $0x6c4] sm:$0xf0]  ;;  %v8937_v28 = vor.u32 %v9529_v3, %v8936_v38  ;;  %v9080_v3 = vld [vmem:[#allocation3 + $0x5b0] sm:$0xf] }
 0x878   :  { %7402 = vmatpush.bf16.msra.mxu2 %v8761_v37  ;;  %7452 = vmatpush.bf16.msra.mxu0 %v9033_v58  ;;  %v8905_v37 = vor.u32 %v9521_v2, %v8904_v10  ;;  %v9517_v58 = vld [vmem:[#allocation3 + $0x434] sm:$0xf0]  ;;  %v8928_v10 = vld [vmem:[#allocation3 + $0x480] sm:$0xf]  ;;  %v9527_v2 = vld [vmem:[#allocation3 + $0x484] sm:$0xf0] }
 0x879   :  { %v8889_v20 = vor.u32 %v9517_v58, %v8888_v23  ;;  %v9563_v5 = vld [vmem:[#allocation3 + $0x5a4] sm:$0xf0] }
 0x87b   :  { %7390 = vmatpush.bf16.msra.mxu1 %v8689_v59  ;;  %v9001_v59 = vor.u32 %v9545_v56, %v9000_v36  ;;  %v9589_v36 = vld [vmem:[#allocation3 + $0x674] sm:$0xf0] }
 0x87c   :  { %7403 = vmatpush.bf16.msra.mxu2 %v8753_v49  ;;  %7453 = vmatpush.bf16.msra.mxu0 %v9025_v34  ;;  %v8897_v49 = vor.u32 %v9519_v12, %v8896_v6  ;;  %v9233_v34 = vor.u32 %v9603_v1, %v9232_v57  ;;  %v9597_v6 = vld [vmem:[#allocation3 + $0x6b4] sm:$0xf0]  ;;  %v8929_v12 = vor.u32 %v9527_v2, %v8928_v10  ;;  %v9192_v57 = vld [vmem:[#allocation3 + $0x690] sm:$0xf]  ;;  %v8530_v10 = vld [vmem:[#allocation3 + $0x168] sm:$0xf0] }
 0x87d   :  { %v9593_v1 = vld [vmem:[#allocation3 + $0x694] sm:$0xf0] }
 0x87f   :  { %7391 = vmatpush.bf16.msra.mxu1 %v8681_v41  ;;  %v8952_v41 = vld [vmem:[#allocation3 + $0x4b0] sm:$0xf] }
 0x880   :  { %7404 = vmatpush.bf16.msra.mxu2 %v8745_v29  ;;  %7454 = vmatpush.bf16.msra.mxu0 %v9017_v40  ;;  %v9241_v29 = vor.u32 %v9605_v33, %v9240_v15  ;;  %v8953_v62 = vor.u32 %v9533_v17, %v8952_v41  ;;  %v9216_v40 = vld [vmem:[#allocation3 + $0x6c0] sm:$0xf]  ;;  %v9096_v41 = vld [vmem:[#allocation3 + $0x5d0] sm:$0xf]  ;;  %v9569_v17 = vld [vmem:[#allocation3 + $0x5d4] sm:$0xf0] }
 0x881   :  { %v9217_v56 = vor.u32 %v9599_v8, %v9216_v40  ;;  %v9200_v33 = vld [vmem:[#allocation3 + $0x6a0] sm:$0xf]  ;;  %v9581_v40 = vld [vmem:[#allocation3 + $0x634] sm:$0xf0]  ;;  %v9185_v8 = vor.u32 %v9591_v46, %v9184_v22  ;;  %v8402_v22 = vld [vmem:[#allocation3 + $0x68] sm:$0xf0] }
 0x882   :  { %v9410_v46 = vld [vmem:[#allocation3 + $0xe4] sm:$0xf] }
 0x883   :  { %7392 = vmatpush.bf16.msra.mxu1 %v8673_v55  ;;  %v8881_v55 = vor.u32 %v9515_v42, %v8880_v13  ;;  %v9088_v42 = vld [vmem:[#allocation3 + $0x5c0] sm:$0xf] }
 0x884   :  { %7405 = vmatpush.bf16.msra.mxu2 %v8737_v54  ;;  %7455 = vmatpush.bf16.msra.mxu0 %v9009_v43  ;;  %v8945_v54 = vor.u32 %v9531_v53, %v8944_v52  ;;  %v9176_v43 = vld [vmem:[#allocation3 + $0x670] sm:$0xf]  ;;  %v9567_v52 = vld [vmem:[#allocation3 + $0x5c4] sm:$0xf0]  ;;  %v9152_v53 = vld [vmem:[#allocation3 + $0x640] sm:$0xf] }
 0x885   :  { %v9177_v39 = vor.u32 %v9589_v36, %v9176_v43  ;;  %v9136_v43 = vld [vmem:[#allocation3 + $0x620] sm:$0xf]  ;;  %v9579_v36 = vld [vmem:[#allocation3 + $0x624] sm:$0xf0] }
 0x886   :  { %7393 = vmatmul.bf16.vlgmr.msra.gmra.mxu1 %v14507_v30 }
 0x887   :  { %7424 = vmatpush.bf16.msrb.mxu1 %v8921_v32  ;;  %7406 = vmatmul.bf16.vlgmr.msra.gmra.mxu2 %v14511_v26  ;;  %v8872_v32 = vld [vmem:[#allocation3 + $0x410] sm:$0xf] }
 0x888   :  { %7437 = vmatpush.bf16.msrb.mxu2 %v8985_v21  ;;  %7456 = vmatpush.bf16.msra.mxu0 %v9001_v59  ;;  %v9513_v21 = vld [vmem:[#allocation3 + $0x414] sm:$0xf0]  ;;  %v9104_v59 = vld [vmem:[#allocation3 + $0x5e0] sm:$0xf] }
 0x889   :  { %v8873_v61 = vor.u32 %v9513_v21, %v8872_v32  ;;  %v9105_v23 = vor.u32 %v9571_v27, %v9104_v59  ;;  %v9428_v32 = vld [vmem:[#allocation3 + $0x174] sm:$0xf]  ;;  %v8538_v21 = vld [vmem:[#allocation3 + $0x178] sm:$0xf0]  ;;  %v9128_v59 = vld [vmem:[#allocation3 + $0x610] sm:$0xf] }
 0x88a   :  { %v9577_v27 = vld [vmem:[#allocation3 + $0x614] sm:$0xf0] }
 0x88b   :  { %7425 = vmatpush.bf16.msrb.mxu1 %v8913_v60  ;;  %v8864_v60 = vld [vmem:[#allocation3 + $0x400] sm:$0xf] }
 0x88c   :  { %7438 = vmatpush.bf16.msrb.mxu2 %v8977_v45  ;;  %7457 = vmatpush.bf16.msra.mxu0 %v8993_v9  ;;  %v9511_v45 = vld [vmem:[#allocation3 + $0x404] sm:$0xf0]  ;;  %v9160_v9 = vld [vmem:[#allocation3 + $0x650] sm:$0xf] }
 0x88f   :  { %7426 = vmatpush.bf16.msrb.mxu1 %v8905_v37  ;;  %7458 = vmatmul.bf16.vlgmr.msra.gmra.mxu0 %v14531_v25  ;;  %v8865_v37 = vor.u32 %v9511_v45, %v8864_v60  ;;  %v9426_v45 = vld [vmem:[#allocation3 + $0x164] sm:$0xf] }
 0x890   :  { %7439 = vmatpush.bf16.msrb.mxu2 %v8969_v24  ;;  %7489 = vmatpush.bf16.msrb.mxu0 %v9241_v29  ;;  %v9208_v24 = vld [vmem:[#allocation3 + $0x6b0] sm:$0xf]  ;;  %v9585_v29 = vld [vmem:[#allocation3 + $0x654] sm:$0xf0] }
 0x891   :  { %v9209_v15 = vor.u32 %v9597_v6, %v9208_v24  ;;  %v9161_v13 = vor.u32 %v9585_v29, %v9160_v9  ;;  %v9424_v24 = vld [vmem:[#allocation3 + $0x154] sm:$0xf]  ;;  %v8522_v6 = vld [vmem:[#allocation3 + $0x158] sm:$0xf0] }
 0x892   :  { %v9396_v9 = vld [vmem:[#allocation3 + $0x74] sm:$0xf]  ;;  %v8410_v29 = vld [vmem:[#allocation3 + $0x78] sm:$0xf0] }
 0x893   :  { %7427 = vmatpush.bf16.msrb.mxu1 %v8897_v49  ;;  %v9587_v49 = vld [vmem:[#allocation3 + $0x664] sm:$0xf0] }
 0x894   :  { %7440 = vmatpush.bf16.msrb.mxu2 %v8961_v4  ;;  %7490 = vmatpush.bf16.msrb.mxu0 %v9233_v34  ;;  %v9595_v4 = vld [vmem:[#allocation3 + $0x6a4] sm:$0xf0]  ;;  %v9169_v58 = vor.u32 %v9587_v49, %v9168_v7  ;;  %v8525_v7 = vor.u32 %v9424_v24, %v8522_v6  ;;  %v9414_v24 = vld [vmem:[#allocation3 + $0x104] sm:$0xf]  ;;  %v8482_v6 = vld [vmem:[#allocation3 + $0x108] sm:$0xf0] }
 0x895   :  { %v9583_v34 = vld [vmem:[#allocation3 + $0x644] sm:$0xf0] }
 0x896   :  { %v9153_v38 = vor.u32 %v9583_v34, %v9152_v53  ;;  %v8413_v53 = vor.u32 %v9396_v9, %v8410_v29  ;;  %v9386_v29 = vld [vmem:[#allocation3 + $0x24] sm:$0xf] }
 0x897   :  { %7428 = vmatpush.bf16.msrb.mxu1 %v8889_v20  ;;  %v9201_v20 = vor.u32 %v9595_v4, %v9200_v33  ;;  %v8514_v33 = vld [vmem:[#allocation3 + $0x148] sm:$0xf0]  ;;  %v9129_v4 = vor.u32 %v9577_v27, %v9128_v59  ;;  %v9388_v27 = vld [vmem:[#allocation3 + $0x34] sm:$0xf] }
 0x898   :  { %7441 = vmatpush.bf16.msrb.mxu2 %v8953_v62  ;;  %7491 = vmatpush.bf16.msrb.mxu0 %v9225_v11  ;;  %v9097_v62 = vor.u32 %v9569_v17, %v9096_v41  ;;  %v9565_v11 = vld [vmem:[#allocation3 + $0x5b4] sm:$0xf0]  ;;  %v9120_v41 = vld [vmem:[#allocation3 + $0x600] sm:$0xf]  ;;  %v9575_v17 = vld [vmem:[#allocation3 + $0x604] sm:$0xf0] }
 0x899   :  { %v9081_v60 = vor.u32 %v9565_v11, %v9080_v3 }
 0x89b   :  { %7429 = vmatpush.bf16.msrb.mxu1 %v8881_v55  ;;  %v9193_v55 = vor.u32 %v9593_v1, %v9192_v57  ;;  %v8474_v57 = vld [vmem:[#allocation3 + $0xf8] sm:$0xf0] }
 0x89c   :  { %7442 = vmatpush.bf16.msrb.mxu2 %v8945_v54  ;;  %7492 = vmatpush.bf16.msrb.mxu0 %v9217_v56  ;;  %v9089_v54 = vor.u32 %v9567_v52, %v9088_v42  ;;  %v8533_v56 = vor.u32 %v9426_v45, %v8530_v10  ;;  %v8506_v42 = vld [vmem:[#allocation3 + $0x138] sm:$0xf0]  ;;  %v9121_v52 = vor.u32 %v9575_v17, %v9120_v41  ;;  %v9416_v45 = vld [vmem:[#allocation3 + $0x114] sm:$0xf]  ;;  %v9474_v41 = vld [vmem:[#allocation3 + $0x2e4] sm:$0xf] }
 0x89d   :  { %v8490_v10 = vld [vmem:[#allocation3 + $0x118] sm:$0xf0]  ;;  %v8722_v17 = vld [vmem:[#allocation3 + $0x2e8] sm:$0xf0] }
 0x89f   :  { %7430 = vmatpush.bf16.msrb.mxu1 %v8873_v61  ;;  %v9144_v61 = vld [vmem:[#allocation3 + $0x630] sm:$0xf] }
 0x8a0   :  { %7443 = vmatpush.bf16.msrb.mxu2 %v8937_v28  ;;  %7493 = vmatpush.bf16.msrb.mxu0 %v9209_v15  ;;  %v8541_v28 = vor.u32 %v9428_v32, %v8538_v21  ;;  %v9145_v2 = vor.u32 %v9581_v40, %v9144_v61  ;;  %v9422_v15 = vld [vmem:[#allocation3 + $0x144] sm:$0xf]  ;;  %v9392_v61 = vld [vmem:[#allocation3 + $0x54] sm:$0xf]  ;;  %v8394_v40 = vld [vmem:[#allocation3 + $0x58] sm:$0xf0] }
 0x8a1   :  { %v8517_v1 = vor.u32 %v9422_v15, %v8514_v33  ;;  %v9418_v21 = vld [vmem:[#allocation3 + $0x124] sm:$0xf]  ;;  %v8442_v15 = vld [vmem:[#allocation3 + $0xb8] sm:$0xf0]  ;;  %v8485_v33 = vor.u32 %v9414_v24, %v8482_v6 }
 0x8a3   :  { %7431 = vmatpush.bf16.msrb.mxu1 %v8865_v37  ;;  %v9073_v37 = vor.u32 %v9563_v5, %v9072_v18  ;;  %v9390_v5 = vld [vmem:[#allocation3 + $0x44] sm:$0xf] }
 0x8a4   :  { %7444 = vmatpush.bf16.msrb.mxu2 %v8929_v12  ;;  %7494 = vmatpush.bf16.msrb.mxu0 %v9201_v20  ;;  %v9137_v12 = vor.u32 %v9579_v36, %v9136_v43  ;;  %v9412_v20 = vld [vmem:[#allocation3 + $0xf4] sm:$0xf]  ;;  %v8386_v43 = vld [vmem:[#allocation3 + $0x48] sm:$0xf0]  ;;  %v9406_v36 = vld [vmem:[#allocation3 + $0xc4] sm:$0xf] }
 0x8a5   :  { %v8477_v34 = vor.u32 %v9412_v20, %v8474_v57  ;;  %v8370_v20 = vld [vmem:[#allocation3 + $0x28] sm:$0xf0]  ;;  %v9402_v57 = vld [vmem:[#allocation3 + $0xa4] sm:$0xf] }
 0x8a6   :  { %7432 = vmatmul.bf16.vlgmr.msrb.gmra.mxu1 %v14523_v14 }
 0x8a7   :  { %7463 = vmatpush.bf16.msra.mxu1 %v9113_v48  ;;  %7445 = vmatmul.bf16.vlgmr.msrb.gmra.mxu2 %v14528_v0  ;;  %v9064_v48 = vld [vmem:[#allocation3 + $0x590] sm:$0xf] }
 0x8a8   :  { %7476 = vmatpush.bf16.msra.mxu2 %v9177_v39  ;;  %7495 = vmatpush.bf16.msrb.mxu0 %v9193_v55  ;;  %v9561_v39 = vld [vmem:[#allocation3 + $0x594] sm:$0xf0]  ;;  %v9394_v55 = vld [vmem:[#allocation3 + $0x64] sm:$0xf] }
 0x8a9   :  { %v9065_v49 = vor.u32 %v9561_v39, %v9064_v48  ;;  %v8405_v3 = vor.u32 %v9394_v55, %v8402_v22  ;;  %v9476_v48 = vld [vmem:[#allocation3 + $0x2f4] sm:$0xf]  ;;  %v8730_v39 = vld [vmem:[#allocation3 + $0x2f8] sm:$0xf0] }
 0x8aa   :  { %v8362_v55 = vld [vmem:[#allocation3 + $0x18] sm:$0xf0]  ;;  %v9400_v22 = vld [vmem:[#allocation3 + $0x94] sm:$0xf] }
 0x8ab   :  { %7464 = vmatpush.bf16.msra.mxu1 %v9105_v23  ;;  %v9056_v23 = vld [vmem:[#allocation3 + $0x580] sm:$0xf] }
 0x8ac   :  { %7477 = vmatpush.bf16.msra.mxu2 %v9169_v58  ;;  %7496 = vmatpush.bf16.msrb.mxu0 %v9185_v8  ;;  %v9559_v58 = vld [vmem:[#allocation3 + $0x584] sm:$0xf0]  ;;  %v9408_v8 = vld [vmem:[#allocation3 + $0xd4] sm:$0xf] }
 0x8af   :  { %7465 = vmatpush.bf16.msra.mxu1 %v9097_v62  ;;  %7497 = vmatmul.bf16.vlgmr.msrb.gmra.mxu0 %v14547_v51  ;;  %v9057_v62 = vor.u32 %v9559_v58, %v9056_v23  ;;  %v8733_v23 = vor.u32 %v9476_v48, %v8730_v39  ;;  %v8594_v48 = vld [vmem:[#allocation3 + $0x1e8] sm:$0xf0] }
 0x8b0   :  { %7478 = vmatpush.bf16.msra.mxu2 %v9161_v13  ;;  %7528 = vmatpush.bf16.msra.mxu0 %v8541_v28  ;;  %v9420_v13 = vld [vmem:[#allocation3 + $0x134] sm:$0xf]  ;;  %v8458_v28 = vld [vmem:[#allocation3 + $0xd8] sm:$0xf0] }
 0x8b1   :  { %v8509_v32 = vor.u32 %v9420_v13, %v8506_v42  ;;  %v8461_v18 = vor.u32 %v9408_v8, %v8458_v28  ;;  %v8373_v13 = vor.u32 %v9386_v29, %v8370_v20  ;;  %v9472_v42 = vld [vmem:[#allocation3 + $0x2d4] sm:$0xf]  ;;  %v9382_v8 = vld [vmem:[#allocation3 + $0x4] sm:$0xf]  ;;  %v8354_v28 = vld [vmem:[#allocation3 + $0x8] sm:$0xf0] }
 0x8b2   :  { %v9464_v20 = vld [vmem:[#allocation3 + $0x294] sm:$0xf] }
 0x8b3   :  { %7466 = vmatpush.bf16.msra.mxu1 %v9089_v54  ;;  %v8466_v54 = vld [vmem:[#allocation3 + $0xe8] sm:$0xf0] }
 0x8b4   :  { %7479 = vmatpush.bf16.msra.mxu2 %v9153_v38  ;;  %7529 = vmatpush.bf16.msra.mxu0 %v8533_v56  ;;  %v8498_v38 = vld [vmem:[#allocation3 + $0x128] sm:$0xf0]  ;;  %v8469_v11 = vor.u32 %v9410_v46, %v8466_v54  ;;  %v8426_v46 = vld [vmem:[#allocation3 + $0x98] sm:$0xf0] }
 0x8b5   :  { %v8450_v56 = vld [vmem:[#allocation3 + $0xc8] sm:$0xf0] }
 0x8b6   :  { %v8453_v59 = vor.u32 %v9406_v36, %v8450_v56  ;;  %v9468_v36 = vld [vmem:[#allocation3 + $0x2b4] sm:$0xf]  ;;  %v8698_v56 = vld [vmem:[#allocation3 + $0x2b8] sm:$0xf0] }
 0x8b7   :  { %7467 = vmatpush.bf16.msra.mxu1 %v9081_v60  ;;  %v8501_v60 = vor.u32 %v9418_v21, %v8498_v38 }
 0x8b8   :  { %7480 = vmatpush.bf16.msra.mxu2 %v9145_v2  ;;  %7530 = vmatpush.bf16.msra.mxu0 %v8525_v7  ;;  %v8397_v2 = vor.u32 %v9392_v61, %v8394_v40  ;;  %v8378_v7 = vld [vmem:[#allocation3 + $0x38] sm:$0xf0]  ;;  %v8706_v61 = vld [vmem:[#allocation3 + $0x2c8] sm:$0xf0]  ;;  %v8429_v40 = vor.u32 %v9400_v22, %v8426_v46  ;;  %v9462_v22 = vld [vmem:[#allocation3 + $0x284] sm:$0xf] }
 0x8b9   :  { %v8381_v58 = vor.u32 %v9388_v27, %v8378_v7  ;;  %v9458_v27 = vld [vmem:[#allocation3 + $0x264] sm:$0xf]  ;;  %v8658_v7 = vld [vmem:[#allocation3 + $0x268] sm:$0xf0] }
 0x8ba   :  { %v8674_v46 = vld [vmem:[#allocation3 + $0x288] sm:$0xf0] }
 0x8bb   :  { %7468 = vmatpush.bf16.msra.mxu1 %v9073_v37  ;;  %v8493_v37 = vor.u32 %v9416_v45, %v8490_v10  ;;  %v8418_v45 = vld [vmem:[#allocation3 + $0x88] sm:$0xf0]  ;;  %v9444_v10 = vld [vmem:[#allocation3 + $0x1f4] sm:$0xf] }
 0x8bc   :  { %7481 = vmatpush.bf16.msra.mxu2 %v9137_v12  ;;  %7531 = vmatpush.bf16.msra.mxu0 %v8517_v1  ;;  %v8389_v12 = vor.u32 %v9390_v5, %v8386_v43  ;;  %v8434_v1 = vld [vmem:[#allocation3 + $0xa8] sm:$0xf0]  ;;  %v8357_v43 = vor.u32 %v9382_v8, %v8354_v28 }
 0x8bf   :  { %7469 = vmatpush.bf16.msra.mxu1 %v9065_v49  ;;  %v9404_v49 = vld [vmem:[#allocation3 + $0xb4] sm:$0xf] }
 0x8c0   :  { %7482 = vmatpush.bf16.msra.mxu2 %v9129_v4  ;;  %7532 = vmatpush.bf16.msra.mxu0 %v8509_v32  ;;  %v8445_v9 = vor.u32 %v9404_v49, %v8442_v15  ;;  %v8701_v49 = vor.u32 %v9468_v36, %v8698_v56  ;;  %v9466_v15 = vld [vmem:[#allocation3 + $0x2a4] sm:$0xf]  ;;  %v8626_v36 = vld [vmem:[#allocation3 + $0x228] sm:$0xf0] }
 0x8c3   :  { %7470 = vmatpush.bf16.msra.mxu1 %v9057_v62  ;;  %v7329_v4 = vpop.f32.mrf.mxu1  ;;  %v8725_v62 = vor.u32 %v9474_v41, %v8722_v17  ;;  %v8586_v41 = vld [vmem:[#allocation3 + $0x1d8] sm:$0xf0]  ;;  %v9456_v17 = vld [vmem:[#allocation3 + $0x254] sm:$0xf] }
 0x8c4   :  { %7483 = vmatpush.bf16.msra.mxu2 %v9121_v52  ;;  %7533 = vmatpush.bf16.msra.mxu0 %v8501_v60  ;;  %v8714_v52 = vld [vmem:[#allocation3 + $0x2d8] sm:$0xf0]  ;;  %v9398_v60 = vld [vmem:[#allocation3 + $0x84] sm:$0xf] }
 0x8c5   :  { %v8717_v38 = vor.u32 %v9472_v42, %v8714_v52  ;;  %v8578_v42 = vld [vmem:[#allocation3 + $0x1c8] sm:$0xf0] }
 0x8c6   :  { %7471 = vmatmul.bf16.vlgmr.msra.gmra.mxu1 %v14540_v63 }
 0x8c7   :  { %7502 = vmatpush.bf16.msrb.mxu1 %v8413_v53  ;;  %7484 = vmatmul.bf16.vlgmr.msra.gmra.mxu2 %v14543_v31  ;;  %v8437_v53 = vor.u32 %v9402_v57, %v8434_v1  ;;  %v8682_v57 = vld [vmem:[#allocation3 + $0x298] sm:$0xf0] }
 0x8c8   :  { %7515 = vmatpush.bf16.msrb.mxu2 %v8477_v34  ;;  %7534 = vmatpush.bf16.msra.mxu0 %v8493_v37  ;;  %v9384_v34 = vld [vmem:[#allocation3 + $0x14] sm:$0xf]  ;;  %v8421_v37 = vor.u32 %v9398_v60, %v8418_v45 }
 0x8ca   :  { %v7342_v54 = vpop.f32.mrf.mxu2 }
 0x8cb   :  { %7503 = vmatpush.bf16.msrb.mxu1 %v8405_v3  ;;  %v14564_v32 = vadd.f32 %v7342_v54, %v7329_v4  ;;  %v7331_v21 = vpop.f32.mrf.mxu1  ;;  %v8365_v3 = vor.u32 %v9384_v34, %v8362_v55  ;;  %v8642_v34 = vld [vmem:[#allocation3 + $0x248] sm:$0xf0]  ;;  %v8685_v55 = vor.u32 %v9464_v20, %v8682_v57  ;;  %v9524_v54 = vld [vmem:[#allocation3 + $0x474] sm:$0xf]  ;;  %v9446_v20 = vld [vmem:[#allocation3 + $0x204] sm:$0xf] }
 0x8cc   :  { %7516 = vmatpush.bf16.msrb.mxu2 %v8469_v11  ;;  %7535 = vmatpush.bf16.msra.mxu0 %v8485_v33  ;;  %v9470_v11 = vld [vmem:[#allocation3 + $0x2c4] sm:$0xf]  ;;  %v8690_v33 = vld [vmem:[#allocation3 + $0x2a8] sm:$0xf0]  ;;  %v8922_v21 = vld [vmem:[#allocation3 + $0x478] sm:$0xf0] }
 0x8cd   :  { %v8709_v5 = vor.u32 %v9470_v11, %v8706_v61  ;;  %v8693_v29 = vor.u32 %v9466_v15, %v8690_v33  ;;  %v9452_v11 = vld [vmem:[#allocation3 + $0x234] sm:$0xf]  ;;  %v8634_v61 = vld [vmem:[#allocation3 + $0x238] sm:$0xf0]  ;;  %v8925_v28 = vor.u32 %v9524_v54, %v8922_v21 }
 0x8ce   :  { %v9492_v57 = vld [vmem:[#allocation3 + $0x374] sm:$0xf] }
 0x8cf   :  { %7504 = vmatpush.bf16.msrb.mxu1 %v8397_v2  ;;  %7536 = vmatmul.bf16.vlgmr.msra.gmra.mxu0 %v14490_v16  ;;  %v8602_v16 = vld [vmem:[#allocation3 + $0x1f8] sm:$0xf0]  ;;  %v9460_v2 = vld [vmem:[#allocation3 + $0x274] sm:$0xf] }
 0x8d0   :  { %7517 = vmatpush.bf16.msrb.mxu2 %v8461_v18  ;;  %7567 = vmatpush.bf16.msrb.mxu0 %v8733_v23  ;;  %v8666_v18 = vld [vmem:[#allocation3 + $0x278] sm:$0xf0]  ;;  %v8605_v24 = vor.u32 %v9444_v10, %v8602_v16  ;;  %v8661_v23 = vor.u32 %v9458_v27, %v8658_v7  ;;  %v9522_v10 = vld [vmem:[#allocation3 + $0x464] sm:$0xf]  ;;  %v8914_v16 = vld [vmem:[#allocation3 + $0x468] sm:$0xf0] }
 0x8d1   :  { %v8669_v6 = vor.u32 %v9460_v2, %v8666_v18  ;;  %v8637_v2 = vor.u32 %v9452_v11, %v8634_v61  ;;  %v9434_v18 = vld [vmem:[#allocation3 + $0x1a4] sm:$0xf]  ;;  %v8917_v56 = vor.u32 %v9522_v10, %v8914_v16  ;;  %v9448_v27 = vld [vmem:[#allocation3 + $0x214] sm:$0xf]  ;;  %v8618_v7 = vld [vmem:[#allocation3 + $0x218] sm:$0xf0] }
 0x8d2   :  { %v7344_v39 = vpop.f32.mrf.mxu2  ;;  %v9514_v11 = vld [vmem:[#allocation3 + $0x424] sm:$0xf]  ;;  %v8882_v61 = vld [vmem:[#allocation3 + $0x428] sm:$0xf0]  ;;  %v8842_v10 = vld [vmem:[#allocation3 + $0x3d8] sm:$0xf0] }
 0x8d3   :  { %7505 = vmatpush.bf16.msrb.mxu1 %v8389_v12  ;;  %v9442_v12 = vld [vmem:[#allocation3 + $0x1e4] sm:$0xf]  ;;  %v8885_v16 = vor.u32 %v9514_v11, %v8882_v61 }
 0x8d4   :  { %7518 = vmatpush.bf16.msrb.mxu2 %v8453_v59  ;;  %7568 = vmatpush.bf16.msrb.mxu0 %v8725_v62  ;;  %v14566_v59 = vpop.f32.mrf.mxu0  ;;  %v8597_v4 = vor.u32 %v9442_v12, %v8594_v48  ;;  %v9432_v48 = vld [vmem:[#allocation3 + $0x194] sm:$0xf]  ;;  %v9566_v61 = vld [vmem:[#allocation3 + $0x5c4] sm:$0xf] }
 0x8d7   :  { %7506 = vmatpush.bf16.msrb.mxu1 %v8381_v58  ;;  %v9440_v58 = vld [vmem:[#allocation3 + $0x1d4] sm:$0xf] }
 0x8d8   :  { %7519 = vmatpush.bf16.msrb.mxu2 %v8445_v9  ;;  %7569 = vmatpush.bf16.msrb.mxu0 %v8717_v38  ;;  %v8650_v9 = vld [vmem:[#allocation3 + $0x258] sm:$0xf0]  ;;  %v8589_v1 = vor.u32 %v9440_v58, %v8586_v41  ;;  %v9436_v38 = vld [vmem:[#allocation3 + $0x1b4] sm:$0xf]  ;;  %v8898_v58 = vld [vmem:[#allocation3 + $0x448] sm:$0xf0] }
 0x8d9   :  { %v8653_v62 = vor.u32 %v9456_v17, %v8650_v9  ;;  %v8621_v17 = vor.u32 %v9448_v27, %v8618_v7  ;;  %v9430_v9 = vld [vmem:[#allocation3 + $0x184] sm:$0xf]  ;;  %v9114_v27 = vld [vmem:[#allocation3 + $0x5f8] sm:$0xf0]  ;;  %v9484_v7 = vld [vmem:[#allocation3 + $0x334] sm:$0xf] }
 0x8db   :  { %7507 = vmatpush.bf16.msrb.mxu1 %v8373_v13  ;;  %v9438_v13 = vld [vmem:[#allocation3 + $0x1c4] sm:$0xf] }
 0x8dc   :  { %7520 = vmatpush.bf16.msrb.mxu2 %v8437_v53  ;;  %7570 = vmatpush.bf16.msrb.mxu0 %v8709_v5  ;;  %v7383_v52 = vpop.f32.mrf.mxu0  ;;  %v9454_v53 = vld [vmem:[#allocation3 + $0x244] sm:$0xf]  ;;  %v8562_v5 = vld [vmem:[#allocation3 + $0x1a8] sm:$0xf0] }
 0x8df   :  { %7508 = vmatpush.bf16.msrb.mxu1 %v8365_v3  ;;  %v8570_v3 = vld [vmem:[#allocation3 + $0x1b8] sm:$0xf0] }
 0x8e0   :  { %7521 = vmatpush.bf16.msrb.mxu2 %v8429_v40  ;;  %7571 = vmatpush.bf16.msrb.mxu0 %v8701_v49  ;;  %v8677_v40 = vor.u32 %v9462_v22, %v8674_v46  ;;  %v8573_v45 = vor.u32 %v9436_v38, %v8570_v3  ;;  %v9490_v46 = vld [vmem:[#allocation3 + $0x364] sm:$0xf]  ;;  %v8850_v38 = vld [vmem:[#allocation3 + $0x3e8] sm:$0xf0] }
 0x8e3   :  { %7509 = vmatpush.bf16.msrb.mxu1 %v8357_v43  ;;  %v7355_v8 = vpop.f32.mrf.mxu1  ;;  %v9450_v43 = vld [vmem:[#allocation3 + $0x224] sm:$0xf] }
 0x8e4   :  { %7522 = vmatpush.bf16.msrb.mxu2 %v8421_v37  ;;  %7572 = vmatpush.bf16.msrb.mxu0 %v8693_v29  ;;  %v7356_v60 = vadd.f32 %v7355_v8, %v14564_v32  ;;  %v8565_v37 = vor.u32 %v9434_v18, %v8562_v5  ;;  %v8629_v12 = vor.u32 %v9450_v43, %v8626_v36  ;;  %v8554_v32 = vld [vmem:[#allocation3 + $0x198] sm:$0xf0]  ;;  %v8546_v29 = vld [vmem:[#allocation3 + $0x188] sm:$0xf0]  ;;  %v9486_v36 = vld [vmem:[#allocation3 + $0x344] sm:$0xf] }
 0x8e5   :  { %v8549_v52 = vor.u32 %v9430_v9, %v8546_v29  ;;  %v8874_v18 = vld [vmem:[#allocation3 + $0x418] sm:$0xf0]  ;;  %v9570_v9 = vld [vmem:[#allocation3 + $0x5e4] sm:$0xf]  ;;  %v9106_v29 = vld [vmem:[#allocation3 + $0x5e8] sm:$0xf0] }
 0x8e6   :  { %7510 = vmatmul.bf16.vlgmr.msrb.gmra.mxu1 %v14481_v19  ;;  %v8581_v19 = vor.u32 %v9438_v13, %v8578_v42  ;;  %v8858_v13 = vld [vmem:[#allocation3 + $0x3f8] sm:$0xf0] }
 0x8e7   :  { %7541 = vmatpush.bf16.msra.mxu1 %v8605_v24  ;;  %7523 = vmatmul.bf16.vlgmr.msrb.gmra.mxu2 %v14486_v50  ;;  %v8645_v50 = vor.u32 %v9454_v53, %v8642_v34  ;;  %v9520_v24 = vld [vmem:[#allocation3 + $0x454] sm:$0xf]  ;;  %v8890_v34 = vld [vmem:[#allocation3 + $0x438] sm:$0xf0] }
 0x8e8   :  { %7554 = vmatpush.bf16.msra.mxu2 %v8669_v6  ;;  %7573 = vmatpush.bf16.msrb.mxu0 %v8685_v55  ;;  %v8906_v6 = vld [vmem:[#allocation3 + $0x458] sm:$0xf0]  ;;  %v9516_v53 = vld [vmem:[#allocation3 + $0x434] sm:$0xf] }
 0x8e9   :  { %v8909_v33 = vor.u32 %v9520_v24, %v8906_v6  ;;  %v8893_v3 = vor.u32 %v9516_v53, %v8890_v34  ;;  %v9502_v24 = vld [vmem:[#allocation3 + $0x3c4] sm:$0xf]  ;;  %v8834_v6 = vld [vmem:[#allocation3 + $0x3c8] sm:$0xf0]  ;;  %v9098_v53 = vld [vmem:[#allocation3 + $0x5d8] sm:$0xf0] }
 0x8ea   :  { %v7368_v39 = vpop.f32.mrf.mxu2 }
 0x8eb   :  { %7542 = vmatpush.bf16.msra.mxu1 %v8597_v4  ;;  %v7369_v49 = vadd.f32 %v7368_v39, %v7356_v60  ;;  %v7357_v15 = vpop.f32.mrf.mxu1  ;;  %v8557_v4 = vor.u32 %v9432_v48, %v8554_v32  ;;  %v8778_v60 = vld [vmem:[#allocation3 + $0x358] sm:$0xf0]  ;;  %v8866_v48 = vld [vmem:[#allocation3 + $0x408] sm:$0xf0]  ;;  %v9572_v39 = vld [vmem:[#allocation3 + $0x5f4] sm:$0xf] }
 0x8ec   :  { %7555 = vmatpush.bf16.msra.mxu2 %v8661_v23  ;;  %7574 = vmatpush.bf16.msrb.mxu0 %v8677_v40  ;;  %v9518_v23 = vld [vmem:[#allocation3 + $0x444] sm:$0xf]  ;;  %v14575_v21 = vpop.f32.mrf.mxu0  ;;  %v9500_v15 = vld [vmem:[#allocation3 + $0x3b4] sm:$0xf] }
 0x8ed   :  { %v14573_v41 = vadd.f32 %v14566_v59, %v7369_v49  ;;  %v8901_v42 = vor.u32 %v9518_v23, %v8898_v58  ;;  %v8762_v49 = vld [vmem:[#allocation3 + $0x338] sm:$0xf0]  ;;  %v9117_v58 = vor.u32 %v9572_v39, %v9114_v27  ;;  %v9042_v39 = vld [vmem:[#allocation3 + $0x568] sm:$0xf0] }
 0x8ef   :  { %7543 = vmatpush.bf16.msra.mxu1 %v8589_v1  ;;  %7575 = vmatmul.bf16.vlgmr.msrb.gmra.mxu0 %v14507_v30  ;;  %v8610_v30 = vld [vmem:[#allocation3 + $0x208] sm:$0xf0]  ;;  %v8794_v1 = vld [vmem:[#allocation3 + $0x378] sm:$0xf0] }
 0x8f0   :  { %7556 = vmatpush.bf16.msra.mxu2 %v8653_v62  ;;  %7606 = vmatpush.bf16.msra.mxu0 %v8925_v28  ;;  %v9508_v62 = vld [vmem:[#allocation3 + $0x3f4] sm:$0xf]  ;;  %v8613_v55 = vor.u32 %v9446_v20, %v8610_v30  ;;  %v8797_v59 = vor.u32 %v9492_v57, %v8794_v1  ;;  %v9482_v30 = vld [vmem:[#allocation3 + $0x324] sm:$0xf]  ;;  %v8754_v57 = vld [vmem:[#allocation3 + $0x328] sm:$0xf0] }
 0x8f1   :  { %v8861_v22 = vor.u32 %v9508_v62, %v8858_v13  ;;  %v9488_v28 = vld [vmem:[#allocation3 + $0x354] sm:$0xf]  ;;  %v9498_v1 = vld [vmem:[#allocation3 + $0x3a4] sm:$0xf]  ;;  %v8818_v62 = vld [vmem:[#allocation3 + $0x3a8] sm:$0xf0]  ;;  %v9109_v13 = vor.u32 %v9570_v9, %v9106_v29 }
 0x8f2   :  { %v7370_v54 = vpop.f32.mrf.mxu2  ;;  %v8781_v5 = vor.u32 %v9488_v28, %v8778_v60  ;;  %v9478_v28 = vld [vmem:[#allocation3 + $0x304] sm:$0xf]  ;;  %v8738_v60 = vld [vmem:[#allocation3 + $0x308] sm:$0xf0]  ;;  %v9560_v9 = vld [vmem:[#allocation3 + $0x594] sm:$0xf] }
 0x8f3   :  { %7544 = vmatpush.bf16.msra.mxu1 %v8581_v19  ;;  %v8786_v19 = vld [vmem:[#allocation3 + $0x368] sm:$0xf0]  ;;  %v8810_v54 = vld [vmem:[#allocation3 + $0x398] sm:$0xf0] }
 0x8f4   :  { %7557 = vmatpush.bf16.msra.mxu2 %v8645_v50  ;;  %7607 = vmatpush.bf16.msra.mxu0 %v8917_v56  ;;  %v9506_v50 = vld [vmem:[#allocation3 + $0x3e4] sm:$0xf]  ;;  %v8789_v40 = vor.u32 %v9490_v46, %v8786_v19  ;;  %v8770_v56 = vld [vmem:[#allocation3 + $0x348] sm:$0xf0]  ;;  %v9496_v19 = vld [vmem:[#allocation3 + $0x394] sm:$0xf] }
 0x8f5   :  { %v8853_v8 = vor.u32 %v9506_v50, %v8850_v38  ;;  %v8773_v32 = vor.u32 %v9486_v36, %v8770_v56  ;;  %v9564_v36 = vld [vmem:[#allocation3 + $0x5b4] sm:$0xf]  ;;  %v9082_v56 = vld [vmem:[#allocation3 + $0x5b8] sm:$0xf0] }
 0x8f6   :  { %v9085_v27 = vor.u32 %v9564_v36, %v9082_v56  ;;  %v9066_v29 = vld [vmem:[#allocation3 + $0x598] sm:$0xf0]  ;;  %v8930_v36 = vld [vmem:[#allocation3 + $0x488] sm:$0xf0]  ;;  %v9542_v56 = vld [vmem:[#allocation3 + $0x504] sm:$0xf] }
 0x8f7   :  { %7545 = vmatpush.bf16.msra.mxu1 %v8573_v45  ;;  %v9504_v45 = vld [vmem:[#allocation3 + $0x3d4] sm:$0xf] }
 0x8f8   :  { %7558 = vmatpush.bf16.msra.mxu2 %v8637_v2  ;;  %7608 = vmatpush.bf16.msra.mxu0 %v8909_v33  ;;  %v9512_v2 = vld [vmem:[#allocation3 + $0x414] sm:$0xf]  ;;  %v8845_v43 = vor.u32 %v9504_v45, %v8842_v10  ;;  %v8826_v33 = vld [vmem:[#allocation3 + $0x3b8] sm:$0xf0]  ;;  %v9494_v45 = vld [vmem:[#allocation3 + $0x384] sm:$0xf] }
 0x8f9   :  { %v8829_v20 = vor.u32 %v9500_v15, %v8826_v33  ;;  %v9540_v10 = vld [vmem:[#allocation3 + $0x4f4] sm:$0xf] }
 0x8fa   :  { %v9536_v33 = vld [vmem:[#allocation3 + $0x4d4] sm:$0xf] }
 0x8fb   :  { %7546 = vmatpush.bf16.msra.mxu1 %v8565_v37  ;;  %v7422_v37 = vpop.f32.mrf.mxu0 }
 0x8fc   :  { %7559 = vmatpush.bf16.msra.mxu2 %v8629_v12  ;;  %7609 = vmatpush.bf16.msra.mxu0 %v8901_v42  ;;  %v8877_v12 = vor.u32 %v9512_v2, %v8874_v18  ;;  %v8757_v42 = vor.u32 %v9482_v30, %v8754_v57  ;;  %v9556_v2 = vld [vmem:[#allocation3 + $0x574] sm:$0xf]  ;;  %v9050_v18 = vld [vmem:[#allocation3 + $0x578] sm:$0xf0]  ;;  %v9534_v57 = vld [vmem:[#allocation3 + $0x4c4] sm:$0xf] }
 0x8ff   :  { %7547 = vmatpush.bf16.msra.mxu1 %v8557_v4 }
 0x900   :  { %7560 = vmatpush.bf16.msra.mxu2 %v8621_v17  ;;  %7610 = vmatpush.bf16.msra.mxu0 %v8893_v3  ;;  %v8765_v17 = vor.u32 %v9484_v7, %v8762_v49  ;;  %v9074_v7 = vld [vmem:[#allocation3 + $0x5a8] sm:$0xf0] }
 0x903   :  { %7548 = vmatpush.bf16.msra.mxu1 %v8549_v52  ;;  %v7394_v23 = vpop.f32.mrf.mxu1  ;;  %v9568_v52 = vld [vmem:[#allocation3 + $0x5d4] sm:$0xf] }
 0x904   :  { %7561 = vmatpush.bf16.msra.mxu2 %v8613_v55  ;;  %7611 = vmatpush.bf16.msra.mxu0 %v8885_v16  ;;  %v7395_v34 = vadd.f32 %v7394_v23, %v14573_v41  ;;  %v8821_v55 = vor.u32 %v9498_v1, %v8818_v62  ;;  %v9101_v3 = vor.u32 %v9568_v52, %v9098_v53  ;;  %v8986_v16 = vld [vmem:[#allocation3 + $0x4f8] sm:$0xf0]  ;;  %v9552_v23 = vld [vmem:[#allocation3 + $0x554] sm:$0xf]  ;;  %v8962_v1 = vld [vmem:[#allocation3 + $0x4c8] sm:$0xf0] }
 0x905   :  { %v8813_v41 = vor.u32 %v9496_v19, %v8810_v54  ;;  %v9069_v52 = vor.u32 %v9560_v9, %v9066_v29  ;;  %v9058_v53 = vld [vmem:[#allocation3 + $0x588] sm:$0xf0]  ;;  %v9600_v9 = vld [vmem:[#allocation3 + $0x6d4] sm:$0xf]  ;;  %v9226_v29 = vld [vmem:[#allocation3 + $0x6d8] sm:$0xf0] }
 0x906   :  { %7549 = vmatmul.bf16.vlgmr.msra.gmra.mxu1 %v14498_v35  ;;  %v9510_v35 = vld [vmem:[#allocation3 + $0x404] sm:$0xf] }
 0x907   :  { %7580 = vmatpush.bf16.msrb.mxu1 %v8797_v59  ;;  %7562 = vmatmul.bf16.vlgmr.msra.gmra.mxu2 %v14502_v47  ;;  %v8837_v47 = vor.u32 %v9502_v24, %v8834_v6  ;;  %v8869_v4 = vor.u32 %v9510_v35, %v8866_v48  ;;  %v9480_v59 = vld [vmem:[#allocation3 + $0x314] sm:$0xf]  ;;  %v9053_v24 = vor.u32 %v9556_v2, %v9050_v18  ;;  %v9538_v6 = vld [vmem:[#allocation3 + $0x4e4] sm:$0xf] }
 0x908   :  { %7593 = vmatpush.bf16.msrb.mxu2 %v8861_v22  ;;  %7612 = vmatpush.bf16.msra.mxu0 %v8877_v12  ;;  %v8746_v22 = vld [vmem:[#allocation3 + $0x318] sm:$0xf0]  ;;  %v8978_v12 = vld [vmem:[#allocation3 + $0x4e8] sm:$0xf0] }
 0x909   :  { %v8749_v11 = vor.u32 %v9480_v59, %v8746_v22  ;;  %v8981_v49 = vor.u32 %v9538_v6, %v8978_v12  ;;  %v8954_v59 = vld [vmem:[#allocation3 + $0x4b8] sm:$0xf0]  ;;  %v9548_v22 = vld [vmem:[#allocation3 + $0x534] sm:$0xf] }
 0x90a   :  { %v7407_v46 = vpop.f32.mrf.mxu2  ;;  %v9604_v6 = vld [vmem:[#allocation3 + $0x6f4] sm:$0xf]  ;;  %v9242_v12 = vld [vmem:[#allocation3 + $0x6f8] sm:$0xf0] }
 0x90b   :  { %7581 = vmatpush.bf16.msrb.mxu1 %v8789_v40  ;;  %v7408_v50 = vadd.f32 %v7407_v46, %v7395_v34  ;;  %v7396_v38 = vpop.f32.mrf.mxu1  ;;  %v9090_v40 = vld [vmem:[#allocation3 + $0x5c8] sm:$0xf0]  ;;  %v8965_v34 = vor.u32 %v9534_v57, %v8962_v1  ;;  %v9018_v46 = vld [vmem:[#allocation3 + $0x538] sm:$0xf0]  ;;  %v9582_v57 = vld [vmem:[#allocation3 + $0x644] sm:$0xf] }
 0x90c   :  { %7594 = vmatpush.bf16.msrb.mxu2 %v8853_v8  ;;  %7613 = vmatpush.bf16.msra.mxu0 %v8869_v4  ;;  %v14584_v48 = vpop.f32.mrf.mxu0  ;;  %v8970_v4 = vld [vmem:[#allocation3 + $0x4d8] sm:$0xf0]  ;;  %v9021_v38 = vor.u32 %v9548_v22, %v9018_v46  ;;  %v9154_v1 = vld [vmem:[#allocation3 + $0x648] sm:$0xf0] }
 0x90d   :  { %v14582_v8 = vadd.f32 %v14575_v21, %v7408_v50  ;;  %v8989_v21 = vor.u32 %v9540_v10, %v8986_v16  ;;  %v9544_v10 = vld [vmem:[#allocation3 + $0x514] sm:$0xf]  ;;  %v9002_v16 = vld [vmem:[#allocation3 + $0x518] sm:$0xf0] }
 0x90f   :  { %7582 = vmatpush.bf16.msrb.mxu1 %v8781_v5  ;;  %7614 = vmatmul.bf16.vlgmr.msra.gmra.mxu0 %v14523_v14  ;;  %v8802_v14 = vld [vmem:[#allocation3 + $0x388] sm:$0xf0]  ;;  %v9093_v5 = vor.u32 %v9566_v61, %v9090_v40  ;;  %v9546_v61 = vld [vmem:[#allocation3 + $0x524] sm:$0xf] }
 0x910   :  { %7595 = vmatpush.bf16.msrb.mxu2 %v8845_v43  ;;  %7645 = vmatpush.bf16.msrb.mxu0 %v9117_v58  ;;  %v8741_v43 = vor.u32 %v9478_v28, %v8738_v60  ;;  %v8805_v37 = vor.u32 %v9494_v45, %v8802_v14  ;;  %v9034_v58 = vld [vmem:[#allocation3 + $0x558] sm:$0xf0]  ;;  %v9010_v40 = vld [vmem:[#allocation3 + $0x528] sm:$0xf0]  ;;  %v9528_v60 = vld [vmem:[#allocation3 + $0x494] sm:$0xf] }
 0x911   :  { %v9037_v30 = vor.u32 %v9552_v23, %v9034_v58  ;;  %v9013_v28 = vor.u32 %v9546_v61, %v9010_v40  ;;  %v8938_v45 = vld [vmem:[#allocation3 + $0x498] sm:$0xf0]  ;;  %v9584_v58 = vld [vmem:[#allocation3 + $0x654] sm:$0xf] }
 0x912   :  { %v7409_v35 = vpop.f32.mrf.mxu2  ;;  %v8941_v18 = vor.u32 %v9528_v60, %v8938_v45  ;;  %v9576_v40 = vld [vmem:[#allocation3 + $0x614] sm:$0xf]  ;;  %v9194_v45 = vld [vmem:[#allocation3 + $0x698] sm:$0xf0] }
 0x913   :  { %7583 = vmatpush.bf16.msrb.mxu1 %v8773_v32  ;;  %v9554_v32 = vld [vmem:[#allocation3 + $0x564] sm:$0xf]  ;;  %v9592_v60 = vld [vmem:[#allocation3 + $0x694] sm:$0xf] }
 0x914   :  { %7596 = vmatpush.bf16.msrb.mxu2 %v8837_v47  ;;  %7646 = vmatpush.bf16.msrb.mxu0 %v9109_v13  ;;  %v9562_v47 = vld [vmem:[#allocation3 + $0x5a4] sm:$0xf]  ;;  %v9045_v15 = vor.u32 %v9554_v32, %v9042_v39  ;;  %v7461_v62 = vpop.f32.mrf.mxu0  ;;  %v9245_v39 = vor.u32 %v9604_v6, %v9242_v12 }
 0x915   :  { %v9550_v13 = vld [vmem:[#allocation3 + $0x544] sm:$0xf] }
 0x917   :  { %7584 = vmatpush.bf16.msrb.mxu1 %v8765_v17  ;;  %v9077_v17 = vor.u32 %v9562_v47, %v9074_v7  ;;  %v9170_v47 = vld [vmem:[#allocation3 + $0x668] sm:$0xf0] }
 0x918   :  { %7597 = vmatpush.bf16.msrb.mxu2 %v8829_v20  ;;  %7647 = vmatpush.bf16.msrb.mxu0 %v9101_v3  ;;  %v8973_v20 = vor.u32 %v9536_v33, %v8970_v4  ;;  %v9530_v3 = vld [vmem:[#allocation3 + $0x4a4] sm:$0xf]  ;;  %v9234_v33 = vld [vmem:[#allocation3 + $0x6e8] sm:$0xf0] }
 0x91b   :  { %7585 = vmatpush.bf16.msrb.mxu1 %v8757_v42  ;;  %v9026_v42 = vld [vmem:[#allocation3 + $0x548] sm:$0xf0] }
 0x91c   :  { %7598 = vmatpush.bf16.msrb.mxu2 %v8821_v55  ;;  %7648 = vmatpush.bf16.msrb.mxu0 %v9093_v5  ;;  %v9029_v55 = vor.u32 %v9550_v13, %v9026_v42  ;;  %v9005_v5 = vor.u32 %v9544_v10, %v9002_v16  ;;  %v9598_v13 = vld [vmem:[#allocation3 + $0x6c4] sm:$0xf]  ;;  %v9218_v42 = vld [vmem:[#allocation3 + $0x6c8] sm:$0xf0] }
 0x91f   :  { %7586 = vmatpush.bf16.msrb.mxu1 %v8749_v11  ;;  %v8946_v11 = vld [vmem:[#allocation3 + $0x4a8] sm:$0xf0] }
 0x920   :  { %7599 = vmatpush.bf16.msrb.mxu2 %v8813_v41  ;;  %7649 = vmatpush.bf16.msrb.mxu0 %v9085_v27  ;;  %v8949_v41 = vor.u32 %v9530_v3, %v8946_v11  ;;  %v9586_v27 = vld [vmem:[#allocation3 + $0x664] sm:$0xf]  ;;  %v9202_v3 = vld [vmem:[#allocation3 + $0x6a8] sm:$0xf0] }
 0x921   :  { %v9173_v4 = vor.u32 %v9586_v27, %v9170_v47 }
 0x923   :  { %7587 = vmatpush.bf16.msrb.mxu1 %v8741_v43  ;;  %v14588_v54 = vpop.f32.mrf.mxu1  ;;  %v9526_v43 = vld [vmem:[#allocation3 + $0x484] sm:$0xf] }
 0x924   :  { %7600 = vmatpush.bf16.msrb.mxu2 %v8805_v37  ;;  %7650 = vmatpush.bf16.msrb.mxu0 %v9077_v17  ;;  %v8994_v37 = vld [vmem:[#allocation3 + $0x508] sm:$0xf0]  ;;  %v8933_v35 = vor.u32 %v9526_v43, %v8930_v36  ;;  %v9162_v17 = vld [vmem:[#allocation3 + $0x658] sm:$0xf0]  ;;  %v9590_v43 = vld [vmem:[#allocation3 + $0x684] sm:$0xf] }
 0x925   :  { %v9186_v36 = vld [vmem:[#allocation3 + $0x688] sm:$0xf0] }
 0x926   :  { %7588 = vmatmul.bf16.vlgmr.msrb.gmra.mxu1 %v14511_v26  ;;  %v9558_v26 = vld [vmem:[#allocation3 + $0x584] sm:$0xf] }
 0x927   :  { %7619 = vmatpush.bf16.msra.mxu1 %v8989_v21  ;;  %7601 = vmatmul.bf16.vlgmr.msrb.gmra.mxu2 %v14519_v44  ;;  %v9532_v44 = vld [vmem:[#allocation3 + $0x4b4] sm:$0xf]  ;;  %v9061_v19 = vor.u32 %v9558_v26, %v9058_v53  ;;  %v7434_v26 = vadd.f32 %v14588_v54, %v14582_v8 }
 0x928   :  { %7632 = vmatpush.bf16.msra.mxu2 %v9053_v24  ;;  %7651 = vmatpush.bf16.msrb.mxu0 %v9069_v52  ;;  %v8957_v50 = vor.u32 %v9532_v44, %v8954_v59  ;;  %v9588_v21 = vld [vmem:[#allocation3 + $0x674] sm:$0xf]  ;;  %v9178_v24 = vld [vmem:[#allocation3 + $0x678] sm:$0xf0]  ;;  %v9157_v52 = vor.u32 %v9582_v57, %v9154_v1 }
 0x929   :  { %v9181_v32 = vor.u32 %v9588_v21, %v9178_v24  ;;  %v9580_v53 = vld [vmem:[#allocation3 + $0x634] sm:$0xf] }
 0x92a   :  { %v7446_v14 = vpop.f32.mrf.mxu2 }
 0x92b   :  { %7620 = vmatpush.bf16.msra.mxu1 %v8981_v49  ;;  %v7435_v2 = vpop.f32.mrf.mxu1  ;;  %v7447_v44 = vadd.f32 %v7446_v14, %v7434_v26 }
 0x92c   :  { %7633 = vmatpush.bf16.msra.mxu2 %v9045_v15  ;;  %7652 = vmatpush.bf16.msrb.mxu0 %v9061_v19  ;;  %v7498_v49 = vpop.f32.mrf.mxu0  ;;  %v9602_v15 = vld [vmem:[#allocation3 + $0x6e4] sm:$0xf] }
 0x92d   :  { %v9237_v23 = vor.u32 %v9602_v15, %v9234_v33  ;;  %v9578_v19 = vld [vmem:[#allocation3 + $0x624] sm:$0xf]  ;;  %v7460_v11 = vadd.f32 %v14584_v48, %v7447_v44  ;;  %v9122_v48 = vld [vmem:[#allocation3 + $0x608] sm:$0xf0] }
 0x92f   :  { %7621 = vmatpush.bf16.msra.mxu1 %v8973_v20  ;;  %7653 = vmatmul.bf16.vlgmr.msrb.gmra.mxu0 %v14540_v63  ;;  %v8997_v63 = vor.u32 %v9542_v56, %v8994_v37  ;;  %v9165_v20 = vor.u32 %v9584_v58, %v9162_v17  ;;  %v9189_v37 = vor.u32 %v9590_v43, %v9186_v36 }
 0x930   :  { %7634 = vmatpush.bf16.msra.mxu2 %v9037_v30  ;;  %v9229_v30 = vor.u32 %v9600_v9, %v9226_v29 }
 0x932   :  { %v7448_v7 = vpop.f32.mrf.mxu2 }
 0x933   :  { %7622 = vmatpush.bf16.msra.mxu1 %v8965_v34  ;;  %v9146_v34 = vld [vmem:[#allocation3 + $0x638] sm:$0xf0] }
 0x934   :  { %7635 = vmatpush.bf16.msra.mxu2 %v9029_v55  ;;  %v7500_v62 = vpop.f32.mrf.mxu0  ;;  %v9596_v55 = vld [vmem:[#allocation3 + $0x6b4] sm:$0xf]  ;;  %v9149_v22 = vor.u32 %v9580_v53, %v9146_v34 }
 0x937   :  { %7623 = vmatpush.bf16.msra.mxu1 %v8957_v50  ;;  %v9138_v50 = vld [vmem:[#allocation3 + $0x628] sm:$0xf0] }
 0x938   :  { %7636 = vmatpush.bf16.msra.mxu2 %v9021_v38  ;;  %v9594_v38 = vld [vmem:[#allocation3 + $0x6a4] sm:$0xf]  ;;  %v9141_v8 = vor.u32 %v9578_v19, %v9138_v50 }
 0x939   :  { %v9205_v61 = vor.u32 %v9594_v38, %v9202_v3 }
 0x93b   :  { %7624 = vmatpush.bf16.msra.mxu1 %v8949_v41  ;;  %v9130_v41 = vld [vmem:[#allocation3 + $0x618] sm:$0xf0] }
 0x93c   :  { %7637 = vmatpush.bf16.msra.mxu2 %v9013_v28  ;;  %v9133_v16 = vor.u32 %v9576_v40, %v9130_v41  ;;  %v9609_v41 = vld [vmem:[%s14671_s9 + $0x18] sm:$0xff] }
 0x93d   :  { %7778 = vmatpush.bf16.msra.mxu0 %v9609_v41 }
 0x93f   :  { %7625 = vmatpush.bf16.msra.mxu1 %v8941_v18  ;;  %v9197_v18 = vor.u32 %v9592_v60, %v9194_v45  ;;  %v9607_v60 = vld [vmem:[%s14671_s9 + $0x8] sm:$0xff]  ;;  %v9606_v45 = vld [vmem:[%s14671_s9] sm:$0xff] }
 0x940   :  { %7638 = vmatpush.bf16.msra.mxu2 %v9005_v5  ;;  %v9574_v5 = vld [vmem:[#allocation3 + $0x604] sm:$0xf] }
 0x941   :  { %v9125_v56 = vor.u32 %v9574_v5, %v9122_v48  ;;  %v7684_v5 = vld [vmem:[%s14670_s8] sm:$0x1] }
 0x943   :  { %7626 = vmatpush.bf16.msra.mxu1 %v8933_v35  ;;  %v7472_v59 = vpop.f32.mrf.mxu1 }
 0x944   :  { %7639 = vmatpush.bf16.msra.mxu2 %v8997_v63  ;;  %v7473_v54 = vadd.f32 %v7472_v59, %v7460_v11 }
 0x946   :  { %7627 = vmatmul.bf16.vlgmr.msra.gmra.mxu1 %v14528_v0  ;;  %v9221_v0 = vor.u32 %v9598_v13, %v9218_v42 }
 0x947   :  { %7658 = vmatpush.bf16.msrb.mxu1 %v9181_v32  ;;  %7640 = vmatmul.bf16.vlgmr.msra.gmra.mxu2 %v14531_v25  ;;  %v9210_v25 = vld [vmem:[#allocation3 + $0x6b8] sm:$0xf0] }
 0x948   :  { %7671 = vmatpush.bf16.msrb.mxu2 %v9245_v39  ;;  %v9213_v46 = vor.u32 %v9596_v55, %v9210_v25 }
 0x94a   :  { %v7485_v28 = vpop.f32.mrf.mxu2 }
 0x94b   :  { %7659 = vmatpush.bf16.msrb.mxu1 %v9173_v4  ;;  %v7486_v14 = vadd.f32 %v7485_v28, %v7473_v54  ;;  %v7474_v10 = vpop.f32.mrf.mxu1  ;;  %v9608_v28 = vld [vmem:[%s14671_s9 + $0x10] sm:$0xff] }
 0x94c   :  { %7672 = vmatpush.bf16.msrb.mxu2 %v9237_v23  ;;  %v7537_v24 = vpop.f32.mrf.mxu0  ;;  %7779 = vmatpush.bf16.msra.mxu0 %v9608_v28  ;;  %v9612_v10 = vld [vmem:[%s14673_s11 + $0x10] sm:$0xff] }
 0x94d   :  { %v14596_v2 = vadd.f32 %v7498_v49, %v7486_v14  ;;  %v9613_v14 = vld [vmem:[%s14673_s11 + $0x18] sm:$0xff] }
 0x94f   :  { %7660 = vmatpush.bf16.msrb.mxu1 %v9165_v20  ;;  %7687 = vst [vmem:[#allocation1] sm:$0xff] %v14596_v2 }
 0x950   :  { %7673 = vmatpush.bf16.msrb.mxu2 %v9229_v30  ;;  %7780 = vmatpush.bf16.msra.mxu0 %v9607_v60 }
 0x952   :  { %v7487_v21 = vpop.f32.mrf.mxu2 }
 0x953   :  { %7661 = vmatpush.bf16.msrb.mxu1 %v9157_v52 }
 0x954   :  { %7674 = vmatpush.bf16.msrb.mxu2 %v9221_v0  ;;  %v7539_v6 = vpop.f32.mrf.mxu0  ;;  %7781 = vmatpush.bf16.msra.mxu0 %v9606_v45 }
 0x956   :  { %v7689_v50 = vld [vmem:[#allocation1 + $0x1] ss:$9 sm:$0xff] }
 0x957   :  { %7662 = vmatpush.bf16.msrb.mxu1 %v9149_v22 }
 0x958   :  { %7675 = vmatpush.bf16.msrb.mxu2 %v9213_v46  ;;  %7832 = vmatpush.bf16.msrb.mxu0 %v9613_v14 }
 0x95b   :  { %7663 = vmatpush.bf16.msrb.mxu1 %v9141_v8 }
 0x95c   :  { %7676 = vmatpush.bf16.msrb.mxu2 %v9205_v61  ;;  %7833 = vmatpush.bf16.msrb.mxu0 %v9612_v10 }
 0x95f   :  { %7664 = vmatpush.bf16.msrb.mxu1 %v9133_v16 }
 0x960   :  { %7677 = vmatpush.bf16.msrb.mxu2 %v9197_v18  ;;  %v9611_v18 = vld [vmem:[%s14673_s11 + $0x8] sm:$0xff] }
 0x961   :  { %7834 = vmatpush.bf16.msrb.mxu0 %v9611_v18 }
 0x963   :  { %7665 = vmatpush.bf16.msrb.mxu1 %v9125_v56  ;;  %v7511_v12 = vpop.f32.mrf.mxu1 }
 0x964   :  { %7678 = vmatpush.bf16.msrb.mxu2 %v9189_v37  ;;  %v7685_v37 = vadd.f32 %v7684_v5, %v14596_v2 }
 0x966   :  { %7666 = vmatmul.bf16.vlgmr.msrb.gmra.mxu1 %v14543_v31 }
 0x967   :  { %7679 = vmatmul.bf16.vlgmr.msrb.gmra.mxu2 %v14547_v51 }
 0x96a   :  { %v7524_v35 = vpop.f32.mrf.mxu2 }
 0x96b   :  { %v7525_v63 = vadd.f32 %v7524_v35, %v7511_v12  ;;  %v7513_v32 = vpop.f32.mrf.mxu1 }
 0x96c   :  { %v7576_v47 = vpop.f32.mrf.mxu0 }
 0x96d   :  { %v7538_v39 = vadd.f32 %v7537_v24, %v7525_v63 }
 0x972   :  { %v7526_v27 = vpop.f32.mrf.mxu2 }
 0x974   :  { %v7578_v7 = vpop.f32.mrf.mxu0 }
 0x975   :  { %v9610_v7 = vld [vmem:[%s14673_s11] sm:$0xff] }
 0x976   :  { %7835 = vmatpush.bf16.msrb.mxu0 %v9610_v7 }
 0x983   :  { %v7550_v49 = vpop.f32.mrf.mxu1 }
 0x984   :  { %v7551_v15 = vadd.f32 %v7550_v49, %v7538_v39  ;;  %v9616_v49 = vld [vmem:[%s14675_s13 + $0x10] sm:$0xff] }
 0x98a   :  { %v7563_v33 = vpop.f32.mrf.mxu2 }
 0x98b   :  { %v7564_v4 = vadd.f32 %v7563_v33, %v7551_v15  ;;  %v7552_v23 = vpop.f32.mrf.mxu1  ;;  %v9615_v15 = vld [vmem:[%s14675_s13 + $0x8] sm:$0xff]  ;;  %v7746_v33 = vld [vmem:[%s14672_s10] sm:$0x3] }
 0x98c   :  { %v7615_v9 = vpop.f32.mrf.mxu0 }
 0x98d   :  { %v7577_v58 = vadd.f32 %v7576_v47, %v7564_v4 }
 0x992   :  { %v7565_v17 = vpop.f32.mrf.mxu2 }
 0x994   :  { %v7617_v31 = vpop.f32.mrf.mxu0 }
 0x995   :  { %v9614_v31 = vld [vmem:[%s14675_s13] sm:$0xff] }
 0x9a3   :  { %v7589_v29 = vpop.f32.mrf.mxu1 }
 0x9a4   :  { %v7590_v51 = vadd.f32 %v7589_v29, %v7577_v58  ;;  %v9629_v29 = vld [vmem:[%s14674_s12] ss:$0 sm:$0xff] }
 0x9aa   :  { %v7602_v20 = vpop.f32.mrf.mxu2 }
 0x9ab   :  { %v7603_v30 = vadd.f32 %v7602_v20, %v7590_v51  ;;  %v7591_v57 = vpop.f32.mrf.mxu1 }
 0x9ac   :  { %v7654_v13 = vpop.f32.mrf.mxu0 }
 0x9ad   :  { %v7616_v1 = vadd.f32 %v7615_v9, %v7603_v30 }
 0x9b2   :  { %v7604_v62 = vpop.f32.mrf.mxu2 }
 0x9b3   :  { %v9630_v62 = vld [vmem:[%s14676_s14] ss:$0 sm:$0xff] }
 0x9b4   :  { %v7656_v42 = vpop.f32.mrf.mxu0 }
 0x9c3   :  { %v7628_v52 = vpop.f32.mrf.mxu1 }
 0x9c4   :  { %v7629_v34 = vadd.f32 %v7628_v52, %v7616_v1 }
 0x9ca   :  { %v7641_v26 = vpop.f32.mrf.mxu2 }
 0x9cb   :  { %v7630_v0 = vpop.f32.mrf.mxu1  ;;  %v7642_v55 = vadd.f32 %v7641_v26, %v7629_v34 }
 0x9cd   :  { %v7655_v44 = vadd.f32 %v7654_v13, %v7642_v55 }
 0x9d2   :  { %v7643_v53 = vpop.f32.mrf.mxu2 }
 0x9e3   :  { %v7667_v25 = vpop.f32.mrf.mxu1 }
 0x9e4   :  { %v7668_v59 = vadd.f32 %v7667_v25, %v7655_v44 }
 0x9ea   :  { %v7680_v22 = vpop.f32.mrf.mxu2 }
 0x9eb   :  { %v7681_v46 = vadd.f32 %v7680_v22, %v7668_v59  ;;  %v7669_v19 = vpop.f32.mrf.mxu1 }
 0x9ed   :  { %7695 = vst [vmem:[#allocation1] sm:$0xff] %v7681_v46 }
 0x9f2   :  { %v7682_v38 = vpop.f32.mrf.mxu2 }
 0x9f4   :  { %v7697_v3 = vld [vmem:[#allocation1 + $0x2] ss:$9 sm:$0xff] }
 0x9f5   :  { %7700 = vst [vmem:[#allocation1] sm:$0xff] %v7681_v46 }
 0x9fc   :  { %v7702_v11 = vld [vmem:[#allocation1 + $0x3] ss:$9 sm:$0xff] }
 0x9fd   :  { %7707 = vst [vmem:[#allocation1] sm:$0xff] %v14596_v2 }
 0xa04   :  { %v7709_v8 = vld [vmem:[#allocation1 + $0x4] ss:$9 sm:$0xff] }
 0xa05   :  { %7712 = vst [vmem:[#allocation1] sm:$0xff] %v14596_v2  ;;  %v7711_v48 = vadd.f32 %v7709_v8, %v7684_v5  ;;  %v9617_v2 = vld [vmem:[%s14675_s13 + $0x18] sm:$0xff] }
 0xa06   :  { %7886 = vmatpush.bf16.msra.mxu1 %v9617_v2 }
 0xa0a   :  { %7887 = vmatpush.bf16.msra.mxu1 %v9616_v49 }
 0xa0c   :  { %v7714_v54 = vld [vmem:[#allocation1 + $0x5] ss:$9 sm:$0xff] }
 0xa0d   :  { %7715 = vrot.lane.b32.xlu0 %v7714_v54, %s9661_s24  ;;  %7719 = vst [vmem:[#allocation1] sm:$0xff] %v7681_v46 }
 0xa0e   :  { %7888 = vmatpush.bf16.msra.mxu1 %v9615_v15 }
 0xa12   :  { %7889 = vmatpush.bf16.msra.mxu1 %v9614_v31 }
 0xa14   :  { %v7721_v61 = vld [vmem:[#allocation1 + $0x6] ss:$9 sm:$0xff] }
 0xa15   :  { %7724 = vst [vmem:[#allocation1] sm:$0xff] %v7681_v46  ;;  %7690 = vrot.lane.b32.xlu0 %v7689_v50, %s9661_s24 }
 0xa1c   :  { %v7726_v40 = vld [vmem:[#allocation1 + $0x7] ss:$9 sm:$0xff] }
 0xa1d   :  { %7727 = vrot.lane.b32.xlu1 %v7726_v40, %s9661_s24 }
 0xa25   :  { %7703 = vrot.lane.b32.xlu1 %v7702_v11, %s9661_s24  ;;  %s7903_s24 = sshll.u32 %s14677_s15, 4  ;;  %s7904_s24 = int_to_ptr.hbm [resolvable:$true] %s7903_s24 }
 0xa7f   :  { %v7716_v16 = vpop.permute.xlu0 %7715 }
 0xa80   :  { %v7718_v43 = vadd.f32 %v7716_v16, %v7711_v48 }
 0xa82   :  { %v7723_v24 = vadd.f32 %v7721_v61, %v7718_v43 }
 0xa87   :  { %v7691_v36 = vpop.permute.xlu0 %7690 }
 0xa88   :  { %v7693_v21 = vadd.f32 %v7691_v36, %v7685_v37 }
 0xa8a   :  { %v7699_v12 = vadd.f32 %v7697_v3, %v7693_v21 }
 0xa8f   :  { %v7728_v56 = vpop.permute.xlu1 %7727 }
 0xa90   :  { %v7730_v6 = vadd.f32 %v7728_v56, %v7723_v24 }
 0xa92   :  { %v7732_v63 = vperm.slane %v7730_v6, 0 }
 0xa97   :  { %v7704_v35 = vpop.permute.xlu1 %7703 }
 0xa98   :  { %v7706_v32 = vadd.f32 %v7704_v35, %v7699_v12 }
 0xa9a   :  { %v7735_v39 = vsel %vm7734_vm11, %v7706_v32, %v7732_v63 }
 0xa9b   :  { %v7736_v27 = vmax.f32 %v7735_v39, 0.0 }
 0xa9d   :  { %v7737_v47 = vpack.c.bf16 %v7736_v27, %v7736_v27 }
 0xa9f   :  { %9262 = vmatmul.msk.bf16.vlgmr.msra.gmra.mxu0 %vm2448_vm8, %v7737_v47 }
 0xb1c   :  { %v7783_v4 = vpop.f32.mrf.mxu0 }
 0xb1d   :  { %v7784_v23 = vadd.f32 %v7783_v4, %v7746_v33 }
 0xb1f   :  { %v7787_v58 = vmax.f32 %v7784_v23, 0.0 }
 0xb21   :  { %v7788_v17 = vpack.c.bf16 %v7787_v58, %v7787_v58 }
 0xb23   :  { %9279 = vmatmul.msk.bf16.vlgmr.msrb.gmra.mxu0 %vm2448_vm8, %v7788_v17 }
 0xb24   :  { %v7785_v9 = vpop.f32.mrf.mxu0 }
 0xba0   :  { %v7837_v51 = vpop.f32.mrf.mxu0 }
 0xba1   :  { %v7838_v20 = vadd.f32 %v9629_v29, %v7837_v51 }
 0xba3   :  { %v7841_v30 = vmax.f32 %v7838_v20, 0.0 }
 0xba5   :  { %v7842_v57 = vpack.c.bf16 %v7841_v30, %v7841_v30 }
 0xba7   :  { %9296 = vmatmul.msk.bf16.vlgmr.msra.gmra.mxu1 %vm2448_vm8, %v7842_v57 }
 0xba8   :  { %v7839_v1 = vpop.f32.mrf.mxu0 }
 0xc24   :  { %v7891_v13 = vpop.f32.mrf.mxu1 }
 0xc25   :  { %v7892_v42 = vadd.f32 %v9630_v62, %v7891_v13 }
 0xc27   :  { %7895 = vst [vmem:[#allocation5] sm:$0x3] %v7892_v42 }
 0xc28   :  { %7906 = dma.vmem_to_hbm [thread:$0]  %s7902_s3, 32, %s7904_s24, [#allocation6]  }
 0xc2c   :  { %v7893_v52 = vpop.f32.mrf.mxu1 }
 0xc2d   :  { %9659 = dma.done.wait [#allocation6], 32  }
 0xc2e   :  { %9660 = vsyncadd [#allocation6], 4294967264 }
 0xc2f   :  { %7911 = vsyncpa [#allocation6], 1 }
 0xc30   :  { %7912 = vsyncmov [#allocation4] }
 0xc33   :  { %s7913_s12 = vpop.sfrf %7912 }
 0xc34   :  { %p9297_p0 = scmp.ne.s32.totalorder %s7913_s12, 0 }
 0xc36   :  { %7917 = shalt.err (%p9297_p0)  }
 0xc37   :  { %7919 = vsyncmov [#allocation4 + $0x1] }
 0xc3a   :  { %s7920_s14 = vpop.sfrf %7919 }
 0xc3b   :  { %p9298_p1 = scmp.ne.s32.totalorder %s7920_s14, 0 }
 0xc3d   :  { %7924 = shalt.err (%p9298_p1)  }

</bundles_post_ra>
